<compile_context>
chip_gen: v7x
topology: tpu7x:2x2x1
jax: 0.10.0
libtpu: 0.0.40
codegen_flags: <defaults>
</compile_context>

<pallas_src>
import functools

import jax
import jax.numpy as jnp
import numpy as np
from jax import lax
from jax.experimental import pallas as pl
from jax.experimental.pallas import tpu as pltpu

HIDDEN = 32          # hidden_dim (demo scale; real model uses 128)
INPUT = 64           # input_dim  (demo scale; real model uses 320)
K = 5                # kernel_size
PAD = (K - 1) // 2


# -------------------- shared GRU stage kernel (conv along leading axis) ------
def _gru_stage_kernel(h_ref, xpad_ref, wxzr_ref, wxq_ref, whzr_ref, whq_ref,
                      bzr_ref, bq_ref, out_ref, hpad_ref, acczr_ref, accq_ref,
                      *, L, tS, Ch, Cx):
    """One GRU stage; the separable conv runs along the LEADING block axis.

    h_ref:     (L, tS, Ch)          f32  hidden state (conv axis leading)
    xpad_ref:  (L + 2*PAD, tS, Cx)  bf16 pre-padded input features
    w*_ref:    fused bf16 conv taps; b*_ref: f32 biases
    out_ref:   (L, tS, Ch)          f32
    hpad_ref:  (L + 2*PAD, tS, Ch)  bf16 scratch (h / r*h staging)
    acczr_ref: (L*tS, 2*Ch) f32 scratch; accq_ref: (L*tS, Ch) f32 scratch
    """
    M = L * tS
    h3d = h_ref[...]                                     # (L, tS, Ch) f32
    h0 = h3d.reshape(M, Ch)

    # Seed accumulators with the bias, then add the K-tap x-contribution for
    # all three gates straight into the f32 scratch (MXU-path accumulation).
    acczr_ref[...] = jnp.broadcast_to(bzr_ref[...], (M, 2 * Ch))
    accq_ref[...] = jnp.broadcast_to(bq_ref[...], (M, Ch))
    for k in range(K):
        xwin = xpad_ref[k:k + L, :, :].reshape(M, Cx)    # bf16, layout-free
        acczr_ref[...] += jnp.dot(xwin, wxzr_ref[k],
                                  preferred_element_type=jnp.float32)
        accq_ref[...] += jnp.dot(xwin, wxq_ref[k],
                                 preferred_element_type=jnp.float32)

    # Zero only the 2*PAD halo rows of the h staging buffer.
    zh = jnp.zeros((PAD, tS, Ch), jnp.bfloat16)
    hpad_ref[0:PAD, :, :] = zh
    hpad_ref[PAD + L:PAD + L + PAD, :, :] = zh

    # h-contribution to z and r (fused along the output dim).
    hpad_ref[PAD:PAD + L, :, :] = h3d.astype(jnp.bfloat16)
    for k in range(K):
        hwin = hpad_ref[k:k + L, :, :].reshape(M, Ch)
        acczr_ref[...] += jnp.dot(hwin, whzr_ref[k],
                                  preferred_element_type=jnp.float32)
    z = jax.nn.sigmoid(acczr_ref[:, :Ch])
    r = jax.nn.sigmoid(acczr_ref[:, Ch:])

    # h-contribution to q uses r*h.
    hpad_ref[PAD:PAD + L, :, :] = (r * h0).reshape(L, tS, Ch).astype(jnp.bfloat16)
    for k in range(K):
        hwin = hpad_ref[k:k + L, :, :].reshape(M, Ch)
        accq_ref[...] += jnp.dot(hwin, whq_ref[k],
                                 preferred_element_type=jnp.float32)
    q = jnp.tanh(accq_ref[...])

    out_ref[...] = ((1.0 - z) * h0 + z * q).reshape(L, tS, Ch)


# ------------------------------- pallas_call wrapper --------------------------
_COMPILER_PARAMS = pltpu.CompilerParams(
    dimension_semantics=("parallel", "parallel"),
    # Leave headroom on v7x (64 MiB physical VMEM) while still generous on
    # v5e/v6e (128 MiB).
    vmem_limit_bytes=40 * 1024 * 1024,
)


def _stage_call(h, xpad, wxzr, wxq, whzr, whq, bzr, bq, tS):
    """h: (B, L, S, Ch) f32 with the conv axis at dim 1; xpad: (B, L+2PAD, S, Cx) bf16."""
    B, L, S, Ch = h.shape
    Lp, Cx = xpad.shape[1], xpad.shape[-1]
    assert Lp == L + 2 * PAD
    assert S % tS == 0 and (tS % 8 == 0 or tS == S), (S, tS)
    kernel = functools.partial(_gru_stage_kernel, L=L, tS=tS, Ch=Ch, Cx=Cx)
    return pl.pallas_call(
        kernel,
        out_shape=jax.ShapeDtypeStruct((B, L, S, Ch), jnp.float32),
        grid_spec=pltpu.PrefetchScalarGridSpec(
            num_scalar_prefetch=0,
            grid=(B, S // tS),
            in_specs=[
                pl.BlockSpec((None, L, tS, Ch), lambda b, s: (b, 0, s, 0)),
                pl.BlockSpec((None, Lp, tS, Cx), lambda b, s: (b, 0, s, 0)),
                pl.BlockSpec((K, Cx, 2 * Ch), lambda b, s: (0, 0, 0)),
                pl.BlockSpec((K, Cx, Ch), lambda b, s: (0, 0, 0)),
                pl.BlockSpec((K, Ch, 2 * Ch), lambda b, s: (0, 0, 0)),
                pl.BlockSpec((K, Ch, Ch), lambda b, s: (0, 0, 0)),
                pl.BlockSpec((1, 2 * Ch), lambda b, s: (0, 0)),
                pl.BlockSpec((1, Ch), lambda b, s: (0, 0)),
            ],
            out_specs=pl.BlockSpec((None, L, tS, Ch), lambda b, s: (b, 0, s, 0)),
            scratch_shapes=[
                pltpu.VMEM((L + 2 * PAD, tS, Ch), jnp.bfloat16),   # h / r*h staging
                pltpu.VMEM((L * tS, 2 * Ch), jnp.float32),         # z|r accumulator
                pltpu.VMEM((L * tS, Ch), jnp.float32),             # q accumulator
            ],
        ),
        # h is an internal temporary of the fused forward pass: reuse its HBM
        # buffer for the stage output (each grid step writes exactly the block
        # it reads, so the alias is hazard-free).
        input_output_aliases={0: 0},
        compiler_params=_COMPILER_PARAMS,
    )(h, xpad, wxzr, wxq, whzr, whq, bzr, bq)


def _fuse_stage(params, stage, Ch):
    """Fused bf16 conv taps: x->(z|r), x->q, h->(z|r), (r*h)->q, plus f32 biases."""
    wz, wr, wq = params[f"wz{stage}"], params[f"wr{stage}"], params[f"wq{stage}"]
    bz, br, bq = params[f"bz{stage}"], params[f"br{stage}"], params[f"bq{stage}"]
    wxzr = jnp.concatenate([wz[:, Ch:, :], wr[:, Ch:, :]], axis=-1).astype(jnp.bfloat16)
    wxq = wq[:, Ch:, :].astype(jnp.bfloat16)
    whzr = jnp.concatenate([wz[:, :Ch, :], wr[:, :Ch, :]], axis=-1).astype(jnp.bfloat16)
    whq = wq[:, :Ch, :].astype(jnp.bfloat16)
    bzr = jnp.concatenate([bz, br], axis=-1)                        # (1, 2*Ch) f32
    return wxzr, wxq, whzr, whq, bzr, bq


def _default_tile(S):
    # >= 2 tiles along the pointwise axis (keeps both v7x TensorCores busy even
    # when B == 1); tile stays a multiple of 8 so reshapes remain layout-free.
    if S % 16 == 0:
        return S // 2
    return S


@functools.partial(jax.jit, static_argnames=("tile_h", "tile_w"))
def sepconv_gru(h, x, params, tile_h=None, tile_w=None):
    """h: (B,H,W,HIDDEN) f32, x: (B,H,W,INPUT) f32 -> (B,H,W,HIDDEN) f32 (NHWC)."""
    B, H, W, Ch = h.shape
    assert H % 8 == 0 and W % 8 == 0, "spatial dims must be multiples of 8"
    tH = _default_tile(H) if tile_h is None else tile_h   # stage-1 pointwise tile (H)
    tW = _default_tile(W) if tile_w is None else tile_w   # stage-2 pointwise tile (W)

    x_bf = x.astype(jnp.bfloat16)          # cast ONCE; both stages read bf16 x

    # ---- stage 1: (1,K) conv along W, run in (B, W, H, C) layout ------------
    x1 = jnp.pad(jnp.transpose(x_bf, (0, 2, 1, 3)),
                 ((0, 0), (PAD, PAD), (0, 0), (0, 0)))
    h_t = jnp.transpose(h, (0, 2, 1, 3))
    h1_t = _stage_call(h_t, x1, *_fuse_stage(params, 1, Ch), tS=tH)

    # ---- stage 2: (K,1) conv along H, natural (B, H, W, C) layout -----------
    x2 = jnp.pad(x_bf, ((0, 0), (PAD, PAD), (0, 0), (0, 0)))
    h1 = jnp.transpose(h1_t, (0, 2, 1, 3))
    h2 = _stage_call(h1, x2, *_fuse_stage(params, 2, Ch), tS=tW)
    return h2


# ------------------------- pure-JAX f32 reference -----------------------------
def _conv_sep_ref(inp, w_taps, b, horizontal):
    if horizontal:
        w = w_taps[None]               # HWIO = (1, K, Cin, Ch)
        pad = ((0, 0), (PAD, PAD))
    else:
        w = w_taps[:, None]            # HWIO = (K, 1, Cin, Ch)
        pad = ((PAD, PAD), (0, 0))
    out = lax.conv_general_dilated(inp, w, (1, 1), pad,
                                   dimension_numbers=('NHWC', 'HWIO', 'NHWC'))
    return out + b.reshape(1, 1, 1, -1)


def sepconv_gru_ref(h, x, p):
    hx = jnp.concatenate([h, x], axis=-1)
    z = jax.nn.sigmoid(_conv_sep_ref(hx, p["wz1"], p["bz1"], True))
    r = jax.nn.sigmoid(_conv_sep_ref(hx, p["wr1"], p["br1"], True))
    q = jnp.tanh(_conv_sep_ref(jnp.concatenate([r * h, x], -1), p["wq1"], p["bq1"], True))
    h = (1 - z) * h + z * q
    hx = jnp.concatenate([h, x], axis=-1)
    z = jax.nn.sigmoid(_conv_sep_ref(hx, p["wz2"], p["bz2"], False))
    r = jax.nn.sigmoid(_conv_sep_ref(hx, p["wr2"], p["br2"], False))
    q = jnp.tanh(_conv_sep_ref(jnp.concatenate([r * h, x], -1), p["wq2"], p["bq2"], False))
    h = (1 - z) * h + z * q
    return h


if __name__ == "__main__":
    key = jax.random.PRNGKey(0)
    B, Hd, Wd = 2, 16, 16
    Cin = HIDDEN + INPUT
    keys = jax.random.split(key, 14)

    # Deterministic synthetic parameters. Weight taps stored as (K, Cin, Ch):
    # tap k of torch weight (Cout, Cin, 1, K) is w[k] = weight[:, :, 0, k].T
    names = ["z1", "r1", "q1", "z2", "r2", "q2"]
    params = {}
    for i, n in enumerate(names):
        params["w" + n] = jax.random.normal(keys[i], (K, Cin, HIDDEN), jnp.float32) * 0.05
        params["b" + n] = jax.random.normal(keys[6 + i], (1, HIDDEN), jnp.float32) * 0.05

    h = jax.random.normal(keys[12], (B, Hd, Wd, HIDDEN), jnp.float32)
    x = jax.random.normal(keys[13], (B, Hd, Wd, INPUT), jnp.float32)

    ref = sepconv_gru_ref(h, x, params)
    out = jax.block_until_ready(sepconv_gru(h, x, params))

    assert out.shape == (B, Hd, Wd, HIDDEN)
    # bf16 matmul operands (f32 accumulation) -> looser tolerance vs f32 reference.
    np.testing.assert_allclose(np.asarray(out), np.asarray(ref), atol=3e-2, rtol=3e-2)
    print("KERNEL_OK")
</pallas_src>

<mosaic_0001>
module attributes {stable_mosaic.version = 11 : i64} {
  func.func @_gru_stage_kernel(%arg0: i32, %arg1: i32, %arg2: memref<1x16x8x32xf32, #tpu.memory_space<vmem>>, %arg3: memref<1x20x8x64xbf16, #tpu.memory_space<vmem>>, %arg4: memref<5x64x64xbf16, #tpu.memory_space<vmem>>, %arg5: memref<5x64x32xbf16, #tpu.memory_space<vmem>>, %arg6: memref<5x32x64xbf16, #tpu.memory_space<vmem>>, %arg7: memref<5x32x32xbf16, #tpu.memory_space<vmem>>, %arg8: memref<1x64xf32, #tpu.memory_space<vmem>>, %arg9: memref<1x32xf32, #tpu.memory_space<vmem>>, %arg10: memref<1x16x8x32xf32, #tpu.memory_space<vmem>>, %arg11: memref<20x8x32xbf16, #tpu.memory_space<vmem>>, %arg12: memref<128x64xf32, #tpu.memory_space<vmem>>, %arg13: memref<128x32xf32, #tpu.memory_space<vmem>>) attributes {dimension_semantics = [#tpu.dimension_semantics<parallel>, #tpu.dimension_semantics<parallel>], iteration_bounds = array<i64: 2, 2>, scalar_prefetch = 0 : i64, scratch_operands = 3 : i64, tpu.core_type = #tpu.core_type<tc>, window_params = [{transform_indices = @transform_0, window_bounds = array<i64: 1, 16, 8, 32>}, {transform_indices = @transform_1, window_bounds = array<i64: 1, 20, 8, 64>}, {pipeline_mode = #tpu.pipeline_mode<synchronous>, transform_indices = @transform_2, window_bounds = array<i64: 5, 64, 64>}, {pipeline_mode = #tpu.pipeline_mode<synchronous>, transform_indices = @transform_3, window_bounds = array<i64: 5, 64, 32>}, {pipeline_mode = #tpu.pipeline_mode<synchronous>, transform_indices = @transform_4, window_bounds = array<i64: 5, 32, 64>}, {pipeline_mode = #tpu.pipeline_mode<synchronous>, transform_indices = @transform_5, window_bounds = array<i64: 5, 32, 32>}, {pipeline_mode = #tpu.pipeline_mode<synchronous>, transform_indices = @transform_6, window_bounds = array<i64: 1, 64>}, {pipeline_mode = #tpu.pipeline_mode<synchronous>, transform_indices = @transform_7, window_bounds = array<i64: 1, 32>}, {transform_indices = @transform_8, window_bounds = array<i64: 1, 16, 8, 32>}]} {
    %c0 = arith.constant 0 : index
    %c0_0 = arith.constant 0 : index
    %c0_1 = arith.constant 0 : index
    %c0_2 = arith.constant 0 : index
    %0 = vector.load %arg2[%c0, %c0_0, %c0_1, %c0_2] : memref<1x16x8x32xf32, #tpu.memory_space<vmem>>, vector<1x16x8x32xf32>
    %1 = vector.shape_cast %0 : vector<1x16x8x32xf32> to vector<16x8x32xf32>
    %2 = vector.shape_cast %1 : vector<16x8x32xf32> to vector<128x32xf32>
    %c0_3 = arith.constant 0 : index
    %c0_4 = arith.constant 0 : index
    %3 = vector.load %arg8[%c0_3, %c0_4] : memref<1x64xf32, #tpu.memory_space<vmem>>, vector<1x64xf32>
    %4 = vector.shape_cast %3 : vector<1x64xf32> to vector<1x64xf32>
    %5 = vector.broadcast %4 : vector<1x64xf32> to vector<128x64xf32>
    %c0_5 = arith.constant 0 : index
    %c0_6 = arith.constant 0 : index
    %6 = vector.load %arg12[%c0_5, %c0_6] : memref<128x64xf32, #tpu.memory_space<vmem>>, vector<128x64xf32>
    tpu.vector_store %arg12[%c0_5, %c0_6], %5 {strides = array<i32>} : memref<128x64xf32, #tpu.memory_space<vmem>>, vector<128x64xf32>,
    %c0_7 = arith.constant 0 : index
    %c0_8 = arith.constant 0 : index
    %7 = vector.load %arg9[%c0_7, %c0_8] : memref<1x32xf32, #tpu.memory_space<vmem>>, vector<1x32xf32>
    %8 = vector.shape_cast %7 : vector<1x32xf32> to vector<1x32xf32>
    %9 = vector.broadcast %8 : vector<1x32xf32> to vector<128x32xf32>
    %c0_9 = arith.constant 0 : index
    %c0_10 = arith.constant 0 : index
    %10 = vector.load %arg13[%c0_9, %c0_10] : memref<128x32xf32, #tpu.memory_space<vmem>>, vector<128x32xf32>
    tpu.vector_store %arg13[%c0_9, %c0_10], %9 {strides = array<i32>} : memref<128x32xf32, #tpu.memory_space<vmem>>, vector<128x32xf32>,
    %c0_11 = arith.constant 0 : index
    %c0_12 = arith.constant 0 : index
    %c0_13 = arith.constant 0 : index
    %c0_14 = arith.constant 0 : index
    %11 = vector.load %arg3[%c0_11, %c0_12, %c0_13, %c0_14] : memref<1x20x8x64xbf16, #tpu.memory_space<vmem>>, vector<1x16x8x64xbf16>
    %12 = vector.shape_cast %11 : vector<1x16x8x64xbf16> to vector<16x8x64xbf16>
    %13 = vector.shape_cast %12 : vector<16x8x64xbf16> to vector<128x64xbf16>
    %c0_15 = arith.constant 0 : index
    %c0_16 = arith.constant 0 : index
    %14 = vector.load %arg12[%c0_15, %c0_16] : memref<128x64xf32, #tpu.memory_space<vmem>>, vector<128x64xf32>
    %c0_17 = arith.constant 0 : index
    %c0_18 = arith.constant 0 : index
    %c0_19 = arith.constant 0 : index
    %15 = vector.load %arg4[%c0_17, %c0_18, %c0_19] : memref<5x64x64xbf16, #tpu.memory_space<vmem>>, vector<1x64x64xbf16>
    %16 = vector.shape_cast %15 : vector<1x64x64xbf16> to vector<64x64xbf16>
    %cst = arith.constant dense<0.000000e+00> : vector<128x64xf32>
    %17 = tpu.matmul %13, %16, %cst {dimension_numbers = #tpu.dot_dimension_numbers<[1], [0], [0], [1], [0, 0, 1, 1], [], []>} : vector<128x64xbf16>, vector<64x64xbf16>, vector<128x64xf32> -> vector<128x64xf32>
    %18 = arith.addf %14, %17 : vector<128x64xf32>
    %c0_20 = arith.constant 0 : index
    %c0_21 = arith.constant 0 : index
    %19 = vector.load %arg12[%c0_20, %c0_21] : memref<128x64xf32, #tpu.memory_space<vmem>>, vector<128x64xf32>
    tpu.vector_store %arg12[%c0_20, %c0_21], %18 {strides = array<i32>} : memref<128x64xf32, #tpu.memory_space<vmem>>, vector<128x64xf32>,
    %c0_22 = arith.constant 0 : index
    %c0_23 = arith.constant 0 : index
    %20 = vector.load %arg13[%c0_22, %c0_23] : memref<128x32xf32, #tpu.memory_space<vmem>>, vector<128x32xf32>
    %c0_24 = arith.constant 0 : index
    %c0_25 = arith.constant 0 : index
    %c0_26 = arith.constant 0 : index
    %21 = vector.load %arg5[%c0_24, %c0_25, %c0_26] : memref<5x64x32xbf16, #tpu.memory_space<vmem>>, vector<1x64x32xbf16>
    %22 = vector.shape_cast %21 : vector<1x64x32xbf16> to vector<64x32xbf16>
    %cst_27 = arith.constant dense<0.000000e+00> : vector<128x32xf32>
    %23 = tpu.matmul %13, %22, %cst_27 {dimension_numbers = #tpu.dot_dimension_numbers<[1], [0], [0], [1], [0, 0, 1, 1], [], []>} : vector<128x64xbf16>, vector<64x32xbf16>, vector<128x32xf32> -> vector<128x32xf32>
    %24 = arith.addf %20, %23 : vector<128x32xf32>
    %c0_28 = arith.constant 0 : index
    %c0_29 = arith.constant 0 : index
    %25 = vector.load %arg13[%c0_28, %c0_29] : memref<128x32xf32, #tpu.memory_space<vmem>>, vector<128x32xf32>
    tpu.vector_store %arg13[%c0_28, %c0_29], %24 {strides = array<i32>} : memref<128x32xf32, #tpu.memory_space<vmem>>, vector<128x32xf32>,
    %c0_30 = arith.constant 0 : index
    %c1 = arith.constant 1 : index
    %c0_31 = arith.constant 0 : index
    %c0_32 = arith.constant 0 : index
    %26 = vector.load %arg3[%c0_30, %c1, %c0_31, %c0_32] : memref<1x20x8x64xbf16, #tpu.memory_space<vmem>>, vector<1x16x8x64xbf16>
    %27 = vector.shape_cast %26 : vector<1x16x8x64xbf16> to vector<16x8x64xbf16>
    %28 = vector.shape_cast %27 : vector<16x8x64xbf16> to vector<128x64xbf16>
    %c0_33 = arith.constant 0 : index
    %c0_34 = arith.constant 0 : index
    %29 = vector.load %arg12[%c0_33, %c0_34] : memref<128x64xf32, #tpu.memory_space<vmem>>, vector<128x64xf32>
    %c1_35 = arith.constant 1 : index
    %c0_36 = arith.constant 0 : index
    %c0_37 = arith.constant 0 : index
    %30 = vector.load %arg4[%c1_35, %c0_36, %c0_37] : memref<5x64x64xbf16, #tpu.memory_space<vmem>>, vector<1x64x64xbf16>
    %31 = vector.shape_cast %30 : vector<1x64x64xbf16> to vector<64x64xbf16>
    %cst_38 = arith.constant dense<0.000000e+00> : vector<128x64xf32>
    %32 = tpu.matmul %28, %31, %cst_38 {dimension_numbers = #tpu.dot_dimension_numbers<[1], [0], [0], [1], [0, 0, 1, 1], [], []>} : vector<128x64xbf16>, vector<64x64xbf16>, vector<128x64xf32> -> vector<128x64xf32>
    %33 = arith.addf %29, %32 : vector<128x64xf32>
    %c0_39 = arith.constant 0 : index
    %c0_40 = arith.constant 0 : index
    %34 = vector.load %arg12[%c0_39, %c0_40] : memref<128x64xf32, #tpu.memory_space<vmem>>, vector<128x64xf32>
    tpu.vector_store %arg12[%c0_39, %c0_40], %33 {strides = array<i32>} : memref<128x64xf32, #tpu.memory_space<vmem>>, vector<128x64xf32>,
    %c0_41 = arith.constant 0 : index
    %c0_42 = arith.constant 0 : index
    %35 = vector.load %arg13[%c0_41, %c0_42] : memref<128x32xf32, #tpu.memory_space<vmem>>, vector<128x32xf32>
    %c1_43 = arith.constant 1 : index
    %c0_44 = arith.constant 0 : index
    %c0_45 = arith.constant 0 : index
    %36 = vector.load %arg5[%c1_43, %c0_44, %c0_45] : memref<5x64x32xbf16, #tpu.memory_space<vmem>>, vector<1x64x32xbf16>
    %37 = vector.shape_cast %36 : vector<1x64x32xbf16> to vector<64x32xbf16>
    %cst_46 = arith.constant dense<0.000000e+00> : vector<128x32xf32>
    %38 = tpu.matmul %28, %37, %cst_46 {dimension_numbers = #tpu.dot_dimension_numbers<[1], [0], [0], [1], [0, 0, 1, 1], [], []>} : vector<128x64xbf16>, vector<64x32xbf16>, vector<128x32xf32> -> vector<128x32xf32>
    %39 = arith.addf %35, %38 : vector<128x32xf32>
    %c0_47 = arith.constant 0 : index
    %c0_48 = arith.constant 0 : index
    %40 = vector.load %arg13[%c0_47, %c0_48] : memref<128x32xf32, #tpu.memory_space<vmem>>, vector<128x32xf32>
    tpu.vector_store %arg13[%c0_47, %c0_48], %39 {strides = array<i32>} : memref<128x32xf32, #tpu.memory_space<vmem>>, vector<128x32xf32>,
    %c0_49 = arith.constant 0 : index
    %c2 = arith.constant 2 : index
    %c0_50 = arith.constant 0 : index
    %c0_51 = arith.constant 0 : index
    %41 = vector.load %arg3[%c0_49, %c2, %c0_50, %c0_51] : memref<1x20x8x64xbf16, #tpu.memory_space<vmem>>, vector<1x16x8x64xbf16>
    %42 = vector.shape_cast %41 : vector<1x16x8x64xbf16> to vector<16x8x64xbf16>
    %43 = vector.shape_cast %42 : vector<16x8x64xbf16> to vector<128x64xbf16>
    %c0_52 = arith.constant 0 : index
    %c0_53 = arith.constant 0 : index
    %44 = vector.load %arg12[%c0_52, %c0_53] : memref<128x64xf32, #tpu.memory_space<vmem>>, vector<128x64xf32>
    %c2_54 = arith.constant 2 : index
    %c0_55 = arith.constant 0 : index
    %c0_56 = arith.constant 0 : index
    %45 = vector.load %arg4[%c2_54, %c0_55, %c0_56] : memref<5x64x64xbf16, #tpu.memory_space<vmem>>, vector<1x64x64xbf16>
    %46 = vector.shape_cast %45 : vector<1x64x64xbf16> to vector<64x64xbf16>
    %cst_57 = arith.constant dense<0.000000e+00> : vector<128x64xf32>
    %47 = tpu.matmul %43, %46, %cst_57 {dimension_numbers = #tpu.dot_dimension_numbers<[1], [0], [0], [1], [0, 0, 1, 1], [], []>} : vector<128x64xbf16>, vector<64x64xbf16>, vector<128x64xf32> -> vector<128x64xf32>
    %48 = arith.addf %44, %47 : vector<128x64xf32>
    %c0_58 = arith.constant 0 : index
    %c0_59 = arith.constant 0 : index
    %49 = vector.load %arg12[%c0_58, %c0_59] : memref<128x64xf32, #tpu.memory_space<vmem>>, vector<128x64xf32>
    tpu.vector_store %arg12[%c0_58, %c0_59], %48 {strides = array<i32>} : memref<128x64xf32, #tpu.memory_space<vmem>>, vector<128x64xf32>,
    %c0_60 = arith.constant 0 : index
    %c0_61 = arith.constant 0 : index
    %50 = vector.load %arg13[%c0_60, %c0_61] : memref<128x32xf32, #tpu.memory_space<vmem>>, vector<128x32xf32>
    %c2_62 = arith.constant 2 : index
    %c0_63 = arith.constant 0 : index
    %c0_64 = arith.constant 0 : index
    %51 = vector.load %arg5[%c2_62, %c0_63, %c0_64] : memref<5x64x32xbf16, #tpu.memory_space<vmem>>, vector<1x64x32xbf16>
    %52 = vector.shape_cast %51 : vector<1x64x32xbf16> to vector<64x32xbf16>
    %cst_65 = arith.constant dense<0.000000e+00> : vector<128x32xf32>
    %53 = tpu.matmul %43, %52, %cst_65 {dimension_numbers = #tpu.dot_dimension_numbers<[1], [0], [0], [1], [0, 0, 1, 1], [], []>} : vector<128x64xbf16>, vector<64x32xbf16>, vector<128x32xf32> -> vector<128x32xf32>
    %54 = arith.addf %50, %53 : vector<128x32xf32>
    %c0_66 = arith.constant 0 : index
    %c0_67 = arith.constant 0 : index
    %55 = vector.load %arg13[%c0_66, %c0_67] : memref<128x32xf32, #tpu.memory_space<vmem>>, vector<128x32xf32>
    tpu.vector_store %arg13[%c0_66, %c0_67], %54 {strides = array<i32>} : memref<128x32xf32, #tpu.memory_space<vmem>>, vector<128x32xf32>,
    %c0_68 = arith.constant 0 : index
    %c3 = arith.constant 3 : index
    %c0_69 = arith.constant 0 : index
    %c0_70 = arith.constant 0 : index
    %56 = vector.load %arg3[%c0_68, %c3, %c0_69, %c0_70] : memref<1x20x8x64xbf16, #tpu.memory_space<vmem>>, vector<1x16x8x64xbf16>
    %57 = vector.shape_cast %56 : vector<1x16x8x64xbf16> to vector<16x8x64xbf16>
    %58 = vector.shape_cast %57 : vector<16x8x64xbf16> to vector<128x64xbf16>
    %c0_71 = arith.constant 0 : index
    %c0_72 = arith.constant 0 : index
    %59 = vector.load %arg12[%c0_71, %c0_72] : memref<128x64xf32, #tpu.memory_space<vmem>>, vector<128x64xf32>
    %c3_73 = arith.constant 3 : index
    %c0_74 = arith.constant 0 : index
    %c0_75 = arith.constant 0 : index
    %60 = vector.load %arg4[%c3_73, %c0_74, %c0_75] : memref<5x64x64xbf16, #tpu.memory_space<vmem>>, vector<1x64x64xbf16>
    %61 = vector.shape_cast %60 : vector<1x64x64xbf16> to vector<64x64xbf16>
    %cst_76 = arith.constant dense<0.000000e+00> : vector<128x64xf32>
    %62 = tpu.matmul %58, %61, %cst_76 {dimension_numbers = #tpu.dot_dimension_numbers<[1], [0], [0], [1], [0, 0, 1, 1], [], []>} : vector<128x64xbf16>, vector<64x64xbf16>, vector<128x64xf32> -> vector<128x64xf32>
    %63 = arith.addf %59, %62 : vector<128x64xf32>
    %c0_77 = arith.constant 0 : index
    %c0_78 = arith.constant 0 : index
    %64 = vector.load %arg12[%c0_77, %c0_78] : memref<128x64xf32, #tpu.memory_space<vmem>>, vector<128x64xf32>
    tpu.vector_store %arg12[%c0_77, %c0_78], %63 {strides = array<i32>} : memref<128x64xf32, #tpu.memory_space<vmem>>, vector<128x64xf32>,
    %c0_79 = arith.constant 0 : index
    %c0_80 = arith.constant 0 : index
    %65 = vector.load %arg13[%c0_79, %c0_80] : memref<128x32xf32, #tpu.memory_space<vmem>>, vector<128x32xf32>
    %c3_81 = arith.constant 3 : index
    %c0_82 = arith.constant 0 : index
    %c0_83 = arith.constant 0 : index
    %66 = vector.load %arg5[%c3_81, %c0_82, %c0_83] : memref<5x64x32xbf16, #tpu.memory_space<vmem>>, vector<1x64x32xbf16>
    %67 = vector.shape_cast %66 : vector<1x64x32xbf16> to vector<64x32xbf16>
    %cst_84 = arith.constant dense<0.000000e+00> : vector<128x32xf32>
    %68 = tpu.matmul %58, %67, %cst_84 {dimension_numbers = #tpu.dot_dimension_numbers<[1], [0], [0], [1], [0, 0, 1, 1], [], []>} : vector<128x64xbf16>, vector<64x32xbf16>, vector<128x32xf32> -> vector<128x32xf32>
    %69 = arith.addf %65, %68 : vector<128x32xf32>
    %c0_85 = arith.constant 0 : index
    %c0_86 = arith.constant 0 : index
    %70 = vector.load %arg13[%c0_85, %c0_86] : memref<128x32xf32, #tpu.memory_space<vmem>>, vector<128x32xf32>
    tpu.vector_store %arg13[%c0_85, %c0_86], %69 {strides = array<i32>} : memref<128x32xf32, #tpu.memory_space<vmem>>, vector<128x32xf32>,
    %c0_87 = arith.constant 0 : index
    %c4 = arith.constant 4 : index
    %c0_88 = arith.constant 0 : index
    %c0_89 = arith.constant 0 : index
    %71 = vector.load %arg3[%c0_87, %c4, %c0_88, %c0_89] : memref<1x20x8x64xbf16, #tpu.memory_space<vmem>>, vector<1x16x8x64xbf16>
    %72 = vector.shape_cast %71 : vector<1x16x8x64xbf16> to vector<16x8x64xbf16>
    %73 = vector.shape_cast %72 : vector<16x8x64xbf16> to vector<128x64xbf16>
    %c0_90 = arith.constant 0 : index
    %c0_91 = arith.constant 0 : index
    %74 = vector.load %arg12[%c0_90, %c0_91] : memref<128x64xf32, #tpu.memory_space<vmem>>, vector<128x64xf32>
    %c4_92 = arith.constant 4 : index
    %c0_93 = arith.constant 0 : index
    %c0_94 = arith.constant 0 : index
    %75 = vector.load %arg4[%c4_92, %c0_93, %c0_94] : memref<5x64x64xbf16, #tpu.memory_space<vmem>>, vector<1x64x64xbf16>
    %76 = vector.shape_cast %75 : vector<1x64x64xbf16> to vector<64x64xbf16>
    %cst_95 = arith.constant dense<0.000000e+00> : vector<128x64xf32>
    %77 = tpu.matmul %73, %76, %cst_95 {dimension_numbers = #tpu.dot_dimension_numbers<[1], [0], [0], [1], [0, 0, 1, 1], [], []>} : vector<128x64xbf16>, vector<64x64xbf16>, vector<128x64xf32> -> vector<128x64xf32>
    %78 = arith.addf %74, %77 : vector<128x64xf32>
    %c0_96 = arith.constant 0 : index
    %c0_97 = arith.constant 0 : index
    %79 = vector.load %arg12[%c0_96, %c0_97] : memref<128x64xf32, #tpu.memory_space<vmem>>, vector<128x64xf32>
    tpu.vector_store %arg12[%c0_96, %c0_97], %78 {strides = array<i32>} : memref<128x64xf32, #tpu.memory_space<vmem>>, vector<128x64xf32>,
    %c0_98 = arith.constant 0 : index
    %c0_99 = arith.constant 0 : index
    %80 = vector.load %arg13[%c0_98, %c0_99] : memref<128x32xf32, #tpu.memory_space<vmem>>, vector<128x32xf32>
    %c4_100 = arith.constant 4 : index
    %c0_101 = arith.constant 0 : index
    %c0_102 = arith.constant 0 : index
    %81 = vector.load %arg5[%c4_100, %c0_101, %c0_102] : memref<5x64x32xbf16, #tpu.memory_space<vmem>>, vector<1x64x32xbf16>
    %82 = vector.shape_cast %81 : vector<1x64x32xbf16> to vector<64x32xbf16>
    %cst_103 = arith.constant dense<0.000000e+00> : vector<128x32xf32>
    %83 = tpu.matmul %73, %82, %cst_103 {dimension_numbers = #tpu.dot_dimension_numbers<[1], [0], [0], [1], [0, 0, 1, 1], [], []>} : vector<128x64xbf16>, vector<64x32xbf16>, vector<128x32xf32> -> vector<128x32xf32>
    %84 = arith.addf %80, %83 : vector<128x32xf32>
    %c0_104 = arith.constant 0 : index
    %c0_105 = arith.constant 0 : index
    %85 = vector.load %arg13[%c0_104, %c0_105] : memref<128x32xf32, #tpu.memory_space<vmem>>, vector<128x32xf32>
    tpu.vector_store %arg13[%c0_104, %c0_105], %84 {strides = array<i32>} : memref<128x32xf32, #tpu.memory_space<vmem>>, vector<128x32xf32>,
    %cst_106 = arith.constant 0.000000e+00 : bf16
    %86 = vector.broadcast %cst_106 : bf16 to vector<2x8x32xbf16>
    %c0_107 = arith.constant 0 : index
    %c0_108 = arith.constant 0 : index
    %c0_109 = arith.constant 0 : index
    %87 = vector.load %arg11[%c0_107, %c0_108, %c0_109] : memref<20x8x32xbf16, #tpu.memory_space<vmem>>, vector<2x8x32xbf16>
    tpu.vector_store %arg11[%c0_107, %c0_108, %c0_109], %86 {strides = array<i32>} : memref<20x8x32xbf16, #tpu.memory_space<vmem>>, vector<2x8x32xbf16>,
    %c18 = arith.constant 18 : index
    %c0_110 = arith.constant 0 : index
    %c0_111 = arith.constant 0 : index
    %88 = vector.load %arg11[%c18, %c0_110, %c0_111] : memref<20x8x32xbf16, #tpu.memory_space<vmem>>, vector<2x8x32xbf16>
    tpu.vector_store %arg11[%c18, %c0_110, %c0_111], %86 {strides = array<i32>} : memref<20x8x32xbf16, #tpu.memory_space<vmem>>, vector<2x8x32xbf16>,
    %89 = arith.truncf %1 : vector<16x8x32xf32> to vector<16x8x32xbf16>
    %c2_112 = arith.constant 2 : index
    %c0_113 = arith.constant 0 : index
    %c0_114 = arith.constant 0 : index
    %90 = vector.load %arg11[%c2_112, %c0_113, %c0_114] : memref<20x8x32xbf16, #tpu.memory_space<vmem>>, vector<16x8x32xbf16>
    tpu.vector_store %arg11[%c2_112, %c0_113, %c0_114], %89 {strides = array<i32>} : memref<20x8x32xbf16, #tpu.memory_space<vmem>>, vector<16x8x32xbf16>,
    %c0_115 = arith.constant 0 : index
    %c0_116 = arith.constant 0 : index
    %c0_117 = arith.constant 0 : index
    %91 = vector.load %arg11[%c0_115, %c0_116, %c0_117] : memref<20x8x32xbf16, #tpu.memory_space<vmem>>, vector<16x8x32xbf16>
    %92 = vector.shape_cast %91 : vector<16x8x32xbf16> to vector<128x32xbf16>
    %c0_118 = arith.constant 0 : index
    %c0_119 = arith.constant 0 : index
    %93 = vector.load %arg12[%c0_118, %c0_119] : memref<128x64xf32, #tpu.memory_space<vmem>>, vector<128x64xf32>
    %c0_120 = arith.constant 0 : index
    %c0_121 = arith.constant 0 : index
    %c0_122 = arith.constant 0 : index
    %94 = vector.load %arg6[%c0_120, %c0_121, %c0_122] : memref<5x32x64xbf16, #tpu.memory_space<vmem>>, vector<1x32x64xbf16>
    %95 = vector.shape_cast %94 : vector<1x32x64xbf16> to vector<32x64xbf16>
    %cst_123 = arith.constant dense<0.000000e+00> : vector<128x64xf32>
    %96 = tpu.matmul %92, %95, %cst_123 {dimension_numbers = #tpu.dot_dimension_numbers<[1], [0], [0], [1], [0, 0, 1, 1], [], []>} : vector<128x32xbf16>, vector<32x64xbf16>, vector<128x64xf32> -> vector<128x64xf32>
    %97 = arith.addf %93, %96 : vector<128x64xf32>
    %c0_124 = arith.constant 0 : index
    %c0_125 = arith.constant 0 : index
    %98 = vector.load %arg12[%c0_124, %c0_125] : memref<128x64xf32, #tpu.memory_space<vmem>>, vector<128x64xf32>
    tpu.vector_store %arg12[%c0_124, %c0_125], %97 {strides = array<i32>} : memref<128x64xf32, #tpu.memory_space<vmem>>, vector<128x64xf32>,
    %c1_126 = arith.constant 1 : index
    %c0_127 = arith.constant 0 : index
    %c0_128 = arith.constant 0 : index
    %99 = vector.load %arg11[%c1_126, %c0_127, %c0_128] : memref<20x8x32xbf16, #tpu.memory_space<vmem>>, vector<16x8x32xbf16>
    %100 = vector.shape_cast %99 : vector<16x8x32xbf16> to vector<128x32xbf16>
    %c0_129 = arith.constant 0 : index
    %c0_130 = arith.constant 0 : index
    %101 = vector.load %arg12[%c0_129, %c0_130] : memref<128x64xf32, #tpu.memory_space<vmem>>, vector<128x64xf32>
    %c1_131 = arith.constant 1 : index
    %c0_132 = arith.constant 0 : index
    %c0_133 = arith.constant 0 : index
    %102 = vector.load %arg6[%c1_131, %c0_132, %c0_133] : memref<5x32x64xbf16, #tpu.memory_space<vmem>>, vector<1x32x64xbf16>
    %103 = vector.shape_cast %102 : vector<1x32x64xbf16> to vector<32x64xbf16>
    %cst_134 = arith.constant dense<0.000000e+00> : vector<128x64xf32>
    %104 = tpu.matmul %100, %103, %cst_134 {dimension_numbers = #tpu.dot_dimension_numbers<[1], [0], [0], [1], [0, 0, 1, 1], [], []>} : vector<128x32xbf16>, vector<32x64xbf16>, vector<128x64xf32> -> vector<128x64xf32>
    %105 = arith.addf %101, %104 : vector<128x64xf32>
    %c0_135 = arith.constant 0 : index
    %c0_136 = arith.constant 0 : index
    %106 = vector.load %arg12[%c0_135, %c0_136] : memref<128x64xf32, #tpu.memory_space<vmem>>, vector<128x64xf32>
    tpu.vector_store %arg12[%c0_135, %c0_136], %105 {strides = array<i32>} : memref<128x64xf32, #tpu.memory_space<vmem>>, vector<128x64xf32>,
    %c2_137 = arith.constant 2 : index
    %c0_138 = arith.constant 0 : index
    %c0_139 = arith.constant 0 : index
    %107 = vector.load %arg11[%c2_137, %c0_138, %c0_139] : memref<20x8x32xbf16, #tpu.memory_space<vmem>>, vector<16x8x32xbf16>
    %108 = vector.shape_cast %107 : vector<16x8x32xbf16> to vector<128x32xbf16>
    %c0_140 = arith.constant 0 : index
    %c0_141 = arith.constant 0 : index
    %109 = vector.load %arg12[%c0_140, %c0_141] : memref<128x64xf32, #tpu.memory_space<vmem>>, vector<128x64xf32>
    %c2_142 = arith.constant 2 : index
    %c0_143 = arith.constant 0 : index
    %c0_144 = arith.constant 0 : index
    %110 = vector.load %arg6[%c2_142, %c0_143, %c0_144] : memref<5x32x64xbf16, #tpu.memory_space<vmem>>, vector<1x32x64xbf16>
    %111 = vector.shape_cast %110 : vector<1x32x64xbf16> to vector<32x64xbf16>
    %cst_145 = arith.constant dense<0.000000e+00> : vector<128x64xf32>
    %112 = tpu.matmul %108, %111, %cst_145 {dimension_numbers = #tpu.dot_dimension_numbers<[1], [0], [0], [1], [0, 0, 1, 1], [], []>} : vector<128x32xbf16>, vector<32x64xbf16>, vector<128x64xf32> -> vector<128x64xf32>
    %113 = arith.addf %109, %112 : vector<128x64xf32>
    %c0_146 = arith.constant 0 : index
    %c0_147 = arith.constant 0 : index
    %114 = vector.load %arg12[%c0_146, %c0_147] : memref<128x64xf32, #tpu.memory_space<vmem>>, vector<128x64xf32>
    tpu.vector_store %arg12[%c0_146, %c0_147], %113 {strides = array<i32>} : memref<128x64xf32, #tpu.memory_space<vmem>>, vector<128x64xf32>,
    %c3_148 = arith.constant 3 : index
    %c0_149 = arith.constant 0 : index
    %c0_150 = arith.constant 0 : index
    %115 = vector.load %arg11[%c3_148, %c0_149, %c0_150] : memref<20x8x32xbf16, #tpu.memory_space<vmem>>, vector<16x8x32xbf16>
    %116 = vector.shape_cast %115 : vector<16x8x32xbf16> to vector<128x32xbf16>
    %c0_151 = arith.constant 0 : index
    %c0_152 = arith.constant 0 : index
    %117 = vector.load %arg12[%c0_151, %c0_152] : memref<128x64xf32, #tpu.memory_space<vmem>>, vector<128x64xf32>
    %c3_153 = arith.constant 3 : index
    %c0_154 = arith.constant 0 : index
    %c0_155 = arith.constant 0 : index
    %118 = vector.load %arg6[%c3_153, %c0_154, %c0_155] : memref<5x32x64xbf16, #tpu.memory_space<vmem>>, vector<1x32x64xbf16>
    %119 = vector.shape_cast %118 : vector<1x32x64xbf16> to vector<32x64xbf16>
    %cst_156 = arith.constant dense<0.000000e+00> : vector<128x64xf32>
    %120 = tpu.matmul %116, %119, %cst_156 {dimension_numbers = #tpu.dot_dimension_numbers<[1], [0], [0], [1], [0, 0, 1, 1], [], []>} : vector<128x32xbf16>, vector<32x64xbf16>, vector<128x64xf32> -> vector<128x64xf32>
    %121 = arith.addf %117, %120 : vector<128x64xf32>
    %c0_157 = arith.constant 0 : index
    %c0_158 = arith.constant 0 : index
    %122 = vector.load %arg12[%c0_157, %c0_158] : memref<128x64xf32, #tpu.memory_space<vmem>>, vector<128x64xf32>
    tpu.vector_store %arg12[%c0_157, %c0_158], %121 {strides = array<i32>} : memref<128x64xf32, #tpu.memory_space<vmem>>, vector<128x64xf32>,
    %c4_159 = arith.constant 4 : index
    %c0_160 = arith.constant 0 : index
    %c0_161 = arith.constant 0 : index
    %123 = vector.load %arg11[%c4_159, %c0_160, %c0_161] : memref<20x8x32xbf16, #tpu.memory_space<vmem>>, vector<16x8x32xbf16>
    %124 = vector.shape_cast %123 : vector<16x8x32xbf16> to vector<128x32xbf16>
    %c0_162 = arith.constant 0 : index
    %c0_163 = arith.constant 0 : index
    %125 = vector.load %arg12[%c0_162, %c0_163] : memref<128x64xf32, #tpu.memory_space<vmem>>, vector<128x64xf32>
    %c4_164 = arith.constant 4 : index
    %c0_165 = arith.constant 0 : index
    %c0_166 = arith.constant 0 : index
    %126 = vector.load %arg6[%c4_164, %c0_165, %c0_166] : memref<5x32x64xbf16, #tpu.memory_space<vmem>>, vector<1x32x64xbf16>
    %127 = vector.shape_cast %126 : vector<1x32x64xbf16> to vector<32x64xbf16>
    %cst_167 = arith.constant dense<0.000000e+00> : vector<128x64xf32>
    %128 = tpu.matmul %124, %127, %cst_167 {dimension_numbers = #tpu.dot_dimension_numbers<[1], [0], [0], [1], [0, 0, 1, 1], [], []>} : vector<128x32xbf16>, vector<32x64xbf16>, vector<128x64xf32> -> vector<128x64xf32>
    %129 = arith.addf %125, %128 : vector<128x64xf32>
    %c0_168 = arith.constant 0 : index
    %c0_169 = arith.constant 0 : index
    %130 = vector.load %arg12[%c0_168, %c0_169] : memref<128x64xf32, #tpu.memory_space<vmem>>, vector<128x64xf32>
    tpu.vector_store %arg12[%c0_168, %c0_169], %129 {strides = array<i32>} : memref<128x64xf32, #tpu.memory_space<vmem>>, vector<128x64xf32>,
    %c0_170 = arith.constant 0 : index
    %c0_171 = arith.constant 0 : index
    %131 = vector.load %arg12[%c0_170, %c0_171] : memref<128x64xf32, #tpu.memory_space<vmem>>, vector<128x32xf32>
    %132 = arith.negf %131 : vector<128x32xf32>
    %133 = math.exp %132 : vector<128x32xf32>
    %cst_172 = arith.constant 1.000000e+00 : f32
    %134 = vector.broadcast %cst_172 : f32 to vector<128x32xf32>
    %135 = arith.addf %134, %133 : vector<128x32xf32>
    %136 = arith.divf %134, %135 : vector<128x32xf32>
    %c0_173 = arith.constant 0 : index
    %c32 = arith.constant 32 : index
    %137 = vector.load %arg12[%c0_173, %c32] : memref<128x64xf32, #tpu.memory_space<vmem>>, vector<128x32xf32>
    %138 = arith.negf %137 : vector<128x32xf32>
    %139 = math.exp %138 : vector<128x32xf32>
    %cst_174 = arith.constant 1.000000e+00 : f32
    %140 = vector.broadcast %cst_174 : f32 to vector<128x32xf32>
    %141 = arith.addf %140, %139 : vector<128x32xf32>
    %142 = arith.divf %140, %141 : vector<128x32xf32>
    %143 = arith.mulf %142, %2 : vector<128x32xf32>
    %144 = vector.shape_cast %143 : vector<128x32xf32> to vector<16x8x32xf32>
    %145 = arith.truncf %144 : vector<16x8x32xf32> to vector<16x8x32xbf16>
    %c2_175 = arith.constant 2 : index
    %c0_176 = arith.constant 0 : index
    %c0_177 = arith.constant 0 : index
    %146 = vector.load %arg11[%c2_175, %c0_176, %c0_177] : memref<20x8x32xbf16, #tpu.memory_space<vmem>>, vector<16x8x32xbf16>
    tpu.vector_store %arg11[%c2_175, %c0_176, %c0_177], %145 {strides = array<i32>} : memref<20x8x32xbf16, #tpu.memory_space<vmem>>, vector<16x8x32xbf16>,
    %c0_178 = arith.constant 0 : index
    %c0_179 = arith.constant 0 : index
    %c0_180 = arith.constant 0 : index
    %147 = vector.load %arg11[%c0_178, %c0_179, %c0_180] : memref<20x8x32xbf16, #tpu.memory_space<vmem>>, vector<16x8x32xbf16>
    %148 = vector.shape_cast %147 : vector<16x8x32xbf16> to vector<128x32xbf16>
    %c0_181 = arith.constant 0 : index
    %c0_182 = arith.constant 0 : index
    %149 = vector.load %arg13[%c0_181, %c0_182] : memref<128x32xf32, #tpu.memory_space<vmem>>, vector<128x32xf32>
    %c0_183 = arith.constant 0 : index
    %c0_184 = arith.constant 0 : index
    %c0_185 = arith.constant 0 : index
    %150 = vector.load %arg7[%c0_183, %c0_184, %c0_185] : memref<5x32x32xbf16, #tpu.memory_space<vmem>>, vector<1x32x32xbf16>
    %151 = vector.shape_cast %150 : vector<1x32x32xbf16> to vector<32x32xbf16>
    %cst_186 = arith.constant dense<0.000000e+00> : vector<128x32xf32>
    %152 = tpu.matmul %148, %151, %cst_186 {dimension_numbers = #tpu.dot_dimension_numbers<[1], [0], [0], [1], [0, 0, 1, 1], [], []>} : vector<128x32xbf16>, vector<32x32xbf16>, vector<128x32xf32> -> vector<128x32xf32>
    %153 = arith.addf %149, %152 : vector<128x32xf32>
    %c0_187 = arith.constant 0 : index
    %c0_188 = arith.constant 0 : index
    %154 = vector.load %arg13[%c0_187, %c0_188] : memref<128x32xf32, #tpu.memory_space<vmem>>, vector<128x32xf32>
    tpu.vector_store %arg13[%c0_187, %c0_188], %153 {strides = array<i32>} : memref<128x32xf32, #tpu.memory_space<vmem>>, vector<128x32xf32>,
    %c1_189 = arith.constant 1 : index
    %c0_190 = arith.constant 0 : index
    %c0_191 = arith.constant 0 : index
    %155 = vector.load %arg11[%c1_189, %c0_190, %c0_191] : memref<20x8x32xbf16, #tpu.memory_space<vmem>>, vector<16x8x32xbf16>
    %156 = vector.shape_cast %155 : vector<16x8x32xbf16> to vector<128x32xbf16>
    %c0_192 = arith.constant 0 : index
    %c0_193 = arith.constant 0 : index
    %157 = vector.load %arg13[%c0_192, %c0_193] : memref<128x32xf32, #tpu.memory_space<vmem>>, vector<128x32xf32>
    %c1_194 = arith.constant 1 : index
    %c0_195 = arith.constant 0 : index
    %c0_196 = arith.constant 0 : index
    %158 = vector.load %arg7[%c1_194, %c0_195, %c0_196] : memref<5x32x32xbf16, #tpu.memory_space<vmem>>, vector<1x32x32xbf16>
    %159 = vector.shape_cast %158 : vector<1x32x32xbf16> to vector<32x32xbf16>
    %cst_197 = arith.constant dense<0.000000e+00> : vector<128x32xf32>
    %160 = tpu.matmul %156, %159, %cst_197 {dimension_numbers = #tpu.dot_dimension_numbers<[1], [0], [0], [1], [0, 0, 1, 1], [], []>} : vector<128x32xbf16>, vector<32x32xbf16>, vector<128x32xf32> -> vector<128x32xf32>
    %161 = arith.addf %157, %160 : vector<128x32xf32>
    %c0_198 = arith.constant 0 : index
    %c0_199 = arith.constant 0 : index
    %162 = vector.load %arg13[%c0_198, %c0_199] : memref<128x32xf32, #tpu.memory_space<vmem>>, vector<128x32xf32>
    tpu.vector_store %arg13[%c0_198, %c0_199], %161 {strides = array<i32>} : memref<128x32xf32, #tpu.memory_space<vmem>>, vector<128x32xf32>,
    %c2_200 = arith.constant 2 : index
    %c0_201 = arith.constant 0 : index
    %c0_202 = arith.constant 0 : index
    %163 = vector.load %arg11[%c2_200, %c0_201, %c0_202] : memref<20x8x32xbf16, #tpu.memory_space<vmem>>, vector<16x8x32xbf16>
    %164 = vector.shape_cast %163 : vector<16x8x32xbf16> to vector<128x32xbf16>
    %c0_203 = arith.constant 0 : index
    %c0_204 = arith.constant 0 : index
    %165 = vector.load %arg13[%c0_203, %c0_204] : memref<128x32xf32, #tpu.memory_space<vmem>>, vector<128x32xf32>
    %c2_205 = arith.constant 2 : index
    %c0_206 = arith.constant 0 : index
    %c0_207 = arith.constant 0 : index
    %166 = vector.load %arg7[%c2_205, %c0_206, %c0_207] : memref<5x32x32xbf16, #tpu.memory_space<vmem>>, vector<1x32x32xbf16>
    %167 = vector.shape_cast %166 : vector<1x32x32xbf16> to vector<32x32xbf16>
    %cst_208 = arith.constant dense<0.000000e+00> : vector<128x32xf32>
    %168 = tpu.matmul %164, %167, %cst_208 {dimension_numbers = #tpu.dot_dimension_numbers<[1], [0], [0], [1], [0, 0, 1, 1], [], []>} : vector<128x32xbf16>, vector<32x32xbf16>, vector<128x32xf32> -> vector<128x32xf32>
    %169 = arith.addf %165, %168 : vector<128x32xf32>
    %c0_209 = arith.constant 0 : index
    %c0_210 = arith.constant 0 : index
    %170 = vector.load %arg13[%c0_209, %c0_210] : memref<128x32xf32, #tpu.memory_space<vmem>>, vector<128x32xf32>
    tpu.vector_store %arg13[%c0_209, %c0_210], %169 {strides = array<i32>} : memref<128x32xf32, #tpu.memory_space<vmem>>, vector<128x32xf32>,
    %c3_211 = arith.constant 3 : index
    %c0_212 = arith.constant 0 : index
    %c0_213 = arith.constant 0 : index
    %171 = vector.load %arg11[%c3_211, %c0_212, %c0_213] : memref<20x8x32xbf16, #tpu.memory_space<vmem>>, vector<16x8x32xbf16>
    %172 = vector.shape_cast %171 : vector<16x8x32xbf16> to vector<128x32xbf16>
    %c0_214 = arith.constant 0 : index
    %c0_215 = arith.constant 0 : index
    %173 = vector.load %arg13[%c0_214, %c0_215] : memref<128x32xf32, #tpu.memory_space<vmem>>, vector<128x32xf32>
    %c3_216 = arith.constant 3 : index
    %c0_217 = arith.constant 0 : index
    %c0_218 = arith.constant 0 : index
    %174 = vector.load %arg7[%c3_216, %c0_217, %c0_218] : memref<5x32x32xbf16, #tpu.memory_space<vmem>>, vector<1x32x32xbf16>
    %175 = vector.shape_cast %174 : vector<1x32x32xbf16> to vector<32x32xbf16>
    %cst_219 = arith.constant dense<0.000000e+00> : vector<128x32xf32>
    %176 = tpu.matmul %172, %175, %cst_219 {dimension_numbers = #tpu.dot_dimension_numbers<[1], [0], [0], [1], [0, 0, 1, 1], [], []>} : vector<128x32xbf16>, vector<32x32xbf16>, vector<128x32xf32> -> vector<128x32xf32>
    %177 = arith.addf %173, %176 : vector<128x32xf32>
    %c0_220 = arith.constant 0 : index
    %c0_221 = arith.constant 0 : index
    %178 = vector.load %arg13[%c0_220, %c0_221] : memref<128x32xf32, #tpu.memory_space<vmem>>, vector<128x32xf32>
    tpu.vector_store %arg13[%c0_220, %c0_221], %177 {strides = array<i32>} : memref<128x32xf32, #tpu.memory_space<vmem>>, vector<128x32xf32>,
    %c4_222 = arith.constant 4 : index
    %c0_223 = arith.constant 0 : index
    %c0_224 = arith.constant 0 : index
    %179 = vector.load %arg11[%c4_222, %c0_223, %c0_224] : memref<20x8x32xbf16, #tpu.memory_space<vmem>>, vector<16x8x32xbf16>
    %180 = vector.shape_cast %179 : vector<16x8x32xbf16> to vector<128x32xbf16>
    %c0_225 = arith.constant 0 : index
    %c0_226 = arith.constant 0 : index
    %181 = vector.load %arg13[%c0_225, %c0_226] : memref<128x32xf32, #tpu.memory_space<vmem>>, vector<128x32xf32>
    %c4_227 = arith.constant 4 : index
    %c0_228 = arith.constant 0 : index
    %c0_229 = arith.constant 0 : index
    %182 = vector.load %arg7[%c4_227, %c0_228, %c0_229] : memref<5x32x32xbf16, #tpu.memory_space<vmem>>, vector<1x32x32xbf16>
    %183 = vector.shape_cast %182 : vector<1x32x32xbf16> to vector<32x32xbf16>
    %cst_230 = arith.constant dense<0.000000e+00> : vector<128x32xf32>
    %184 = tpu.matmul %180, %183, %cst_230 {dimension_numbers = #tpu.dot_dimension_numbers<[1], [0], [0], [1], [0, 0, 1, 1], [], []>} : vector<128x32xbf16>, vector<32x32xbf16>, vector<128x32xf32> -> vector<128x32xf32>
    %185 = arith.addf %181, %184 : vector<128x32xf32>
    %c0_231 = arith.constant 0 : index
    %c0_232 = arith.constant 0 : index
    %186 = vector.load %arg13[%c0_231, %c0_232] : memref<128x32xf32, #tpu.memory_space<vmem>>, vector<128x32xf32>
    tpu.vector_store %arg13[%c0_231, %c0_232], %185 {strides = array<i32>} : memref<128x32xf32, #tpu.memory_space<vmem>>, vector<128x32xf32>,
    %c0_233 = arith.constant 0 : index
    %c0_234 = arith.constant 0 : index
    %187 = vector.load %arg13[%c0_233, %c0_234] : memref<128x32xf32, #tpu.memory_space<vmem>>, vector<128x32xf32>
    %188 = math.tanh %187 : vector<128x32xf32>
    %cst_235 = arith.constant 1.000000e+00 : f32
    %189 = vector.broadcast %cst_235 : f32 to vector<128x32xf32>
    %190 = arith.subf %189, %136 : vector<128x32xf32>
    %191 = arith.mulf %190, %2 : vector<128x32xf32>
    %192 = arith.mulf %136, %188 : vector<128x32xf32>
    %193 = arith.addf %191, %192 : vector<128x32xf32>
    %194 = vector.shape_cast %193 : vector<128x32xf32> to vector<16x8x32xf32>
    %c0_236 = arith.constant 0 : index
    %c0_237 = arith.constant 0 : index
    %c0_238 = arith.constant 0 : index
    %c0_239 = arith.constant 0 : index
    %195 = vector.load %arg10[%c0_236, %c0_237, %c0_238, %c0_239] : memref<1x16x8x32xf32, #tpu.memory_space<vmem>>, vector<1x16x8x32xf32>
    %196 = vector.shape_cast %195 : vector<1x16x8x32xf32> to vector<16x8x32xf32>
    %197 = vector.shape_cast %194 : vector<16x8x32xf32> to vector<1x16x8x32xf32>
    tpu.vector_store %arg10[%c0_236, %c0_237, %c0_238, %c0_239], %197 {strides = array<i32>} : memref<1x16x8x32xf32, #tpu.memory_space<vmem>>, vector<1x16x8x32xf32>,
    return
  }
  func.func @transform_0(%arg0: i32, %arg1: i32) -> (i32, i32, i32, i32) {
    %c0_i32 = arith.constant 0 : i32
    %c0_i32_0 = arith.constant 0 : i32
    %c0_i32_1 = arith.constant 0 : i32
    return %arg0, %c0_i32, %arg1, %c0_i32_0 : i32, i32, i32, i32
  }
  func.func @transform_1(%arg0: i32, %arg1: i32) -> (i32, i32, i32, i32) {
    %c0_i32 = arith.constant 0 : i32
    %c0_i32_0 = arith.constant 0 : i32
    %c0_i32_1 = arith.constant 0 : i32
    return %arg0, %c0_i32, %arg1, %c0_i32_0 : i32, i32, i32, i32
  }
  func.func @transform_2(%arg0: i32, %arg1: i32) -> (i32, i32, i32) {
    %c0_i32 = arith.constant 0 : i32
    %c0_i32_0 = arith.constant 0 : i32
    %c0_i32_1 = arith.constant 0 : i32
    %c0_i32_2 = arith.constant 0 : i32
    return %c0_i32, %c0_i32_0, %c0_i32_1 : i32, i32, i32
  }
  func.func @transform_3(%arg0: i32, %arg1: i32) -> (i32, i32, i32) {
    %c0_i32 = arith.constant 0 : i32
    %c0_i32_0 = arith.constant 0 : i32
    %c0_i32_1 = arith.constant 0 : i32
    %c0_i32_2 = arith.constant 0 : i32
    return %c0_i32, %c0_i32_0, %c0_i32_1 : i32, i32, i32
  }
  func.func @transform_4(%arg0: i32, %arg1: i32) -> (i32, i32, i32) {
    %c0_i32 = arith.constant 0 : i32
    %c0_i32_0 = arith.constant 0 : i32
    %c0_i32_1 = arith.constant 0 : i32
    %c0_i32_2 = arith.constant 0 : i32
    return %c0_i32, %c0_i32_0, %c0_i32_1 : i32, i32, i32
  }
  func.func @transform_5(%arg0: i32, %arg1: i32) -> (i32, i32, i32) {
    %c0_i32 = arith.constant 0 : i32
    %c0_i32_0 = arith.constant 0 : i32
    %c0_i32_1 = arith.constant 0 : i32
    %c0_i32_2 = arith.constant 0 : i32
    return %c0_i32, %c0_i32_0, %c0_i32_1 : i32, i32, i32
  }
  func.func @transform_6(%arg0: i32, %arg1: i32) -> (i32, i32) {
    %c0_i32 = arith.constant 0 : i32
    %c0_i32_0 = arith.constant 0 : i32
    %c0_i32_1 = arith.constant 0 : i32
    return %c0_i32, %c0_i32_0 : i32, i32
  }
  func.func @transform_7(%arg0: i32, %arg1: i32) -> (i32, i32) {
    %c0_i32 = arith.constant 0 : i32
    %c0_i32_0 = arith.constant 0 : i32
    %c0_i32_1 = arith.constant 0 : i32
    return %c0_i32, %c0_i32_0 : i32, i32
  }
  func.func @transform_8(%arg0: i32, %arg1: i32) -> (i32, i32, i32, i32) {
    %c0_i32 = arith.constant 0 : i32
    %c0_i32_0 = arith.constant 0 : i32
    %c0_i32_1 = arith.constant 0 : i32
    return %arg0, %c0_i32, %arg1, %c0_i32_0 : i32, i32, i32, i32
  }
}

module attributes {stable_mosaic.version = 11 : i64} {
  func.func @_gru_stage_kernel(%arg0: i32, %arg1: i32, %arg2: memref<1x16x8x32xf32, #tpu.memory_space<vmem>>, %arg3: memref<1x20x8x64xbf16, #tpu.memory_space<vmem>>, %arg4: memref<5x64x64xbf16, #tpu.memory_space<vmem>>, %arg5: memref<5x64x32xbf16, #tpu.memory_space<vmem>>, %arg6: memref<5x32x64xbf16, #tpu.memory_space<vmem>>, %arg7: memref<5x32x32xbf16, #tpu.memory_space<vmem>>, %arg8: memref<1x64xf32, #tpu.memory_space<vmem>>, %arg9: memref<1x32xf32, #tpu.memory_space<vmem>>, %arg10: memref<1x16x8x32xf32, #tpu.memory_space<vmem>>, %arg11: memref<20x8x32xbf16, #tpu.memory_space<vmem>>, %arg12: memref<128x64xf32, #tpu.memory_space<vmem>>, %arg13: memref<128x32xf32, #tpu.memory_space<vmem>>) attributes {dimension_semantics = [#tpu.dimension_semantics<parallel>, #tpu.dimension_semantics<parallel>], iteration_bounds = array<i64: 2, 2>, scalar_prefetch = 0 : i64, scratch_operands = 3 : i64, tpu.core_type = #tpu.core_type<tc>, window_params = [{transform_indices = @transform_0, window_bounds = array<i64: 1, 16, 8, 32>}, {transform_indices = @transform_1, window_bounds = array<i64: 1, 20, 8, 64>}, {pipeline_mode = #tpu.pipeline_mode<synchronous>, transform_indices = @transform_2, window_bounds = array<i64: 5, 64, 64>}, {pipeline_mode = #tpu.pipeline_mode<synchronous>, transform_indices = @transform_3, window_bounds = array<i64: 5, 64, 32>}, {pipeline_mode = #tpu.pipeline_mode<synchronous>, transform_indices = @transform_4, window_bounds = array<i64: 5, 32, 64>}, {pipeline_mode = #tpu.pipeline_mode<synchronous>, transform_indices = @transform_5, window_bounds = array<i64: 5, 32, 32>}, {pipeline_mode = #tpu.pipeline_mode<synchronous>, transform_indices = @transform_6, window_bounds = array<i64: 1, 64>}, {pipeline_mode = #tpu.pipeline_mode<synchronous>, transform_indices = @transform_7, window_bounds = array<i64: 1, 32>}, {transform_indices = @transform_8, window_bounds = array<i64: 1, 16, 8, 32>}]} {
    %c0 = arith.constant 0 : index
    %c0_0 = arith.constant 0 : index
    %c0_1 = arith.constant 0 : index
    %c0_2 = arith.constant 0 : index
    %0 = vector.load %arg2[%c0, %c0_0, %c0_1, %c0_2] : memref<1x16x8x32xf32, #tpu.memory_space<vmem>>, vector<1x16x8x32xf32>
    %1 = vector.shape_cast %0 : vector<1x16x8x32xf32> to vector<16x8x32xf32>
    %2 = vector.shape_cast %1 : vector<16x8x32xf32> to vector<128x32xf32>
    %c0_3 = arith.constant 0 : index
    %c0_4 = arith.constant 0 : index
    %3 = vector.load %arg8[%c0_3, %c0_4] : memref<1x64xf32, #tpu.memory_space<vmem>>, vector<1x64xf32>
    %4 = vector.shape_cast %3 : vector<1x64xf32> to vector<1x64xf32>
    %5 = vector.broadcast %4 : vector<1x64xf32> to vector<128x64xf32>
    %c0_5 = arith.constant 0 : index
    %c0_6 = arith.constant 0 : index
    %6 = vector.load %arg12[%c0_5, %c0_6] : memref<128x64xf32, #tpu.memory_space<vmem>>, vector<128x64xf32>
    tpu.vector_store %arg12[%c0_5, %c0_6], %5 {strides = array<i32>} : memref<128x64xf32, #tpu.memory_space<vmem>>, vector<128x64xf32>,
    %c0_7 = arith.constant 0 : index
    %c0_8 = arith.constant 0 : index
    %7 = vector.load %arg9[%c0_7, %c0_8] : memref<1x32xf32, #tpu.memory_space<vmem>>, vector<1x32xf32>
    %8 = vector.shape_cast %7 : vector<1x32xf32> to vector<1x32xf32>
    %9 = vector.broadcast %8 : vector<1x32xf32> to vector<128x32xf32>
    %c0_9 = arith.constant 0 : index
    %c0_10 = arith.constant 0 : index
    %10 = vector.load %arg13[%c0_9, %c0_10] : memref<128x32xf32, #tpu.memory_space<vmem>>, vector<128x32xf32>
    tpu.vector_store %arg13[%c0_9, %c0_10], %9 {strides = array<i32>} : memref<128x32xf32, #tpu.memory_space<vmem>>, vector<128x32xf32>,
    %c0_11 = arith.constant 0 : index
    %c0_12 = arith.constant 0 : index
    %c0_13 = arith.constant 0 : index
    %c0_14 = arith.constant 0 : index
    %11 = vector.load %arg3[%c0_11, %c0_12, %c0_13, %c0_14] : memref<1x20x8x64xbf16, #tpu.memory_space<vmem>>, vector<1x16x8x64xbf16>
    %12 = vector.shape_cast %11 : vector<1x16x8x64xbf16> to vector<16x8x64xbf16>
    %13 = vector.shape_cast %12 : vector<16x8x64xbf16> to vector<128x64xbf16>
    %c0_15 = arith.constant 0 : index
    %c0_16 = arith.constant 0 : index
    %14 = vector.load %arg12[%c0_15, %c0_16] : memref<128x64xf32, #tpu.memory_space<vmem>>, vector<128x64xf32>
    %c0_17 = arith.constant 0 : index
    %c0_18 = arith.constant 0 : index
    %c0_19 = arith.constant 0 : index
    %15 = vector.load %arg4[%c0_17, %c0_18, %c0_19] : memref<5x64x64xbf16, #tpu.memory_space<vmem>>, vector<1x64x64xbf16>
    %16 = vector.shape_cast %15 : vector<1x64x64xbf16> to vector<64x64xbf16>
    %cst = arith.constant dense<0.000000e+00> : vector<128x64xf32>
    %17 = tpu.matmul %13, %16, %cst {dimension_numbers = #tpu.dot_dimension_numbers<[1], [0], [0], [1], [0, 0, 1, 1], [], []>} : vector<128x64xbf16>, vector<64x64xbf16>, vector<128x64xf32> -> vector<128x64xf32>
    %18 = arith.addf %14, %17 : vector<128x64xf32>
    %c0_20 = arith.constant 0 : index
    %c0_21 = arith.constant 0 : index
    %19 = vector.load %arg12[%c0_20, %c0_21] : memref<128x64xf32, #tpu.memory_space<vmem>>, vector<128x64xf32>
    tpu.vector_store %arg12[%c0_20, %c0_21], %18 {strides = array<i32>} : memref<128x64xf32, #tpu.memory_space<vmem>>, vector<128x64xf32>,
    %c0_22 = arith.constant 0 : index
    %c0_23 = arith.constant 0 : index
    %20 = vector.load %arg13[%c0_22, %c0_23] : memref<128x32xf32, #tpu.memory_space<vmem>>, vector<128x32xf32>
    %c0_24 = arith.constant 0 : index
    %c0_25 = arith.constant 0 : index
    %c0_26 = arith.constant 0 : index
    %21 = vector.load %arg5[%c0_24, %c0_25, %c0_26] : memref<5x64x32xbf16, #tpu.memory_space<vmem>>, vector<1x64x32xbf16>
    %22 = vector.shape_cast %21 : vector<1x64x32xbf16> to vector<64x32xbf16>
    %cst_27 = arith.constant dense<0.000000e+00> : vector<128x32xf32>
    %23 = tpu.matmul %13, %22, %cst_27 {dimension_numbers = #tpu.dot_dimension_numbers<[1], [0], [0], [1], [0, 0, 1, 1], [], []>} : vector<128x64xbf16>, vector<64x32xbf16>, vector<128x32xf32> -> vector<128x32xf32>
    %24 = arith.addf %20, %23 : vector<128x32xf32>
    %c0_28 = arith.constant 0 : index
    %c0_29 = arith.constant 0 : index
    %25 = vector.load %arg13[%c0_28, %c0_29] : memref<128x32xf32, #tpu.memory_space<vmem>>, vector<128x32xf32>
    tpu.vector_store %arg13[%c0_28, %c0_29], %24 {strides = array<i32>} : memref<128x32xf32, #tpu.memory_space<vmem>>, vector<128x32xf32>,
    %c0_30 = arith.constant 0 : index
    %c1 = arith.constant 1 : index
    %c0_31 = arith.constant 0 : index
    %c0_32 = arith.constant 0 : index
    %26 = vector.load %arg3[%c0_30, %c1, %c0_31, %c0_32] : memref<1x20x8x64xbf16, #tpu.memory_space<vmem>>, vector<1x16x8x64xbf16>
    %27 = vector.shape_cast %26 : vector<1x16x8x64xbf16> to vector<16x8x64xbf16>
    %28 = vector.shape_cast %27 : vector<16x8x64xbf16> to vector<128x64xbf16>
    %c0_33 = arith.constant 0 : index
    %c0_34 = arith.constant 0 : index
    %29 = vector.load %arg12[%c0_33, %c0_34] : memref<128x64xf32, #tpu.memory_space<vmem>>, vector<128x64xf32>
    %c1_35 = arith.constant 1 : index
    %c0_36 = arith.constant 0 : index
    %c0_37 = arith.constant 0 : index
    %30 = vector.load %arg4[%c1_35, %c0_36, %c0_37] : memref<5x64x64xbf16, #tpu.memory_space<vmem>>, vector<1x64x64xbf16>
    %31 = vector.shape_cast %30 : vector<1x64x64xbf16> to vector<64x64xbf16>
    %cst_38 = arith.constant dense<0.000000e+00> : vector<128x64xf32>
    %32 = tpu.matmul %28, %31, %cst_38 {dimension_numbers = #tpu.dot_dimension_numbers<[1], [0], [0], [1], [0, 0, 1, 1], [], []>} : vector<128x64xbf16>, vector<64x64xbf16>, vector<128x64xf32> -> vector<128x64xf32>
    %33 = arith.addf %29, %32 : vector<128x64xf32>
    %c0_39 = arith.constant 0 : index
    %c0_40 = arith.constant 0 : index
    %34 = vector.load %arg12[%c0_39, %c0_40] : memref<128x64xf32, #tpu.memory_space<vmem>>, vector<128x64xf32>
    tpu.vector_store %arg12[%c0_39, %c0_40], %33 {strides = array<i32>} : memref<128x64xf32, #tpu.memory_space<vmem>>, vector<128x64xf32>,
    %c0_41 = arith.constant 0 : index
    %c0_42 = arith.constant 0 : index
    %35 = vector.load %arg13[%c0_41, %c0_42] : memref<128x32xf32, #tpu.memory_space<vmem>>, vector<128x32xf32>
    %c1_43 = arith.constant 1 : index
    %c0_44 = arith.constant 0 : index
    %c0_45 = arith.constant 0 : index
    %36 = vector.load %arg5[%c1_43, %c0_44, %c0_45] : memref<5x64x32xbf16, #tpu.memory_space<vmem>>, vector<1x64x32xbf16>
    %37 = vector.shape_cast %36 : vector<1x64x32xbf16> to vector<64x32xbf16>
    %cst_46 = arith.constant dense<0.000000e+00> : vector<128x32xf32>
    %38 = tpu.matmul %28, %37, %cst_46 {dimension_numbers = #tpu.dot_dimension_numbers<[1], [0], [0], [1], [0, 0, 1, 1], [], []>} : vector<128x64xbf16>, vector<64x32xbf16>, vector<128x32xf32> -> vector<128x32xf32>
    %39 = arith.addf %35, %38 : vector<128x32xf32>
    %c0_47 = arith.constant 0 : index
    %c0_48 = arith.constant 0 : index
    %40 = vector.load %arg13[%c0_47, %c0_48] : memref<128x32xf32, #tpu.memory_space<vmem>>, vector<128x32xf32>
    tpu.vector_store %arg13[%c0_47, %c0_48], %39 {strides = array<i32>} : memref<128x32xf32, #tpu.memory_space<vmem>>, vector<128x32xf32>,
    %c0_49 = arith.constant 0 : index
    %c2 = arith.constant 2 : index
    %c0_50 = arith.constant 0 : index
    %c0_51 = arith.constant 0 : index
    %41 = vector.load %arg3[%c0_49, %c2, %c0_50, %c0_51] : memref<1x20x8x64xbf16, #tpu.memory_space<vmem>>, vector<1x16x8x64xbf16>
    %42 = vector.shape_cast %41 : vector<1x16x8x64xbf16> to vector<16x8x64xbf16>
    %43 = vector.shape_cast %42 : vector<16x8x64xbf16> to vector<128x64xbf16>
    %c0_52 = arith.constant 0 : index
    %c0_53 = arith.constant 0 : index
    %44 = vector.load %arg12[%c0_52, %c0_53] : memref<128x64xf32, #tpu.memory_space<vmem>>, vector<128x64xf32>
    %c2_54 = arith.constant 2 : index
    %c0_55 = arith.constant 0 : index
    %c0_56 = arith.constant 0 : index
    %45 = vector.load %arg4[%c2_54, %c0_55, %c0_56] : memref<5x64x64xbf16, #tpu.memory_space<vmem>>, vector<1x64x64xbf16>
    %46 = vector.shape_cast %45 : vector<1x64x64xbf16> to vector<64x64xbf16>
    %cst_57 = arith.constant dense<0.000000e+00> : vector<128x64xf32>
    %47 = tpu.matmul %43, %46, %cst_57 {dimension_numbers = #tpu.dot_dimension_numbers<[1], [0], [0], [1], [0, 0, 1, 1], [], []>} : vector<128x64xbf16>, vector<64x64xbf16>, vector<128x64xf32> -> vector<128x64xf32>
    %48 = arith.addf %44, %47 : vector<128x64xf32>
    %c0_58 = arith.constant 0 : index
    %c0_59 = arith.constant 0 : index
    %49 = vector.load %arg12[%c0_58, %c0_59] : memref<128x64xf32, #tpu.memory_space<vmem>>, vector<128x64xf32>
    tpu.vector_store %arg12[%c0_58, %c0_59], %48 {strides = array<i32>} : memref<128x64xf32, #tpu.memory_space<vmem>>, vector<128x64xf32>,
    %c0_60 = arith.constant 0 : index
    %c0_61 = arith.constant 0 : index
    %50 = vector.load %arg13[%c0_60, %c0_61] : memref<128x32xf32, #tpu.memory_space<vmem>>, vector<128x32xf32>
    %c2_62 = arith.constant 2 : index
    %c0_63 = arith.constant 0 : index
    %c0_64 = arith.constant 0 : index
    %51 = vector.load %arg5[%c2_62, %c0_63, %c0_64] : memref<5x64x32xbf16, #tpu.memory_space<vmem>>, vector<1x64x32xbf16>
    %52 = vector.shape_cast %51 : vector<1x64x32xbf16> to vector<64x32xbf16>
    %cst_65 = arith.constant dense<0.000000e+00> : vector<128x32xf32>
    %53 = tpu.matmul %43, %52, %cst_65 {dimension_numbers = #tpu.dot_dimension_numbers<[1], [0], [0], [1], [0, 0, 1, 1], [], []>} : vector<128x64xbf16>, vector<64x32xbf16>, vector<128x32xf32> -> vector<128x32xf32>
    %54 = arith.addf %50, %53 : vector<128x32xf32>
    %c0_66 = arith.constant 0 : index
    %c0_67 = arith.constant 0 : index
    %55 = vector.load %arg13[%c0_66, %c0_67] : memref<128x32xf32, #tpu.memory_space<vmem>>, vector<128x32xf32>
    tpu.vector_store %arg13[%c0_66, %c0_67], %54 {strides = array<i32>} : memref<128x32xf32, #tpu.memory_space<vmem>>, vector<128x32xf32>,
    %c0_68 = arith.constant 0 : index
    %c3 = arith.constant 3 : index
    %c0_69 = arith.constant 0 : index
    %c0_70 = arith.constant 0 : index
    %56 = vector.load %arg3[%c0_68, %c3, %c0_69, %c0_70] : memref<1x20x8x64xbf16, #tpu.memory_space<vmem>>, vector<1x16x8x64xbf16>
    %57 = vector.shape_cast %56 : vector<1x16x8x64xbf16> to vector<16x8x64xbf16>
    %58 = vector.shape_cast %57 : vector<16x8x64xbf16> to vector<128x64xbf16>
    %c0_71 = arith.constant 0 : index
    %c0_72 = arith.constant 0 : index
    %59 = vector.load %arg12[%c0_71, %c0_72] : memref<128x64xf32, #tpu.memory_space<vmem>>, vector<128x64xf32>
    %c3_73 = arith.constant 3 : index
    %c0_74 = arith.constant 0 : index
    %c0_75 = arith.constant 0 : index
    %60 = vector.load %arg4[%c3_73, %c0_74, %c0_75] : memref<5x64x64xbf16, #tpu.memory_space<vmem>>, vector<1x64x64xbf16>
    %61 = vector.shape_cast %60 : vector<1x64x64xbf16> to vector<64x64xbf16>
    %cst_76 = arith.constant dense<0.000000e+00> : vector<128x64xf32>
    %62 = tpu.matmul %58, %61, %cst_76 {dimension_numbers = #tpu.dot_dimension_numbers<[1], [0], [0], [1], [0, 0, 1, 1], [], []>} : vector<128x64xbf16>, vector<64x64xbf16>, vector<128x64xf32> -> vector<128x64xf32>
    %63 = arith.addf %59, %62 : vector<128x64xf32>
    %c0_77 = arith.constant 0 : index
    %c0_78 = arith.constant 0 : index
    %64 = vector.load %arg12[%c0_77, %c0_78] : memref<128x64xf32, #tpu.memory_space<vmem>>, vector<128x64xf32>
    tpu.vector_store %arg12[%c0_77, %c0_78], %63 {strides = array<i32>} : memref<128x64xf32, #tpu.memory_space<vmem>>, vector<128x64xf32>,
    %c0_79 = arith.constant 0 : index
    %c0_80 = arith.constant 0 : index
    %65 = vector.load %arg13[%c0_79, %c0_80] : memref<128x32xf32, #tpu.memory_space<vmem>>, vector<128x32xf32>
    %c3_81 = arith.constant 3 : index
    %c0_82 = arith.constant 0 : index
    %c0_83 = arith.constant 0 : index
    %66 = vector.load %arg5[%c3_81, %c0_82, %c0_83] : memref<5x64x32xbf16, #tpu.memory_space<vmem>>, vector<1x64x32xbf16>
    %67 = vector.shape_cast %66 : vector<1x64x32xbf16> to vector<64x32xbf16>
    %cst_84 = arith.constant dense<0.000000e+00> : vector<128x32xf32>
    %68 = tpu.matmul %58, %67, %cst_84 {dimension_numbers = #tpu.dot_dimension_numbers<[1], [0], [0], [1], [0, 0, 1, 1], [], []>} : vector<128x64xbf16>, vector<64x32xbf16>, vector<128x32xf32> -> vector<128x32xf32>
    %69 = arith.addf %65, %68 : vector<128x32xf32>
    %c0_85 = arith.constant 0 : index
    %c0_86 = arith.constant 0 : index
    %70 = vector.load %arg13[%c0_85, %c0_86] : memref<128x32xf32, #tpu.memory_space<vmem>>, vector<128x32xf32>
    tpu.vector_store %arg13[%c0_85, %c0_86], %69 {strides = array<i32>} : memref<128x32xf32, #tpu.memory_space<vmem>>, vector<128x32xf32>,
    %c0_87 = arith.constant 0 : index
    %c4 = arith.constant 4 : index
    %c0_88 = arith.constant 0 : index
    %c0_89 = arith.constant 0 : index
    %71 = vector.load %arg3[%c0_87, %c4, %c0_88, %c0_89] : memref<1x20x8x64xbf16, #tpu.memory_space<vmem>>, vector<1x16x8x64xbf16>
    %72 = vector.shape_cast %71 : vector<1x16x8x64xbf16> to vector<16x8x64xbf16>
    %73 = vector.shape_cast %72 : vector<16x8x64xbf16> to vector<128x64xbf16>
    %c0_90 = arith.constant 0 : index
    %c0_91 = arith.constant 0 : index
    %74 = vector.load %arg12[%c0_90, %c0_91] : memref<128x64xf32, #tpu.memory_space<vmem>>, vector<128x64xf32>
    %c4_92 = arith.constant 4 : index
    %c0_93 = arith.constant 0 : index
    %c0_94 = arith.constant 0 : index
    %75 = vector.load %arg4[%c4_92, %c0_93, %c0_94] : memref<5x64x64xbf16, #tpu.memory_space<vmem>>, vector<1x64x64xbf16>
    %76 = vector.shape_cast %75 : vector<1x64x64xbf16> to vector<64x64xbf16>
    %cst_95 = arith.constant dense<0.000000e+00> : vector<128x64xf32>
    %77 = tpu.matmul %73, %76, %cst_95 {dimension_numbers = #tpu.dot_dimension_numbers<[1], [0], [0], [1], [0, 0, 1, 1], [], []>} : vector<128x64xbf16>, vector<64x64xbf16>, vector<128x64xf32> -> vector<128x64xf32>
    %78 = arith.addf %74, %77 : vector<128x64xf32>
    %c0_96 = arith.constant 0 : index
    %c0_97 = arith.constant 0 : index
    %79 = vector.load %arg12[%c0_96, %c0_97] : memref<128x64xf32, #tpu.memory_space<vmem>>, vector<128x64xf32>
    tpu.vector_store %arg12[%c0_96, %c0_97], %78 {strides = array<i32>} : memref<128x64xf32, #tpu.memory_space<vmem>>, vector<128x64xf32>,
    %c0_98 = arith.constant 0 : index
    %c0_99 = arith.constant 0 : index
    %80 = vector.load %arg13[%c0_98, %c0_99] : memref<128x32xf32, #tpu.memory_space<vmem>>, vector<128x32xf32>
    %c4_100 = arith.constant 4 : index
    %c0_101 = arith.constant 0 : index
    %c0_102 = arith.constant 0 : index
    %81 = vector.load %arg5[%c4_100, %c0_101, %c0_102] : memref<5x64x32xbf16, #tpu.memory_space<vmem>>, vector<1x64x32xbf16>
    %82 = vector.shape_cast %81 : vector<1x64x32xbf16> to vector<64x32xbf16>
    %cst_103 = arith.constant dense<0.000000e+00> : vector<128x32xf32>
    %83 = tpu.matmul %73, %82, %cst_103 {dimension_numbers = #tpu.dot_dimension_numbers<[1], [0], [0], [1], [0, 0, 1, 1], [], []>} : vector<128x64xbf16>, vector<64x32xbf16>, vector<128x32xf32> -> vector<128x32xf32>
    %84 = arith.addf %80, %83 : vector<128x32xf32>
    %c0_104 = arith.constant 0 : index
    %c0_105 = arith.constant 0 : index
    %85 = vector.load %arg13[%c0_104, %c0_105] : memref<128x32xf32, #tpu.memory_space<vmem>>, vector<128x32xf32>
    tpu.vector_store %arg13[%c0_104, %c0_105], %84 {strides = array<i32>} : memref<128x32xf32, #tpu.memory_space<vmem>>, vector<128x32xf32>,
    %cst_106 = arith.constant 0.000000e+00 : bf16
    %86 = vector.broadcast %cst_106 : bf16 to vector<2x8x32xbf16>
    %c0_107 = arith.constant 0 : index
    %c0_108 = arith.constant 0 : index
    %c0_109 = arith.constant 0 : index
    %87 = vector.load %arg11[%c0_107, %c0_108, %c0_109] : memref<20x8x32xbf16, #tpu.memory_space<vmem>>, vector<2x8x32xbf16>
    tpu.vector_store %arg11[%c0_107, %c0_108, %c0_109], %86 {strides = array<i32>} : memref<20x8x32xbf16, #tpu.memory_space<vmem>>, vector<2x8x32xbf16>,
    %c18 = arith.constant 18 : index
    %c0_110 = arith.constant 0 : index
    %c0_111 = arith.constant 0 : index
    %88 = vector.load %arg11[%c18, %c0_110, %c0_111] : memref<20x8x32xbf16, #tpu.memory_space<vmem>>, vector<2x8x32xbf16>
    tpu.vector_store %arg11[%c18, %c0_110, %c0_111], %86 {strides = array<i32>} : memref<20x8x32xbf16, #tpu.memory_space<vmem>>, vector<2x8x32xbf16>,
    %89 = arith.truncf %1 : vector<16x8x32xf32> to vector<16x8x32xbf16>
    %c2_112 = arith.constant 2 : index
    %c0_113 = arith.constant 0 : index
    %c0_114 = arith.constant 0 : index
    %90 = vector.load %arg11[%c2_112, %c0_113, %c0_114] : memref<20x8x32xbf16, #tpu.memory_space<vmem>>, vector<16x8x32xbf16>
    tpu.vector_store %arg11[%c2_112, %c0_113, %c0_114], %89 {strides = array<i32>} : memref<20x8x32xbf16, #tpu.memory_space<vmem>>, vector<16x8x32xbf16>,
    %c0_115 = arith.constant 0 : index
    %c0_116 = arith.constant 0 : index
    %c0_117 = arith.constant 0 : index
    %91 = vector.load %arg11[%c0_115, %c0_116, %c0_117] : memref<20x8x32xbf16, #tpu.memory_space<vmem>>, vector<16x8x32xbf16>
    %92 = vector.shape_cast %91 : vector<16x8x32xbf16> to vector<128x32xbf16>
    %c0_118 = arith.constant 0 : index
    %c0_119 = arith.constant 0 : index
    %93 = vector.load %arg12[%c0_118, %c0_119] : memref<128x64xf32, #tpu.memory_space<vmem>>, vector<128x64xf32>
    %c0_120 = arith.constant 0 : index
    %c0_121 = arith.constant 0 : index
    %c0_122 = arith.constant 0 : index
    %94 = vector.load %arg6[%c0_120, %c0_121, %c0_122] : memref<5x32x64xbf16, #tpu.memory_space<vmem>>, vector<1x32x64xbf16>
    %95 = vector.shape_cast %94 : vector<1x32x64xbf16> to vector<32x64xbf16>
    %cst_123 = arith.constant dense<0.000000e+00> : vector<128x64xf32>
    %96 = tpu.matmul %92, %95, %cst_123 {dimension_numbers = #tpu.dot_dimension_numbers<[1], [0], [0], [1], [0, 0, 1, 1], [], []>} : vector<128x32xbf16>, vector<32x64xbf16>, vector<128x64xf32> -> vector<128x64xf32>
    %97 = arith.addf %93, %96 : vector<128x64xf32>
    %c0_124 = arith.constant 0 : index
    %c0_125 = arith.constant 0 : index
    %98 = vector.load %arg12[%c0_124, %c0_125] : memref<128x64xf32, #tpu.memory_space<vmem>>, vector<128x64xf32>
    tpu.vector_store %arg12[%c0_124, %c0_125], %97 {strides = array<i32>} : memref<128x64xf32, #tpu.memory_space<vmem>>, vector<128x64xf32>,
    %c1_126 = arith.constant 1 : index
    %c0_127 = arith.constant 0 : index
    %c0_128 = arith.constant 0 : index
    %99 = vector.load %arg11[%c1_126, %c0_127, %c0_128] : memref<20x8x32xbf16, #tpu.memory_space<vmem>>, vector<16x8x32xbf16>
    %100 = vector.shape_cast %99 : vector<16x8x32xbf16> to vector<128x32xbf16>
    %c0_129 = arith.constant 0 : index
    %c0_130 = arith.constant 0 : index
    %101 = vector.load %arg12[%c0_129, %c0_130] : memref<128x64xf32, #tpu.memory_space<vmem>>, vector<128x64xf32>
    %c1_131 = arith.constant 1 : index
    %c0_132 = arith.constant 0 : index
    %c0_133 = arith.constant 0 : index
    %102 = vector.load %arg6[%c1_131, %c0_132, %c0_133] : memref<5x32x64xbf16, #tpu.memory_space<vmem>>, vector<1x32x64xbf16>
    %103 = vector.shape_cast %102 : vector<1x32x64xbf16> to vector<32x64xbf16>
    %cst_134 = arith.constant dense<0.000000e+00> : vector<128x64xf32>
    %104 = tpu.matmul %100, %103, %cst_134 {dimension_numbers = #tpu.dot_dimension_numbers<[1], [0], [0], [1], [0, 0, 1, 1], [], []>} : vector<128x32xbf16>, vector<32x64xbf16>, vector<128x64xf32> -> vector<128x64xf32>
    %105 = arith.addf %101, %104 : vector<128x64xf32>
    %c0_135 = arith.constant 0 : index
    %c0_136 = arith.constant 0 : index
    %106 = vector.load %arg12[%c0_135, %c0_136] : memref<128x64xf32, #tpu.memory_space<vmem>>, vector<128x64xf32>
    tpu.vector_store %arg12[%c0_135, %c0_136], %105 {strides = array<i32>} : memref<128x64xf32, #tpu.memory_space<vmem>>, vector<128x64xf32>,
    %c2_137 = arith.constant 2 : index
    %c0_138 = arith.constant 0 : index
    %c0_139 = arith.constant 0 : index
    %107 = vector.load %arg11[%c2_137, %c0_138, %c0_139] : memref<20x8x32xbf16, #tpu.memory_space<vmem>>, vector<16x8x32xbf16>
    %108 = vector.shape_cast %107 : vector<16x8x32xbf16> to vector<128x32xbf16>
    %c0_140 = arith.constant 0 : index
    %c0_141 = arith.constant 0 : index
    %109 = vector.load %arg12[%c0_140, %c0_141] : memref<128x64xf32, #tpu.memory_space<vmem>>, vector<128x64xf32>
    %c2_142 = arith.constant 2 : index
    %c0_143 = arith.constant 0 : index
    %c0_144 = arith.constant 0 : index
    %110 = vector.load %arg6[%c2_142, %c0_143, %c0_144] : memref<5x32x64xbf16, #tpu.memory_space<vmem>>, vector<1x32x64xbf16>
    %111 = vector.shape_cast %110 : vector<1x32x64xbf16> to vector<32x64xbf16>
    %cst_145 = arith.constant dense<0.000000e+00> : vector<128x64xf32>
    %112 = tpu.matmul %108, %111, %cst_145 {dimension_numbers = #tpu.dot_dimension_numbers<[1], [0], [0], [1], [0, 0, 1, 1], [], []>} : vector<128x32xbf16>, vector<32x64xbf16>, vector<128x64xf32> -> vector<128x64xf32>
    %113 = arith.addf %109, %112 : vector<128x64xf32>
    %c0_146 = arith.constant 0 : index
    %c0_147 = arith.constant 0 : index
    %114 = vector.load %arg12[%c0_146, %c0_147] : memref<128x64xf32, #tpu.memory_space<vmem>>, vector<128x64xf32>
    tpu.vector_store %arg12[%c0_146, %c0_147], %113 {strides = array<i32>} : memref<128x64xf32, #tpu.memory_space<vmem>>, vector<128x64xf32>,
    %c3_148 = arith.constant 3 : index
    %c0_149 = arith.constant 0 : index
    %c0_150 = arith.constant 0 : index
    %115 = vector.load %arg11[%c3_148, %c0_149, %c0_150] : memref<20x8x32xbf16, #tpu.memory_space<vmem>>, vector<16x8x32xbf16>
    %116 = vector.shape_cast %115 : vector<16x8x32xbf16> to vector<128x32xbf16>
    %c0_151 = arith.constant 0 : index
    %c0_152 = arith.constant 0 : index
    %117 = vector.load %arg12[%c0_151, %c0_152] : memref<128x64xf32, #tpu.memory_space<vmem>>, vector<128x64xf32>
    %c3_153 = arith.constant 3 : index
    %c0_154 = arith.constant 0 : index
    %c0_155 = arith.constant 0 : index
    %118 = vector.load %arg6[%c3_153, %c0_154, %c0_155] : memref<5x32x64xbf16, #tpu.memory_space<vmem>>, vector<1x32x64xbf16>
    %119 = vector.shape_cast %118 : vector<1x32x64xbf16> to vector<32x64xbf16>
    %cst_156 = arith.constant dense<0.000000e+00> : vector<128x64xf32>
    %120 = tpu.matmul %116, %119, %cst_156 {dimension_numbers = #tpu.dot_dimension_numbers<[1], [0], [0], [1], [0, 0, 1, 1], [], []>} : vector<128x32xbf16>, vector<32x64xbf16>, vector<128x64xf32> -> vector<128x64xf32>
    %121 = arith.addf %117, %120 : vector<128x64xf32>
    %c0_157 = arith.constant 0 : index
    %c0_158 = arith.constant 0 : index
    %122 = vector.load %arg12[%c0_157, %c0_158] : memref<128x64xf32, #tpu.memory_space<vmem>>, vector<128x64xf32>
    tpu.vector_store %arg12[%c0_157, %c0_158], %121 {strides = array<i32>} : memref<128x64xf32, #tpu.memory_space<vmem>>, vector<128x64xf32>,
    %c4_159 = arith.constant 4 : index
    %c0_160 = arith.constant 0 : index
    %c0_161 = arith.constant 0 : index
    %123 = vector.load %arg11[%c4_159, %c0_160, %c0_161] : memref<20x8x32xbf16, #tpu.memory_space<vmem>>, vector<16x8x32xbf16>
    %124 = vector.shape_cast %123 : vector<16x8x32xbf16> to vector<128x32xbf16>
    %c0_162 = arith.constant 0 : index
    %c0_163 = arith.constant 0 : index
    %125 = vector.load %arg12[%c0_162, %c0_163] : memref<128x64xf32, #tpu.memory_space<vmem>>, vector<128x64xf32>
    %c4_164 = arith.constant 4 : index
    %c0_165 = arith.constant 0 : index
    %c0_166 = arith.constant 0 : index
    %126 = vector.load %arg6[%c4_164, %c0_165, %c0_166] : memref<5x32x64xbf16, #tpu.memory_space<vmem>>, vector<1x32x64xbf16>
    %127 = vector.shape_cast %126 : vector<1x32x64xbf16> to vector<32x64xbf16>
    %cst_167 = arith.constant dense<0.000000e+00> : vector<128x64xf32>
    %128 = tpu.matmul %124, %127, %cst_167 {dimension_numbers = #tpu.dot_dimension_numbers<[1], [0], [0], [1], [0, 0, 1, 1], [], []>} : vector<128x32xbf16>, vector<32x64xbf16>, vector<128x64xf32> -> vector<128x64xf32>
    %129 = arith.addf %125, %128 : vector<128x64xf32>
    %c0_168 = arith.constant 0 : index
    %c0_169 = arith.constant 0 : index
    %130 = vector.load %arg12[%c0_168, %c0_169] : memref<128x64xf32, #tpu.memory_space<vmem>>, vector<128x64xf32>
    tpu.vector_store %arg12[%c0_168, %c0_169], %129 {strides = array<i32>} : memref<128x64xf32, #tpu.memory_space<vmem>>, vector<128x64xf32>,
    %c0_170 = arith.constant 0 : index
    %c0_171 = arith.constant 0 : index
    %131 = vector.load %arg12[%c0_170, %c0_171] : memref<128x64xf32, #tpu.memory_space<vmem>>, vector<128x32xf32>
    %132 = arith.negf %131 : vector<128x32xf32>
    %133 = math.exp %132 : vector<128x32xf32>
    %cst_172 = arith.constant 1.000000e+00 : f32
    %134 = vector.broadcast %cst_172 : f32 to vector<128x32xf32>
    %135 = arith.addf %134, %133 : vector<128x32xf32>
    %136 = arith.divf %134, %135 : vector<128x32xf32>
    %c0_173 = arith.constant 0 : index
    %c32 = arith.constant 32 : index
    %137 = vector.load %arg12[%c0_173, %c32] : memref<128x64xf32, #tpu.memory_space<vmem>>, vector<128x32xf32>
    %138 = arith.negf %137 : vector<128x32xf32>
    %139 = math.exp %138 : vector<128x32xf32>
    %cst_174 = arith.constant 1.000000e+00 : f32
    %140 = vector.broadcast %cst_174 : f32 to vector<128x32xf32>
    %141 = arith.addf %140, %139 : vector<128x32xf32>
    %142 = arith.divf %140, %141 : vector<128x32xf32>
    %143 = arith.mulf %142, %2 : vector<128x32xf32>
    %144 = vector.shape_cast %143 : vector<128x32xf32> to vector<16x8x32xf32>
    %145 = arith.truncf %144 : vector<16x8x32xf32> to vector<16x8x32xbf16>
    %c2_175 = arith.constant 2 : index
    %c0_176 = arith.constant 0 : index
    %c0_177 = arith.constant 0 : index
    %146 = vector.load %arg11[%c2_175, %c0_176, %c0_177] : memref<20x8x32xbf16, #tpu.memory_space<vmem>>, vector<16x8x32xbf16>
    tpu.vector_store %arg11[%c2_175, %c0_176, %c0_177], %145 {strides = array<i32>} : memref<20x8x32xbf16, #tpu.memory_space<vmem>>, vector<16x8x32xbf16>,
    %c0_178 = arith.constant 0 : index
    %c0_179 = arith.constant 0 : index
    %c0_180 = arith.constant 0 : index
    %147 = vector.load %arg11[%c0_178, %c0_179, %c0_180] : memref<20x8x32xbf16, #tpu.memory_space<vmem>>, vector<16x8x32xbf16>
    %148 = vector.shape_cast %147 : vector<16x8x32xbf16> to vector<128x32xbf16>
    %c0_181 = arith.constant 0 : index
    %c0_182 = arith.constant 0 : index
    %149 = vector.load %arg13[%c0_181, %c0_182] : memref<128x32xf32, #tpu.memory_space<vmem>>, vector<128x32xf32>
    %c0_183 = arith.constant 0 : index
    %c0_184 = arith.constant 0 : index
    %c0_185 = arith.constant 0 : index
    %150 = vector.load %arg7[%c0_183, %c0_184, %c0_185] : memref<5x32x32xbf16, #tpu.memory_space<vmem>>, vector<1x32x32xbf16>
    %151 = vector.shape_cast %150 : vector<1x32x32xbf16> to vector<32x32xbf16>
    %cst_186 = arith.constant dense<0.000000e+00> : vector<128x32xf32>
    %152 = tpu.matmul %148, %151, %cst_186 {dimension_numbers = #tpu.dot_dimension_numbers<[1], [0], [0], [1], [0, 0, 1, 1], [], []>} : vector<128x32xbf16>, vector<32x32xbf16>, vector<128x32xf32> -> vector<128x32xf32>
    %153 = arith.addf %149, %152 : vector<128x32xf32>
    %c0_187 = arith.constant 0 : index
    %c0_188 = arith.constant 0 : index
    %154 = vector.load %arg13[%c0_187, %c0_188] : memref<128x32xf32, #tpu.memory_space<vmem>>, vector<128x32xf32>
    tpu.vector_store %arg13[%c0_187, %c0_188], %153 {strides = array<i32>} : memref<128x32xf32, #tpu.memory_space<vmem>>, vector<128x32xf32>,
    %c1_189 = arith.constant 1 : index
    %c0_190 = arith.constant 0 : index
    %c0_191 = arith.constant 0 : index
    %155 = vector.load %arg11[%c1_189, %c0_190, %c0_191] : memref<20x8x32xbf16, #tpu.memory_space<vmem>>, vector<16x8x32xbf16>
    %156 = vector.shape_cast %155 : vector<16x8x32xbf16> to vector<128x32xbf16>
    %c0_192 = arith.constant 0 : index
    %c0_193 = arith.constant 0 : index
    %157 = vector.load %arg13[%c0_192, %c0_193] : memref<128x32xf32, #tpu.memory_space<vmem>>, vector<128x32xf32>
    %c1_194 = arith.constant 1 : index
    %c0_195 = arith.constant 0 : index
    %c0_196 = arith.constant 0 : index
    %158 = vector.load %arg7[%c1_194, %c0_195, %c0_196] : memref<5x32x32xbf16, #tpu.memory_space<vmem>>, vector<1x32x32xbf16>
    %159 = vector.shape_cast %158 : vector<1x32x32xbf16> to vector<32x32xbf16>
    %cst_197 = arith.constant dense<0.000000e+00> : vector<128x32xf32>
    %160 = tpu.matmul %156, %159, %cst_197 {dimension_numbers = #tpu.dot_dimension_numbers<[1], [0], [0], [1], [0, 0, 1, 1], [], []>} : vector<128x32xbf16>, vector<32x32xbf16>, vector<128x32xf32> -> vector<128x32xf32>
    %161 = arith.addf %157, %160 : vector<128x32xf32>
    %c0_198 = arith.constant 0 : index
    %c0_199 = arith.constant 0 : index
    %162 = vector.load %arg13[%c0_198, %c0_199] : memref<128x32xf32, #tpu.memory_space<vmem>>, vector<128x32xf32>
    tpu.vector_store %arg13[%c0_198, %c0_199], %161 {strides = array<i32>} : memref<128x32xf32, #tpu.memory_space<vmem>>, vector<128x32xf32>,
    %c2_200 = arith.constant 2 : index
    %c0_201 = arith.constant 0 : index
    %c0_202 = arith.constant 0 : index
    %163 = vector.load %arg11[%c2_200, %c0_201, %c0_202] : memref<20x8x32xbf16, #tpu.memory_space<vmem>>, vector<16x8x32xbf16>
    %164 = vector.shape_cast %163 : vector<16x8x32xbf16> to vector<128x32xbf16>
    %c0_203 = arith.constant 0 : index
    %c0_204 = arith.constant 0 : index
    %165 = vector.load %arg13[%c0_203, %c0_204] : memref<128x32xf32, #tpu.memory_space<vmem>>, vector<128x32xf32>
    %c2_205 = arith.constant 2 : index
    %c0_206 = arith.constant 0 : index
    %c0_207 = arith.constant 0 : index
    %166 = vector.load %arg7[%c2_205, %c0_206, %c0_207] : memref<5x32x32xbf16, #tpu.memory_space<vmem>>, vector<1x32x32xbf16>
    %167 = vector.shape_cast %166 : vector<1x32x32xbf16> to vector<32x32xbf16>
    %cst_208 = arith.constant dense<0.000000e+00> : vector<128x32xf32>
    %168 = tpu.matmul %164, %167, %cst_208 {dimension_numbers = #tpu.dot_dimension_numbers<[1], [0], [0], [1], [0, 0, 1, 1], [], []>} : vector<128x32xbf16>, vector<32x32xbf16>, vector<128x32xf32> -> vector<128x32xf32>
    %169 = arith.addf %165, %168 : vector<128x32xf32>
    %c0_209 = arith.constant 0 : index
    %c0_210 = arith.constant 0 : index
    %170 = vector.load %arg13[%c0_209, %c0_210] : memref<128x32xf32, #tpu.memory_space<vmem>>, vector<128x32xf32>
    tpu.vector_store %arg13[%c0_209, %c0_210], %169 {strides = array<i32>} : memref<128x32xf32, #tpu.memory_space<vmem>>, vector<128x32xf32>,
    %c3_211 = arith.constant 3 : index
    %c0_212 = arith.constant 0 : index
    %c0_213 = arith.constant 0 : index
    %171 = vector.load %arg11[%c3_211, %c0_212, %c0_213] : memref<20x8x32xbf16, #tpu.memory_space<vmem>>, vector<16x8x32xbf16>
    %172 = vector.shape_cast %171 : vector<16x8x32xbf16> to vector<128x32xbf16>
    %c0_214 = arith.constant 0 : index
    %c0_215 = arith.constant 0 : index
    %173 = vector.load %arg13[%c0_214, %c0_215] : memref<128x32xf32, #tpu.memory_space<vmem>>, vector<128x32xf32>
    %c3_216 = arith.constant 3 : index
    %c0_217 = arith.constant 0 : index
    %c0_218 = arith.constant 0 : index
    %174 = vector.load %arg7[%c3_216, %c0_217, %c0_218] : memref<5x32x32xbf16, #tpu.memory_space<vmem>>, vector<1x32x32xbf16>
    %175 = vector.shape_cast %174 : vector<1x32x32xbf16> to vector<32x32xbf16>
    %cst_219 = arith.constant dense<0.000000e+00> : vector<128x32xf32>
    %176 = tpu.matmul %172, %175, %cst_219 {dimension_numbers = #tpu.dot_dimension_numbers<[1], [0], [0], [1], [0, 0, 1, 1], [], []>} : vector<128x32xbf16>, vector<32x32xbf16>, vector<128x32xf32> -> vector<128x32xf32>
    %177 = arith.addf %173, %176 : vector<128x32xf32>
    %c0_220 = arith.constant 0 : index
    %c0_221 = arith.constant 0 : index
    %178 = vector.load %arg13[%c0_220, %c0_221] : memref<128x32xf32, #tpu.memory_space<vmem>>, vector<128x32xf32>
    tpu.vector_store %arg13[%c0_220, %c0_221], %177 {strides = array<i32>} : memref<128x32xf32, #tpu.memory_space<vmem>>, vector<128x32xf32>,
    %c4_222 = arith.constant 4 : index
    %c0_223 = arith.constant 0 : index
    %c0_224 = arith.constant 0 : index
    %179 = vector.load %arg11[%c4_222, %c0_223, %c0_224] : memref<20x8x32xbf16, #tpu.memory_space<vmem>>, vector<16x8x32xbf16>
    %180 = vector.shape_cast %179 : vector<16x8x32xbf16> to vector<128x32xbf16>
    %c0_225 = arith.constant 0 : index
    %c0_226 = arith.constant 0 : index
    %181 = vector.load %arg13[%c0_225, %c0_226] : memref<128x32xf32, #tpu.memory_space<vmem>>, vector<128x32xf32>
    %c4_227 = arith.constant 4 : index
    %c0_228 = arith.constant 0 : index
    %c0_229 = arith.constant 0 : index
    %182 = vector.load %arg7[%c4_227, %c0_228, %c0_229] : memref<5x32x32xbf16, #tpu.memory_space<vmem>>, vector<1x32x32xbf16>
    %183 = vector.shape_cast %182 : vector<1x32x32xbf16> to vector<32x32xbf16>
    %cst_230 = arith.constant dense<0.000000e+00> : vector<128x32xf32>
    %184 = tpu.matmul %180, %183, %cst_230 {dimension_numbers = #tpu.dot_dimension_numbers<[1], [0], [0], [1], [0, 0, 1, 1], [], []>} : vector<128x32xbf16>, vector<32x32xbf16>, vector<128x32xf32> -> vector<128x32xf32>
    %185 = arith.addf %181, %184 : vector<128x32xf32>
    %c0_231 = arith.constant 0 : index
    %c0_232 = arith.constant 0 : index
    %186 = vector.load %arg13[%c0_231, %c0_232] : memref<128x32xf32, #tpu.memory_space<vmem>>, vector<128x32xf32>
    tpu.vector_store %arg13[%c0_231, %c0_232], %185 {strides = array<i32>} : memref<128x32xf32, #tpu.memory_space<vmem>>, vector<128x32xf32>,
    %c0_233 = arith.constant 0 : index
    %c0_234 = arith.constant 0 : index
    %187 = vector.load %arg13[%c0_233, %c0_234] : memref<128x32xf32, #tpu.memory_space<vmem>>, vector<128x32xf32>
    %188 = math.tanh %187 : vector<128x32xf32>
    %cst_235 = arith.constant 1.000000e+00 : f32
    %189 = vector.broadcast %cst_235 : f32 to vector<128x32xf32>
    %190 = arith.subf %189, %136 : vector<128x32xf32>
    %191 = arith.mulf %190, %2 : vector<128x32xf32>
    %192 = arith.mulf %136, %188 : vector<128x32xf32>
    %193 = arith.addf %191, %192 : vector<128x32xf32>
    %194 = vector.shape_cast %193 : vector<128x32xf32> to vector<16x8x32xf32>
    %c0_236 = arith.constant 0 : index
    %c0_237 = arith.constant 0 : index
    %c0_238 = arith.constant 0 : index
    %c0_239 = arith.constant 0 : index
    %195 = vector.load %arg10[%c0_236, %c0_237, %c0_238, %c0_239] : memref<1x16x8x32xf32, #tpu.memory_space<vmem>>, vector<1x16x8x32xf32>
    %196 = vector.shape_cast %195 : vector<1x16x8x32xf32> to vector<16x8x32xf32>
    %197 = vector.shape_cast %194 : vector<16x8x32xf32> to vector<1x16x8x32xf32>
    tpu.vector_store %arg10[%c0_236, %c0_237, %c0_238, %c0_239], %197 {strides = array<i32>} : memref<1x16x8x32xf32, #tpu.memory_space<vmem>>, vector<1x16x8x32xf32>,
    return
  }
  func.func @transform_0(%arg0: i32, %arg1: i32) -> (i32, i32, i32, i32) {
    %c0_i32 = arith.constant 0 : i32
    %c0_i32_0 = arith.constant 0 : i32
    %c0_i32_1 = arith.constant 0 : i32
    return %arg0, %c0_i32, %arg1, %c0_i32_0 : i32, i32, i32, i32
  }
  func.func @transform_1(%arg0: i32, %arg1: i32) -> (i32, i32, i32, i32) {
    %c0_i32 = arith.constant 0 : i32
    %c0_i32_0 = arith.constant 0 : i32
    %c0_i32_1 = arith.constant 0 : i32
    return %arg0, %c0_i32, %arg1, %c0_i32_0 : i32, i32, i32, i32
  }
  func.func @transform_2(%arg0: i32, %arg1: i32) -> (i32, i32, i32) {
    %c0_i32 = arith.constant 0 : i32
    %c0_i32_0 = arith.constant 0 : i32
    %c0_i32_1 = arith.constant 0 : i32
    %c0_i32_2 = arith.constant 0 : i32
    return %c0_i32, %c0_i32_0, %c0_i32_1 : i32, i32, i32
  }
  func.func @transform_3(%arg0: i32, %arg1: i32) -> (i32, i32, i32) {
    %c0_i32 = arith.constant 0 : i32
    %c0_i32_0 = arith.constant 0 : i32
    %c0_i32_1 = arith.constant 0 : i32
    %c0_i32_2 = arith.constant 0 : i32
    return %c0_i32, %c0_i32_0, %c0_i32_1 : i32, i32, i32
  }
  func.func @transform_4(%arg0: i32, %arg1: i32) -> (i32, i32, i32) {
    %c0_i32 = arith.constant 0 : i32
    %c0_i32_0 = arith.constant 0 : i32
    %c0_i32_1 = arith.constant 0 : i32
    %c0_i32_2 = arith.constant 0 : i32
    return %c0_i32, %c0_i32_0, %c0_i32_1 : i32, i32, i32
  }
  func.func @transform_5(%arg0: i32, %arg1: i32) -> (i32, i32, i32) {
    %c0_i32 = arith.constant 0 : i32
    %c0_i32_0 = arith.constant 0 : i32
    %c0_i32_1 = arith.constant 0 : i32
    %c0_i32_2 = arith.constant 0 : i32
    return %c0_i32, %c0_i32_0, %c0_i32_1 : i32, i32, i32
  }
  func.func @transform_6(%arg0: i32, %arg1: i32) -> (i32, i32) {
    %c0_i32 = arith.constant 0 : i32
    %c0_i32_0 = arith.constant 0 : i32
    %c0_i32_1 = arith.constant 0 : i32
    return %c0_i32, %c0_i32_0 : i32, i32
  }
  func.func @transform_7(%arg0: i32, %arg1: i32) -> (i32, i32) {
    %c0_i32 = arith.constant 0 : i32
    %c0_i32_0 = arith.constant 0 : i32
    %c0_i32_1 = arith.constant 0 : i32
    return %c0_i32, %c0_i32_0 : i32, i32
  }
  func.func @transform_8(%arg0: i32, %arg1: i32) -> (i32, i32, i32, i32) {
    %c0_i32 = arith.constant 0 : i32
    %c0_i32_0 = arith.constant 0 : i32
    %c0_i32_1 = arith.constant 0 : i32
    return %arg0, %c0_i32, %arg1, %c0_i32_0 : i32, i32, i32, i32
  }
}

</mosaic_0001>

<bundles_post_ra>
// kernel: sepconv_gru.2
= control target key start
LH: loop header
LB: loop body
LE: loop exit
PB: predicated region body
PF: predicated region fallthrough
CT: control target
= control target key end

     0   :  { %s7577_s27 = smov 0   ;;  %s7579_s28 = smov 0   ;;  %s8798_s0 = inlined_call_operand.vmem [shape: f32[2,16,16,32], index: 0, kind: input, shape index: {}, may-alias: {0,8}]   ;;  %s8799_s1 = inlined_call_operand.vmem [shape: bf16[2,20,16,64], index: 1, kind: input, shape index: {}]   ;;  %s8800_s2 = inlined_call_operand.vmem [shape: bf16[5,64,64], index: 2, kind: input, shape index: {}]   ;;  %s8801_s3 = inlined_call_operand.vmem [shape: bf16[5,64,32], index: 3, kind: input, shape index: {}]   ;;  %s8802_s4 = inlined_call_operand.vmem [shape: bf16[5,32,64], index: 4, kind: input, shape index: {}]   ;;  %s8803_s5 = inlined_call_operand.vmem [shape: bf16[5,32,32], index: 5, kind: input, shape index: {}]   ;;  %s8804_s6 = inlined_call_operand.vmem [shape: f32[1,64], index: 6, kind: input, shape index: {}]   ;;  %s8805_s7 = inlined_call_operand.vmem [shape: f32[1,32], index: 7, kind: input, shape index: {}]   ;;  %s8806_s8 = inlined_call_operand.vmem [shape: f32[2,16,16,32], index: 8, kind: output, shape index: {}, may-alias: {0,8}]  }
   0x1   :  { %s7581_s29 = smov 0   ;;  %s7583_s30 = smov 0  }
   0x2   :  { %s7585_s9 = smov 0   ;;  %s7587_s10 = smov 0  }
   0x3   :  { %s7589_s11 = smov 0  }
   0x4 LB: > { %s27_s12 = sadd.s32 1, %s7519_s9  ;;  %s30_s13 = sadd.s32 1, %s7523_s10  ;;  %s7527_s11 = sphi %s7589_s11, %s18_s11   ;;  %s7523_s10 = sphi %s7587_s10, %s8814_s10   ;;  %s7519_s9 = sphi %s7585_s9, %s8813_s9   ;;  %s7515_s30 = sphi %s7583_s30, %s8812_s30   ;;  %s7511_s29 = sphi %s7581_s29, %s8811_s29   ;;  %s7507_s28 = sphi %s7579_s28, %s8810_s28   ;;  %s7503_s27 = sphi %s7577_s27, %s8809_s27  }
   0x5   : > { %p28_p0 = scmp.ge.s32.totalorder %s27_s12, 2  ;;  %s5887_s14 = sadd.s32 4294967295, %s7527_s11  }
   0x6   : > { %p46_p1 = scmp.ne.s32.totalorder %s7507_s28, %s7503_s27  ;;  %p47_p2 = scmp.eq.s32.totalorder %s7527_s11, 0 }
   0x7   : > { %s8816_s12 = smov (%p28_p0, %s27_s12), 0  ;;  %s8818_s13 = smov (!%p28_p0, %s30_s13), %s7523_s10 }
   0x8   : > { %p32_p3 = scmp.ge.s32.totalorder %s8818_s13, 2  ;;  %p232_p4 = scmp.eq.s32.totalorder %s5887_s14, 3 }
   0x9   : > { %s35_s15 = ssub.s32 %s7519_s9, %s8816_s12  ;;  %p7623_p5 = por %p47_p2, %p46_p1 }
   0xa   : > { %s8820_s13 = smov (%p32_p3, %s8818_s13), 0  ;;  %p7629_p6 = por %p232_p4, %p46_p1 }
   0xb   : > { %s34_s18 = ssub.s32 %s7523_s10, %s8820_s13  ;;  %s39_s20 = sadd.s32 1, %s7507_s28 }
   0xc   : > { %s36_s19 = sor.u32 %s35_s15, %s34_s18  ;;  %p5890_p8 = scmp.ge.s32.totalorder %s7527_s11, 4 }
   0xd   : > { %p37_p7 = scmp.eq.s32.totalorder %s36_s19, 0 }
   0xe   : > { %272 = sbr.rel (%p5890_p8) target bundleno = 55 (0x37), region = 40 }
   0xf   : > { %s7637_s21 = scalar_select %p37_p7, %s7507_s28, %s39_s20  }
  0x15   : > { %275 = sbr.rel (!%p7623_p5) target bundleno = 35 (0x23), region = 44  ;;  %s277_s22 = sand.u32 (%p7623_p5), 1, %s7507_s28  }
  0x16   : > { %s5892_s23 = sshll.u32 (%p7623_p5), %s7523_s10, 5  ;;  %s5891_s24 = sshll.u32 (%p7623_p5), %s277_s22, 7 }
  0x17   : > { %s281_s25 = sadd.s32 (%p7623_p5), %s7519_s9, %s5892_s23  ;;  %s279_s19 = scalar_lea.vmem (%p7623_p5), [#allocation5], %s5891_s24 }
  0x18   : > { %s5893_s26 = sshll.u32 (%p7623_p5), %s281_s25, 3 }
  0x19   : > { %s7648_s18 = scalar_lea.vmem (%p7623_p5), %s8798_s0, %s5893_s26 }
  0x1a   : > { %v341_v0 = vld [vmem:[%s7648_s18] sm:$0xff] (%p7623_p5)  ;;  %v343_v1 = vld [vmem:[%s7648_s18 + $0x10] sm:$0xff] (%p7623_p5) }
  0x1b   : > { %v345_v2 = vld [vmem:[%s7648_s18 + $0x20] sm:$0xff] (%p7623_p5)  ;;  %342 = vst [vmem:[%s279_s19] sm:$0xff] (%p7623_p5), %v341_v0  ;;  %344 = vst [vmem:[%s279_s19 + $0x8] sm:$0xff] (%p7623_p5), %v343_v1  ;;  %v347_v3 = vld [vmem:[%s7648_s18 + $0x30] sm:$0xff] (%p7623_p5) }
  0x1c   : > { %346 = vst [vmem:[%s279_s19 + $0x10] sm:$0xff] %v345_v2  ;;  %v349_v4 = vld [vmem:[%s7648_s18 + $0x40] sm:$0xff]  ;;  %v351_v5 = vld [vmem:[%s7648_s18 + $0x50] sm:$0xff]  ;;  %348 = vst [vmem:[%s279_s19 + $0x18] sm:$0xff] %v347_v3 }
  0x1d   : > { %350 = vst [vmem:[%s279_s19 + $0x20] sm:$0xff] %v349_v4  ;;  %352 = vst [vmem:[%s279_s19 + $0x28] sm:$0xff] %v351_v5  ;;  %v353_v6 = vld [vmem:[%s7648_s18 + $0x60] sm:$0xff]  ;;  %v355_v7 = vld [vmem:[%s7648_s18 + $0x70] sm:$0xff] }
  0x1e   : > { %v357_v8 = vld [vmem:[%s7648_s18 + $0x80] sm:$0xff]  ;;  %354 = vst [vmem:[%s279_s19 + $0x30] sm:$0xff] %v353_v6  ;;  %356 = vst [vmem:[%s279_s19 + $0x38] sm:$0xff] %v355_v7  ;;  %v359_v9 = vld [vmem:[%s7648_s18 + $0x90] sm:$0xff] }
  0x1f   : > { %358 = vst [vmem:[%s279_s19 + $0x40] sm:$0xff] %v357_v8  ;;  %v361_v10 = vld [vmem:[%s7648_s18 + $0xa0] sm:$0xff]  ;;  %v363_v11 = vld [vmem:[%s7648_s18 + $0xb0] sm:$0xff]  ;;  %360 = vst [vmem:[%s279_s19 + $0x48] sm:$0xff] %v359_v9 }
  0x20   : > { %362 = vst [vmem:[%s279_s19 + $0x50] sm:$0xff] %v361_v10  ;;  %364 = vst [vmem:[%s279_s19 + $0x58] sm:$0xff] %v363_v11  ;;  %v365_v12 = vld [vmem:[%s7648_s18 + $0xc0] sm:$0xff]  ;;  %v367_v13 = vld [vmem:[%s7648_s18 + $0xd0] sm:$0xff] }
  0x21   : > { %v369_v14 = vld [vmem:[%s7648_s18 + $0xe0] sm:$0xff]  ;;  %366 = vst [vmem:[%s279_s19 + $0x60] sm:$0xff] %v365_v12  ;;  %368 = vst [vmem:[%s279_s19 + $0x68] sm:$0xff] %v367_v13  ;;  %v371_v15 = vld [vmem:[%s7648_s18 + $0xf0] sm:$0xff] }
  0x22   : > { %370 = vst [vmem:[%s279_s19 + $0x70] sm:$0xff] %v369_v14  ;;  %372 = vst [vmem:[%s279_s19 + $0x78] sm:$0xff] %v371_v15 }
  0x23 PF: > { %378 = sbr.rel (!%p7623_p5) target bundleno = 55 (0x37), region = 82  ;;  %s380_s20 = sand.u32 (%p7623_p5), 1, %s7507_s28  }
  0x24   : > { %s7114_s22 = smul.u32 (%p7623_p5), 40, %s7523_s10 }
  0x25   : > { %s7113_s23 = smul.u32 (%p7623_p5), 80, %s380_s20 }
  0x26   : > { %s384_s24 = sadd.s32 (%p7623_p5), %s7519_s9, %s7114_s22 }
  0x27   : > { %s5894_s25 = sshll.u32 (%p7623_p5), %s384_s24, 2  ;;  %s7679_s16 = scalar_lea.vmem (%p7623_p5), [#allocation6], %s7113_s23 }
  0x28   : > { %s7674_s15 = scalar_lea.vmem (%p7623_p5), %s8799_s1, %s5894_s25 }
  0x29   : > { %v402_v16 = vld [vmem:[%s7674_s15] sm:$0xf] (%p7623_p5)  ;;  %v404_v17 = vld [vmem:[%s7674_s15 + $0x8] sm:$0xf] (%p7623_p5)  ;;  %v406_v18 = vld [vmem:[%s7674_s15 + $0x10] sm:$0xf] (%p7623_p5) }
  0x2a   : > { %403 = vst [vmem:[%s7679_s16] sm:$0xf] %v402_v16  ;;  %405 = vst [vmem:[%s7679_s16 + $0x4] sm:$0xf] %v404_v17  ;;  %v408_v19 = vld [vmem:[%s7674_s15 + $0x18] sm:$0xf] }
  0x2b   : > { %407 = vst [vmem:[%s7679_s16 + $0x8] sm:$0xf] %v406_v18  ;;  %v410_v20 = vld [vmem:[%s7674_s15 + $0x20] sm:$0xf]  ;;  %v412_v21 = vld [vmem:[%s7674_s15 + $0x28] sm:$0xf] }
  0x2c   : > { %409 = vst [vmem:[%s7679_s16 + $0xc] sm:$0xf] %v408_v19  ;;  %411 = vst [vmem:[%s7679_s16 + $0x10] sm:$0xf] %v410_v20  ;;  %v414_v22 = vld [vmem:[%s7674_s15 + $0x30] sm:$0xf] }
  0x2d   : > { %413 = vst [vmem:[%s7679_s16 + $0x14] sm:$0xf] %v412_v21  ;;  %v416_v23 = vld [vmem:[%s7674_s15 + $0x38] sm:$0xf]  ;;  %v418_v24 = vld [vmem:[%s7674_s15 + $0x40] sm:$0xf] }
  0x2e   : > { %415 = vst [vmem:[%s7679_s16 + $0x18] sm:$0xf] %v414_v22  ;;  %417 = vst [vmem:[%s7679_s16 + $0x1c] sm:$0xf] %v416_v23  ;;  %v420_v25 = vld [vmem:[%s7674_s15 + $0x48] sm:$0xf] }
  0x2f   : > { %419 = vst [vmem:[%s7679_s16 + $0x20] sm:$0xf] %v418_v24  ;;  %v422_v26 = vld [vmem:[%s7674_s15 + $0x50] sm:$0xf]  ;;  %v424_v27 = vld [vmem:[%s7674_s15 + $0x58] sm:$0xf] }
  0x30   : > { %421 = vst [vmem:[%s7679_s16 + $0x24] sm:$0xf] %v420_v25  ;;  %423 = vst [vmem:[%s7679_s16 + $0x28] sm:$0xf] %v422_v26  ;;  %v426_v28 = vld [vmem:[%s7674_s15 + $0x60] sm:$0xf] }
  0x31   : > { %425 = vst [vmem:[%s7679_s16 + $0x2c] sm:$0xf] %v424_v27  ;;  %v428_v29 = vld [vmem:[%s7674_s15 + $0x68] sm:$0xf]  ;;  %v430_v30 = vld [vmem:[%s7674_s15 + $0x70] sm:$0xf] }
  0x32   : > { %427 = vst [vmem:[%s7679_s16 + $0x30] sm:$0xf] %v426_v28  ;;  %429 = vst [vmem:[%s7679_s16 + $0x34] sm:$0xf] %v428_v29  ;;  %v432_v31 = vld [vmem:[%s7674_s15 + $0x78] sm:$0xf] }
  0x33   : > { %431 = vst [vmem:[%s7679_s16 + $0x38] sm:$0xf] %v430_v30  ;;  %v434_v32 = vld [vmem:[%s7674_s15 + $0x80] sm:$0xf]  ;;  %v436_v33 = vld [vmem:[%s7674_s15 + $0x88] sm:$0xf] }
  0x34   : > { %433 = vst [vmem:[%s7679_s16 + $0x3c] sm:$0xf] %v432_v31  ;;  %435 = vst [vmem:[%s7679_s16 + $0x40] sm:$0xf] %v434_v32  ;;  %v438_v34 = vld [vmem:[%s7674_s15 + $0x90] sm:$0xf] }
  0x35   : > { %437 = vst [vmem:[%s7679_s16 + $0x44] sm:$0xf] %v436_v33  ;;  %v440_v35 = vld [vmem:[%s7674_s15 + $0x98] sm:$0xf]  ;;  %439 = vst [vmem:[%s7679_s16 + $0x48] sm:$0xf] %v438_v34 }
  0x36   : > { %441 = vst [vmem:[%s7679_s16 + $0x4c] sm:$0xf] %v440_v35 }
  0x37 PF: > { %p5895_p9 = scmp.ge.s32.totalorder %s7527_s11, 1  ;;  %p503_p10 = scmp.lt.s32.totalorder %s7527_s11, 5 }
  0x39   : > { %p504_p11 = pnand %p5895_p9, %p503_p10 }
  0x3a   : > { %v7175_v36 = vld [vmem:[%s8800_s2] sm:$0xff] (!%p504_p11)   ;;  %s510_s20 = sand.u32 (!%p504_p11), 1, %s7503_s27   ;;  %v7177_v38 = vld [vmem:[%s8800_s2 + $0x8] sm:$0xff] (!%p504_p11)   ;;  %v7179_v40 = vld [vmem:[%s8800_s2 + $0x10] sm:$0xff] (!%p504_p11)   ;;  %vm577_vm0 = vcmask (!%p504_p11), 523264   ;;  %vm2800_vm1 = vcmask (!%p504_p11), 257024  }
  0x3b   : > { %507 = sbr.rel (%p504_p11) target bundleno = 1014 (0x3f6), region = 123  ;;  %v7176_v37 = vld [vmem:[%s8801_s3] sm:$0xff] (!%p504_p11)   ;;  %6673 = vmatprep.subr.bf16.mxu0 (!%p504_p11), %v7175_v36  ;;  %v7178_v39 = vld [vmem:[%s8801_s3 + $0x8] sm:$0xff] (!%p504_p11)   ;;  %v7180_v41 = vld [vmem:[%s8801_s3 + $0x10] sm:$0xff] (!%p504_p11)   ;;  %v7529_v63 = vmov (!%p504_p11), 0   ;;  %s7861_s16 = sshll.u32 (!%p504_p11), %s510_s20, 7 }
  0x3c   : > { %s7115_s24 = smul.u32 (!%p504_p11), 80, %s510_s20  ;;  %6697 = vmatprep.subr.bf16.mxu1 (!%p504_p11), %v7176_v37  ;;  %6674 = vmatpush3.bf16.msra.mxu0 (!%p504_p11), %v7175_v36  ;;  %v7181_v42 = vld [vmem:[%s8800_s2 + $0x18] sm:$0xff] (!%p504_p11)   ;;  %v7185_v45 = vld [vmem:[%s8800_s2 + $0x20] sm:$0xff] (!%p504_p11)   ;;  %v7188_v48 = vld [vmem:[%s8800_s2 + $0x28] sm:$0xff] (!%p504_p11)   ;;  %2801 = vst.msk [vmem:[#allocation2] sm:$0xf] (!%p504_p11), %vm2800_vm1, %v7529_v63 }
  0x3d   : > { %6698 = vmatpush3.bf16.msra.mxu1 (!%p504_p11), %v7176_v37  ;;  %6675 = vmatprep.subr.bf16.mxu0 (!%p504_p11), %v7177_v38  ;;  %v7182_v44 = vld [vmem:[%s8801_s3 + $0x18] sm:$0xff] (!%p504_p11)   ;;  %v7192_v49 = vld [vmem:[%s8801_s3 + $0x20] sm:$0xff] (!%p504_p11)   ;;  %v7193_v50 = vld [vmem:[%s8801_s3 + $0x28] sm:$0xff] (!%p504_p11)   ;;  %2802 = vst.msk [vmem:[#allocation2 + $0x4] sm:$0xf] (!%p504_p11), %vm2800_vm1, %v7529_v63  ;;  %s7879_s20 = scalar_lea.vmem (!%p504_p11), [#allocation5], %s7861_s16 }
  0x3e   : > { %6699 = vmatprep.subr.bf16.mxu1 (!%p504_p11), %v7178_v39  ;;  %s7744_s26 = scalar_lea.vmem (!%p504_p11), [#allocation6], %s7115_s24  ;;  %v7191_v51 = vld [vmem:[%s8800_s2 + $0x30] sm:$0xff] (!%p504_p11)   ;;  %v7196_v54 = vld [vmem:[%s8800_s2 + $0x38] sm:$0xff] (!%p504_p11)   ;;  %v7201_v57 = vld [vmem:[%s8800_s2 + $0x40] sm:$0xff] (!%p504_p11)   ;;  %2804 = vst.msk [vmem:[#allocation2 + $0x48] sm:$0xf] (!%p504_p11), %vm2800_vm1, %v7529_v63 }
  0x3f   : > { %v7183_v43 = vld [vmem:[%s7744_s26] sm:$0xff] (!%p504_p11)   ;;  %v7184_v46 = vld [vmem:[%s7744_s26 + $0x8] sm:$0xff] (!%p504_p11)   ;;  %v7186_v47 = vld [vmem:[%s7744_s26 + $0x10] sm:$0xff] (!%p504_p11)   ;;  %2805 = vst.msk [vmem:[#allocation2 + $0x4c] sm:$0xf] (!%p504_p11), %vm2800_vm1, %v7529_v63  ;;  %vm601_vm2 = vcmask (!%p504_p11), 261120  }
  0x40   : > { %6676 = vmatpush3.bf16.msra.mxu0 (!%p504_p11), %v7177_v38  ;;  %6681 = vmatprep.mubr.msk.bf16.mxu0 (!%p504_p11), %vm577_vm0, %v7183_v43  ;;  %v7187_v52 = vld [vmem:[%s7744_s26 + $0x18] sm:$0xff] (!%p504_p11)   ;;  %v7189_v53 = vld [vmem:[%s7744_s26 + $0x20] sm:$0xff] (!%p504_p11)   ;;  %v7190_v58 = vld [vmem:[%s7744_s26 + $0x28] sm:$0xff] (!%p504_p11)   ;;  %s7530_s25 = smov (!%p504_p11), 32   ;;  %s7531_s14 = smov (!%p504_p11), 96  }
  0x41   : > { %6700 = vmatpush3.bf16.msra.mxu1 (!%p504_p11), %v7178_v39  ;;  %6677 = vmatprep.subr.bf16.mxu0 (!%p504_p11), %v7179_v40  ;;  %v7197_v55 = vld [vmem:[%s8801_s3 + $0x30] sm:$0xff] (!%p504_p11)   ;;  %v7198_v56 = vld [vmem:[%s8801_s3 + $0x38] sm:$0xff] (!%p504_p11)   ;;  %v7208_v60 = vld [vmem:[%s8801_s3 + $0x40] sm:$0xff] (!%p504_p11)   ;;  %s8681_s15 = scalar_lea.vmem (!%p504_p11), [#allocation7], %s7861_s16 }
  0x42   : > { %6701 = vmatprep.subr.bf16.mxu1 %v7180_v41  ;;  %6705 = vmatprep.mubr.msk.bf16.mxu1 %vm577_vm0, %v7183_v43  ;;  %v7194_v59 = vld [vmem:[%s7744_s26 + $0x30] sm:$0xff]   ;;  %v7195_v61 = vld [vmem:[%s7744_s26 + $0x38] sm:$0xff]   ;;  %v7199_v62 = vld [vmem:[%s7744_s26 + $0x4] sm:$0xff]   ;;  %s6433_s16 = sshll.u32 (%p7629_p6), %s7515_s30, 5 }
  0x43   : > { %v7200_v0 = vld [vmem:[%s7744_s26 + $0xc] sm:$0xff]   ;;  %v7202_v1 = vld [vmem:[%s7744_s26 + $0x14] sm:$0xff]   ;;  %v7203_v5 = vld [vmem:[%s7744_s26 + $0x1c] sm:$0xff]   ;;  %s5700_s17 = sadd.s32 (%p7629_p6), %s7511_s29, %s6433_s16 }
  0x44   : > { %6678 = vmatpush3.bf16.msra.mxu0 %v7179_v40  ;;  %v7204_v2 = vld [vmem:[%s8800_s2 + $0x48] sm:$0xff]   ;;  %v7207_v4 = vld [vmem:[%s8800_s2 + $0x50] sm:$0xff]   ;;  %v7212_v8 = vld [vmem:[%s8800_s2 + $0x58] sm:$0xff]  }
  0x45   : > { %6702 = vmatpush3.bf16.msra.mxu1 %v7180_v41  ;;  %6679 = vmatprep.subr.bf16.mxu0 %v7181_v42  ;;  %v7209_v3 = vld [vmem:[%s8801_s3 + $0x48] sm:$0xff]   ;;  %v7213_v6 = vld [vmem:[%s8801_s3 + $0x50] sm:$0xff]   ;;  %v7214_v9 = vld [vmem:[%s8801_s3 + $0x58] sm:$0xff]  }
  0x46   : > { %6703 = vmatprep.subr.bf16.mxu1 %v7182_v44  ;;  %v7205_v7 = vld [vmem:[%s7744_s26 + $0x24] sm:$0xff]   ;;  %v7206_v10 = vld [vmem:[%s7744_s26 + $0x2c] sm:$0xff]   ;;  %v7210_v13 = vld [vmem:[%s7744_s26 + $0x34] sm:$0xff]  }
  0x47   : > { %v7217_v11 = vld [vmem:[%s8800_s2 + $0x60] sm:$0xff]   ;;  %v7215_v15 = vld [vmem:[%s7744_s26 + $0x8] sm:$0xff]   ;;  %v7218_v17 = vld [vmem:[%s7744_s26 + $0x18] sm:$0xff]  }
  0x48   : > { %6680 = vmatpush3.bf16.msra.mxu0 %v7181_v42  ;;  %v7224_v12 = vld [vmem:[%s8801_s3 + $0x60] sm:$0xff]   ;;  %v7220_v18 = vld [vmem:[%s8800_s2 + $0x68] sm:$0xff]   ;;  %v7223_v20 = vld [vmem:[%s8800_s2 + $0x70] sm:$0xff]  }
  0x49   : > { %6704 = vmatpush3.bf16.msra.mxu1 %v7182_v44  ;;  %6721 = vmatprep.subr.bf16.mxu0 %v7185_v45  ;;  %v7211_v14 = vld [vmem:[%s7744_s26 + $0x3c] sm:$0xff]   ;;  %v7216_v16 = vld [vmem:[%s7744_s26 + $0x10] sm:$0xff]   ;;  %v7221_v24 = vld [vmem:[%s7744_s26 + $0x28] sm:$0xff]  }
  0x4a   : > { %6745 = vmatprep.subr.bf16.mxu1 %v7192_v49  ;;  %v7225_v19 = vld [vmem:[%s8801_s3 + $0x68] sm:$0xff]   ;;  %v7219_v21 = vld [vmem:[%s7744_s26 + $0x20] sm:$0xff]   ;;  %v7885_v23 = vld [vmem:[%s7879_s20 + $0x8] sm:$0xff] }
  0x4b   : > { %6682 = vmatmul.mubr.msk.bf16.vlgmr.msra.gmra.mrb[0].mxu0 %vm577_vm0, %v7184_v46  ;;  %v7882_v22 = vld [vmem:[%s7879_s20] sm:$0xff]  ;;  %v2807_v26 = vpack.c.bf16 %v7885_v23, %v7885_v23  ;;  %v7896_v28 = vld [vmem:[%s7879_s20 + $0x10] sm:$0xff]  ;;  %v7228_v29 = vld [vmem:[%s8800_s2 + $0x78] sm:$0xff]  }
  0x4c   : > { %6706 = vmatmul.mubr.msk.bf16.vlgmr.msra.gmra.mrb[0].mxu1 %vm577_vm0, %v7184_v46  ;;  %6722 = vmatpush3.bf16.msra.mxu0 %v7185_v45  ;;  %v2806_v25 = vpack.c.bf16 %v7882_v22, %v7882_v22  ;;  %v7229_v27 = vld [vmem:[%s8801_s3 + $0x70] sm:$0xff]   ;;  %v7904_v30 = vld [vmem:[%s7879_s20 + $0x18] sm:$0xff]  ;;  %v2808_v31 = vpack.c.bf16 %v7896_v28, %v7896_v28  ;;  %v7912_v33 = vld [vmem:[%s7879_s20 + $0x28] sm:$0xff] }
  0x4d   : > { %6685 = vmatprep.mubr.msk.bf16.mxu0 %vm577_vm0, %v7186_v47  ;;  %6709 = vmatprep.mubr.msk.bf16.mxu1 %vm577_vm0, %v7186_v47  ;;  %2824 = vst.msk [vmem:[#allocation2 + $0xc] sm:$0xf] %vm2800_vm1, %v2807_v26  ;;  %v7909_v32 = vld [vmem:[%s7879_s20 + $0x20] sm:$0xff]  ;;  %v2809_v34 = vpack.c.bf16 %v7904_v30, %v7904_v30  ;;  %v2811_v36 = vpack.c.bf16 %v7912_v33, %v7912_v33  ;;  %v7921_v37 = vld [vmem:[%s7879_s20 + $0x30] sm:$0xff]  ;;  %v7924_v38 = vld [vmem:[%s7879_s20 + $0x38] sm:$0xff] }
  0x4e   : > { %6723 = vmatprep.subr.bf16.mxu0 %v7188_v48  ;;  %6746 = vmatpush3.bf16.msra.mxu1 %v7192_v49  ;;  %2823 = vst.msk [vmem:[#allocation2 + $0x8] sm:$0xf] %vm2800_vm1, %v2806_v25  ;;  %v2810_v35 = vpack.c.bf16 %v7909_v32, %v7909_v32  ;;  %2825 = vst.msk [vmem:[#allocation2 + $0x10] sm:$0xf] %vm2800_vm1, %v2808_v31  ;;  %v2812_v39 = vpack.c.bf16 %v7921_v37, %v7921_v37  ;;  %v562_v41 = vld [vmem:[%s7879_s20 + $0x40] sm:$0xff]  ;;  %v563_v42 = vld [vmem:[%s7879_s20 + $0x48] sm:$0xff] }
  0x4f   : > { %6747 = vmatprep.subr.bf16.mxu1 %v7193_v50  ;;  %v2813_v40 = vpack.c.bf16 %v7924_v38, %v7924_v38  ;;  %v7230_v43 = vld [vmem:[%s8801_s3 + $0x78] sm:$0xff]   ;;  %2826 = vst.msk [vmem:[#allocation2 + $0x14] sm:$0xf] %vm2800_vm1, %v2809_v34  ;;  %2828 = vst.msk [vmem:[#allocation2 + $0x1c] sm:$0xf] %vm2800_vm1, %v2811_v36  ;;  %v2814_v44 = vpack.c.bf16 %v562_v41, %v562_v41  ;;  %v2815_v45 = vpack.c.bf16 %v563_v42, %v563_v42  ;;  %v564_v46 = vld [vmem:[%s7879_s20 + $0x50] sm:$0xff] }
  0x50   : > { %6724 = vmatpush3.bf16.msra.mxu0 %v7188_v48  ;;  %2827 = vst.msk [vmem:[#allocation2 + $0x18] sm:$0xf] %vm2800_vm1, %v2810_v35  ;;  %2829 = vst.msk [vmem:[#allocation2 + $0x20] sm:$0xf] %vm2800_vm1, %v2812_v39  ;;  %v7222_v47 = vld [vmem:[%s7744_s26 + $0x30] sm:$0xff]   ;;  %v565_v48 = vld [vmem:[%s7879_s20 + $0x58] sm:$0xff]  ;;  %v2816_v49 = vpack.c.bf16 %v564_v46, %v564_v46  ;;  %4179 = vrot.lane.b32.xlu0 %v7882_v22, %s7530_s25 }
  0x51   : > { %6725 = vmatprep.subr.bf16.mxu0 %v7191_v51  ;;  %2830 = vst.msk [vmem:[#allocation2 + $0x24] sm:$0xf] %vm2800_vm1, %v2813_v40  ;;  %2831 = vst.msk [vmem:[#allocation2 + $0x28] sm:$0xf] %vm2800_vm1, %v2814_v44  ;;  %v7234_v63 = vld [vmem:[%s7744_s26 + $0x1c] sm:$0xff]   ;;  %v7251_v25 = vld [vmem:[%s7744_s26 + $0x28] sm:$0xff]   ;;  %4183 = vrot.lane.b32.xlu1 %v7896_v28, %s7530_s25 }
  0x52   : > { %6748 = vmatpush3.bf16.msra.mxu1 %v7193_v50  ;;  %2832 = vst.msk [vmem:[#allocation2 + $0x2c] sm:$0xf] %vm2800_vm1, %v2815_v45  ;;  %v566_v50 = vld [vmem:[%s7879_s20 + $0x60] sm:$0xff]  ;;  %2833 = vst.msk [vmem:[#allocation2 + $0x30] sm:$0xf] %vm2800_vm1, %v2816_v49  ;;  %v7257_v34 = vld [vmem:[%s7744_s26 + $0x48] sm:$0xff]  }
  0x53   : > { %6686 = vmatmul.mubr.msk.bf16.gmra.mrb[4].mxu0 %vm577_vm0, %v7187_v52  ;;  %6749 = vmatprep.subr.bf16.mxu1 %v7197_v55  ;;  %v7271_v26 = vld [vmem:[%s8802_s4 + $0x30] sm:$0xff]   ;;  %v7258_v35 = vld [vmem:[#allocation2] sm:$0xff]   ;;  %v7268_v42 = vld [vmem:[%s8802_s4 + $0x28] sm:$0xff]  }
  0x54   : > { %6710 = vmatmul.mubr.msk.bf16.gmra.mrb[4].mxu1 %vm577_vm0, %v7187_v52  ;;  %6689 = vmatprep.mubr.msk.bf16.mxu0 %vm577_vm0, %v7189_v53  ;;  %v7233_v52 = vld [vmem:[%s8800_s2 + $0x80] sm:$0xff]   ;;  %v7281_v44 = vld [vmem:[%s8802_s4 + $0x38] sm:$0xff]  }
  0x55   : > { %6713 = vmatprep.mubr.msk.bf16.mxu1 %vm577_vm0, %v7189_v53  ;;  %6726 = vmatpush3.bf16.msra.mxu0 %v7191_v51  ;;  %v567_v51 = vld [vmem:[%s7879_s20 + $0x68] sm:$0xff]  ;;  %v2817_v53 = vpack.c.bf16 %v565_v48, %v565_v48  ;;  %v7256_v31 = vld [vmem:[%s7744_s26 + $0x40] sm:$0xff]   ;;  %v7259_v39 = vld [vmem:[#allocation2 + $0x8] sm:$0xff]  }
  0x56   : > { %6727 = vmatprep.subr.bf16.mxu0 %v7196_v54  ;;  %6750 = vmatpush3.bf16.msra.mxu1 %v7197_v55  ;;  %v2819_v55 = vpack.c.bf16 %v567_v51, %v567_v51  ;;  %v7264_v36 = vld [vmem:[#allocation2 + $0x4] sm:$0xff]   ;;  %v7262_v40 = vld [vmem:[#allocation2 + $0x10] sm:$0xff]  }
  0x57   : > { %6751 = vmatprep.subr.bf16.mxu1 %v7198_v56  ;;  %2834 = vst.msk [vmem:[#allocation2 + $0x34] sm:$0xf] %vm2800_vm1, %v2817_v53  ;;  %v7265_v41 = vld [vmem:[#allocation2 + $0xc] sm:$0xff]   ;;  %v7278_v45 = vld [vmem:[%s8802_s4 + $0x40] sm:$0xff]   ;;  %v7263_v46 = vld [vmem:[#allocation2 + $0x18] sm:$0xff]   ;;  %4181 = vrot.lane.b32.xlu0 %v7885_v23, %s7530_s25 }
  0x58   : > { %2836 = vst.msk [vmem:[#allocation2 + $0x3c] sm:$0xf] %vm2800_vm1, %v2819_v55  ;;  %v7270_v48 = vld [vmem:[#allocation2 + $0x1c] sm:$0xff]   ;;  %v7274_v49 = vld [vmem:[#allocation2 + $0x24] sm:$0xff]   ;;  %4185 = vrot.lane.b32.xlu1 %v7904_v30, %s7530_s25 }
  0x59   : > { %6728 = vmatpush3.bf16.msra.mxu0 %v7196_v54  ;;  %v2818_v54 = vpack.c.bf16 %v566_v50, %v566_v50  ;;  %v7267_v50 = vld [vmem:[#allocation2 + $0x28] sm:$0xff]  }
  0x5a   : > { %6769 = vmatprep.subr.bf16.mxu0 %v7201_v57  ;;  %6752 = vmatpush3.bf16.msra.mxu1 %v7198_v56  ;;  %v7240_v56 = vld [vmem:[%s8801_s3 + $0x80] sm:$0xff]   ;;  %v7276_v55 = vld [vmem:[#allocation2 + $0x8] sm:$0xff]  }
  0x5b   : > { %6690 = vmatmul.mubr.msk.bf16.gmra.mrb[8].mxu0 %vm577_vm0, %v7190_v58  ;;  %6793 = vmatprep.subr.bf16.mxu1 %v7208_v60  ;;  %2835 = vst.msk [vmem:[#allocation2 + $0x38] sm:$0xf] %vm2800_vm1, %v2818_v54 }
  0x5c   : > { %6714 = vmatmul.mubr.msk.bf16.gmra.mrb[8].mxu1 %vm577_vm0, %v7190_v58  ;;  %6693 = vmatprep.mubr.msk.bf16.mxu0 %vm577_vm0, %v7194_v59  ;;  %v7227_v58 = vld [vmem:[%s7744_s26 + $0x40] sm:$0xff]  }
  0x5d   : > { %6717 = vmatprep.mubr.msk.bf16.mxu1 %vm577_vm0, %v7194_v59  ;;  %v7231_v59 = vld [vmem:[%s7744_s26 + $0xc] sm:$0xff]   ;;  %4187 = vrot.lane.b32.xlu0 %v7909_v32, %s7530_s25 }
  0x5e   : > { %v7272_v51 = vld [vmem:[#allocation2 + $0x30] sm:$0xff]   ;;  %4189 = vrot.lane.b32.xlu1 %v7912_v33, %s7530_s25 }
  0x61   : > { %4191 = vrot.lane.b32.xlu0 %v7921_v37, %s7530_s25 }
  0x62   : > { %v7279_v53 = vld [vmem:[#allocation2 + $0x34] sm:$0xff]   ;;  %4193 = vrot.lane.b32.xlu1 %v7924_v38, %s7530_s25 }
  0x63   : > { %6694 = vmatmul.mubr.msk.bf16.gmra.mrb[12].mxu0 %vm577_vm0, %v7195_v61  ;;  %v7273_v54 = vld [vmem:[#allocation2 + $0x38] sm:$0xff]   ;;  %v7451_v38 = vld [vmem:[%s7879_s20 + $0x40] sm:$0xff] }
  0x64   : > { %6718 = vmatmul.mubr.msk.bf16.gmra.mrb[12].mxu1 %vm577_vm0, %v7195_v61  ;;  %6729 = vmatprep.mubr.msk.bf16.mxu0 %vm577_vm0, %v7199_v62  ;;  %v7975_v61 = vld [vmem:[%s7879_s20 + $0x70] sm:$0xff] }
  0x65   : > { %6753 = vmatprep.mubr.msk.bf16.mxu1 %vm577_vm0, %v7199_v62  ;;  %v2820_v62 = vpack.c.bf16 %v7975_v61, %v7975_v61  ;;  %4195 = vrot.lane.b32.xlu0 %v7451_v38, %s7530_s25 }
  0x67   : > { %2837 = vst.msk [vmem:[#allocation2 + $0x40] sm:$0xf] %vm2800_vm1, %v2820_v62  ;;  %v7288_v62 = vld [vmem:[%s8802_s4 + $0x48] sm:$0xff]  }
  0x6b   : > { %6730 = vmatmul.mubr.msk.bf16.vlgmr.msra.gmra.mrb[16].mxu0 %vm577_vm0, %v7200_v0 }
  0x6c   : > { %6754 = vmatmul.mubr.msk.bf16.vlgmr.msra.gmra.mrb[16].mxu1 %vm577_vm0, %v7200_v0  ;;  %6770 = vmatpush3.bf16.msra.mxu0 %v7201_v57  ;;  %v7226_v57 = vld [vmem:[%s7744_s26 + $0x38] sm:$0xff]  }
  0x6d   : > { %6733 = vmatprep.mubr.msk.bf16.mxu0 %vm577_vm0, %v7202_v1  ;;  %6757 = vmatprep.mubr.msk.bf16.mxu1 %vm577_vm0, %v7202_v1  ;;  %v7236_v0 = vld [vmem:[%s8800_s2 + $0x88] sm:$0xff]  }
  0x6e   : > { %6771 = vmatprep.subr.bf16.mxu0 %v7204_v2  ;;  %6794 = vmatpush3.bf16.msra.mxu1 %v7208_v60  ;;  %v7232_v60 = vld [vmem:[%s7744_s26 + $0x14] sm:$0xff]  }
  0x6f   : > { %6795 = vmatprep.subr.bf16.mxu1 %v7209_v3  ;;  %v7241_v1 = vld [vmem:[%s8801_s3 + $0x88] sm:$0xff]  }
  0x70   : > { %6772 = vmatpush3.bf16.msra.mxu0 %v7204_v2  ;;  %v7239_v2 = vld [vmem:[%s8800_s2 + $0x90] sm:$0xff]  }
  0x71   : > { %6773 = vmatprep.subr.bf16.mxu0 %v7207_v4 }
  0x72   : > { %6796 = vmatpush3.bf16.msra.mxu1 %v7209_v3  ;;  %v7235_v3 = vld [vmem:[%s7744_s26 + $0x24] sm:$0xff]  }
  0x73   : > { %6734 = vmatmul.mubr.msk.bf16.gmra.mrb[20].mxu0 %vm577_vm0, %v7203_v5  ;;  %6797 = vmatprep.subr.bf16.mxu1 %v7213_v6 }
  0x74   : > { %6758 = vmatmul.mubr.msk.bf16.gmra.mrb[20].mxu1 %vm577_vm0, %v7203_v5  ;;  %6737 = vmatprep.mubr.msk.bf16.mxu0 %vm577_vm0, %v7205_v7  ;;  %v7237_v5 = vld [vmem:[%s7744_s26 + $0x2c] sm:$0xff]  }
  0x75   : > { %6761 = vmatprep.mubr.msk.bf16.mxu1 %vm577_vm0, %v7205_v7  ;;  %6774 = vmatpush3.bf16.msra.mxu0 %v7207_v4  ;;  %v7245_v4 = vld [vmem:[%s8801_s3 + $0x90] sm:$0xff]   ;;  %v5898_v7 = vld [vmem:[%s8804_s6] ss:$0 sm:$0xff] }
  0x76   : > { %6775 = vmatprep.subr.bf16.mxu0 %v7212_v8  ;;  %6798 = vmatpush3.bf16.msra.mxu1 %v7213_v6  ;;  %v7244_v6 = vld [vmem:[%s8800_s2 + $0x98] sm:$0xff]   ;;  %580 = vst.msk [vmem:[#allocation3 + $0x10] sm:$0xff] %vm577_vm0, %v5898_v7  ;;  %578 = vst.msk [vmem:[#allocation3] sm:$0xff] %vm577_vm0, %v5898_v7 }
  0x77   : > { %6799 = vmatprep.subr.bf16.mxu1 %v7214_v9  ;;  %579 = vst.msk [vmem:[#allocation3 + $0x8] sm:$0xff] %vm577_vm0, %v5898_v7  ;;  %581 = vst.msk [vmem:[#allocation3 + $0x18] sm:$0xff] %vm577_vm0, %v5898_v7 }
  0x78   : > { %582 = vst.msk [vmem:[#allocation3 + $0x20] sm:$0xff] %vm577_vm0, %v5898_v7  ;;  %583 = vst.msk [vmem:[#allocation3 + $0x28] sm:$0xff] %vm577_vm0, %v5898_v7 }
  0x79   : > { %6776 = vmatpush3.bf16.msra.mxu0 %v7212_v8  ;;  %v7246_v8 = vld [vmem:[%s8801_s3 + $0x98] sm:$0xff]   ;;  %584 = vst.msk [vmem:[#allocation3 + $0x30] sm:$0xff] %vm577_vm0, %v5898_v7  ;;  %585 = vst.msk [vmem:[#allocation3 + $0x38] sm:$0xff] %vm577_vm0, %v5898_v7 }
  0x7a   : > { %6800 = vmatpush3.bf16.msra.mxu1 %v7214_v9  ;;  %6817 = vmatprep.subr.bf16.mxu0 %v7217_v11  ;;  %586 = vst.msk [vmem:[#allocation3 + $0x40] sm:$0xff] %vm577_vm0, %v5898_v7  ;;  %587 = vst.msk [vmem:[#allocation3 + $0x48] sm:$0xff] %vm577_vm0, %v5898_v7  ;;  %v8026_v9 = vld [vmem:[%s7879_s20 + $0x78] sm:$0xff] }
  0x7b   : > { %6738 = vmatmul.mubr.msk.bf16.gmra.mrb[24].mxu0 %vm577_vm0, %v7206_v10  ;;  %6841 = vmatprep.subr.bf16.mxu1 %v7224_v12  ;;  %588 = vst.msk [vmem:[#allocation3 + $0x50] sm:$0xff] %vm577_vm0, %v5898_v7  ;;  %589 = vst.msk [vmem:[#allocation3 + $0x58] sm:$0xff] %vm577_vm0, %v5898_v7 }
  0x7c   : > { %6762 = vmatmul.mubr.msk.bf16.gmra.mrb[24].mxu1 %vm577_vm0, %v7206_v10  ;;  %6741 = vmatprep.mubr.msk.bf16.mxu0 %vm577_vm0, %v7210_v13  ;;  %590 = vst.msk [vmem:[#allocation3 + $0x60] sm:$0xff] %vm577_vm0, %v5898_v7  ;;  %591 = vst.msk [vmem:[#allocation3 + $0x68] sm:$0xff] %vm577_vm0, %v5898_v7  ;;  %v2821_v10 = vpack.c.bf16 %v8026_v9, %v8026_v9 }
  0x7d   : > { %6765 = vmatprep.mubr.msk.bf16.mxu1 %vm577_vm0, %v7210_v13  ;;  %592 = vst.msk [vmem:[#allocation3 + $0x70] sm:$0xff] %vm577_vm0, %v5898_v7  ;;  %593 = vst.msk [vmem:[#allocation3 + $0x78] sm:$0xff] %vm577_vm0, %v5898_v7  ;;  %v7255_v13 = vld [vmem:[%s8802_s4 + $0x10] sm:$0xff]   ;;  %v7297_v7 = vld [vmem:[#allocation2 + $0x3c] sm:$0xff]  }
  0x7e   : > { %2838 = vst.msk [vmem:[#allocation2 + $0x44] sm:$0xf] %vm2800_vm1, %v2821_v10  ;;  %v634_v10 = vld [vmem:[#allocation3] sm:$0xff] }
  0x83   : > { %6742 = vmatmul.mubr.msk.bf16.gmra.mrb[28].mxu0 %vm577_vm0, %v7211_v14  ;;  %v646_v30 = vld [vmem:[#allocation3 + $0x60] sm:$0xff] }
  0x84   : > { %6766 = vmatmul.mubr.msk.bf16.gmra.mrb[28].mxu1 %vm577_vm0, %v7211_v14  ;;  %6777 = vmatprep.mubr.msk.bf16.mxu0 %vm577_vm0, %v7215_v15  ;;  %v7242_v14 = vld [vmem:[%s7744_s26 + $0x3c] sm:$0xff]  }
  0x85   : > { %6801 = vmatprep.mubr.msk.bf16.mxu1 %vm577_vm0, %v7215_v15  ;;  %v5899_v15 = vld [vmem:[%s8805_s7] ss:$0 sm:$0xff] }
  0x86   : > { %604 = vst.msk [vmem:[#allocation4 + $0x10] sm:$0xff] %vm601_vm2, %v5899_v15  ;;  %602 = vst.msk [vmem:[#allocation4] sm:$0xff] %vm601_vm2, %v5899_v15  ;;  %v648_v23 = vld [vmem:[#allocation3 + $0x70] sm:$0xff] }
  0x87   : > { %603 = vst.msk [vmem:[#allocation4 + $0x8] sm:$0xff] %vm601_vm2, %v5899_v15  ;;  %605 = vst.msk [vmem:[#allocation4 + $0x18] sm:$0xff] %vm601_vm2, %v5899_v15 }
  0x88   : > { %606 = vst.msk [vmem:[#allocation4 + $0x20] sm:$0xff] %vm601_vm2, %v5899_v15  ;;  %607 = vst.msk [vmem:[#allocation4 + $0x28] sm:$0xff] %vm601_vm2, %v5899_v15 }
  0x89   : > { %608 = vst.msk [vmem:[#allocation4 + $0x30] sm:$0xff] %vm601_vm2, %v5899_v15  ;;  %609 = vst.msk [vmem:[#allocation4 + $0x38] sm:$0xff] %vm601_vm2, %v5899_v15 }
  0x8a   : > { %610 = vst.msk [vmem:[#allocation4 + $0x40] sm:$0xff] %vm601_vm2, %v5899_v15  ;;  %611 = vst.msk [vmem:[#allocation4 + $0x48] sm:$0xff] %vm601_vm2, %v5899_v15 }
  0x8b   : > { %6778 = vmatmul.mubr.msk.bf16.vlgmr.msra.gmra.mrb[32].mxu0 %vm577_vm0, %v7216_v16  ;;  %612 = vst.msk [vmem:[#allocation4 + $0x50] sm:$0xff] %vm601_vm2, %v5899_v15  ;;  %613 = vst.msk [vmem:[#allocation4 + $0x58] sm:$0xff] %vm601_vm2, %v5899_v15 }
  0x8c   : > { %6802 = vmatmul.mubr.msk.bf16.vlgmr.msra.gmra.mrb[32].mxu1 %vm577_vm0, %v7216_v16  ;;  %6818 = vmatpush3.bf16.msra.mxu0 %v7217_v11  ;;  %v7238_v11 = vld [vmem:[%s7744_s26 + $0x34] sm:$0xff]   ;;  %614 = vst.msk [vmem:[#allocation4 + $0x60] sm:$0xff] %vm601_vm2, %v5899_v15  ;;  %615 = vst.msk [vmem:[#allocation4 + $0x68] sm:$0xff] %vm601_vm2, %v5899_v15  ;;  %v7243_v16 = vld [vmem:[%s7744_s26 + $0x44] sm:$0xff]  }
  0x8d   : > { %6781 = vmatprep.mubr.msk.bf16.mxu0 %vm577_vm0, %v7218_v17  ;;  %6805 = vmatprep.mubr.msk.bf16.mxu1 %vm577_vm0, %v7218_v17  ;;  %616 = vst.msk [vmem:[#allocation4 + $0x70] sm:$0xff] %vm601_vm2, %v5899_v15  ;;  %617 = vst.msk [vmem:[#allocation4 + $0x78] sm:$0xff] %vm601_vm2, %v5899_v15  ;;  %v7247_v17 = vld [vmem:[%s7744_s26 + $0x10] sm:$0xff]  }
  0x8e   : > { %6819 = vmatprep.subr.bf16.mxu0 %v7220_v18  ;;  %6842 = vmatpush3.bf16.msra.mxu1 %v7224_v12  ;;  %v7249_v12 = vld [vmem:[%s8802_s4] sm:$0xff]  }
  0x8f   : > { %6843 = vmatprep.subr.bf16.mxu1 %v7225_v19 }
  0x90   : > { %6820 = vmatpush3.bf16.msra.mxu0 %v7220_v18  ;;  %v7248_v18 = vld [vmem:[%s7744_s26 + $0x18] sm:$0xff]  }
  0x91   : > { %6821 = vmatprep.subr.bf16.mxu0 %v7223_v20 }
  0x92   : > { %6844 = vmatpush3.bf16.msra.mxu1 %v7225_v19  ;;  %v7250_v19 = vld [vmem:[%s7744_s26 + $0x20] sm:$0xff]  }
  0x93   : > { %6782 = vmatmul.mubr.msk.bf16.gmra.mrb[36].mxu0 %vm577_vm0, %v7219_v21  ;;  %6845 = vmatprep.subr.bf16.mxu1 %v7229_v27 }
  0x94   : > { %6806 = vmatmul.mubr.msk.bf16.gmra.mrb[36].mxu1 %vm577_vm0, %v7219_v21  ;;  %6785 = vmatprep.mubr.msk.bf16.mxu0 %vm577_vm0, %v7221_v24  ;;  %v7260_v21 = vld [vmem:[%s8802_s4 + $0x20] sm:$0xff]  }
  0x95   : > { %6809 = vmatprep.mubr.msk.bf16.mxu1 %vm577_vm0, %v7221_v24  ;;  %6822 = vmatpush3.bf16.msra.mxu0 %v7223_v20  ;;  %v7254_v20 = vld [vmem:[%s8802_s4 + $0x8] sm:$0xff]   ;;  %v7261_v24 = vld [vmem:[%s8802_s4 + $0x18] sm:$0xff]  }
  0x96   : > { %6823 = vmatprep.subr.bf16.mxu0 %v7228_v29  ;;  %6846 = vmatpush3.bf16.msra.mxu1 %v7229_v27  ;;  %v7252_v27 = vld [vmem:[%s7744_s26 + $0x30] sm:$0xff]  }
  0x97   : > { %6847 = vmatprep.subr.bf16.mxu1 %v7230_v43 }
  0x99   : > { %6824 = vmatpush3.bf16.msra.mxu0 %v7228_v29  ;;  %v7253_v29 = vld [vmem:[%s7744_s26 + $0x38] sm:$0xff]  }
  0x9a   : > { %6848 = vmatpush3.bf16.msra.mxu1 %v7230_v43  ;;  %6865 = vmatprep.subr.bf16.mxu0 %v7233_v52  ;;  %v7269_v43 = vld [vmem:[#allocation2 + $0x14] sm:$0xff]  }
  0x9b   : > { %6786 = vmatmul.mubr.msk.bf16.gmra.mrb[40].mxu0 %vm577_vm0, %v7222_v47  ;;  %6889 = vmatprep.subr.bf16.mxu1 %v7240_v56 }
  0x9c   : > { %6810 = vmatmul.mubr.msk.bf16.gmra.mrb[40].mxu1 %vm577_vm0, %v7222_v47  ;;  %6789 = vmatprep.mubr.msk.bf16.mxu0 %vm577_vm0, %v7226_v57  ;;  %v7266_v47 = vld [vmem:[#allocation2 + $0x20] sm:$0xff]  }
  0x9d   : > { %6813 = vmatprep.mubr.msk.bf16.mxu1 %vm577_vm0, %v7226_v57  ;;  %v7284_v57 = vld [vmem:[#allocation2 + $0xc] sm:$0xff]  }
  0xa3   : > { %6790 = vmatmul.mubr.msk.bf16.gmra.mrb[44].mxu0 %vm577_vm0, %v7227_v58 }
  0xa4   : > { %6814 = vmatmul.mubr.msk.bf16.gmra.mrb[44].mxu1 %vm577_vm0, %v7227_v58  ;;  %6825 = vmatprep.mubr.msk.bf16.mxu0 %vm577_vm0, %v7231_v59  ;;  %v7277_v58 = vld [vmem:[#allocation2 + $0x10] sm:$0xff]  }
  0xa5   : > { %6849 = vmatprep.mubr.msk.bf16.mxu1 %vm577_vm0, %v7231_v59  ;;  %v7282_v59 = vld [vmem:[#allocation2 + $0x18] sm:$0xff]  }
  0xab   : > { %6826 = vmatmul.mubr.msk.bf16.vlgmr.msra.gmra.mrb[48].mxu0 %vm577_vm0, %v7232_v60 }
  0xac   : > { %6850 = vmatmul.mubr.msk.bf16.vlgmr.msra.gmra.mrb[48].mxu1 %vm577_vm0, %v7232_v60  ;;  %6866 = vmatpush3.bf16.msra.mxu0 %v7233_v52  ;;  %v7275_v52 = vld [vmem:[#allocation2 + $0x2c] sm:$0xff]   ;;  %v7285_v60 = vld [vmem:[#allocation2 + $0x14] sm:$0xff]  }
  0xad   : > { %6829 = vmatprep.mubr.msk.bf16.mxu0 %vm577_vm0, %v7234_v63  ;;  %6853 = vmatprep.mubr.msk.bf16.mxu1 %vm577_vm0, %v7234_v63  ;;  %v7289_v63 = vld [vmem:[#allocation2 + $0x1c] sm:$0xff]  }
  0xae   : > { %6867 = vmatprep.subr.bf16.mxu0 %v7236_v0  ;;  %6890 = vmatpush3.bf16.msra.mxu1 %v7240_v56  ;;  %v7280_v56 = vld [vmem:[#allocation2 + $0x3c] sm:$0xff]  }
  0xaf   : > { %6891 = vmatprep.subr.bf16.mxu1 %v7241_v1 }
  0xb0   : > { %6868 = vmatpush3.bf16.msra.mxu0 %v7236_v0  ;;  %v7283_v0 = vld [vmem:[#allocation2 + $0x20] sm:$0xff]  }
  0xb1   : > { %6869 = vmatprep.subr.bf16.mxu0 %v7239_v2 }
  0xb2   : > { %6892 = vmatpush3.bf16.msra.mxu1 %v7241_v1  ;;  %v7286_v1 = vld [vmem:[#allocation2 + $0x28] sm:$0xff]  }
  0xb3   : > { %6830 = vmatmul.mubr.msk.bf16.gmra.mrb[52].mxu0 %vm577_vm0, %v7235_v3  ;;  %6893 = vmatprep.subr.bf16.mxu1 %v7245_v4 }
  0xb4   : > { %6854 = vmatmul.mubr.msk.bf16.gmra.mrb[52].mxu1 %vm577_vm0, %v7235_v3  ;;  %6833 = vmatprep.mubr.msk.bf16.mxu0 %vm577_vm0, %v7237_v5  ;;  %v7293_v3 = vld [vmem:[#allocation2 + $0x2c] sm:$0xff]  }
  0xb5   : > { %6857 = vmatprep.mubr.msk.bf16.mxu1 %vm577_vm0, %v7237_v5  ;;  %6870 = vmatpush3.bf16.msra.mxu0 %v7239_v2  ;;  %v7290_v2 = vld [vmem:[#allocation2 + $0x24] sm:$0xff]   ;;  %v7291_v5 = vld [vmem:[#allocation2 + $0x38] sm:$0xff]  }
  0xb6   : > { %6871 = vmatprep.subr.bf16.mxu0 %v7244_v6  ;;  %6894 = vmatpush3.bf16.msra.mxu1 %v7245_v4  ;;  %v7287_v4 = vld [vmem:[#allocation2 + $0x30] sm:$0xff]  }
  0xb7   : > { %6895 = vmatprep.subr.bf16.mxu1 %v7246_v8 }
  0xb9   : > { %6872 = vmatpush3.bf16.msra.mxu0 %v7244_v6  ;;  %v7294_v6 = vld [vmem:[#allocation2 + $0x34] sm:$0xff]  }
  0xba   : > { %6896 = vmatpush3.bf16.msra.mxu1 %v7246_v8  ;;  %6913 = vmatprep.subr.bf16.mxu0 %v7249_v12  ;;  %v636_v8 = vld [vmem:[#allocation3 + $0x10] sm:$0xff] }
  0xbb   : > { %6834 = vmatmul.mubr.msk.bf16.gmra.mrb[56].mxu0 %vm577_vm0, %v7238_v11  ;;  %6933 = vmatprep.subr.bf16.mxu1 %v7255_v13 }
  0xbc   : > { %6858 = vmatmul.mubr.msk.bf16.gmra.mrb[56].mxu1 %vm577_vm0, %v7238_v11  ;;  %6837 = vmatprep.mubr.msk.bf16.mxu0 %vm577_vm0, %v7242_v14  ;;  %v877_v11 = vld [vmem:[#allocation4 + $0x10] sm:$0xff] }
  0xbd   : > { %6861 = vmatprep.mubr.msk.bf16.mxu1 %vm577_vm0, %v7242_v14  ;;  %v875_v14 = vld [vmem:[#allocation4] sm:$0xff] }
  0xc3   : > { %6838 = vmatmul.mubr.msk.bf16.gmra.mrb[60].mxu0 %vm577_vm0, %v7243_v16 }
  0xc4   : > { %6862 = vmatmul.mubr.msk.bf16.gmra.mrb[60].mxu1 %vm577_vm0, %v7243_v16  ;;  %6873 = vmatprep.mubr.msk.bf16.mxu0 %vm577_vm0, %v7247_v17 }
  0xc5   : > { %6897 = vmatprep.mubr.msk.bf16.mxu1 %vm577_vm0, %v7247_v17  ;;  %v635_v17 = vld [vmem:[#allocation3 + $0x8] sm:$0xff] }
  0xcb   : > { %6874 = vmatmul.mubr.msk.bf16.vlgmr.msra.gmra.mrb[64].mxu0 %vm577_vm0, %v7248_v18 }
  0xcc   : > { %6898 = vmatmul.mubr.msk.bf16.vlgmr.msra.gmra.mrb[64].mxu1 %vm577_vm0, %v7248_v18  ;;  %6914 = vmatpush3.bf16.msra.mxu0 %v7249_v12  ;;  %v7292_v18 = vld [vmem:[#allocation2 + $0x40] sm:$0xff]  }
  0xcd   : > { %6877 = vmatprep.mubr.msk.bf16.mxu0 %vm577_vm0, %v7250_v19  ;;  %6901 = vmatprep.mubr.msk.bf16.mxu1 %vm577_vm0, %v7250_v19 }
  0xce   : > { %6915 = vmatprep.subr.bf16.mxu0 %v7254_v20  ;;  %6934 = vmatpush3.bf16.msra.mxu1 %v7255_v13  ;;  %v637_v13 = vld [vmem:[#allocation3 + $0x18] sm:$0xff] }
  0xcf   : > { %6935 = vmatprep.subr.bf16.mxu1 %v7261_v24 }
  0xd0   : > { %6916 = vmatpush3.bf16.msra.mxu0 %v7254_v20  ;;  %v878_v20 = vld [vmem:[#allocation4 + $0x18] sm:$0xff] }
  0xd1   : > { %6953 = vmatprep.subr.bf16.mxu0 %v7260_v21 }
  0xd2   : > { %6936 = vmatpush3.bf16.msra.mxu1 %v7261_v24 }
  0xd3   : > { %6878 = vmatmul.mubr.msk.bf16.gmra.mrb[68].mxu0 %vm577_vm0, %v7251_v25  ;;  %6973 = vmatprep.subr.bf16.mxu1 %v7271_v26 }
  0xd4   : > { %6902 = vmatmul.mubr.msk.bf16.gmra.mrb[68].mxu1 %vm577_vm0, %v7251_v25  ;;  %6881 = vmatprep.mubr.msk.bf16.mxu0 %vm577_vm0, %v7252_v27  ;;  %v7295_v25 = vld [vmem:[#allocation2 + $0x10] sm:$0xff]  }
  0xd5   : > { %6905 = vmatprep.mubr.msk.bf16.mxu1 %vm577_vm0, %v7252_v27 }
  0xdb   : > { %6882 = vmatmul.mubr.msk.bf16.gmra.mrb[72].mxu0 %vm577_vm0, %v7253_v29 }
  0xdc   : > { %6906 = vmatmul.mubr.msk.bf16.gmra.mrb[72].mxu1 %vm577_vm0, %v7253_v29  ;;  %6885 = vmatprep.mubr.msk.bf16.mxu0 %vm577_vm0, %v7256_v31  ;;  %v876_v29 = vld [vmem:[#allocation4 + $0x8] sm:$0xff] }
  0xdd   : > { %6909 = vmatprep.mubr.msk.bf16.mxu1 %vm577_vm0, %v7256_v31 }
  0xe3   : > { %6886 = vmatmul.mubr.msk.bf16.gmra.mrb[76].mxu0 %vm577_vm0, %v7257_v34 }
  0xe4   : > { %6910 = vmatmul.mubr.msk.bf16.gmra.mrb[76].mxu1 %vm577_vm0, %v7257_v34  ;;  %6917 = vmatprep.mubr.msk.bf16.mxu0 %vm601_vm2, %v7258_v35  ;;  %v7298_v35 = vld [vmem:[#allocation2 + $0x44] sm:$0xff]  }
  0xe5   : > { %6937 = vmatprep.mubr.msk.bf16.mxu1 %vm601_vm2, %v7264_v36 }
  0xeb   : > { %6918 = vmatmul.mubr.msk.bf16.vlgmr.msra.gmra.mrb[80].mxu0 %vm601_vm2, %v7259_v39 }
  0xec   : > { %6954 = vmatpush3.bf16.msra.mxu0 %v7260_v21  ;;  %6921 = vmatprep.mubr.msk.bf16.mxu0 %vm601_vm2, %v7262_v40 }
  0xed   : > { %6938 = vmatmul.mubr.msk.bf16.vlgmr.msra.gmra.mrb[80].mxu1 %vm601_vm2, %v7265_v41  ;;  %6955 = vmatprep.subr.bf16.mxu0 %v7268_v42 }
  0xee   : > { %6941 = vmatprep.mubr.msk.bf16.mxu1 %vm601_vm2, %v7269_v43  ;;  %6974 = vmatpush3.bf16.msra.mxu1 %v7271_v26 }
  0xef   : > { %6975 = vmatprep.subr.bf16.mxu1 %v7281_v44 }
  0xf0   : > { %6956 = vmatpush3.bf16.msra.mxu0 %v7268_v42 }
  0xf1   : > { %6993 = vmatprep.subr.bf16.mxu0 %v7278_v45 }
  0xf2   : > { %6976 = vmatpush3.bf16.msra.mxu1 %v7281_v44  ;;  %v640_v44 = vld [vmem:[#allocation3 + $0x30] sm:$0xff] }
  0xf3   : > { %6922 = vmatmul.mubr.msk.bf16.gmra.mrb[84].mxu0 %vm601_vm2, %v7263_v46  ;;  %v881_v46 = vld [vmem:[#allocation4 + $0x30] sm:$0xff] }
  0xf4   : > { %6925 = vmatprep.mubr.msk.bf16.mxu0 %vm601_vm2, %v7266_v47 }
  0xf5   : > { %6942 = vmatmul.mubr.msk.bf16.gmra.mrb[84].mxu1 %vm601_vm2, %v7270_v48  ;;  %v641_v48 = vld [vmem:[#allocation3 + $0x38] sm:$0xff] }
  0xf6   : > { %6945 = vmatprep.mubr.msk.bf16.mxu1 %vm601_vm2, %v7274_v49  ;;  %v879_v49 = vld [vmem:[#allocation4 + $0x20] sm:$0xff] }
  0xfb   : > { %6926 = vmatmul.mubr.msk.bf16.gmra.mrb[88].mxu0 %vm601_vm2, %v7267_v50 }
  0xfc   : > { %6929 = vmatprep.mubr.msk.bf16.mxu0 %vm601_vm2, %v7272_v51 }
  0xfd   : > { %6946 = vmatmul.mubr.msk.bf16.gmra.mrb[88].mxu1 %vm601_vm2, %v7275_v52  ;;  %v639_v52 = vld [vmem:[#allocation3 + $0x28] sm:$0xff] }
  0xfe   : > { %6949 = vmatprep.mubr.msk.bf16.mxu1 %vm601_vm2, %v7279_v53  ;;  %v7296_v53 = vld [vmem:[#allocation2 + $0x18] sm:$0xff]  }
 0x103   : > { %6930 = vmatmul.mubr.msk.bf16.gmra.mrb[92].mxu0 %vm601_vm2, %v7273_v54 }
 0x104   : > { %6957 = vmatprep.mubr.msk.bf16.mxu0 %vm601_vm2, %v7276_v55  ;;  %v882_v55 = vld [vmem:[#allocation4 + $0x38] sm:$0xff] }
 0x105   : > { %6950 = vmatmul.mubr.msk.bf16.gmra.mrb[92].mxu1 %vm601_vm2, %v7280_v56 }
 0x106   : > { %6977 = vmatprep.mubr.msk.bf16.mxu1 %vm601_vm2, %v7284_v57 }
 0x10b   : > { %6958 = vmatmul.mubr.msk.bf16.vlgmr.msra.gmra.mrb[96].mxu0 %vm601_vm2, %v7277_v58 }
 0x10c   : > { %6994 = vmatpush3.bf16.msra.mxu0 %v7278_v45  ;;  %6961 = vmatprep.mubr.msk.bf16.mxu0 %vm601_vm2, %v7282_v59  ;;  %v638_v45 = vld [vmem:[#allocation3 + $0x20] sm:$0xff]  ;;  %v7299_v59 = vld [vmem:[#allocation2 + $0x20] sm:$0xff]  }
 0x10d   : > { %6978 = vmatmul.mubr.msk.bf16.vlgmr.msra.gmra.mrb[96].mxu1 %vm601_vm2, %v7285_v60  ;;  %6995 = vmatprep.subr.bf16.mxu0 %v7288_v62 }
 0x10e   : > { %6981 = vmatprep.mubr.msk.bf16.mxu1 %vm601_vm2, %v7289_v63 }
 0x110   : > { %6996 = vmatpush3.bf16.msra.mxu0 %v7288_v62  ;;  %v880_v62 = vld [vmem:[#allocation4 + $0x28] sm:$0xff] }
 0x113   : > { %6962 = vmatmul.mubr.msk.bf16.gmra.mrb[100].mxu0 %vm601_vm2, %v7283_v0 }
 0x114   : > { %6965 = vmatprep.mubr.msk.bf16.mxu0 %vm601_vm2, %v7286_v1 }
 0x115   : > { %6982 = vmatmul.mubr.msk.bf16.gmra.mrb[100].mxu1 %vm601_vm2, %v7290_v2 }
 0x116   : > { %6985 = vmatprep.mubr.msk.bf16.mxu1 %vm601_vm2, %v7293_v3 }
 0x11b   : > { %6966 = vmatmul.mubr.msk.bf16.gmra.mrb[104].mxu0 %vm601_vm2, %v7287_v4 }
 0x11c   : > { %6969 = vmatprep.mubr.msk.bf16.mxu0 %vm601_vm2, %v7291_v5 }
 0x11d   : > { %6986 = vmatmul.mubr.msk.bf16.gmra.mrb[104].mxu1 %vm601_vm2, %v7294_v6 }
 0x11e   : > { %v6683_v12 = vpop.f32.mrb[0].mxu0  ;;  %6989 = vmatprep.mubr.msk.bf16.mxu1 %vm601_vm2, %v7297_v7  ;;  %v644_v7 = vld [vmem:[#allocation3 + $0x50] sm:$0xff] }
 0x11f   : > { %v845_v15 = vadd.f32 %v6683_v12, %v636_v8  ;;  %v780_v16 = vpop.f32.mrb[1].mxu0  ;;  %v6707_v19 = vpop.f32.mrb[0].mxu1  ;;  %v642_v8 = vld [vmem:[#allocation3 + $0x40] sm:$0xff]  ;;  %v645_v12 = vld [vmem:[#allocation3 + $0x58] sm:$0xff] }
 0x120   : > { %v843_v21 = vadd.f32 %v780_v16, %v634_v10  ;;  %v6684_v24 = vpop.f32.mrb[2].mxu0  ;;  %v1022_v26 = vadd.f32 %v6707_v19, %v877_v11  ;;  %v957_v27 = vpop.f32.mrb[1].mxu1  ;;  %v885_v10 = vld [vmem:[#allocation4 + $0x50] sm:$0xff]  ;;  %v643_v16 = vld [vmem:[#allocation3 + $0x48] sm:$0xff]  ;;  %v886_v19 = vld [vmem:[#allocation4 + $0x58] sm:$0xff] }
 0x121   : > { %861 = vst.msk [vmem:[#allocation3 + $0x10] sm:$0xff] %vm577_vm0, %v845_v15  ;;  %v846_v31 = vadd.f32 %v6684_v24, %v637_v13  ;;  %v783_v34 = vpop.f32.mrb[3].mxu0  ;;  %v1020_v36 = vadd.f32 %v957_v27, %v875_v14  ;;  %v6708_v39 = vpop.f32.mrb[2].mxu1  ;;  %v883_v13 = vld [vmem:[#allocation4 + $0x40] sm:$0xff] }
 0x122   : > { %859 = vst.msk [vmem:[#allocation3] sm:$0xff] %vm577_vm0, %v843_v21  ;;  %v844_v40 = vadd.f32 %v783_v34, %v635_v17  ;;  %v1023_v41 = vadd.f32 %v6708_v39, %v878_v20  ;;  %v960_v42 = vpop.f32.mrb[3].mxu1  ;;  %v7300_v17 = vld [vmem:[#allocation2 + $0x28] sm:$0xff]   ;;  %v7301_v27 = vld [vmem:[#allocation2 + $0x30] sm:$0xff]  }
 0x123   : > { %1038 = vst.msk [vmem:[#allocation4 + $0x10] sm:$0xff] %vm601_vm2, %v1022_v26  ;;  %6970 = vmatmul.mubr.msk.bf16.gmra.mrb[108].mxu0 %vm601_vm2, %v7292_v18  ;;  %1036 = vst.msk [vmem:[#allocation4] sm:$0xff] %vm601_vm2, %v1020_v36  ;;  %v1021_v43 = vadd.f32 %v960_v42, %v876_v29  ;;  %v884_v26 = vld [vmem:[#allocation4 + $0x48] sm:$0xff]  ;;  %v649_v42 = vld [vmem:[#allocation3 + $0x78] sm:$0xff] }
 0x124   : > { %862 = vst.msk [vmem:[#allocation3 + $0x18] sm:$0xff] %vm577_vm0, %v846_v31  ;;  %860 = vst.msk [vmem:[#allocation3 + $0x8] sm:$0xff] %vm577_vm0, %v844_v40  ;;  %6997 = vmatprep.mubr.msk.bf16.mxu0 %vm601_vm2, %v7295_v25  ;;  %v889_v40 = vld [vmem:[#allocation4 + $0x70] sm:$0xff] }
 0x125   : > { %1039 = vst.msk [vmem:[#allocation4 + $0x18] sm:$0xff] %vm601_vm2, %v1023_v41  ;;  %6990 = vmatmul.mubr.msk.bf16.gmra.mrb[108].mxu1 %vm601_vm2, %v7298_v35  ;;  %1037 = vst.msk [vmem:[#allocation4 + $0x8] sm:$0xff] %vm601_vm2, %v1021_v43  ;;  %v887_v43 = vld [vmem:[#allocation4 + $0x60] sm:$0xff] }
 0x126   : > { %v6687_v47 = vpop.f32.mrb[4].mxu0 }
 0x127   : > { %v849_v50 = vadd.f32 %v6687_v47, %v640_v44  ;;  %v796_v51 = vpop.f32.mrb[5].mxu0  ;;  %v6711_v54 = vpop.f32.mrb[4].mxu1 }
 0x128   : > { %v847_v56 = vadd.f32 %v796_v51, %v638_v45  ;;  %v6688_v57 = vpop.f32.mrb[6].mxu0  ;;  %v1026_v58 = vadd.f32 %v6711_v54, %v881_v46  ;;  %v973_v60 = vpop.f32.mrb[5].mxu1  ;;  %v647_v46 = vld [vmem:[#allocation3 + $0x68] sm:$0xff] }
 0x129   : > { %865 = vst.msk [vmem:[#allocation3 + $0x30] sm:$0xff] %vm577_vm0, %v849_v50  ;;  %v850_v63 = vadd.f32 %v6688_v57, %v641_v48  ;;  %v799_v0 = vpop.f32.mrb[7].mxu0  ;;  %v1024_v1 = vadd.f32 %v973_v60, %v879_v49  ;;  %v6712_v2 = vpop.f32.mrb[6].mxu1  ;;  %v7302_v48 = vld [vmem:[#allocation2 + $0x38] sm:$0xff]   ;;  %v890_v49 = vld [vmem:[#allocation4 + $0x78] sm:$0xff] }
 0x12a   : > { %863 = vst.msk [vmem:[#allocation3 + $0x20] sm:$0xff] %vm577_vm0, %v847_v56  ;;  %v848_v3 = vadd.f32 %v799_v0, %v639_v52  ;;  %v1027_v4 = vadd.f32 %v6712_v2, %v882_v55  ;;  %v976_v5 = vpop.f32.mrb[7].mxu1  ;;  %v888_v54 = vld [vmem:[#allocation4 + $0x68] sm:$0xff]  ;;  %v7303_v55 = vld [vmem:[#allocation2 + $0x40] sm:$0xff]   ;;  %v1311_v2 = vld [vmem:[#allocation4] sm:$0xff] }
 0x12b   : > { %1042 = vst.msk [vmem:[#allocation4 + $0x30] sm:$0xff] %vm601_vm2, %v1026_v58  ;;  %6998 = vmatmul.mubr.msk.bf16.vlgmr.msra.gmra.mrb[112].mxu0 %vm601_vm2, %v7296_v53  ;;  %1040 = vst.msk [vmem:[#allocation4 + $0x20] sm:$0xff] %vm601_vm2, %v1024_v1  ;;  %v1025_v6 = vadd.f32 %v976_v5, %v880_v62  ;;  %v1313_v37 = vld [vmem:[#allocation4 + $0x10] sm:$0xff]  ;;  %v1069_v5 = vld [vmem:[#allocation3] sm:$0xff] }
 0x12c   : > { %866 = vst.msk [vmem:[#allocation3 + $0x38] sm:$0xff] %vm577_vm0, %v850_v63  ;;  %864 = vst.msk [vmem:[#allocation3 + $0x28] sm:$0xff] %vm577_vm0, %v848_v3  ;;  %7001 = vmatprep.mubr.msk.bf16.mxu0 %vm601_vm2, %v7299_v59  ;;  %v7452_v63 = vld [vmem:[%s7879_s20 + $0x48] sm:$0xff]  ;;  %v1071_v0 = vld [vmem:[#allocation3 + $0x10] sm:$0xff] }
 0x12d   : > { %1043 = vst.msk [vmem:[#allocation4 + $0x38] sm:$0xff] %vm601_vm2, %v1027_v4  ;;  %1041 = vst.msk [vmem:[#allocation4 + $0x28] sm:$0xff] %vm601_vm2, %v1025_v6  ;;  %4197 = vrot.lane.b32.xlu1 %v7452_v63, %s7530_s25 }
 0x12e   : > { %v6691_v11 = vpop.f32.mrb[8].mxu0 }
 0x12f   : > { %v853_v14 = vadd.f32 %v6691_v11, %v644_v7  ;;  %v812_v15 = vpop.f32.mrb[9].mxu0  ;;  %v6715_v18 = vpop.f32.mrb[8].mxu1  ;;  %v7304_v7 = vld [vmem:[#allocation2 + $0x48] sm:$0xff]  }
 0x130   : > { %v851_v20 = vadd.f32 %v812_v15, %v642_v8  ;;  %v6692_v21 = vpop.f32.mrb[10].mxu0  ;;  %v1030_v24 = vadd.f32 %v6715_v18, %v885_v10  ;;  %v989_v25 = vpop.f32.mrb[9].mxu1  ;;  %v1070_v18 = vld [vmem:[#allocation3 + $0x8] sm:$0xff] }
 0x131   : > { %869 = vst.msk [vmem:[#allocation3 + $0x50] sm:$0xff] %vm577_vm0, %v853_v14  ;;  %v854_v22 = vadd.f32 %v6692_v21, %v645_v12  ;;  %v815_v29 = vpop.f32.mrb[11].mxu0  ;;  %v1028_v28 = vadd.f32 %v989_v25, %v883_v13  ;;  %v6716_v31 = vpop.f32.mrb[10].mxu1  ;;  %v1072_v12 = vld [vmem:[#allocation3 + $0x18] sm:$0xff] }
 0x132   : > { %867 = vst.msk [vmem:[#allocation3 + $0x40] sm:$0xff] %vm577_vm0, %v851_v20  ;;  %v852_v34 = vadd.f32 %v815_v29, %v643_v16  ;;  %v1031_v35 = vadd.f32 %v6716_v31, %v886_v19  ;;  %v992_v36 = vpop.f32.mrb[11].mxu1  ;;  %v1314_v16 = vld [vmem:[#allocation4 + $0x18] sm:$0xff]  ;;  %v7453_v20 = vld [vmem:[%s7879_s20 + $0x50] sm:$0xff]  ;;  %v7456_v31 = vld [vmem:[%s7879_s20 + $0x68] sm:$0xff] }
 0x133   : > { %1046 = vst.msk [vmem:[#allocation4 + $0x50] sm:$0xff] %vm601_vm2, %v1030_v24  ;;  %7002 = vmatmul.mubr.msk.bf16.gmra.mrb[116].mxu0 %vm601_vm2, %v7300_v17  ;;  %1044 = vst.msk [vmem:[#allocation4 + $0x40] sm:$0xff] %vm601_vm2, %v1028_v28  ;;  %v1029_v39 = vadd.f32 %v992_v36, %v884_v26  ;;  %4199 = vrot.lane.b32.xlu0 %v7453_v20, %s7530_s25  ;;  %v7454_v21 = vld [vmem:[%s7879_s20 + $0x58] sm:$0xff]  ;;  %v1312_v26 = vld [vmem:[#allocation4 + $0x8] sm:$0xff] }
 0x134   : > { %870 = vst.msk [vmem:[#allocation3 + $0x58] sm:$0xff] %vm577_vm0, %v854_v22  ;;  %868 = vst.msk [vmem:[#allocation3 + $0x48] sm:$0xff] %vm577_vm0, %v852_v34  ;;  %7005 = vmatprep.mubr.msk.bf16.mxu0 %vm601_vm2, %v7301_v27  ;;  %4201 = vrot.lane.b32.xlu1 %v7454_v21, %s7530_s25  ;;  %v1317_v29 = vld [vmem:[#allocation4 + $0x30] sm:$0xff]  ;;  %v7455_v28 = vld [vmem:[%s7879_s20 + $0x60] sm:$0xff] }
 0x135   : > { %1047 = vst.msk [vmem:[#allocation4 + $0x58] sm:$0xff] %vm601_vm2, %v1031_v35  ;;  %1045 = vst.msk [vmem:[#allocation4 + $0x48] sm:$0xff] %vm601_vm2, %v1029_v39  ;;  %v1075_v34 = vld [vmem:[#allocation3 + $0x30] sm:$0xff]  ;;  %v1315_v36 = vld [vmem:[#allocation4 + $0x20] sm:$0xff] }
 0x136   : > { %v6695_v41 = vpop.f32.mrb[12].mxu0 }
 0x137   : > { %v857_v44 = vadd.f32 %v6695_v41, %v648_v23  ;;  %v828_v45 = vpop.f32.mrb[13].mxu0  ;;  %v6719_v47 = vpop.f32.mrb[12].mxu1  ;;  %4203 = vrot.lane.b32.xlu0 %v7455_v28, %s7530_s25 }
 0x138   : > { %v855_v50 = vadd.f32 %v828_v45, %v646_v30  ;;  %v6696_v51 = vpop.f32.mrb[14].mxu0  ;;  %v1034_v52 = vadd.f32 %v6719_v47, %v889_v40  ;;  %v1005_v53 = vpop.f32.mrb[13].mxu1  ;;  %4205 = vrot.lane.b32.xlu1 %v7456_v31, %s7530_s25  ;;  %v1073_v30 = vld [vmem:[#allocation3 + $0x20] sm:$0xff] }
 0x139   : > { %873 = vst.msk [vmem:[#allocation3 + $0x70] sm:$0xff] %vm577_vm0, %v857_v44  ;;  %v858_v32 = vadd.f32 %v6696_v51, %v649_v42  ;;  %v831_v56 = vpop.f32.mrb[15].mxu0  ;;  %v1032_v33 = vadd.f32 %v1005_v53, %v887_v43  ;;  %v6720_v57 = vpop.f32.mrb[14].mxu1  ;;  %v1076_v44 = vld [vmem:[#allocation3 + $0x38] sm:$0xff] }
 0x13a   : > { %871 = vst.msk [vmem:[#allocation3 + $0x60] sm:$0xff] %vm577_vm0, %v855_v50  ;;  %v856_v58 = vadd.f32 %v831_v56, %v647_v46  ;;  %v1035_v59 = vadd.f32 %v6720_v57, %v890_v49  ;;  %v1008_v60 = vpop.f32.mrb[15].mxu1  ;;  %v1074_v50 = vld [vmem:[#allocation3 + $0x28] sm:$0xff] }
 0x13b   : > { %1050 = vst.msk [vmem:[#allocation4 + $0x70] sm:$0xff] %vm601_vm2, %v1034_v52  ;;  %1048 = vst.msk [vmem:[#allocation4 + $0x60] sm:$0xff] %vm601_vm2, %v1032_v33  ;;  %7006 = vmatmul.mubr.msk.bf16.gmra.mrb[120].mxu0 %vm601_vm2, %v7302_v48  ;;  %v1033_v62 = vadd.f32 %v1008_v60, %v888_v54  ;;  %v1318_v48 = vld [vmem:[#allocation4 + $0x38] sm:$0xff]  ;;  %4207 = vrot.lane.b32.xlu0 %v7975_v61, %s7530_s25  ;;  %v1316_v54 = vld [vmem:[#allocation4 + $0x28] sm:$0xff] }
 0x13c   : > { %874 = vst.msk [vmem:[#allocation3 + $0x78] sm:$0xff] %vm577_vm0, %v858_v32  ;;  %872 = vst.msk [vmem:[#allocation3 + $0x68] sm:$0xff] %vm577_vm0, %v856_v58  ;;  %7009 = vmatprep.mubr.msk.bf16.mxu0 %vm601_vm2, %v7303_v55  ;;  %4209 = vrot.lane.b32.xlu1 %v8026_v9, %s7530_s25  ;;  %v1321_v61 = vld [vmem:[#allocation4 + $0x50] sm:$0xff]  ;;  %v1319_v33 = vld [vmem:[#allocation4 + $0x40] sm:$0xff] }
 0x13d   : > { %1051 = vst.msk [vmem:[#allocation4 + $0x78] sm:$0xff] %vm601_vm2, %v1035_v59  ;;  %1049 = vst.msk [vmem:[#allocation4 + $0x68] sm:$0xff] %vm601_vm2, %v1033_v62  ;;  %v1079_v9 = vld [vmem:[#allocation3 + $0x50] sm:$0xff]  ;;  %v1077_v59 = vld [vmem:[#allocation3 + $0x40] sm:$0xff] }
 0x13e   : > { %v6731_v1 = vpop.f32.mrb[16].mxu0  ;;  %v1080_v63 = vld [vmem:[#allocation3 + $0x58] sm:$0xff] }
 0x13f   : > { %v1281_v3 = vadd.f32 %v6731_v1, %v1071_v0  ;;  %v6755_v4 = vpop.f32.mrb[16].mxu1  ;;  %v1216_v6 = vpop.f32.mrb[17].mxu0 }
 0x140   : > { %v1459_v8 = vadd.f32 %v6755_v4, %v1313_v37  ;;  %v1279_v10 = vadd.f32 %v1216_v6, %v1069_v5  ;;  %v1394_v11 = vpop.f32.mrb[17].mxu1  ;;  %v6732_v13 = vpop.f32.mrb[18].mxu0  ;;  %v1078_v5 = vld [vmem:[#allocation3 + $0x48] sm:$0xff] }
 0x141   : > { %1297 = vst.msk [vmem:[#allocation3 + $0x10] sm:$0xff] %vm577_vm0, %v1281_v3  ;;  %v1457_v14 = vadd.f32 %v1394_v11, %v1311_v2  ;;  %v1282_v15 = vadd.f32 %v6732_v13, %v1072_v12  ;;  %v6756_v17 = vpop.f32.mrb[18].mxu1  ;;  %v1219_v19 = vpop.f32.mrb[19].mxu0  ;;  %v1322_v3 = vld [vmem:[#allocation4 + $0x58] sm:$0xff] }
 0x142   : > { %1475 = vst.msk [vmem:[#allocation4 + $0x10] sm:$0xff] %vm601_vm2, %v1459_v8  ;;  %v1460_v24 = vadd.f32 %v6756_v17, %v1314_v16  ;;  %v1280_v25 = vadd.f32 %v1219_v19, %v1070_v18  ;;  %v1397_v27 = vpop.f32.mrb[19].mxu1  ;;  %v1325_v13 = vld [vmem:[#allocation4 + $0x70] sm:$0xff]  ;;  %v1323_v16 = vld [vmem:[#allocation4 + $0x60] sm:$0xff] }
 0x143   : > { %1295 = vst.msk [vmem:[#allocation3] sm:$0xff] %vm577_vm0, %v1279_v10  ;;  %1298 = vst.msk [vmem:[#allocation3 + $0x18] sm:$0xff] %vm577_vm0, %v1282_v15  ;;  %v1458_v22 = vadd.f32 %v1397_v27, %v1312_v26  ;;  %7010 = vmatmul.mubr.msk.bf16.gmra.mrb[124].mxu0 %vm601_vm2, %v7304_v7  ;;  %v1320_v10 = vld [vmem:[#allocation4 + $0x48] sm:$0xff]  ;;  %v1081_v19 = vld [vmem:[#allocation3 + $0x60] sm:$0xff] }
 0x144   : > { %1473 = vst.msk [vmem:[#allocation4] sm:$0xff] %vm601_vm2, %v1457_v14  ;;  %1476 = vst.msk [vmem:[#allocation4 + $0x18] sm:$0xff] %vm601_vm2, %v1460_v24  ;;  %v1083_v14 = vld [vmem:[#allocation3 + $0x70] sm:$0xff]  ;;  %v1084_v26 = vld [vmem:[#allocation3 + $0x78] sm:$0xff] }
 0x145   : > { %1296 = vst.msk [vmem:[#allocation3 + $0x8] sm:$0xff] %vm577_vm0, %v1280_v25  ;;  %v1326_v28 = vld [vmem:[#allocation4 + $0x78] sm:$0xff] }
 0x146   : > { %1474 = vst.msk [vmem:[#allocation4 + $0x8] sm:$0xff] %vm601_vm2, %v1458_v22  ;;  %v6735_v35 = vpop.f32.mrb[20].mxu0 }
 0x147   : > { %v1285_v39 = vadd.f32 %v6735_v35, %v1075_v34  ;;  %v6759_v23 = vpop.f32.mrb[20].mxu1  ;;  %v1232_v40 = vpop.f32.mrb[21].mxu0  ;;  %v1082_v34 = vld [vmem:[#allocation3 + $0x68] sm:$0xff] }
 0x148   : > { %v1463_v41 = vadd.f32 %v6759_v23, %v1317_v29  ;;  %v1283_v42 = vadd.f32 %v1232_v40, %v1073_v30  ;;  %v1410_v43 = vpop.f32.mrb[21].mxu1  ;;  %v6736_v45 = vpop.f32.mrb[22].mxu0  ;;  %v1324_v23 = vld [vmem:[#allocation4 + $0x68] sm:$0xff] }
 0x149   : > { %1301 = vst.msk [vmem:[#allocation3 + $0x30] sm:$0xff] %vm577_vm0, %v1285_v39  ;;  %v1461_v46 = vadd.f32 %v1410_v43, %v1315_v36  ;;  %v1286_v47 = vadd.f32 %v6736_v45, %v1076_v44  ;;  %v6760_v49 = vpop.f32.mrb[22].mxu1  ;;  %v1235_v51 = vpop.f32.mrb[23].mxu0  ;;  %v1750_v44 = vld [vmem:[#allocation4 + $0x10] sm:$0xff] }
 0x14a   : > { %1479 = vst.msk [vmem:[#allocation4 + $0x30] sm:$0xff] %vm601_vm2, %v1463_v41  ;;  %v1464_v52 = vadd.f32 %v6760_v49, %v1318_v48  ;;  %v1284_v53 = vadd.f32 %v1235_v51, %v1074_v50  ;;  %v1413_v55 = vpop.f32.mrb[23].mxu1  ;;  %v1508_v41 = vld [vmem:[#allocation3 + $0x10] sm:$0xff] }
 0x14b   : > { %1299 = vst.msk [vmem:[#allocation3 + $0x20] sm:$0xff] %vm577_vm0, %v1283_v42  ;;  %1302 = vst.msk [vmem:[#allocation3 + $0x38] sm:$0xff] %vm577_vm0, %v1286_v47  ;;  %v1462_v32 = vadd.f32 %v1413_v55, %v1316_v54  ;;  %v1748_v50 = vld [vmem:[#allocation4] sm:$0xff] }
 0x14c   : > { %1477 = vst.msk [vmem:[#allocation4 + $0x20] sm:$0xff] %vm601_vm2, %v1461_v46  ;;  %1480 = vst.msk [vmem:[#allocation4 + $0x38] sm:$0xff] %vm601_vm2, %v1464_v52  ;;  %v1506_v46 = vld [vmem:[#allocation3] sm:$0xff]  ;;  %v1509_v52 = vld [vmem:[#allocation3 + $0x18] sm:$0xff] }
 0x14d   : > { %1300 = vst.msk [vmem:[#allocation3 + $0x28] sm:$0xff] %vm577_vm0, %v1284_v53 }
 0x14e   : > { %1478 = vst.msk [vmem:[#allocation4 + $0x28] sm:$0xff] %vm601_vm2, %v1462_v32  ;;  %v6739_v56 = vpop.f32.mrb[24].mxu0  ;;  %v1751_v32 = vld [vmem:[#allocation4 + $0x18] sm:$0xff] }
 0x14f   : > { %v1289_v57 = vadd.f32 %v6739_v56, %v1079_v9  ;;  %v6763_v58 = vpop.f32.mrb[24].mxu1  ;;  %v1248_v60 = vpop.f32.mrb[25].mxu0  ;;  %v1507_v9 = vld [vmem:[#allocation3 + $0x8] sm:$0xff] }
 0x150   : > { %v1467_v62 = vadd.f32 %v6763_v58, %v1321_v61  ;;  %v1287_v37 = vadd.f32 %v1248_v60, %v1077_v59  ;;  %v1426_v38 = vpop.f32.mrb[25].mxu1  ;;  %v6740_v0 = vpop.f32.mrb[26].mxu0  ;;  %v1749_v58 = vld [vmem:[#allocation4 + $0x8] sm:$0xff] }
 0x151   : > { %1305 = vst.msk [vmem:[#allocation3 + $0x50] sm:$0xff] %vm577_vm0, %v1289_v57  ;;  %v1465_v1 = vadd.f32 %v1426_v38, %v1319_v33  ;;  %v1290_v2 = vadd.f32 %v6740_v0, %v1080_v63  ;;  %v6764_v4 = vpop.f32.mrb[26].mxu1  ;;  %v1251_v6 = vpop.f32.mrb[27].mxu0  ;;  %v1754_v63 = vld [vmem:[#allocation4 + $0x30] sm:$0xff] }
 0x152   : > { %1483 = vst.msk [vmem:[#allocation4 + $0x50] sm:$0xff] %vm601_vm2, %v1467_v62  ;;  %v1468_v7 = vadd.f32 %v6764_v4, %v1322_v3  ;;  %v1288_v8 = vadd.f32 %v1251_v6, %v1078_v5  ;;  %v1429_v11 = vpop.f32.mrb[27].mxu1  ;;  %v1512_v62 = vld [vmem:[#allocation3 + $0x30] sm:$0xff] }
 0x153   : > { %1303 = vst.msk [vmem:[#allocation3 + $0x40] sm:$0xff] %vm577_vm0, %v1287_v37  ;;  %1306 = vst.msk [vmem:[#allocation3 + $0x58] sm:$0xff] %vm577_vm0, %v1290_v2  ;;  %v1466_v12 = vadd.f32 %v1429_v11, %v1320_v10  ;;  %v1752_v5 = vld [vmem:[#allocation4 + $0x20] sm:$0xff] }
 0x154   : > { %1481 = vst.msk [vmem:[#allocation4 + $0x40] sm:$0xff] %vm601_vm2, %v1465_v1  ;;  %1484 = vst.msk [vmem:[#allocation4 + $0x58] sm:$0xff] %vm601_vm2, %v1468_v7  ;;  %v1510_v1 = vld [vmem:[#allocation3 + $0x20] sm:$0xff]  ;;  %v1513_v7 = vld [vmem:[#allocation3 + $0x38] sm:$0xff] }
 0x155   : > { %1304 = vst.msk [vmem:[#allocation3 + $0x48] sm:$0xff] %vm577_vm0, %v1288_v8 }
 0x156   : > { %1482 = vst.msk [vmem:[#allocation4 + $0x48] sm:$0xff] %vm601_vm2, %v1466_v12  ;;  %v6743_v15 = vpop.f32.mrb[28].mxu0  ;;  %v1755_v12 = vld [vmem:[#allocation4 + $0x38] sm:$0xff] }
 0x157   : > { %v1293_v17 = vadd.f32 %v6743_v15, %v1083_v14  ;;  %v6767_v18 = vpop.f32.mrb[28].mxu1  ;;  %v1264_v20 = vpop.f32.mrb[29].mxu0  ;;  %v1511_v14 = vld [vmem:[#allocation3 + $0x28] sm:$0xff] }
 0x158   : > { %v1471_v21 = vadd.f32 %v6767_v18, %v1325_v13  ;;  %v1291_v24 = vadd.f32 %v1264_v20, %v1081_v19  ;;  %v1442_v25 = vpop.f32.mrb[29].mxu1  ;;  %v6744_v27 = vpop.f32.mrb[30].mxu0  ;;  %v1753_v18 = vld [vmem:[#allocation4 + $0x28] sm:$0xff] }
 0x159   : > { %1309 = vst.msk [vmem:[#allocation3 + $0x70] sm:$0xff] %vm577_vm0, %v1293_v17  ;;  %v1469_v22 = vadd.f32 %v1442_v25, %v1323_v16  ;;  %v1294_v29 = vadd.f32 %v6744_v27, %v1084_v26  ;;  %v6768_v31 = vpop.f32.mrb[30].mxu1  ;;  %v1267_v35 = vpop.f32.mrb[31].mxu0  ;;  %v1758_v26 = vld [vmem:[#allocation4 + $0x50] sm:$0xff] }
 0x15a   : > { %1487 = vst.msk [vmem:[#allocation4 + $0x70] sm:$0xff] %vm601_vm2, %v1471_v21  ;;  %v1472_v36 = vadd.f32 %v6768_v31, %v1326_v28  ;;  %v1292_v39 = vadd.f32 %v1267_v35, %v1082_v34  ;;  %v1445_v30 = vpop.f32.mrb[31].mxu1  ;;  %v1516_v21 = vld [vmem:[#allocation3 + $0x50] sm:$0xff] }
 0x15b   : > { %1307 = vst.msk [vmem:[#allocation3 + $0x60] sm:$0xff] %vm577_vm0, %v1291_v24  ;;  %1310 = vst.msk [vmem:[#allocation3 + $0x78] sm:$0xff] %vm577_vm0, %v1294_v29  ;;  %v1470_v40 = vadd.f32 %v1445_v30, %v1324_v23  ;;  %v1756_v34 = vld [vmem:[#allocation4 + $0x40] sm:$0xff] }
 0x15c   : > { %1485 = vst.msk [vmem:[#allocation4 + $0x60] sm:$0xff] %vm601_vm2, %v1469_v22  ;;  %1488 = vst.msk [vmem:[#allocation4 + $0x78] sm:$0xff] %vm601_vm2, %v1472_v36  ;;  %v1514_v22 = vld [vmem:[#allocation3 + $0x40] sm:$0xff]  ;;  %v1517_v36 = vld [vmem:[#allocation3 + $0x58] sm:$0xff] }
 0x15d   : > { %1308 = vst.msk [vmem:[#allocation3 + $0x68] sm:$0xff] %vm577_vm0, %v1292_v39 }
 0x15e   : > { %1486 = vst.msk [vmem:[#allocation4 + $0x68] sm:$0xff] %vm601_vm2, %v1470_v40  ;;  %v6779_v42 = vpop.f32.mrb[32].mxu0  ;;  %v1759_v40 = vld [vmem:[#allocation4 + $0x58] sm:$0xff] }
 0x15f   : > { %v1718_v43 = vadd.f32 %v6779_v42, %v1508_v41  ;;  %v6803_v45 = vpop.f32.mrb[32].mxu1  ;;  %v1653_v47 = vpop.f32.mrb[33].mxu0  ;;  %v1515_v42 = vld [vmem:[#allocation3 + $0x48] sm:$0xff] }
 0x160   : > { %v1896_v48 = vadd.f32 %v6803_v45, %v1750_v44  ;;  %v1716_v49 = vadd.f32 %v1653_v47, %v1506_v46  ;;  %v1831_v51 = vpop.f32.mrb[33].mxu1  ;;  %v6780_v53 = vpop.f32.mrb[34].mxu0  ;;  %v1757_v46 = vld [vmem:[#allocation4 + $0x48] sm:$0xff] }
 0x161   : > { %1734 = vst.msk [vmem:[#allocation3 + $0x10] sm:$0xff] %vm577_vm0, %v1718_v43  ;;  %v1894_v54 = vadd.f32 %v1831_v51, %v1748_v50  ;;  %v1719_v55 = vadd.f32 %v6780_v53, %v1509_v52  ;;  %v6804_v61 = vpop.f32.mrb[34].mxu1  ;;  %v1656_v56 = vpop.f32.mrb[35].mxu0  ;;  %v1762_v52 = vld [vmem:[#allocation4 + $0x70] sm:$0xff] }
 0x162   : > { %1912 = vst.msk [vmem:[#allocation4 + $0x10] sm:$0xff] %vm601_vm2, %v1896_v48  ;;  %v1897_v33 = vadd.f32 %v6804_v61, %v1751_v32  ;;  %v1717_v57 = vadd.f32 %v1656_v56, %v1507_v9  ;;  %v1834_v59 = vpop.f32.mrb[35].mxu1 }
 0x163   : > { %1732 = vst.msk [vmem:[#allocation3] sm:$0xff] %vm577_vm0, %v1716_v49  ;;  %1735 = vst.msk [vmem:[#allocation3 + $0x18] sm:$0xff] %vm577_vm0, %v1719_v55  ;;  %v1895_v60 = vadd.f32 %v1834_v59, %v1749_v58  ;;  %v1520_v49 = vld [vmem:[#allocation3 + $0x70] sm:$0xff]  ;;  %v1760_v9 = vld [vmem:[#allocation4 + $0x60] sm:$0xff] }
 0x164   : > { %1910 = vst.msk [vmem:[#allocation4] sm:$0xff] %vm601_vm2, %v1894_v54  ;;  %1913 = vst.msk [vmem:[#allocation4 + $0x18] sm:$0xff] %vm601_vm2, %v1897_v33  ;;  %v1518_v54 = vld [vmem:[#allocation3 + $0x60] sm:$0xff]  ;;  %v1521_v33 = vld [vmem:[#allocation3 + $0x78] sm:$0xff] }
 0x165   : > { %1733 = vst.msk [vmem:[#allocation3 + $0x8] sm:$0xff] %vm577_vm0, %v1717_v57 }
 0x166   : > { %1911 = vst.msk [vmem:[#allocation4 + $0x8] sm:$0xff] %vm601_vm2, %v1895_v60  ;;  %v6783_v37 = vpop.f32.mrb[36].mxu0  ;;  %v1763_v60 = vld [vmem:[#allocation4 + $0x78] sm:$0xff] }
 0x167   : > { %v1722_v38 = vadd.f32 %v6783_v37, %v1512_v62  ;;  %v6807_v0 = vpop.f32.mrb[36].mxu1  ;;  %v1669_v2 = vpop.f32.mrb[37].mxu0  ;;  %v1519_v37 = vld [vmem:[#allocation3 + $0x68] sm:$0xff] }
 0x168   : > { %v1900_v3 = vadd.f32 %v6807_v0, %v1754_v63  ;;  %v1720_v4 = vadd.f32 %v1669_v2, %v1510_v1  ;;  %v1847_v6 = vpop.f32.mrb[37].mxu1  ;;  %v6784_v8 = vpop.f32.mrb[38].mxu0  ;;  %v1761_v1 = vld [vmem:[#allocation4 + $0x68] sm:$0xff] }
 0x169   : > { %1738 = vst.msk [vmem:[#allocation3 + $0x30] sm:$0xff] %vm577_vm0, %v1722_v38  ;;  %v1898_v10 = vadd.f32 %v1847_v6, %v1752_v5  ;;  %v1723_v11 = vadd.f32 %v6784_v8, %v1513_v7  ;;  %v6808_v13 = vpop.f32.mrb[38].mxu1  ;;  %v1672_v15 = vpop.f32.mrb[39].mxu0  ;;  %v2187_v7 = vld [vmem:[#allocation4 + $0x10] sm:$0xff] }
 0x16a   : > { %1916 = vst.msk [vmem:[#allocation4 + $0x30] sm:$0xff] %vm601_vm2, %v1900_v3  ;;  %v1901_v16 = vadd.f32 %v6808_v13, %v1755_v12  ;;  %v1721_v17 = vadd.f32 %v1672_v15, %v1511_v14  ;;  %v1850_v19 = vpop.f32.mrb[39].mxu1 }
 0x16b   : > { %1736 = vst.msk [vmem:[#allocation3 + $0x20] sm:$0xff] %vm577_vm0, %v1720_v4  ;;  %1739 = vst.msk [vmem:[#allocation3 + $0x38] sm:$0xff] %vm577_vm0, %v1723_v11  ;;  %v1899_v20 = vadd.f32 %v1850_v19, %v1753_v18  ;;  %v1945_v4 = vld [vmem:[#allocation3 + $0x10] sm:$0xff]  ;;  %v2185_v14 = vld [vmem:[#allocation4] sm:$0xff] }
 0x16c   : > { %1914 = vst.msk [vmem:[#allocation4 + $0x20] sm:$0xff] %vm601_vm2, %v1898_v10  ;;  %1917 = vst.msk [vmem:[#allocation4 + $0x38] sm:$0xff] %vm601_vm2, %v1901_v16  ;;  %v1943_v10 = vld [vmem:[#allocation3] sm:$0xff]  ;;  %v1946_v16 = vld [vmem:[#allocation3 + $0x18] sm:$0xff] }
 0x16d   : > { %1737 = vst.msk [vmem:[#allocation3 + $0x28] sm:$0xff] %vm577_vm0, %v1721_v17 }
 0x16e   : > { %1915 = vst.msk [vmem:[#allocation4 + $0x28] sm:$0xff] %vm601_vm2, %v1899_v20  ;;  %v6787_v24 = vpop.f32.mrb[40].mxu0  ;;  %v2188_v20 = vld [vmem:[#allocation4 + $0x18] sm:$0xff] }
 0x16f   : > { %v1726_v25 = vadd.f32 %v6787_v24, %v1516_v21  ;;  %v6811_v27 = vpop.f32.mrb[40].mxu1  ;;  %v1685_v29 = vpop.f32.mrb[41].mxu0  ;;  %v1944_v24 = vld [vmem:[#allocation3 + $0x8] sm:$0xff] }
 0x170   : > { %v1904_v28 = vadd.f32 %v6811_v27, %v1758_v26  ;;  %v1724_v31 = vadd.f32 %v1685_v29, %v1514_v22  ;;  %v1863_v35 = vpop.f32.mrb[41].mxu1  ;;  %v6788_v39 = vpop.f32.mrb[42].mxu0  ;;  %v2186_v22 = vld [vmem:[#allocation4 + $0x8] sm:$0xff] }
 0x171   : > { %1742 = vst.msk [vmem:[#allocation3 + $0x50] sm:$0xff] %vm577_vm0, %v1726_v25  ;;  %v1902_v23 = vadd.f32 %v1863_v35, %v1756_v34  ;;  %v1727_v30 = vadd.f32 %v6788_v39, %v1517_v36  ;;  %v6812_v41 = vpop.f32.mrb[42].mxu1  ;;  %v1688_v43 = vpop.f32.mrb[43].mxu0  ;;  %v2191_v36 = vld [vmem:[#allocation4 + $0x30] sm:$0xff] }
 0x172   : > { %1920 = vst.msk [vmem:[#allocation4 + $0x50] sm:$0xff] %vm601_vm2, %v1904_v28  ;;  %v1905_v44 = vadd.f32 %v6812_v41, %v1759_v40  ;;  %v1725_v45 = vadd.f32 %v1688_v43, %v1515_v42  ;;  %v1866_v47 = vpop.f32.mrb[43].mxu1 }
 0x173   : > { %1740 = vst.msk [vmem:[#allocation3 + $0x40] sm:$0xff] %vm577_vm0, %v1724_v31  ;;  %1743 = vst.msk [vmem:[#allocation3 + $0x58] sm:$0xff] %vm577_vm0, %v1727_v30  ;;  %v1903_v48 = vadd.f32 %v1866_v47, %v1757_v46  ;;  %v1949_v31 = vld [vmem:[#allocation3 + $0x30] sm:$0xff]  ;;  %v2189_v42 = vld [vmem:[#allocation4 + $0x20] sm:$0xff] }
 0x174   : > { %1918 = vst.msk [vmem:[#allocation4 + $0x40] sm:$0xff] %vm601_vm2, %v1902_v23  ;;  %1921 = vst.msk [vmem:[#allocation4 + $0x58] sm:$0xff] %vm601_vm2, %v1905_v44  ;;  %v1947_v23 = vld [vmem:[#allocation3 + $0x20] sm:$0xff]  ;;  %v1950_v44 = vld [vmem:[#allocation3 + $0x38] sm:$0xff] }
 0x175   : > { %1741 = vst.msk [vmem:[#allocation3 + $0x48] sm:$0xff] %vm577_vm0, %v1725_v45 }
 0x176   : > { %1919 = vst.msk [vmem:[#allocation4 + $0x48] sm:$0xff] %vm601_vm2, %v1903_v48  ;;  %v6791_v50 = vpop.f32.mrb[44].mxu0  ;;  %v2192_v48 = vld [vmem:[#allocation4 + $0x38] sm:$0xff] }
 0x177   : > { %v1730_v51 = vadd.f32 %v6791_v50, %v1520_v49  ;;  %v6815_v53 = vpop.f32.mrb[44].mxu1  ;;  %v1701_v55 = vpop.f32.mrb[45].mxu0  ;;  %v1948_v50 = vld [vmem:[#allocation3 + $0x28] sm:$0xff] }
 0x178   : > { %v1908_v32 = vadd.f32 %v6815_v53, %v1762_v52  ;;  %v1728_v61 = vadd.f32 %v1701_v55, %v1518_v54  ;;  %v1879_v56 = vpop.f32.mrb[45].mxu1  ;;  %v6792_v57 = vpop.f32.mrb[46].mxu0  ;;  %v2190_v54 = vld [vmem:[#allocation4 + $0x28] sm:$0xff] }
 0x179   : > { %1746 = vst.msk [vmem:[#allocation3 + $0x70] sm:$0xff] %vm577_vm0, %v1730_v51  ;;  %v1906_v58 = vadd.f32 %v1879_v56, %v1760_v9  ;;  %v1731_v59 = vadd.f32 %v6792_v57, %v1521_v33  ;;  %v6816_v62 = vpop.f32.mrb[46].mxu1  ;;  %v1704_v38 = vpop.f32.mrb[47].mxu0  ;;  %v2195_v33 = vld [vmem:[#allocation4 + $0x50] sm:$0xff] }
 0x17a   : > { %1924 = vst.msk [vmem:[#allocation4 + $0x70] sm:$0xff] %vm601_vm2, %v1908_v32  ;;  %v1909_v63 = vadd.f32 %v6816_v62, %v1763_v60  ;;  %v1729_v0 = vadd.f32 %v1704_v38, %v1519_v37  ;;  %v1882_v2 = vpop.f32.mrb[47].mxu1 }
 0x17b   : > { %1744 = vst.msk [vmem:[#allocation3 + $0x60] sm:$0xff] %vm577_vm0, %v1728_v61  ;;  %1747 = vst.msk [vmem:[#allocation3 + $0x78] sm:$0xff] %vm577_vm0, %v1731_v59  ;;  %v1907_v3 = vadd.f32 %v1882_v2, %v1761_v1  ;;  %v1953_v61 = vld [vmem:[#allocation3 + $0x50] sm:$0xff]  ;;  %v2193_v37 = vld [vmem:[#allocation4 + $0x40] sm:$0xff] }
 0x17c   : > { %1922 = vst.msk [vmem:[#allocation4 + $0x60] sm:$0xff] %vm601_vm2, %v1906_v58  ;;  %1925 = vst.msk [vmem:[#allocation4 + $0x78] sm:$0xff] %vm601_vm2, %v1909_v63  ;;  %v1951_v58 = vld [vmem:[#allocation3 + $0x40] sm:$0xff]  ;;  %v1954_v63 = vld [vmem:[#allocation3 + $0x58] sm:$0xff] }
 0x17d   : > { %1745 = vst.msk [vmem:[#allocation3 + $0x68] sm:$0xff] %vm577_vm0, %v1729_v0 }
 0x17e   : > { %1923 = vst.msk [vmem:[#allocation4 + $0x68] sm:$0xff] %vm601_vm2, %v1907_v3  ;;  %v6827_v5 = vpop.f32.mrb[48].mxu0  ;;  %v2196_v3 = vld [vmem:[#allocation4 + $0x58] sm:$0xff] }
 0x17f   : > { %v2155_v6 = vadd.f32 %v6827_v5, %v1945_v4  ;;  %v6851_v8 = vpop.f32.mrb[48].mxu1  ;;  %v2090_v11 = vpop.f32.mrb[49].mxu0  ;;  %v1952_v5 = vld [vmem:[#allocation3 + $0x48] sm:$0xff] }
 0x180   : > { %v2333_v12 = vadd.f32 %v6851_v8, %v2187_v7  ;;  %v2153_v13 = vadd.f32 %v2090_v11, %v1943_v10  ;;  %v2268_v15 = vpop.f32.mrb[49].mxu1  ;;  %v6828_v17 = vpop.f32.mrb[50].mxu0  ;;  %v2194_v10 = vld [vmem:[#allocation4 + $0x48] sm:$0xff] }
 0x181   : > { %2171 = vst.msk [vmem:[#allocation3 + $0x10] sm:$0xff] %vm577_vm0, %v2155_v6  ;;  %v2331_v18 = vadd.f32 %v2268_v15, %v2185_v14  ;;  %v2156_v19 = vadd.f32 %v6828_v17, %v1946_v16  ;;  %v6852_v21 = vpop.f32.mrb[50].mxu1  ;;  %v2093_v25 = vpop.f32.mrb[51].mxu0  ;;  %v2199_v16 = vld [vmem:[#allocation4 + $0x70] sm:$0xff] }
 0x182   : > { %2349 = vst.msk [vmem:[#allocation4 + $0x10] sm:$0xff] %vm601_vm2, %v2333_v12  ;;  %v2334_v26 = vadd.f32 %v6852_v21, %v2188_v20  ;;  %v2154_v27 = vadd.f32 %v2093_v25, %v1944_v24  ;;  %v2271_v29 = vpop.f32.mrb[51].mxu1 }
 0x183   : > { %2169 = vst.msk [vmem:[#allocation3] sm:$0xff] %vm577_vm0, %v2153_v13  ;;  %2172 = vst.msk [vmem:[#allocation3 + $0x18] sm:$0xff] %vm577_vm0, %v2156_v19  ;;  %v2332_v28 = vadd.f32 %v2271_v29, %v2186_v22  ;;  %v1957_v13 = vld [vmem:[#allocation3 + $0x70] sm:$0xff]  ;;  %v2197_v24 = vld [vmem:[#allocation4 + $0x60] sm:$0xff] }
 0x184   : > { %2347 = vst.msk [vmem:[#allocation4] sm:$0xff] %vm601_vm2, %v2331_v18  ;;  %2350 = vst.msk [vmem:[#allocation4 + $0x18] sm:$0xff] %vm601_vm2, %v2334_v26  ;;  %v1955_v18 = vld [vmem:[#allocation3 + $0x60] sm:$0xff]  ;;  %v1958_v26 = vld [vmem:[#allocation3 + $0x78] sm:$0xff] }
 0x185   : > { %2170 = vst.msk [vmem:[#allocation3 + $0x8] sm:$0xff] %vm577_vm0, %v2154_v27 }
 0x186   : > { %2348 = vst.msk [vmem:[#allocation4 + $0x8] sm:$0xff] %vm601_vm2, %v2332_v28  ;;  %v6831_v34 = vpop.f32.mrb[52].mxu0  ;;  %v2200_v28 = vld [vmem:[#allocation4 + $0x78] sm:$0xff] }
 0x187   : > { %v2159_v35 = vadd.f32 %v6831_v34, %v1949_v31  ;;  %v6855_v39 = vpop.f32.mrb[52].mxu1  ;;  %v2106_v30 = vpop.f32.mrb[53].mxu0  ;;  %v1956_v34 = vld [vmem:[#allocation3 + $0x68] sm:$0xff] }
 0x188   : > { %v2337_v40 = vadd.f32 %v6855_v39, %v2191_v36  ;;  %v2157_v41 = vadd.f32 %v2106_v30, %v1947_v23  ;;  %v2284_v43 = vpop.f32.mrb[53].mxu1  ;;  %v6832_v45 = vpop.f32.mrb[54].mxu0  ;;  %v2198_v23 = vld [vmem:[#allocation4 + $0x68] sm:$0xff] }
 0x189   : > { %2175 = vst.msk [vmem:[#allocation3 + $0x30] sm:$0xff] %vm577_vm0, %v2159_v35  ;;  %v2335_v46 = vadd.f32 %v2284_v43, %v2189_v42  ;;  %v2160_v47 = vadd.f32 %v6832_v45, %v1950_v44  ;;  %v6856_v49 = vpop.f32.mrb[54].mxu1  ;;  %v2109_v51 = vpop.f32.mrb[55].mxu0  ;;  %v2624_v44 = vld [vmem:[#allocation4 + $0x10] sm:$0xff] }
 0x18a   : > { %2353 = vst.msk [vmem:[#allocation4 + $0x30] sm:$0xff] %vm601_vm2, %v2337_v40  ;;  %v2338_v52 = vadd.f32 %v6856_v49, %v2192_v48  ;;  %v2158_v53 = vadd.f32 %v2109_v51, %v1948_v50  ;;  %v2287_v55 = vpop.f32.mrb[55].mxu1 }
 0x18b   : > { %2173 = vst.msk [vmem:[#allocation3 + $0x20] sm:$0xff] %vm577_vm0, %v2157_v41  ;;  %2176 = vst.msk [vmem:[#allocation3 + $0x38] sm:$0xff] %vm577_vm0, %v2160_v47  ;;  %v2336_v32 = vadd.f32 %v2287_v55, %v2190_v54  ;;  %v2382_v41 = vld [vmem:[#allocation3 + $0x10] sm:$0xff]  ;;  %v2622_v50 = vld [vmem:[#allocation4] sm:$0xff] }
 0x18c   : > { %2351 = vst.msk [vmem:[#allocation4 + $0x20] sm:$0xff] %vm601_vm2, %v2335_v46  ;;  %2354 = vst.msk [vmem:[#allocation4 + $0x38] sm:$0xff] %vm601_vm2, %v2338_v52  ;;  %v2380_v46 = vld [vmem:[#allocation3] sm:$0xff]  ;;  %v2383_v52 = vld [vmem:[#allocation3 + $0x18] sm:$0xff] }
 0x18d   : > { %2174 = vst.msk [vmem:[#allocation3 + $0x28] sm:$0xff] %vm577_vm0, %v2158_v53 }
 0x18e   : > { %2352 = vst.msk [vmem:[#allocation4 + $0x28] sm:$0xff] %vm601_vm2, %v2336_v32  ;;  %v6835_v9 = vpop.f32.mrb[56].mxu0  ;;  %v2625_v32 = vld [vmem:[#allocation4 + $0x18] sm:$0xff] }
 0x18f   : > { %v2163_v56 = vadd.f32 %v6835_v9, %v1953_v61  ;;  %v6859_v57 = vpop.f32.mrb[56].mxu1  ;;  %v2122_v59 = vpop.f32.mrb[57].mxu0  ;;  %v2381_v9 = vld [vmem:[#allocation3 + $0x8] sm:$0xff] }
 0x190   : > { %v2341_v60 = vadd.f32 %v6859_v57, %v2195_v33  ;;  %v2161_v62 = vadd.f32 %v2122_v59, %v1951_v58  ;;  %v2300_v38 = vpop.f32.mrb[57].mxu1  ;;  %v6836_v0 = vpop.f32.mrb[58].mxu0  ;;  %v2623_v58 = vld [vmem:[#allocation4 + $0x8] sm:$0xff] }
 0x191   : > { %2179 = vst.msk [vmem:[#allocation3 + $0x50] sm:$0xff] %vm577_vm0, %v2163_v56  ;;  %v2339_v1 = vadd.f32 %v2300_v38, %v2193_v37  ;;  %v2164_v2 = vadd.f32 %v6836_v0, %v1954_v63  ;;  %v6860_v4 = vpop.f32.mrb[58].mxu1  ;;  %v2125_v6 = vpop.f32.mrb[59].mxu0  ;;  %v2628_v63 = vld [vmem:[#allocation4 + $0x30] sm:$0xff] }
 0x192   : > { %2357 = vst.msk [vmem:[#allocation4 + $0x50] sm:$0xff] %vm601_vm2, %v2341_v60  ;;  %v2342_v7 = vadd.f32 %v6860_v4, %v2196_v3  ;;  %v2162_v8 = vadd.f32 %v2125_v6, %v1952_v5  ;;  %v2303_v11 = vpop.f32.mrb[59].mxu1 }
 0x193   : > { %2177 = vst.msk [vmem:[#allocation3 + $0x40] sm:$0xff] %vm577_vm0, %v2161_v62  ;;  %2180 = vst.msk [vmem:[#allocation3 + $0x58] sm:$0xff] %vm577_vm0, %v2164_v2  ;;  %v2340_v12 = vadd.f32 %v2303_v11, %v2194_v10  ;;  %v2386_v62 = vld [vmem:[#allocation3 + $0x30] sm:$0xff]  ;;  %v2626_v5 = vld [vmem:[#allocation4 + $0x20] sm:$0xff] }
 0x194   : > { %2355 = vst.msk [vmem:[#allocation4 + $0x40] sm:$0xff] %vm601_vm2, %v2339_v1  ;;  %2358 = vst.msk [vmem:[#allocation4 + $0x58] sm:$0xff] %vm601_vm2, %v2342_v7  ;;  %v2384_v1 = vld [vmem:[#allocation3 + $0x20] sm:$0xff]  ;;  %v2387_v7 = vld [vmem:[#allocation3 + $0x38] sm:$0xff] }
 0x195   : > { %2178 = vst.msk [vmem:[#allocation3 + $0x48] sm:$0xff] %vm577_vm0, %v2162_v8 }
 0x196   : > { %2356 = vst.msk [vmem:[#allocation4 + $0x48] sm:$0xff] %vm601_vm2, %v2340_v12  ;;  %v6839_v14 = vpop.f32.mrb[60].mxu0  ;;  %v2629_v12 = vld [vmem:[#allocation4 + $0x38] sm:$0xff] }
 0x197   : > { %v2167_v15 = vadd.f32 %v6839_v14, %v1957_v13  ;;  %v6863_v17 = vpop.f32.mrb[60].mxu1  ;;  %v2138_v19 = vpop.f32.mrb[61].mxu0  ;;  %v2385_v14 = vld [vmem:[#allocation3 + $0x28] sm:$0xff] }
 0x198   : > { %v2345_v20 = vadd.f32 %v6863_v17, %v2199_v16  ;;  %v2165_v21 = vadd.f32 %v2138_v19, %v1955_v18  ;;  %v2316_v25 = vpop.f32.mrb[61].mxu1  ;;  %v6840_v27 = vpop.f32.mrb[62].mxu0  ;;  %v2627_v18 = vld [vmem:[#allocation4 + $0x28] sm:$0xff] }
 0x199   : > { %2183 = vst.msk [vmem:[#allocation3 + $0x70] sm:$0xff] %vm577_vm0, %v2167_v15  ;;  %v2343_v22 = vadd.f32 %v2316_v25, %v2197_v24  ;;  %v2168_v29 = vadd.f32 %v6840_v27, %v1958_v26  ;;  %v6864_v31 = vpop.f32.mrb[62].mxu1  ;;  %v2141_v35 = vpop.f32.mrb[63].mxu0  ;;  %v2632_v26 = vld [vmem:[#allocation4 + $0x50] sm:$0xff] }
 0x19a   : > { %2361 = vst.msk [vmem:[#allocation4 + $0x70] sm:$0xff] %vm601_vm2, %v2345_v20  ;;  %v2346_v36 = vadd.f32 %v6864_v31, %v2200_v28  ;;  %v2166_v39 = vadd.f32 %v2141_v35, %v1956_v34  ;;  %v2319_v30 = vpop.f32.mrb[63].mxu1 }
 0x19b   : > { %2181 = vst.msk [vmem:[#allocation3 + $0x60] sm:$0xff] %vm577_vm0, %v2165_v21  ;;  %2184 = vst.msk [vmem:[#allocation3 + $0x78] sm:$0xff] %vm577_vm0, %v2168_v29  ;;  %v2344_v40 = vadd.f32 %v2319_v30, %v2198_v23  ;;  %v2390_v21 = vld [vmem:[#allocation3 + $0x50] sm:$0xff]  ;;  %v2630_v34 = vld [vmem:[#allocation4 + $0x40] sm:$0xff] }
 0x19c   : > { %2359 = vst.msk [vmem:[#allocation4 + $0x60] sm:$0xff] %vm601_vm2, %v2343_v22  ;;  %2362 = vst.msk [vmem:[#allocation4 + $0x78] sm:$0xff] %vm601_vm2, %v2346_v36  ;;  %v2388_v22 = vld [vmem:[#allocation3 + $0x40] sm:$0xff]  ;;  %v2391_v36 = vld [vmem:[#allocation3 + $0x58] sm:$0xff] }
 0x19d   : > { %2182 = vst.msk [vmem:[#allocation3 + $0x68] sm:$0xff] %vm577_vm0, %v2166_v39 }
 0x19e   : > { %2360 = vst.msk [vmem:[#allocation4 + $0x68] sm:$0xff] %vm601_vm2, %v2344_v40  ;;  %v6875_v42 = vpop.f32.mrb[64].mxu0  ;;  %v2633_v40 = vld [vmem:[#allocation4 + $0x58] sm:$0xff] }
 0x19f   : > { %v2592_v43 = vadd.f32 %v6875_v42, %v2382_v41  ;;  %v6899_v45 = vpop.f32.mrb[64].mxu1  ;;  %v2527_v47 = vpop.f32.mrb[65].mxu0  ;;  %v2389_v42 = vld [vmem:[#allocation3 + $0x48] sm:$0xff] }
 0x1a0   : > { %v2770_v48 = vadd.f32 %v6899_v45, %v2624_v44  ;;  %v2590_v49 = vadd.f32 %v2527_v47, %v2380_v46  ;;  %v2705_v51 = vpop.f32.mrb[65].mxu1  ;;  %v6876_v53 = vpop.f32.mrb[66].mxu0  ;;  %v2631_v46 = vld [vmem:[#allocation4 + $0x48] sm:$0xff] }
 0x1a1   : > { %2608 = vst.msk [vmem:[#allocation3 + $0x10] sm:$0xff] %vm577_vm0, %v2592_v43  ;;  %v2768_v54 = vadd.f32 %v2705_v51, %v2622_v50  ;;  %v2593_v55 = vadd.f32 %v6876_v53, %v2383_v52  ;;  %v6900_v61 = vpop.f32.mrb[66].mxu1  ;;  %v2530_v56 = vpop.f32.mrb[67].mxu0  ;;  %v2636_v52 = vld [vmem:[#allocation4 + $0x70] sm:$0xff] }
 0x1a2   : > { %2786 = vst.msk [vmem:[#allocation4 + $0x10] sm:$0xff] %vm601_vm2, %v2770_v48  ;;  %v2771_v33 = vadd.f32 %v6900_v61, %v2625_v32  ;;  %v2591_v57 = vadd.f32 %v2530_v56, %v2381_v9  ;;  %v2708_v59 = vpop.f32.mrb[67].mxu1 }
 0x1a3   : > { %2606 = vst.msk [vmem:[#allocation3] sm:$0xff] %vm577_vm0, %v2590_v49  ;;  %2609 = vst.msk [vmem:[#allocation3 + $0x18] sm:$0xff] %vm577_vm0, %v2593_v55  ;;  %v2769_v60 = vadd.f32 %v2708_v59, %v2623_v58  ;;  %v2394_v49 = vld [vmem:[#allocation3 + $0x70] sm:$0xff]  ;;  %v2634_v9 = vld [vmem:[#allocation4 + $0x60] sm:$0xff] }
 0x1a4   : > { %2784 = vst.msk [vmem:[#allocation4] sm:$0xff] %vm601_vm2, %v2768_v54  ;;  %2787 = vst.msk [vmem:[#allocation4 + $0x18] sm:$0xff] %vm601_vm2, %v2771_v33  ;;  %v2392_v54 = vld [vmem:[#allocation3 + $0x60] sm:$0xff]  ;;  %v2395_v33 = vld [vmem:[#allocation3 + $0x78] sm:$0xff] }
 0x1a5   : > { %2607 = vst.msk [vmem:[#allocation3 + $0x8] sm:$0xff] %vm577_vm0, %v2591_v57 }
 0x1a6   : > { %2785 = vst.msk [vmem:[#allocation4 + $0x8] sm:$0xff] %vm601_vm2, %v2769_v60  ;;  %v6879_v37 = vpop.f32.mrb[68].mxu0  ;;  %v2637_v60 = vld [vmem:[#allocation4 + $0x78] sm:$0xff] }
 0x1a7   : > { %v2596_v38 = vadd.f32 %v6879_v37, %v2386_v62  ;;  %v6903_v0 = vpop.f32.mrb[68].mxu1  ;;  %v2543_v2 = vpop.f32.mrb[69].mxu0  ;;  %v2393_v37 = vld [vmem:[#allocation3 + $0x68] sm:$0xff] }
 0x1a8   : > { %v2774_v3 = vadd.f32 %v6903_v0, %v2628_v63  ;;  %v2594_v4 = vadd.f32 %v2543_v2, %v2384_v1  ;;  %v2721_v6 = vpop.f32.mrb[69].mxu1  ;;  %v6880_v8 = vpop.f32.mrb[70].mxu0  ;;  %v2635_v1 = vld [vmem:[#allocation4 + $0x68] sm:$0xff] }
 0x1a9   : > { %2612 = vst.msk [vmem:[#allocation3 + $0x30] sm:$0xff] %vm577_vm0, %v2596_v38  ;;  %v2772_v10 = vadd.f32 %v2721_v6, %v2626_v5  ;;  %v2597_v11 = vadd.f32 %v6880_v8, %v2387_v7  ;;  %v6904_v13 = vpop.f32.mrb[70].mxu1  ;;  %v2546_v15 = vpop.f32.mrb[71].mxu0 }
 0x1aa   : > { %2790 = vst.msk [vmem:[#allocation4 + $0x30] sm:$0xff] %vm601_vm2, %v2774_v3  ;;  %v2775_v16 = vadd.f32 %v6904_v13, %v2629_v12  ;;  %v2595_v17 = vadd.f32 %v2546_v15, %v2385_v14  ;;  %v2724_v19 = vpop.f32.mrb[71].mxu1  ;;  %v2855_v7 = vld [vmem:[#allocation3] sm:$0xff] }
 0x1ab   : > { %2610 = vst.msk [vmem:[#allocation3 + $0x20] sm:$0xff] %vm577_vm0, %v2594_v4  ;;  %2613 = vst.msk [vmem:[#allocation3 + $0x38] sm:$0xff] %vm577_vm0, %v2597_v11  ;;  %v2773_v20 = vadd.f32 %v2724_v19, %v2627_v18  ;;  %v2857_v4 = vld [vmem:[#allocation3 + $0x10] sm:$0xff]  ;;  %v2858_v11 = vld [vmem:[#allocation3 + $0x18] sm:$0xff] }
 0x1ac   : > { %2788 = vst.msk [vmem:[#allocation4 + $0x20] sm:$0xff] %vm601_vm2, %v2772_v10  ;;  %2791 = vst.msk [vmem:[#allocation4 + $0x38] sm:$0xff] %vm601_vm2, %v2775_v16  ;;  %v2856_v15 = vld [vmem:[#allocation3 + $0x8] sm:$0xff] }
 0x1ad   : > { %2611 = vst.msk [vmem:[#allocation3 + $0x28] sm:$0xff] %vm577_vm0, %v2595_v17 }
 0x1ae   : > { %2789 = vst.msk [vmem:[#allocation4 + $0x28] sm:$0xff] %vm601_vm2, %v2773_v20  ;;  %v6883_v24 = vpop.f32.mrb[72].mxu0 }
 0x1af   : > { %v2600_v25 = vadd.f32 %v6883_v24, %v2390_v21  ;;  %v6907_v27 = vpop.f32.mrb[72].mxu1  ;;  %v2559_v29 = vpop.f32.mrb[73].mxu0 }
 0x1b0   : > { %v2778_v28 = vadd.f32 %v6907_v27, %v2632_v26  ;;  %v2598_v31 = vadd.f32 %v2559_v29, %v2388_v22  ;;  %v2737_v35 = vpop.f32.mrb[73].mxu1  ;;  %v6884_v39 = vpop.f32.mrb[74].mxu0  ;;  %v2861_v21 = vld [vmem:[#allocation3 + $0x30] sm:$0xff] }
 0x1b1   : > { %2616 = vst.msk [vmem:[#allocation3 + $0x50] sm:$0xff] %vm577_vm0, %v2600_v25  ;;  %v2776_v23 = vadd.f32 %v2737_v35, %v2630_v34  ;;  %v2601_v30 = vadd.f32 %v6884_v39, %v2391_v36  ;;  %v6908_v41 = vpop.f32.mrb[74].mxu1  ;;  %v2562_v43 = vpop.f32.mrb[75].mxu0 }
 0x1b2   : > { %2794 = vst.msk [vmem:[#allocation4 + $0x50] sm:$0xff] %vm601_vm2, %v2778_v28  ;;  %v2779_v44 = vadd.f32 %v6908_v41, %v2633_v40  ;;  %v2599_v45 = vadd.f32 %v2562_v43, %v2389_v42  ;;  %v2740_v47 = vpop.f32.mrb[75].mxu1  ;;  %v2859_v26 = vld [vmem:[#allocation3 + $0x20] sm:$0xff]  ;;  %v2862_v29 = vld [vmem:[#allocation3 + $0x38] sm:$0xff] }
 0x1b3   : > { %2614 = vst.msk [vmem:[#allocation3 + $0x40] sm:$0xff] %vm577_vm0, %v2598_v31  ;;  %2617 = vst.msk [vmem:[#allocation3 + $0x58] sm:$0xff] %vm577_vm0, %v2601_v30  ;;  %v2777_v48 = vadd.f32 %v2740_v47, %v2631_v46 }
 0x1b4   : > { %2792 = vst.msk [vmem:[#allocation4 + $0x40] sm:$0xff] %vm601_vm2, %v2776_v23  ;;  %2795 = vst.msk [vmem:[#allocation4 + $0x58] sm:$0xff] %vm601_vm2, %v2779_v44  ;;  %v2860_v39 = vld [vmem:[#allocation3 + $0x28] sm:$0xff] }
 0x1b5   : > { %2615 = vst.msk [vmem:[#allocation3 + $0x48] sm:$0xff] %vm577_vm0, %v2599_v45 }
 0x1b6   : > { %2793 = vst.msk [vmem:[#allocation4 + $0x48] sm:$0xff] %vm601_vm2, %v2777_v48  ;;  %v6887_v50 = vpop.f32.mrb[76].mxu0  ;;  %v7305_v48 = vld [vmem:[%s8803_s5] sm:$0xff]  }
 0x1b7   : > { %v2604_v51 = vadd.f32 %v6887_v50, %v2394_v49  ;;  %v6911_v53 = vpop.f32.mrb[76].mxu1  ;;  %v2575_v55 = vpop.f32.mrb[77].mxu0  ;;  %v7306_v49 = vld [vmem:[%s8803_s5 + $0x8] sm:$0xff]   ;;  %7013 = vmatprep.subr.bf16.mxu1 %v7305_v48 }
 0x1b8   : > { %v2782_v32 = vadd.f32 %v6911_v53, %v2636_v52  ;;  %v2602_v61 = vadd.f32 %v2575_v55, %v2392_v54  ;;  %v2753_v56 = vpop.f32.mrb[77].mxu1  ;;  %v6888_v57 = vpop.f32.mrb[78].mxu0  ;;  %7014 = vmatpush3.bf16.msra.mxu1 %v7305_v48 }
 0x1b9   : > { %2620 = vst.msk [vmem:[#allocation3 + $0x70] sm:$0xff] %vm577_vm0, %v2604_v51  ;;  %v2780_v58 = vadd.f32 %v2753_v56, %v2634_v9  ;;  %v2605_v59 = vadd.f32 %v6888_v57, %v2395_v33  ;;  %v6912_v62 = vpop.f32.mrb[78].mxu1  ;;  %v2578_v38 = vpop.f32.mrb[79].mxu0  ;;  %v2865_v51 = vld [vmem:[#allocation3 + $0x50] sm:$0xff]  ;;  %7015 = vmatprep.subr.bf16.mxu1 %v7306_v49 }
 0x1ba   : > { %2798 = vst.msk [vmem:[#allocation4 + $0x70] sm:$0xff] %vm601_vm2, %v2782_v32  ;;  %v2783_v63 = vadd.f32 %v6912_v62, %v2637_v60  ;;  %v2603_v0 = vadd.f32 %v2578_v38, %v2393_v37  ;;  %v2756_v2 = vpop.f32.mrb[79].mxu1  ;;  %v2863_v54 = vld [vmem:[#allocation3 + $0x40] sm:$0xff] }
 0x1bb   : > { %2618 = vst.msk [vmem:[#allocation3 + $0x60] sm:$0xff] %vm577_vm0, %v2602_v61  ;;  %2621 = vst.msk [vmem:[#allocation3 + $0x78] sm:$0xff] %vm577_vm0, %v2605_v59  ;;  %v2781_v3 = vadd.f32 %v2756_v2, %v2635_v1  ;;  %v2866_v61 = vld [vmem:[#allocation3 + $0x58] sm:$0xff] }
 0x1bc   : > { %2796 = vst.msk [vmem:[#allocation4 + $0x60] sm:$0xff] %vm601_vm2, %v2780_v58  ;;  %2799 = vst.msk [vmem:[#allocation4 + $0x78] sm:$0xff] %vm601_vm2, %v2783_v63  ;;  %v2864_v59 = vld [vmem:[#allocation3 + $0x48] sm:$0xff]  ;;  %7016 = vmatpush3.bf16.msra.mxu1 %v7306_v49 }
 0x1bd   : > { %2619 = vst.msk [vmem:[#allocation3 + $0x68] sm:$0xff] %vm577_vm0, %v2603_v0 }
 0x1be   : > { %2797 = vst.msk [vmem:[#allocation4 + $0x68] sm:$0xff] %vm601_vm2, %v2781_v3  ;;  %v6919_v5 = vpop.f32.mrb[80].mxu0 }
 0x1bf   : > { %v3050_v6 = vadd.f32 %v6919_v5, %v2857_v4  ;;  %v2985_v8 = vpop.f32.mrb[81].mxu0 }
 0x1c0   : > { %v3048_v10 = vadd.f32 %v2985_v8, %v2855_v7  ;;  %v6920_v12 = vpop.f32.mrb[82].mxu0  ;;  %v6939_v13 = vpop.f32.mrb[80].mxu1 }
 0x1c1   : > { %3066 = vst.msk [vmem:[#allocation3 + $0x10] sm:$0xff] %vm577_vm0, %v3050_v6  ;;  %v3051_v14 = vadd.f32 %v6920_v12, %v2858_v11  ;;  %v2988_v16 = vpop.f32.mrb[83].mxu0  ;;  %v3228_v17 = vpop.f32.mrb[81].mxu1  ;;  %v2869_v6 = vld [vmem:[#allocation3 + $0x70] sm:$0xff] }
 0x1c2   : > { %3064 = vst.msk [vmem:[#allocation3] sm:$0xff] %vm577_vm0, %v3048_v10  ;;  %v3049_v18 = vadd.f32 %v2988_v16, %v2856_v15  ;;  %v6940_v19 = vpop.f32.mrb[82].mxu1  ;;  %v2867_v10 = vld [vmem:[#allocation3 + $0x60] sm:$0xff] }
 0x1c3   : > { %3067 = vst.msk [vmem:[#allocation3 + $0x18] sm:$0xff] %vm577_vm0, %v3051_v14  ;;  %v3231_v20 = vpop.f32.mrb[83].mxu1 }
 0x1c4   : > { %3065 = vst.msk [vmem:[#allocation3 + $0x8] sm:$0xff] %vm577_vm0, %v3049_v18 }
 0x1c6   : > { %v6923_v24 = vpop.f32.mrb[84].mxu0 }
 0x1c7   : > { %v3054_v25 = vadd.f32 %v6923_v24, %v2861_v21  ;;  %v3001_v27 = vpop.f32.mrb[85].mxu0 }
 0x1c8   : > { %v3052_v22 = vadd.f32 %v3001_v27, %v2859_v26  ;;  %v6924_v28 = vpop.f32.mrb[86].mxu0  ;;  %v3099_v31 = vld [vmem:[#allocation3 + $0x10] sm:$0xff]  ;;  %v6943_v34 = vpop.f32.mrb[84].mxu1 }
 0x1c9   : > { %3070 = vst.msk [vmem:[#allocation3 + $0x30] sm:$0xff] %vm577_vm0, %v3054_v25  ;;  %v3055_v35 = vadd.f32 %v6924_v28, %v2862_v29  ;;  %v3293_v36 = vadd.f32 %v6939_v13, %v3099_v31  ;;  %v3004_v23 = vpop.f32.mrb[87].mxu0  ;;  %v3097_v30 = vld [vmem:[#allocation3] sm:$0xff]  ;;  %v3244_v40 = vpop.f32.mrb[85].mxu1  ;;  %v2870_v13 = vld [vmem:[#allocation3 + $0x78] sm:$0xff] }
 0x1ca   : > { %3068 = vst.msk [vmem:[#allocation3 + $0x20] sm:$0xff] %vm577_vm0, %v3052_v22  ;;  %v3053_v41 = vadd.f32 %v3004_v23, %v2860_v39  ;;  %v3291_v42 = vadd.f32 %v3228_v17, %v3097_v30  ;;  %v3100_v43 = vld [vmem:[#allocation3 + $0x18] sm:$0xff]  ;;  %v6944_v44 = vpop.f32.mrb[86].mxu1 }
 0x1cb   : > { %3071 = vst.msk [vmem:[#allocation3 + $0x38] sm:$0xff] %vm577_vm0, %v3055_v35  ;;  %3309 = vst.msk [vmem:[#allocation3 + $0x10] sm:$0xff] %vm577_vm0, %v3293_v36  ;;  %v3294_v45 = vadd.f32 %v6940_v19, %v3100_v43  ;;  %v3098_v46 = vld [vmem:[#allocation3 + $0x8] sm:$0xff]  ;;  %v3247_v47 = vpop.f32.mrb[87].mxu1 }
 0x1cc   : > { %3069 = vst.msk [vmem:[#allocation3 + $0x28] sm:$0xff] %vm577_vm0, %v3053_v41  ;;  %3307 = vst.msk [vmem:[#allocation3] sm:$0xff] %vm577_vm0, %v3291_v42  ;;  %v3292_v50 = vadd.f32 %v3231_v20, %v3098_v46  ;;  %v2868_v19 = vld [vmem:[#allocation3 + $0x68] sm:$0xff] }
 0x1cd   : > { %3310 = vst.msk [vmem:[#allocation3 + $0x18] sm:$0xff] %vm577_vm0, %v3294_v45 }
 0x1ce   : > { %3308 = vst.msk [vmem:[#allocation3 + $0x8] sm:$0xff] %vm577_vm0, %v3292_v50  ;;  %v6927_v52 = vpop.f32.mrb[88].mxu0 }
 0x1cf   : > { %v3058_v53 = vadd.f32 %v6927_v52, %v2865_v51  ;;  %v3017_v55 = vpop.f32.mrb[89].mxu0 }
 0x1d0   : > { %v3056_v32 = vadd.f32 %v3017_v55, %v2863_v54  ;;  %v6928_v9 = vpop.f32.mrb[90].mxu0  ;;  %v3103_v56 = vld [vmem:[#allocation3 + $0x30] sm:$0xff]  ;;  %v6947_v33 = vpop.f32.mrb[88].mxu1 }
 0x1d1   : > { %3074 = vst.msk [vmem:[#allocation3 + $0x50] sm:$0xff] %vm577_vm0, %v3058_v53  ;;  %v3059_v57 = vadd.f32 %v6928_v9, %v2866_v61  ;;  %v3297_v58 = vadd.f32 %v6943_v34, %v3103_v56  ;;  %v3020_v60 = vpop.f32.mrb[91].mxu0  ;;  %v3101_v62 = vld [vmem:[#allocation3 + $0x20] sm:$0xff]  ;;  %v3260_v37 = vpop.f32.mrb[89].mxu1 }
 0x1d2   : > { %3072 = vst.msk [vmem:[#allocation3 + $0x40] sm:$0xff] %vm577_vm0, %v3056_v32  ;;  %v3057_v38 = vadd.f32 %v3020_v60, %v2864_v59  ;;  %v3295_v63 = vadd.f32 %v3244_v40, %v3101_v62  ;;  %v3104_v0 = vld [vmem:[#allocation3 + $0x38] sm:$0xff]  ;;  %v6948_v1 = vpop.f32.mrb[90].mxu1  ;;  %v3341_v35 = vld [vmem:[#allocation3 + $0x10] sm:$0xff] }
 0x1d3   : > { %3075 = vst.msk [vmem:[#allocation3 + $0x58] sm:$0xff] %vm577_vm0, %v3059_v57  ;;  %3313 = vst.msk [vmem:[#allocation3 + $0x30] sm:$0xff] %vm577_vm0, %v3297_v58  ;;  %v3298_v2 = vadd.f32 %v6944_v44, %v3104_v0  ;;  %v3102_v3 = vld [vmem:[#allocation3 + $0x28] sm:$0xff]  ;;  %v3263_v4 = vpop.f32.mrb[91].mxu1  ;;  %v3339_v23 = vld [vmem:[#allocation3] sm:$0xff] }
 0x1d4   : > { %3073 = vst.msk [vmem:[#allocation3 + $0x48] sm:$0xff] %vm577_vm0, %v3057_v38  ;;  %3311 = vst.msk [vmem:[#allocation3 + $0x20] sm:$0xff] %vm577_vm0, %v3295_v63  ;;  %v3296_v5 = vadd.f32 %v3247_v47, %v3102_v3  ;;  %v3342_v42 = vld [vmem:[#allocation3 + $0x18] sm:$0xff] }
 0x1d5   : > { %3314 = vst.msk [vmem:[#allocation3 + $0x38] sm:$0xff] %vm577_vm0, %v3298_v2  ;;  %v3340_v48 = vld [vmem:[#allocation3 + $0x8] sm:$0xff] }
 0x1d6   : > { %3312 = vst.msk [vmem:[#allocation3 + $0x28] sm:$0xff] %vm577_vm0, %v3296_v5  ;;  %v6931_v7 = vpop.f32.mrb[92].mxu0 }
 0x1d7   : > { %v3062_v8 = vadd.f32 %v6931_v7, %v2869_v6  ;;  %v3033_v11 = vpop.f32.mrb[93].mxu0 }
 0x1d8   : > { %v3060_v12 = vadd.f32 %v3033_v11, %v2867_v10  ;;  %v6932_v14 = vpop.f32.mrb[94].mxu0  ;;  %v3107_v15 = vld [vmem:[#allocation3 + $0x50] sm:$0xff]  ;;  %v6951_v16 = vpop.f32.mrb[92].mxu1 }
 0x1d9   : > { %3078 = vst.msk [vmem:[#allocation3 + $0x70] sm:$0xff] %vm577_vm0, %v3062_v8  ;;  %v3063_v17 = vadd.f32 %v6932_v14, %v2870_v13  ;;  %v3301_v18 = vadd.f32 %v6947_v33, %v3107_v15  ;;  %v3036_v20 = vpop.f32.mrb[95].mxu0  ;;  %v3105_v21 = vld [vmem:[#allocation3 + $0x40] sm:$0xff]  ;;  %v3276_v24 = vpop.f32.mrb[93].mxu1 }
 0x1da   : > { %3076 = vst.msk [vmem:[#allocation3 + $0x60] sm:$0xff] %vm577_vm0, %v3060_v12  ;;  %v3061_v25 = vadd.f32 %v3036_v20, %v2868_v19  ;;  %v3299_v26 = vadd.f32 %v3260_v37, %v3105_v21  ;;  %v3108_v27 = vld [vmem:[#allocation3 + $0x58] sm:$0xff]  ;;  %v6952_v22 = vpop.f32.mrb[94].mxu1  ;;  %v3345_v56 = vld [vmem:[#allocation3 + $0x30] sm:$0xff] }
 0x1db   : > { %3079 = vst.msk [vmem:[#allocation3 + $0x78] sm:$0xff] %vm577_vm0, %v3063_v17  ;;  %3317 = vst.msk [vmem:[#allocation3 + $0x50] sm:$0xff] %vm577_vm0, %v3301_v18  ;;  %v3302_v29 = vadd.f32 %v6948_v1, %v3108_v27  ;;  %v3106_v28 = vld [vmem:[#allocation3 + $0x48] sm:$0xff]  ;;  %v3279_v31 = vpop.f32.mrb[95].mxu1  ;;  %v3343_v58 = vld [vmem:[#allocation3 + $0x20] sm:$0xff] }
 0x1dc   : > { %3077 = vst.msk [vmem:[#allocation3 + $0x68] sm:$0xff] %vm577_vm0, %v3061_v25  ;;  %3315 = vst.msk [vmem:[#allocation3 + $0x40] sm:$0xff] %vm577_vm0, %v3299_v26  ;;  %v3300_v34 = vadd.f32 %v3263_v4, %v3106_v28  ;;  %v3346_v62 = vld [vmem:[#allocation3 + $0x38] sm:$0xff] }
 0x1dd   : > { %3318 = vst.msk [vmem:[#allocation3 + $0x58] sm:$0xff] %vm577_vm0, %v3302_v29  ;;  %v3344_v2 = vld [vmem:[#allocation3 + $0x28] sm:$0xff] }
 0x1de   : > { %3316 = vst.msk [vmem:[#allocation3 + $0x48] sm:$0xff] %vm577_vm0, %v3300_v34  ;;  %v6959_v36 = vpop.f32.mrb[96].mxu0 }
 0x1df   : > { %v3535_v39 = vadd.f32 %v6959_v36, %v3341_v35  ;;  %v3470_v30 = vpop.f32.mrb[97].mxu0 }
 0x1e0   : > { %v3533_v40 = vadd.f32 %v3470_v30, %v3339_v23  ;;  %v3111_v41 = vld [vmem:[#allocation3 + $0x70] sm:$0xff]  ;;  %v6960_v43 = vpop.f32.mrb[98].mxu0  ;;  %v6979_v44 = vpop.f32.mrb[96].mxu1 }
 0x1e1   : > { %3551 = vst.msk [vmem:[#allocation3 + $0x10] sm:$0xff] %vm577_vm0, %v3535_v39  ;;  %v3305_v45 = vadd.f32 %v6951_v16, %v3111_v41  ;;  %v3536_v46 = vadd.f32 %v6960_v43, %v3342_v42  ;;  %v3109_v47 = vld [vmem:[#allocation3 + $0x60] sm:$0xff]  ;;  %v3473_v49 = vpop.f32.mrb[99].mxu0  ;;  %v3713_v50 = vpop.f32.mrb[97].mxu1 }
 0x1e2   : > { %3549 = vst.msk [vmem:[#allocation3] sm:$0xff] %vm577_vm0, %v3533_v40  ;;  %v3303_v51 = vadd.f32 %v3276_v24, %v3109_v47  ;;  %v3534_v52 = vadd.f32 %v3473_v49, %v3340_v48  ;;  %v3112_v53 = vld [vmem:[#allocation3 + $0x78] sm:$0xff]  ;;  %v6980_v54 = vpop.f32.mrb[98].mxu1  ;;  %v3349_v15 = vld [vmem:[#allocation3 + $0x50] sm:$0xff] }
 0x1e3   : > { %3321 = vst.msk [vmem:[#allocation3 + $0x70] sm:$0xff] %vm577_vm0, %v3305_v45  ;;  %3552 = vst.msk [vmem:[#allocation3 + $0x18] sm:$0xff] %vm577_vm0, %v3536_v46  ;;  %v3306_v55 = vadd.f32 %v6952_v22, %v3112_v53  ;;  %v3110_v32 = vld [vmem:[#allocation3 + $0x68] sm:$0xff]  ;;  %v3716_v61 = vpop.f32.mrb[99].mxu1  ;;  %v3347_v18 = vld [vmem:[#allocation3 + $0x40] sm:$0xff] }
 0x1e4   : > { %3319 = vst.msk [vmem:[#allocation3 + $0x60] sm:$0xff] %vm577_vm0, %v3303_v51  ;;  %3550 = vst.msk [vmem:[#allocation3 + $0x8] sm:$0xff] %vm577_vm0, %v3534_v52  ;;  %v3304_v9 = vadd.f32 %v3279_v31, %v3110_v32  ;;  %v3350_v21 = vld [vmem:[#allocation3 + $0x58] sm:$0xff] }
 0x1e5   : > { %3322 = vst.msk [vmem:[#allocation3 + $0x78] sm:$0xff] %vm577_vm0, %v3306_v55  ;;  %v3348_v29 = vld [vmem:[#allocation3 + $0x48] sm:$0xff] }
 0x1e6   : > { %3320 = vst.msk [vmem:[#allocation3 + $0x68] sm:$0xff] %vm577_vm0, %v3304_v9  ;;  %v6963_v33 = vpop.f32.mrb[100].mxu0 }
 0x1e7   : > { %v3539_v57 = vadd.f32 %v6963_v33, %v3345_v56  ;;  %v3486_v59 = vpop.f32.mrb[101].mxu0 }
 0x1e8   : > { %v3537_v60 = vadd.f32 %v3486_v59, %v3343_v58  ;;  %v6964_v37 = vpop.f32.mrb[102].mxu0  ;;  %v3584_v38 = vld [vmem:[#allocation3 + $0x10] sm:$0xff]  ;;  %v6983_v63 = vpop.f32.mrb[100].mxu1 }
 0x1e9   : > { %3555 = vst.msk [vmem:[#allocation3 + $0x30] sm:$0xff] %vm577_vm0, %v3539_v57  ;;  %v3540_v0 = vadd.f32 %v6964_v37, %v3346_v62  ;;  %v3778_v1 = vadd.f32 %v6979_v44, %v3584_v38  ;;  %v3489_v3 = vpop.f32.mrb[103].mxu0  ;;  %v3582_v4 = vld [vmem:[#allocation3] sm:$0xff]  ;;  %v3729_v5 = vpop.f32.mrb[101].mxu1 }
 0x1ea   : > { %3553 = vst.msk [vmem:[#allocation3 + $0x20] sm:$0xff] %vm577_vm0, %v3537_v60  ;;  %v3538_v6 = vadd.f32 %v3489_v3, %v3344_v2  ;;  %v3776_v7 = vadd.f32 %v3713_v50, %v3582_v4  ;;  %v3585_v8 = vld [vmem:[#allocation3 + $0x18] sm:$0xff]  ;;  %v6984_v10 = vpop.f32.mrb[102].mxu1  ;;  %v3353_v43 = vld [vmem:[#allocation3 + $0x70] sm:$0xff] }
 0x1eb   : > { %3556 = vst.msk [vmem:[#allocation3 + $0x38] sm:$0xff] %vm577_vm0, %v3540_v0  ;;  %3794 = vst.msk [vmem:[#allocation3 + $0x10] sm:$0xff] %vm577_vm0, %v3778_v1  ;;  %v3779_v11 = vadd.f32 %v6980_v54, %v3585_v8  ;;  %v3583_v12 = vld [vmem:[#allocation3 + $0x8] sm:$0xff]  ;;  %v3732_v13 = vpop.f32.mrb[103].mxu1  ;;  %v3351_v46 = vld [vmem:[#allocation3 + $0x60] sm:$0xff] }
 0x1ec   : > { %3554 = vst.msk [vmem:[#allocation3 + $0x28] sm:$0xff] %vm577_vm0, %v3538_v6  ;;  %3792 = vst.msk [vmem:[#allocation3] sm:$0xff] %vm577_vm0, %v3776_v7  ;;  %v3777_v14 = vadd.f32 %v3716_v61, %v3583_v12  ;;  %v3354_v49 = vld [vmem:[#allocation3 + $0x78] sm:$0xff] }
 0x1ed   : > { %3795 = vst.msk [vmem:[#allocation3 + $0x18] sm:$0xff] %vm577_vm0, %v3779_v11  ;;  %v3352_v55 = vld [vmem:[#allocation3 + $0x68] sm:$0xff] }
 0x1ee   : > { %3793 = vst.msk [vmem:[#allocation3 + $0x8] sm:$0xff] %vm577_vm0, %v3777_v14  ;;  %v6967_v16 = vpop.f32.mrb[104].mxu0 }
 0x1ef   : > { %v3543_v17 = vadd.f32 %v6967_v16, %v3349_v15  ;;  %v3502_v19 = vpop.f32.mrb[105].mxu0 }
 0x1f0   : > { %v3541_v20 = vadd.f32 %v3502_v19, %v3347_v18  ;;  %v6968_v24 = vpop.f32.mrb[106].mxu0  ;;  %v3588_v25 = vld [vmem:[#allocation3 + $0x30] sm:$0xff]  ;;  %v6987_v26 = vpop.f32.mrb[104].mxu1 }
 0x1f1   : > { %3559 = vst.msk [vmem:[#allocation3 + $0x50] sm:$0xff] %vm577_vm0, %v3543_v17  ;;  %v3544_v27 = vadd.f32 %v6968_v24, %v3350_v21  ;;  %v3782_v22 = vadd.f32 %v6983_v63, %v3588_v25  ;;  %v3505_v28 = vpop.f32.mrb[107].mxu0  ;;  %v3586_v31 = vld [vmem:[#allocation3 + $0x20] sm:$0xff]  ;;  %v3745_v34 = vpop.f32.mrb[105].mxu1 }
 0x1f2   : > { %3557 = vst.msk [vmem:[#allocation3 + $0x40] sm:$0xff] %vm577_vm0, %v3541_v20  ;;  %v3542_v35 = vadd.f32 %v3505_v28, %v3348_v29  ;;  %v3780_v36 = vadd.f32 %v3729_v5, %v3586_v31  ;;  %v3589_v39 = vld [vmem:[#allocation3 + $0x38] sm:$0xff]  ;;  %v6988_v23 = vpop.f32.mrb[106].mxu1  ;;  %v3827_v38 = vld [vmem:[#allocation3 + $0x10] sm:$0xff] }
 0x1f3   : > { %3560 = vst.msk [vmem:[#allocation3 + $0x58] sm:$0xff] %vm577_vm0, %v3544_v27  ;;  %3798 = vst.msk [vmem:[#allocation3 + $0x30] sm:$0xff] %vm577_vm0, %v3782_v22  ;;  %v3783_v30 = vadd.f32 %v6984_v10, %v3589_v39  ;;  %v3587_v40 = vld [vmem:[#allocation3 + $0x28] sm:$0xff]  ;;  %v3748_v41 = vpop.f32.mrb[107].mxu1  ;;  %v3825_v1 = vld [vmem:[#allocation3] sm:$0xff] }
 0x1f4   : > { %3558 = vst.msk [vmem:[#allocation3 + $0x48] sm:$0xff] %vm577_vm0, %v3542_v35  ;;  %3796 = vst.msk [vmem:[#allocation3 + $0x20] sm:$0xff] %vm577_vm0, %v3780_v36  ;;  %v3781_v42 = vadd.f32 %v3732_v13, %v3587_v40  ;;  %v3828_v5 = vld [vmem:[#allocation3 + $0x18] sm:$0xff] }
 0x1f5   : > { %3799 = vst.msk [vmem:[#allocation3 + $0x38] sm:$0xff] %vm577_vm0, %v3783_v30  ;;  %v3826_v11 = vld [vmem:[#allocation3 + $0x8] sm:$0xff] }
 0x1f6   : > { %3797 = vst.msk [vmem:[#allocation3 + $0x28] sm:$0xff] %vm577_vm0, %v3781_v42  ;;  %v6971_v44 = vpop.f32.mrb[108].mxu0 }
 0x1f7   : > { %v3547_v45 = vadd.f32 %v6971_v44, %v3353_v43  ;;  %v3518_v47 = vpop.f32.mrb[109].mxu0 }
 0x1f8   : > { %v3545_v48 = vadd.f32 %v3518_v47, %v3351_v46  ;;  %v6972_v50 = vpop.f32.mrb[110].mxu0  ;;  %v3592_v51 = vld [vmem:[#allocation3 + $0x50] sm:$0xff]  ;;  %v6991_v52 = vpop.f32.mrb[108].mxu1 }
 0x1f9   : > { %3563 = vst.msk [vmem:[#allocation3 + $0x70] sm:$0xff] %vm577_vm0, %v3547_v45  ;;  %v3548_v53 = vadd.f32 %v6972_v50, %v3354_v49  ;;  %v3786_v54 = vadd.f32 %v6987_v26, %v3592_v51  ;;  %v3521_v32 = vpop.f32.mrb[111].mxu0  ;;  %v3590_v61 = vld [vmem:[#allocation3 + $0x40] sm:$0xff]  ;;  %v3761_v9 = vpop.f32.mrb[109].mxu1 }
 0x1fa   : > { %3561 = vst.msk [vmem:[#allocation3 + $0x60] sm:$0xff] %vm577_vm0, %v3545_v48  ;;  %v3546_v56 = vadd.f32 %v3521_v32, %v3352_v55  ;;  %v3784_v33 = vadd.f32 %v3745_v34, %v3590_v61  ;;  %v3593_v57 = vld [vmem:[#allocation3 + $0x58] sm:$0xff]  ;;  %v6992_v58 = vpop.f32.mrb[110].mxu1  ;;  %v3831_v19 = vld [vmem:[#allocation3 + $0x30] sm:$0xff] }
 0x1fb   : > { %3564 = vst.msk [vmem:[#allocation3 + $0x78] sm:$0xff] %vm577_vm0, %v3548_v53  ;;  %3802 = vst.msk [vmem:[#allocation3 + $0x50] sm:$0xff] %vm577_vm0, %v3786_v54  ;;  %v3787_v59 = vadd.f32 %v6988_v23, %v3593_v57  ;;  %v3591_v60 = vld [vmem:[#allocation3 + $0x48] sm:$0xff]  ;;  %v3764_v62 = vpop.f32.mrb[111].mxu1  ;;  %v3829_v24 = vld [vmem:[#allocation3 + $0x20] sm:$0xff] }
 0x1fc   : > { %3562 = vst.msk [vmem:[#allocation3 + $0x68] sm:$0xff] %vm577_vm0, %v3546_v56  ;;  %3800 = vst.msk [vmem:[#allocation3 + $0x40] sm:$0xff] %vm577_vm0, %v3784_v33  ;;  %v3785_v37 = vadd.f32 %v3748_v41, %v3591_v60  ;;  %v3832_v27 = vld [vmem:[#allocation3 + $0x38] sm:$0xff]  ;;  %v8429_v33 = vpop.permute.xlu0 %4179 }
 0x1fd   : > { %3803 = vst.msk [vmem:[#allocation3 + $0x58] sm:$0xff] %vm577_vm0, %v3787_v59  ;;  %v3830_v31 = vld [vmem:[#allocation3 + $0x28] sm:$0xff] }
 0x1fe   : > { %3801 = vst.msk [vmem:[#allocation3 + $0x48] sm:$0xff] %vm577_vm0, %v3785_v37  ;;  %v6999_v63 = vpop.f32.mrb[112].mxu0 }
 0x1ff   : > { %v4021_v0 = vadd.f32 %v6999_v63, %v3827_v38  ;;  %v3956_v2 = vpop.f32.mrb[113].mxu0 }
 0x200   : > { %v4019_v3 = vadd.f32 %v3956_v2, %v3825_v1  ;;  %v3596_v4 = vld [vmem:[#allocation3 + $0x70] sm:$0xff]  ;;  %v7000_v6 = vpop.f32.mrb[114].mxu0 }
 0x201   : > { %4037 = vst.msk [vmem:[#allocation3 + $0x10] sm:$0xff] %vm577_vm0, %v4021_v0  ;;  %v3790_v7 = vadd.f32 %v6991_v52, %v3596_v4  ;;  %v4022_v8 = vadd.f32 %v7000_v6, %v3828_v5  ;;  %v3594_v10 = vld [vmem:[#allocation3 + $0x60] sm:$0xff]  ;;  %v3959_v12 = vpop.f32.mrb[115].mxu0  ;;  %v8432_v5 = vpop.permute.xlu1 %4183 }
 0x202   : > { %4035 = vst.msk [vmem:[#allocation3] sm:$0xff] %vm577_vm0, %v4019_v3  ;;  %v3788_v13 = vadd.f32 %v3761_v9, %v3594_v10  ;;  %v4020_v14 = vadd.f32 %v3959_v12, %v3826_v11  ;;  %v3597_v15 = vld [vmem:[#allocation3 + $0x78] sm:$0xff]  ;;  %v3835_v43 = vld [vmem:[#allocation3 + $0x50] sm:$0xff] }
 0x203   : > { %3806 = vst.msk [vmem:[#allocation3 + $0x70] sm:$0xff] %vm577_vm0, %v3790_v7  ;;  %4038 = vst.msk [vmem:[#allocation3 + $0x18] sm:$0xff] %vm577_vm0, %v4022_v8  ;;  %v3791_v16 = vadd.f32 %v6992_v58, %v3597_v15  ;;  %v3595_v17 = vld [vmem:[#allocation3 + $0x68] sm:$0xff]  ;;  %v3833_v46 = vld [vmem:[#allocation3 + $0x40] sm:$0xff] }
 0x204   : > { %3804 = vst.msk [vmem:[#allocation3 + $0x60] sm:$0xff] %vm577_vm0, %v3788_v13  ;;  %4036 = vst.msk [vmem:[#allocation3 + $0x8] sm:$0xff] %vm577_vm0, %v4020_v14  ;;  %v3789_v18 = vadd.f32 %v3764_v62, %v3595_v17  ;;  %v3836_v49 = vld [vmem:[#allocation3 + $0x58] sm:$0xff] }
 0x205   : > { %3807 = vst.msk [vmem:[#allocation3 + $0x78] sm:$0xff] %vm577_vm0, %v3791_v16  ;;  %v3834_v53 = vld [vmem:[#allocation3 + $0x48] sm:$0xff]  ;;  %v4182_v16 = vpop.permute.xlu0 %4181 }
 0x206   : > { %3805 = vst.msk [vmem:[#allocation3 + $0x68] sm:$0xff] %vm577_vm0, %v3789_v18  ;;  %v7003_v20 = vpop.f32.mrb[116].mxu0 }
 0x207   : > { %v4025_v21 = vadd.f32 %v7003_v20, %v3831_v19  ;;  %v3972_v25 = vpop.f32.mrb[117].mxu0 }
 0x208   : > { %v4023_v26 = vadd.f32 %v3972_v25, %v3829_v24  ;;  %v7004_v22 = vpop.f32.mrb[118].mxu0  ;;  %v4053_v29 = vld [vmem:[#allocation3 + $0x10] sm:$0xff] }
 0x209   : > { %4041 = vst.msk [vmem:[#allocation3 + $0x30] sm:$0xff] %vm577_vm0, %v4025_v21  ;;  %v4026_v28 = vadd.f32 %v7004_v22, %v3832_v27  ;;  %v3975_v34 = vpop.f32.mrb[119].mxu0  ;;  %v4051_v35 = vld [vmem:[#allocation3] sm:$0xff]  ;;  %v6296_v36 = vmul.f32 -1.442695, %v4053_v29  ;;  %v4186_v29 = vpop.permute.xlu1 %4185 }
 0x20a   : > { %4039 = vst.msk [vmem:[#allocation3 + $0x20] sm:$0xff] %vm577_vm0, %v4023_v26  ;;  %v4024_v39 = vadd.f32 %v3975_v34, %v3830_v31  ;;  %v6294_v23 = vmul.f32 -1.442695, %v4051_v35  ;;  %v4054_v30 = vld [vmem:[#allocation3 + $0x18] sm:$0xff]  ;;  %v3839_v37 = vld [vmem:[#allocation3 + $0x70] sm:$0xff] }
 0x20b   : > { %4042 = vst.msk [vmem:[#allocation3 + $0x38] sm:$0xff] %vm577_vm0, %v4026_v28  ;;  %7355 = vpow2.f32 %v6296_v36  ;;  %v4052_v40 = vld [vmem:[#allocation3 + $0x8] sm:$0xff]  ;;  %v6297_v41 = vmul.f32 -1.442695, %v4054_v30  ;;  %v3837_v2 = vld [vmem:[#allocation3 + $0x60] sm:$0xff]  ;;  %v8441_v36 = vpop.permute.xlu0 %4187 }
 0x20c   : > { %4040 = vst.msk [vmem:[#allocation3 + $0x28] sm:$0xff] %vm577_vm0, %v4024_v39  ;;  %7357 = vpow2.f32 %v6294_v23  ;;  %v6295_v42 = vmul.f32 -1.442695, %v4052_v40  ;;  %v3840_v8 = vld [vmem:[#allocation3 + $0x78] sm:$0xff]  ;;  %v7307_v28 = vld [vmem:[%s8803_s5 + $0x10] sm:$0xff]  }
 0x20d   : > { %7359 = vpow2.f32 %v6297_v41  ;;  %v3838_v14 = vld [vmem:[#allocation3 + $0x68] sm:$0xff]  ;;  %7033 = vmatprep.subr.bf16.mxu0 %v7307_v28 }
 0x20e   : > { %v7007_v44 = vpop.f32.mrb[120].mxu0  ;;  %7361 = vpow2.f32 %v6295_v42  ;;  %7034 = vmatpush3.bf16.msra.mxu0 %v7307_v28 }
 0x20f   : > { %v4029_v45 = vadd.f32 %v7007_v44, %v3835_v43  ;;  %v3988_v47 = vpop.f32.mrb[121].mxu0 }
 0x210   : > { %v4027_v48 = vadd.f32 %v3988_v47, %v3833_v46  ;;  %v7008_v50 = vpop.f32.mrb[122].mxu0  ;;  %v4057_v51 = vld [vmem:[#allocation3 + $0x30] sm:$0xff]  ;;  %v4190_v46 = vpop.permute.xlu1 %4189 }
 0x211   : > { %4045 = vst.msk [vmem:[#allocation3 + $0x50] sm:$0xff] %vm577_vm0, %v4029_v45  ;;  %v4030_v52 = vadd.f32 %v7008_v50, %v3836_v49  ;;  %v3991_v54 = vpop.f32.mrb[123].mxu0  ;;  %v4055_v55 = vld [vmem:[#allocation3 + $0x20] sm:$0xff]  ;;  %v6300_v32 = vmul.f32 -1.442695, %v4057_v51 }
 0x212   : > { %4043 = vst.msk [vmem:[#allocation3 + $0x40] sm:$0xff] %vm577_vm0, %v4027_v48  ;;  %v4028_v61 = vadd.f32 %v3991_v54, %v3834_v53  ;;  %v6298_v9 = vmul.f32 -1.442695, %v4055_v55  ;;  %v4058_v56 = vld [vmem:[#allocation3 + $0x38] sm:$0xff]  ;;  %v4192_v53 = vpop.permute.xlu0 %4191  ;;  %v7308_v54 = vld [vmem:[%s8803_s5 + $0x18] sm:$0xff]   ;;  %v7310_v55 = vld [vmem:[#allocation2] sm:$0xff]  }
 0x213   : > { %4046 = vst.msk [vmem:[#allocation3 + $0x58] sm:$0xff] %vm577_vm0, %v4030_v52  ;;  %v4056_v57 = vld [vmem:[#allocation3 + $0x28] sm:$0xff]  ;;  %7363 = vpow2.f32 %v6300_v32  ;;  %v6301_v58 = vmul.f32 -1.442695, %v4058_v56  ;;  %7035 = vmatprep.subr.bf16.mxu0 %v7308_v54  ;;  %7017 = vmatprep.mubr.msk.bf16.mxu1 %vm601_vm2, %v7310_v55 }
 0x214   : > { %4044 = vst.msk [vmem:[#allocation3 + $0x48] sm:$0xff] %vm577_vm0, %v4028_v61  ;;  %7365 = vpow2.f32 %v6298_v9  ;;  %v6299_v59 = vmul.f32 -1.442695, %v4056_v57  ;;  %7036 = vmatpush3.bf16.msra.mxu0 %v7308_v54 }
 0x215   : > { %v7356_v60 = vpop.eup %7355  ;;  %7367 = vpow2.f32 %v6301_v58  ;;  %v8463_v58 = vld [vmem:[%s8803_s5 + $0x20] sm:$0xff]  }
 0x216   : > { %v7358_v62 = vpop.eup %7357  ;;  %v7011_v38 = vpop.f32.mrb[124].mxu0  ;;  %v4117_v63 = vadd.f32 1.0, %v7356_v60  ;;  %7369 = vpow2.f32 %v6299_v59  ;;  %7053 = vmatprep.subr.bf16.mxu1 %v8463_v58 }
 0x217   : > { %v7360_v0 = vpop.eup %7359  ;;  %v4033_v1 = vadd.f32 %v7011_v38, %v3839_v37  ;;  %v4004_v3 = vpop.f32.mrb[125].mxu0  ;;  %v4115_v4 = vadd.f32 1.0, %v7358_v62 }
 0x218   : > { %v7362_v6 = vpop.eup %7361  ;;  %v4031_v7 = vadd.f32 %v4004_v3, %v3837_v2  ;;  %v7012_v10 = vpop.f32.mrb[126].mxu0  ;;  %7371 = vrcp.f32 %v4117_v63  ;;  %v4118_v11 = vadd.f32 1.0, %v7360_v0  ;;  %v4061_v12 = vld [vmem:[#allocation3 + $0x50] sm:$0xff] }
 0x219   : > { %4049 = vst.msk [vmem:[#allocation3 + $0x70] sm:$0xff] %vm577_vm0, %v4033_v1  ;;  %v4034_v13 = vadd.f32 %v7012_v10, %v3840_v8  ;;  %v4007_v15 = vpop.f32.mrb[127].mxu0  ;;  %7373 = vrcp.f32 %v4115_v4  ;;  %v4116_v17 = vadd.f32 1.0, %v7362_v6  ;;  %v4059_v18 = vld [vmem:[#allocation3 + $0x40] sm:$0xff]  ;;  %v6304_v19 = vmul.f32 -1.442695, %v4061_v12  ;;  %v4194_v0 = vpop.permute.xlu1 %4193 }
 0x21a   : > { %4047 = vst.msk [vmem:[#allocation3 + $0x60] sm:$0xff] %vm577_vm0, %v4031_v7  ;;  %v4032_v20 = vadd.f32 %v4007_v15, %v3838_v14  ;;  %7375 = vrcp.f32 %v4118_v11  ;;  %v6302_v21 = vmul.f32 -1.442695, %v4059_v18  ;;  %v4062_v24 = vld [vmem:[#allocation3 + $0x58] sm:$0xff]  ;;  %v4196_v6 = vpop.permute.xlu0 %4195 }
 0x21b   : > { %4050 = vst.msk [vmem:[#allocation3 + $0x78] sm:$0xff] %vm577_vm0, %v4034_v13  ;;  %7377 = vrcp.f32 %v4116_v17  ;;  %v4060_v25 = vld [vmem:[#allocation3 + $0x48] sm:$0xff]  ;;  %v6305_v26 = vmul.f32 -1.442695, %v4062_v24 }
 0x21c   : > { %4048 = vst.msk [vmem:[#allocation3 + $0x68] sm:$0xff] %vm577_vm0, %v4032_v20  ;;  %7379 = vpow2.f32 %v6302_v21  ;;  %v6303_v27 = vmul.f32 -1.442695, %v4060_v25 }
 0x21d   : > { %v7364_v22 = vpop.eup %7363  ;;  %7381 = vpow2.f32 %v6304_v19  ;;  %v4198_v17 = vpop.permute.xlu1 %4197 }
 0x21e   : > { %v7366_v31 = vpop.eup %7365  ;;  %v4121_v34 = vadd.f32 1.0, %v7364_v22  ;;  %7383 = vpow2.f32 %v6303_v27  ;;  %v4200_v24 = vpop.permute.xlu0 %4199 }
 0x21f   : > { %v7368_v35 = vpop.eup %7367  ;;  %v4119_v39 = vadd.f32 1.0, %v7366_v31  ;;  %7385 = vpow2.f32 %v6305_v26 }
 0x220   : > { %v7370_v23 = vpop.eup %7369  ;;  %7387 = vrcp.f32 %v4121_v34  ;;  %v4122_v30 = vadd.f32 1.0, %v7368_v35  ;;  %v4065_v42 = vld [vmem:[#allocation3 + $0x70] sm:$0xff] }
 0x221   : > { %7389 = vrcp.f32 %v4119_v39  ;;  %v4120_v40 = vadd.f32 1.0, %v7370_v23  ;;  %v4063_v41 = vld [vmem:[#allocation3 + $0x60] sm:$0xff]  ;;  %v6308_v51 = vmul.f32 -1.442695, %v4065_v42 }
 0x222   : > { %v8443_v43 = vpop.eup %7371  ;;  %7391 = vrcp.f32 %v4122_v30  ;;  %v6306_v44 = vmul.f32 -1.442695, %v4063_v41  ;;  %v4066_v38 = vld [vmem:[#allocation3 + $0x78] sm:$0xff]  ;;  %v4204_v41 = vpop.permute.xlu0 %4203 }
 0x223   : > { %v8445_v45 = vpop.eup %7373  ;;  %7393 = vrcp.f32 %v4120_v40  ;;  %v4064_v47 = vld [vmem:[#allocation3 + $0x68] sm:$0xff]  ;;  %v4229_v9 = vmul.f32 %v8443_v43, %v8432_v5  ;;  %v6309_v7 = vmul.f32 -1.442695, %v4066_v38 }
 0x224   : > { %v8447_v48 = vpop.eup %7375  ;;  %v4227_v49 = vmul.f32 %v8445_v45, %v8429_v33  ;;  %7395 = vpow2.f32 %v6306_v44  ;;  %v6307_v50 = vmul.f32 -1.442695, %v4064_v47 }
 0x225   : > { %v8451_v52 = vpop.eup %7377  ;;  %v4230_v62 = vmul.f32 %v8447_v48, %v4186_v29  ;;  %v6439_v3 = vpack.c.bf16 %v4229_v9, %v4229_v9  ;;  %v7325_v9 = vld [vmem:[%s8803_s5 + $0x30] sm:$0xff]  }
 0x226   : > { %v7380_v32 = vpop.eup %7379  ;;  %v6437_v61 = vpack.c.bf16 %v4227_v49, %v4227_v49  ;;  %v4228_v56 = vmul.f32 %v8451_v52, %v4182_v16  ;;  %7397 = vpow2.f32 %v6307_v50  ;;  %v4208_v54 = vpop.permute.xlu0 %4207  ;;  %7073 = vmatprep.subr.bf16.mxu0 %v7325_v9 }
 0x227   : > { %v7382_v57 = vpop.eup %7381  ;;  %v4123_v33 = vadd.f32 1.0, %v7380_v32  ;;  %7399 = vpow2.f32 %v6308_v51  ;;  %v6440_v10 = vpack.c.bf16 %v4230_v62, %v4230_v62 }
 0x228   : > { %v7384_v59 = vpop.eup %7383  ;;  %v6438_v60 = vpack.c.bf16 %v4228_v56, %v4228_v56  ;;  %4307 = vrot.lane.b32.xlu0 %v6437_v61, %s7531_s14  ;;  %v4125_v37 = vadd.f32 1.0, %v7382_v57 }
 0x229   : > { %v7386_v63 = vpop.eup %7385  ;;  %7401 = vrcp.f32 %v4123_v33  ;;  %v4124_v1 = vadd.f32 1.0, %v7384_v59 }
 0x22a   : > { %v8468_v2 = vpop.eup %7387  ;;  %4309 = vrot.lane.b32.xlu1 %v6438_v60, %s7531_s14  ;;  %7403 = vrcp.f32 %v4125_v37  ;;  %v4126_v4 = vadd.f32 1.0, %v7386_v63 }
 0x22b   : > { %v8471_v5 = vpop.eup %7389  ;;  %7405 = vrcp.f32 %v4124_v1  ;;  %v4233_v16 = vmul.f32 %v8468_v2, %v4192_v53 }
 0x22c   : > { %v8473_v8 = vpop.eup %7391  ;;  %v4231_v11 = vmul.f32 %v8471_v5, %v8441_v36  ;;  %4311 = vrot.lane.b32.xlu0 %v6439_v3, %s7531_s14  ;;  %7407 = vrcp.f32 %v4126_v4  ;;  %v4202_v36 = vpop.permute.xlu1 %4201 }
 0x22d   : > { %v8478_v12 = vpop.eup %7393  ;;  %7409 = vpow2.f32 %v6309_v7  ;;  %v4234_v20 = vmul.f32 %v8473_v8, %v4194_v0  ;;  %v6443_v26 = vpack.c.bf16 %v4233_v16, %v4233_v16 }
 0x22e   : > { %v7396_v13 = vpop.eup %7395  ;;  %v6441_v14 = vpack.c.bf16 %v4231_v11, %v4231_v11  ;;  %v4232_v15 = vmul.f32 %v8478_v12, %v4190_v46  ;;  %4313 = vrot.lane.b32.xlu1 %v6440_v10, %s7531_s14  ;;  %v7321_v10 = vld [vmem:[%s8803_s5 + $0x28] sm:$0xff]  }
 0x22f   : > { %v4127_v18 = vadd.f32 1.0, %v7396_v13  ;;  %v6444_v31 = vpack.c.bf16 %v4234_v20, %v4234_v20 }
 0x230   : > { %v6442_v19 = vpack.c.bf16 %v4232_v15, %v4232_v15  ;;  %4315 = vrot.lane.b32.xlu0 %v6441_v14, %s7531_s14  ;;  %v7398_v21 = vpop.eup %7397  ;;  %v4206_v61 = vpop.permute.xlu1 %4205  ;;  %v7330_v14 = vld [vmem:[%s8803_s5 + $0x38] sm:$0xff]  }
 0x231   : > { %7411 = vrcp.f32 %v4127_v18  ;;  %v7400_v25 = vpop.eup %7399  ;;  %v4128_v27 = vadd.f32 1.0, %v7398_v21 }
 0x232   : > { %4317 = vrot.lane.b32.xlu1 %v6442_v19, %s7531_s14  ;;  %v4129_v29 = vadd.f32 1.0, %v7400_v25 }
 0x233   : > { %v8486_v22 = vpop.eup %7401  ;;  %7413 = vrcp.f32 %v4128_v27 }
 0x234   : > { %v8488_v28 = vpop.eup %7403  ;;  %v4235_v34 = vmul.f32 %v8486_v22, %v4196_v6  ;;  %4319 = vrot.lane.b32.xlu0 %v6443_v26, %s7531_s14  ;;  %7415 = vrcp.f32 %v4129_v29  ;;  %v4210_v62 = vpop.permute.xlu1 %4209 }
 0x235   : > { %v8492_v35 = vpop.eup %7405  ;;  %v4237_v40 = vmul.f32 %v8488_v28, %v4200_v24 }
 0x236   : > { %v8494_v39 = vpop.eup %7407  ;;  %v6445_v23 = vpack.c.bf16 %v4235_v34, %v4235_v34  ;;  %v4236_v30 = vmul.f32 %v8492_v35, %v4198_v17  ;;  %4321 = vrot.lane.b32.xlu1 %v6444_v31, %s7531_s14  ;;  %v7332_v17 = vld [vmem:[%s8803_s5 + $0x40] sm:$0xff]  }
 0x237   : > { %v4238_v44 = vmul.f32 %v8494_v39, %v4202_v36  ;;  %v7410_v46 = vpop.eup %7409  ;;  %v6447_v47 = vpack.c.bf16 %v4237_v40, %v4237_v40 }
 0x238   : > { %v6446_v42 = vpack.c.bf16 %v4236_v30, %v4236_v30  ;;  %4323 = vrot.lane.b32.xlu0 %v6445_v23, %s7531_s14  ;;  %v4130_v49 = vadd.f32 1.0, %v7410_v46 }
 0x239   : > { %v6448_v51 = vpack.c.bf16 %v4238_v44, %v4238_v44 }
 0x23a   : > { %4325 = vrot.lane.b32.xlu1 %v6446_v42, %s7531_s14  ;;  %7417 = vrcp.f32 %v4130_v49 }
 0x23b   : > { %v8502_v50 = vpop.eup %7411 }
 0x23c   : > { %v4239_v53 = vmul.f32 %v8502_v50, %v4204_v41  ;;  %4327 = vrot.lane.b32.xlu0 %v6447_v47, %s7531_s14 }
 0x23d   : > { %v8506_v55 = vpop.eup %7413 }
 0x23e   : > { %v6449_v32 = vpack.c.bf16 %v4239_v53, %v4239_v53  ;;  %4329 = vrot.lane.b32.xlu1 %v6448_v51, %s7531_s14  ;;  %v8512_v56 = vpop.eup %7415  ;;  %v4240_v57 = vmul.f32 %v8506_v55, %v4206_v61  ;;  %v7341_v53 = vld [vmem:[%s8803_s5 + $0x48] sm:$0xff]  }
 0x23f   : > { %v4241_v33 = vmul.f32 %v8512_v56, %v4208_v54 }
 0x240   : > { %4331 = vrot.lane.b32.xlu0 %v6449_v32, %s7531_s14  ;;  %v6450_v59 = vpack.c.bf16 %v4240_v57, %v4240_v57 }
 0x241   : > { %v6451_v60 = vpack.c.bf16 %v4241_v33, %v4241_v33 }
 0x242   : > { %4333 = vrot.lane.b32.xlu1 %v6450_v59, %s7531_s14 }
 0x244   : > { %4335 = vrot.lane.b32.xlu0 %v6451_v60, %s7531_s14  ;;  %v8519_v37 = vpop.eup %7417 }
 0x245   : > { %v4242_v38 = vmul.f32 %v8519_v37, %v4210_v62 }
 0x247   : > { %v6452_v63 = vpack.c.bf16 %v4242_v38, %v4242_v38 }
 0x249   : > { %4337 = vrot.lane.b32.xlu1 %v6452_v63, %s7531_s14 }
 0x29a   : > { %v4308_v0 = vpop.permute.xlu0 %4307 }
 0x29b   : > { %4355 = vst.msk [vmem:[#allocation2 + $0x8] sm:$0xf] %vm2800_vm1, %v4308_v0 }
 0x29c   : > { %v4310_v1 = vpop.permute.xlu1 %4309 }
 0x29d   : > { %4356 = vst.msk [vmem:[#allocation2 + $0xc] sm:$0xf] %vm2800_vm1, %v4310_v1 }
 0x29e   : > { %v4312_v3 = vpop.permute.xlu0 %4311 }
 0x29f   : > { %4357 = vst.msk [vmem:[#allocation2 + $0x10] sm:$0xf] %vm2800_vm1, %v4312_v3 }
 0x2a0   : > { %v4314_v4 = vpop.permute.xlu1 %4313 }
 0x2a1   : > { %4358 = vst.msk [vmem:[#allocation2 + $0x14] sm:$0xf] %vm2800_vm1, %v4314_v4 }
 0x2a2   : > { %v4316_v6 = vpop.permute.xlu0 %4315  ;;  %v7309_v7 = vld [vmem:[#allocation2 + $0x4] sm:$0xff]  }
 0x2a3   : > { %4359 = vst.msk [vmem:[#allocation2 + $0x18] sm:$0xf] %vm2800_vm1, %v4316_v6  ;;  %7037 = vmatprep.mubr.msk.bf16.mxu0 %vm601_vm2, %v7309_v7 }
 0x2a4   : > { %v4318_v11 = vpop.permute.xlu1 %4317  ;;  %v7311_v13 = vld [vmem:[#allocation2 + $0x8] sm:$0xff]  }
 0x2a5   : > { %4360 = vst.msk [vmem:[#allocation2 + $0x1c] sm:$0xf] %vm2800_vm1, %v4318_v11  ;;  %7018 = vmatmul.mubr.msk.bf16.vlgmr.msra.gmra.mrb[112].mxu1 %vm601_vm2, %v7311_v13  ;;  %v7327_v44 = vld [vmem:[#allocation2 + $0x8] sm:$0xff]  }
 0x2a6   : > { %v4320_v15 = vpop.permute.xlu0 %4319  ;;  %v7313_v16 = vld [vmem:[#allocation2 + $0xc] sm:$0xff]   ;;  %7054 = vmatpush3.bf16.msra.mxu1 %v8463_v58 }
 0x2a7   : > { %4361 = vst.msk [vmem:[#allocation2 + $0x20] sm:$0xf] %vm2800_vm1, %v4320_v15  ;;  %7038 = vmatmul.mubr.msk.bf16.vlgmr.msra.gmra.mrb[128].mxu0 %vm601_vm2, %v7313_v16  ;;  %7055 = vmatprep.subr.bf16.mxu1 %v7321_v10  ;;  %v7329_v51 = vld [vmem:[#allocation2 + $0xc] sm:$0xff]   ;;  %v4389_v16 = vld [vmem:[#allocation4 + $0x10] sm:$0xff] }
 0x2a8   : > { %v4322_v18 = vpop.permute.xlu1 %4321  ;;  %v7314_v19 = vld [vmem:[#allocation2 + $0x10] sm:$0xff]   ;;  %7074 = vmatpush3.bf16.msra.mxu0 %v7325_v9  ;;  %v7354_v15 = vld [vmem:[#allocation2 + $0x48] sm:$0xff]  }
 0x2a9   : > { %4362 = vst.msk [vmem:[#allocation2 + $0x24] sm:$0xf] %vm2800_vm1, %v4322_v18  ;;  %7021 = vmatprep.mubr.msk.bf16.mxu1 %vm601_vm2, %v7314_v19  ;;  %7075 = vmatprep.subr.bf16.mxu0 %v7330_v14  ;;  %v7331_v54 = vld [vmem:[#allocation2 + $0x10] sm:$0xff]  }
 0x2aa   : > { %v4324_v20 = vpop.permute.xlu0 %4323  ;;  %v7315_v21 = vld [vmem:[#allocation2 + $0x14] sm:$0xff]   ;;  %7056 = vmatpush3.bf16.msra.mxu1 %v7321_v10 }
 0x2ab   : > { %4363 = vst.msk [vmem:[#allocation2 + $0x28] sm:$0xf] %vm2800_vm1, %v4324_v20  ;;  %7041 = vmatprep.mubr.msk.bf16.mxu0 %vm601_vm2, %v7315_v21  ;;  %7093 = vmatprep.subr.bf16.mxu1 %v7332_v17  ;;  %v7334_v61 = vld [vmem:[#allocation2 + $0x14] sm:$0xff]  }
 0x2ac   : > { %v4326_v58 = vpop.permute.xlu1 %4325  ;;  %v7316_v24 = vld [vmem:[#allocation2 + $0x18] sm:$0xff]   ;;  %7076 = vmatpush3.bf16.msra.mxu0 %v7330_v14  ;;  %v7346_v3 = vld [vmem:[#allocation2 + $0x10] sm:$0xff]  }
 0x2ad   : > { %4364 = vst.msk [vmem:[#allocation2 + $0x2c] sm:$0xf] %vm2800_vm1, %v4326_v58  ;;  %7022 = vmatmul.mubr.msk.bf16.gmra.mrb[116].mxu1 %vm601_vm2, %v7316_v24  ;;  %v7333_v32 = vld [vmem:[#allocation2 + $0x18] sm:$0xff]   ;;  %v4387_v19 = vld [vmem:[#allocation4] sm:$0xff]  ;;  %v4390_v58 = vld [vmem:[#allocation4 + $0x18] sm:$0xff] }
 0x2ae   : > { %v4328_v25 = vpop.permute.xlu0 %4327  ;;  %v7317_v26 = vld [vmem:[#allocation2 + $0x1c] sm:$0xff]  }
 0x2af   : > { %4365 = vst.msk [vmem:[#allocation2 + $0x30] sm:$0xf] %vm2800_vm1, %v4328_v25  ;;  %7042 = vmatmul.mubr.msk.bf16.gmra.mrb[132].mxu0 %vm601_vm2, %v7317_v26  ;;  %v7335_v9 = vld [vmem:[#allocation2 + $0x1c] sm:$0xff]  }
 0x2b0   : > { %v4330_v27 = vpop.permute.xlu1 %4329  ;;  %v7318_v29 = vld [vmem:[#allocation2 + $0x20] sm:$0xff]   ;;  %v7348_v6 = vld [vmem:[#allocation2 + $0x18] sm:$0xff]  }
 0x2b1   : > { %4366 = vst.msk [vmem:[#allocation2 + $0x34] sm:$0xf] %vm2800_vm1, %v4330_v27  ;;  %7025 = vmatprep.mubr.msk.bf16.mxu1 %vm601_vm2, %v7318_v29  ;;  %v7336_v57 = vld [vmem:[#allocation2 + $0x20] sm:$0xff]   ;;  %v4388_v27 = vld [vmem:[#allocation4 + $0x8] sm:$0xff] }
 0x2b2   : > { %v4332_v31 = vpop.permute.xlu0 %4331  ;;  %v7319_v34 = vld [vmem:[#allocation2 + $0x24] sm:$0xff]  }
 0x2b3   : > { %4367 = vst.msk [vmem:[#allocation2 + $0x38] sm:$0xf] %vm2800_vm1, %v4332_v31  ;;  %7045 = vmatprep.mubr.msk.bf16.mxu0 %vm601_vm2, %v7319_v34  ;;  %v7338_v59 = vld [vmem:[#allocation2 + $0x24] sm:$0xff]  }
 0x2b4   : > { %v7320_v36 = vld [vmem:[#allocation2 + $0x28] sm:$0xff]   ;;  %v4334_v23 = vpop.permute.xlu1 %4333  ;;  %v7349_v7 = vld [vmem:[#allocation2 + $0x20] sm:$0xff]  }
 0x2b5   : > { %4368 = vst.msk [vmem:[#allocation2 + $0x3c] sm:$0xf] %vm2800_vm1, %v4334_v23  ;;  %7026 = vmatmul.mubr.msk.bf16.gmra.mrb[120].mxu1 %vm601_vm2, %v7320_v36  ;;  %v7337_v33 = vld [vmem:[#allocation2 + $0x28] sm:$0xff]  }
 0x2b6   : > { %v4336_v30 = vpop.permute.xlu0 %4335  ;;  %v7322_v40 = vld [vmem:[#allocation2 + $0x2c] sm:$0xff]  }
 0x2b7   : > { %4369 = vst.msk [vmem:[#allocation2 + $0x40] sm:$0xf] %vm2800_vm1, %v4336_v30  ;;  %7046 = vmatmul.mubr.msk.bf16.gmra.mrb[136].mxu0 %vm601_vm2, %v7322_v40  ;;  %v7339_v60 = vld [vmem:[#allocation2 + $0x2c] sm:$0xff]   ;;  %v4393_v30 = vld [vmem:[#allocation4 + $0x30] sm:$0xff] }
 0x2b8   : > { %v7323_v41 = vld [vmem:[#allocation2 + $0x30] sm:$0xff]   ;;  %v7350_v10 = vld [vmem:[#allocation2 + $0x28] sm:$0xff]  }
 0x2b9   : > { %7029 = vmatprep.mubr.msk.bf16.mxu1 %vm601_vm2, %v7323_v41  ;;  %v7340_v62 = vld [vmem:[#allocation2 + $0x30] sm:$0xff]  }
 0x2ba   : > { %v7324_v42 = vld [vmem:[#allocation2 + $0x34] sm:$0xff]  }
 0x2bb   : > { %7049 = vmatprep.mubr.msk.bf16.mxu0 %vm601_vm2, %v7324_v42  ;;  %v4338_v46 = vpop.permute.xlu1 %4337  ;;  %v7343_v63 = vld [vmem:[#allocation2 + $0x34] sm:$0xff]  }
 0x2bc   : > { %v7326_v47 = vld [vmem:[#allocation2 + $0x38] sm:$0xff]   ;;  %4370 = vst.msk [vmem:[#allocation2 + $0x44] sm:$0xf] %vm2800_vm1, %v4338_v46  ;;  %v7351_v11 = vld [vmem:[#allocation2 + $0x30] sm:$0xff]  }
 0x2bd   : > { %7030 = vmatmul.mubr.msk.bf16.gmra.mrb[124].mxu1 %vm601_vm2, %v7326_v47  ;;  %v7342_v38 = vld [vmem:[#allocation2 + $0x38] sm:$0xff]   ;;  %v4391_v42 = vld [vmem:[#allocation4 + $0x20] sm:$0xff] }
 0x2be   : > { %v7328_v49 = vld [vmem:[#allocation2 + $0x3c] sm:$0xff]   ;;  %7057 = vmatprep.mubr.msk.bf16.mxu1 %vm601_vm2, %v7327_v44 }
 0x2bf   : > { %7050 = vmatmul.mubr.msk.bf16.gmra.mrb[140].mxu0 %vm601_vm2, %v7328_v49  ;;  %v7344_v0 = vld [vmem:[#allocation2 + $0x3c] sm:$0xff]   ;;  %v4394_v49 = vld [vmem:[#allocation4 + $0x38] sm:$0xff] }
 0x2c0   : > { %7077 = vmatprep.mubr.msk.bf16.mxu0 %vm601_vm2, %v7329_v51  ;;  %v7352_v13 = vld [vmem:[#allocation2 + $0x38] sm:$0xff]  }
 0x2c3   : > { %v7345_v1 = vld [vmem:[#allocation2 + $0x40] sm:$0xff]  }
 0x2c4   : > { %v7347_v4 = vld [vmem:[#allocation2 + $0x44] sm:$0xff]  }
 0x2c5   : > { %7058 = vmatmul.mubr.msk.bf16.vlgmr.msra.gmra.mrb[128].mxu1 %vm601_vm2, %v7331_v54  ;;  %v7353_v14 = vld [vmem:[#allocation2 + $0x40] sm:$0xff]  }
 0x2c6   : > { %7061 = vmatprep.mubr.msk.bf16.mxu1 %vm601_vm2, %v7333_v32  ;;  %7094 = vmatpush3.bf16.msra.mxu1 %v7332_v17 }
 0x2c7   : > { %7078 = vmatmul.mubr.msk.bf16.vlgmr.msra.gmra.mrb[144].mxu0 %vm601_vm2, %v7334_v61  ;;  %7095 = vmatprep.subr.bf16.mxu1 %v7341_v53 }
 0x2c8   : > { %7081 = vmatprep.mubr.msk.bf16.mxu0 %vm601_vm2, %v7335_v9  ;;  %v4392_v9 = vld [vmem:[#allocation4 + $0x28] sm:$0xff] }
 0x2ca   : > { %7096 = vmatpush3.bf16.msra.mxu1 %v7341_v53 }
 0x2cd   : > { %7062 = vmatmul.mubr.msk.bf16.gmra.mrb[132].mxu1 %vm601_vm2, %v7336_v57 }
 0x2ce   : > { %7065 = vmatprep.mubr.msk.bf16.mxu1 %vm601_vm2, %v7337_v33 }
 0x2cf   : > { %7082 = vmatmul.mubr.msk.bf16.gmra.mrb[148].mxu0 %vm601_vm2, %v7338_v59 }
 0x2d0   : > { %7085 = vmatprep.mubr.msk.bf16.mxu0 %vm601_vm2, %v7339_v60 }
 0x2d5   : > { %7066 = vmatmul.mubr.msk.bf16.gmra.mrb[136].mxu1 %vm601_vm2, %v7340_v62 }
 0x2d6   : > { %7069 = vmatprep.mubr.msk.bf16.mxu1 %vm601_vm2, %v7342_v38 }
 0x2d7   : > { %7086 = vmatmul.mubr.msk.bf16.gmra.mrb[152].mxu0 %vm601_vm2, %v7343_v63 }
 0x2d8   : > { %7089 = vmatprep.mubr.msk.bf16.mxu0 %vm601_vm2, %v7344_v0 }
 0x2dd   : > { %7070 = vmatmul.mubr.msk.bf16.gmra.mrb[140].mxu1 %vm601_vm2, %v7345_v1 }
 0x2de   : > { %7097 = vmatprep.mubr.msk.bf16.mxu1 %vm601_vm2, %v7346_v3 }
 0x2df   : > { %7090 = vmatmul.mubr.msk.bf16.gmra.mrb[156].mxu0 %vm601_vm2, %v7347_v4  ;;  %v4397_v4 = vld [vmem:[#allocation4 + $0x50] sm:$0xff] }
 0x2e5   : > { %7098 = vmatmul.mubr.msk.bf16.vlgmr.msra.gmra.mrb[144].mxu1 %vm601_vm2, %v7348_v6 }
 0x2e6   : > { %7101 = vmatprep.mubr.msk.bf16.mxu1 %vm601_vm2, %v7349_v7 }
 0x2ed   : > { %7102 = vmatmul.mubr.msk.bf16.gmra.mrb[148].mxu1 %vm601_vm2, %v7350_v10  ;;  %v4395_v10 = vld [vmem:[#allocation4 + $0x40] sm:$0xff] }
 0x2ee   : > { %7105 = vmatprep.mubr.msk.bf16.mxu1 %vm601_vm2, %v7351_v11 }
 0x2f5   : > { %7106 = vmatmul.mubr.msk.bf16.gmra.mrb[152].mxu1 %vm601_vm2, %v7352_v13 }
 0x2f6   : > { %7109 = vmatprep.mubr.msk.bf16.mxu1 %vm601_vm2, %v7353_v14 }
 0x2fd   : > { %7110 = vmatmul.mubr.msk.bf16.gmra.mrb[156].mxu1 %vm601_vm2, %v7354_v15  ;;  %v4398_v15 = vld [vmem:[#allocation4 + $0x58] sm:$0xff] }
 0x378   : > { %v7019_v17 = vpop.f32.mrb[112].mxu1 }
 0x379   : > { %v4582_v18 = vadd.f32 %v7019_v17, %v4389_v16  ;;  %v4517_v20 = vpop.f32.mrb[113].mxu1 }
 0x37a   : > { %v4580_v21 = vadd.f32 %v4517_v20, %v4387_v19  ;;  %v7020_v24 = vpop.f32.mrb[114].mxu1  ;;  %v7039_v25 = vpop.f32.mrb[128].mxu0 }
 0x37b   : > { %4598 = vst.msk [vmem:[#allocation4 + $0x10] sm:$0xff] %vm601_vm2, %v4582_v18  ;;  %v4583_v26 = vadd.f32 %v7020_v24, %v4390_v58  ;;  %v4520_v29 = vpop.f32.mrb[115].mxu1  ;;  %v4759_v31 = vpop.f32.mrb[129].mxu0 }
 0x37c   : > { %4596 = vst.msk [vmem:[#allocation4] sm:$0xff] %vm601_vm2, %v4580_v21  ;;  %v4581_v34 = vadd.f32 %v4520_v29, %v4388_v27  ;;  %v7040_v36 = vpop.f32.mrb[130].mxu0  ;;  %v4396_v21 = vld [vmem:[#allocation4 + $0x48] sm:$0xff] }
 0x37d   : > { %4599 = vst.msk [vmem:[#allocation4 + $0x18] sm:$0xff] %vm601_vm2, %v4583_v26  ;;  %v4762_v23 = vpop.f32.mrb[131].mxu0 }
 0x37e   : > { %4597 = vst.msk [vmem:[#allocation4 + $0x8] sm:$0xff] %vm601_vm2, %v4581_v34 }
 0x380   : > { %v7023_v40 = vpop.f32.mrb[116].mxu1 }
 0x381   : > { %v4586_v41 = vadd.f32 %v7023_v40, %v4393_v30  ;;  %v4533_v44 = vpop.f32.mrb[117].mxu1  ;;  %v4401_v30 = vld [vmem:[#allocation4 + $0x70] sm:$0xff] }
 0x382   : > { %v4630_v46 = vld [vmem:[#allocation4 + $0x10] sm:$0xff]  ;;  %v4584_v47 = vadd.f32 %v4533_v44, %v4391_v42  ;;  %v7024_v51 = vpop.f32.mrb[118].mxu1  ;;  %v7043_v53 = vpop.f32.mrb[132].mxu0  ;;  %v4399_v44 = vld [vmem:[#allocation4 + $0x60] sm:$0xff] }
 0x383   : > { %v4824_v54 = vadd.f32 %v7039_v25, %v4630_v46  ;;  %v4628_v32 = vld [vmem:[#allocation4] sm:$0xff]  ;;  %4602 = vst.msk [vmem:[#allocation4 + $0x30] sm:$0xff] %vm601_vm2, %v4586_v41  ;;  %v4587_v61 = vadd.f32 %v7024_v51, %v4394_v49  ;;  %v4536_v57 = vpop.f32.mrb[119].mxu1  ;;  %v4775_v33 = vpop.f32.mrb[133].mxu0 }
 0x384   : > { %v4822_v59 = vadd.f32 %v4759_v31, %v4628_v32  ;;  %v4631_v60 = vld [vmem:[#allocation4 + $0x18] sm:$0xff]  ;;  %4600 = vst.msk [vmem:[#allocation4 + $0x20] sm:$0xff] %vm601_vm2, %v4584_v47  ;;  %v4585_v62 = vadd.f32 %v4536_v57, %v4392_v9  ;;  %v7044_v38 = vpop.f32.mrb[134].mxu0 }
 0x385   : > { %4840 = vst.msk [vmem:[#allocation4 + $0x10] sm:$0xff] %vm601_vm2, %v4824_v54  ;;  %v4825_v63 = vadd.f32 %v7040_v36, %v4631_v60  ;;  %v4629_v0 = vld [vmem:[#allocation4 + $0x8] sm:$0xff]  ;;  %4603 = vst.msk [vmem:[#allocation4 + $0x38] sm:$0xff] %vm601_vm2, %v4587_v61  ;;  %v4778_v1 = vpop.f32.mrb[135].mxu0  ;;  %v4402_v54 = vld [vmem:[#allocation4 + $0x78] sm:$0xff] }
 0x386   : > { %4838 = vst.msk [vmem:[#allocation4] sm:$0xff] %vm601_vm2, %v4822_v59  ;;  %v4823_v3 = vadd.f32 %v4762_v23, %v4629_v0  ;;  %4601 = vst.msk [vmem:[#allocation4 + $0x28] sm:$0xff] %vm601_vm2, %v4585_v62  ;;  %v4400_v59 = vld [vmem:[#allocation4 + $0x68] sm:$0xff] }
 0x387   : > { %4841 = vst.msk [vmem:[#allocation4 + $0x18] sm:$0xff] %vm601_vm2, %v4825_v63 }
 0x388   : > { %4839 = vst.msk [vmem:[#allocation4 + $0x8] sm:$0xff] %vm601_vm2, %v4823_v3  ;;  %v7027_v6 = vpop.f32.mrb[120].mxu1 }
 0x389   : > { %v4590_v7 = vadd.f32 %v7027_v6, %v4397_v4  ;;  %v4549_v11 = vpop.f32.mrb[121].mxu1 }
 0x38a   : > { %v4634_v13 = vld [vmem:[#allocation4 + $0x30] sm:$0xff]  ;;  %v4588_v14 = vadd.f32 %v4549_v11, %v4395_v10  ;;  %v7028_v16 = vpop.f32.mrb[122].mxu1  ;;  %v7047_v17 = vpop.f32.mrb[136].mxu0 }
 0x38b   : > { %v4828_v18 = vadd.f32 %v7043_v53, %v4634_v13  ;;  %v4632_v19 = vld [vmem:[#allocation4 + $0x20] sm:$0xff]  ;;  %4606 = vst.msk [vmem:[#allocation4 + $0x50] sm:$0xff] %vm601_vm2, %v4590_v7  ;;  %v4591_v20 = vadd.f32 %v7028_v16, %v4398_v15  ;;  %v4552_v58 = vpop.f32.mrb[123].mxu1  ;;  %v4791_v24 = vpop.f32.mrb[137].mxu0 }
 0x38c   : > { %v4826_v25 = vadd.f32 %v4775_v33, %v4632_v19  ;;  %v4635_v26 = vld [vmem:[#allocation4 + $0x38] sm:$0xff]  ;;  %4604 = vst.msk [vmem:[#allocation4 + $0x40] sm:$0xff] %vm601_vm2, %v4588_v14  ;;  %v4589_v27 = vadd.f32 %v4552_v58, %v4396_v21  ;;  %v7048_v29 = vpop.f32.mrb[138].mxu0  ;;  %v4872_v4 = vld [vmem:[#allocation4 + $0x10] sm:$0xff] }
 0x38d   : > { %4844 = vst.msk [vmem:[#allocation4 + $0x30] sm:$0xff] %vm601_vm2, %v4828_v18  ;;  %v4829_v31 = vadd.f32 %v7044_v38, %v4635_v26  ;;  %v4633_v34 = vld [vmem:[#allocation4 + $0x28] sm:$0xff]  ;;  %4607 = vst.msk [vmem:[#allocation4 + $0x58] sm:$0xff] %vm601_vm2, %v4591_v20  ;;  %v4794_v36 = vpop.f32.mrb[139].mxu0  ;;  %v4870_v10 = vld [vmem:[#allocation4] sm:$0xff] }
 0x38e   : > { %4842 = vst.msk [vmem:[#allocation4 + $0x20] sm:$0xff] %vm601_vm2, %v4826_v25  ;;  %v4827_v23 = vadd.f32 %v4778_v1, %v4633_v34  ;;  %4605 = vst.msk [vmem:[#allocation4 + $0x48] sm:$0xff] %vm601_vm2, %v4589_v27  ;;  %v4873_v15 = vld [vmem:[#allocation4 + $0x18] sm:$0xff] }
 0x38f   : > { %4845 = vst.msk [vmem:[#allocation4 + $0x38] sm:$0xff] %vm601_vm2, %v4829_v31  ;;  %v4871_v21 = vld [vmem:[#allocation4 + $0x8] sm:$0xff] }
 0x390   : > { %4843 = vst.msk [vmem:[#allocation4 + $0x28] sm:$0xff] %vm601_vm2, %v4827_v23  ;;  %v7031_v40 = vpop.f32.mrb[124].mxu1 }
 0x391   : > { %v4594_v42 = vadd.f32 %v7031_v40, %v4401_v30  ;;  %v4565_v46 = vpop.f32.mrb[125].mxu1 }
 0x392   : > { %v4638_v41 = vld [vmem:[#allocation4 + $0x50] sm:$0xff]  ;;  %v7051_v47 = vpop.f32.mrb[140].mxu0  ;;  %v4592_v53 = vadd.f32 %v4565_v46, %v4399_v44  ;;  %v7032_v32 = vpop.f32.mrb[126].mxu1 }
 0x393   : > { %v4832_v49 = vadd.f32 %v7047_v17, %v4638_v41  ;;  %v4636_v51 = vld [vmem:[#allocation4 + $0x40] sm:$0xff]  ;;  %v4807_v61 = vpop.f32.mrb[141].mxu0  ;;  %4610 = vst.msk [vmem:[#allocation4 + $0x70] sm:$0xff] %vm601_vm2, %v4594_v42  ;;  %v4595_v33 = vadd.f32 %v7032_v32, %v4402_v54  ;;  %v4568_v60 = vpop.f32.mrb[127].mxu1 }
 0x394   : > { %v4830_v9 = vadd.f32 %v4791_v24, %v4636_v51  ;;  %v4639_v57 = vld [vmem:[#allocation4 + $0x58] sm:$0xff]  ;;  %v7052_v62 = vpop.f32.mrb[142].mxu0  ;;  %4608 = vst.msk [vmem:[#allocation4 + $0x60] sm:$0xff] %vm601_vm2, %v4592_v53  ;;  %v4593_v0 = vadd.f32 %v4568_v60, %v4400_v59  ;;  %v4876_v30 = vld [vmem:[#allocation4 + $0x30] sm:$0xff] }
 0x395   : > { %4848 = vst.msk [vmem:[#allocation4 + $0x50] sm:$0xff] %vm601_vm2, %v4832_v49  ;;  %v4833_v38 = vadd.f32 %v7048_v29, %v4639_v57  ;;  %v4637_v63 = vld [vmem:[#allocation4 + $0x48] sm:$0xff]  ;;  %v4810_v1 = vpop.f32.mrb[143].mxu0  ;;  %4611 = vst.msk [vmem:[#allocation4 + $0x78] sm:$0xff] %vm601_vm2, %v4595_v33  ;;  %v4874_v42 = vld [vmem:[#allocation4 + $0x20] sm:$0xff] }
 0x396   : > { %4846 = vst.msk [vmem:[#allocation4 + $0x40] sm:$0xff] %vm601_vm2, %v4830_v9  ;;  %v4831_v3 = vadd.f32 %v4794_v36, %v4637_v63  ;;  %4609 = vst.msk [vmem:[#allocation4 + $0x68] sm:$0xff] %vm601_vm2, %v4593_v0  ;;  %v4877_v49 = vld [vmem:[#allocation4 + $0x38] sm:$0xff] }
 0x397   : > { %4849 = vst.msk [vmem:[#allocation4 + $0x58] sm:$0xff] %vm601_vm2, %v4833_v38  ;;  %v4875_v9 = vld [vmem:[#allocation4 + $0x28] sm:$0xff] }
 0x398   : > { %4847 = vst.msk [vmem:[#allocation4 + $0x48] sm:$0xff] %vm601_vm2, %v4831_v3  ;;  %v7059_v6 = vpop.f32.mrb[128].mxu1 }
 0x399   : > { %v5066_v7 = vadd.f32 %v7059_v6, %v4872_v4  ;;  %v5001_v11 = vpop.f32.mrb[129].mxu1 }
 0x39a   : > { %v4642_v13 = vld [vmem:[#allocation4 + $0x70] sm:$0xff]  ;;  %v5064_v14 = vadd.f32 %v5001_v11, %v4870_v10  ;;  %v7060_v16 = vpop.f32.mrb[130].mxu1  ;;  %v7079_v17 = vpop.f32.mrb[144].mxu0 }
 0x39b   : > { %v4836_v18 = vadd.f32 %v7051_v47, %v4642_v13  ;;  %v4640_v19 = vld [vmem:[#allocation4 + $0x60] sm:$0xff]  ;;  %5082 = vst.msk [vmem:[#allocation4 + $0x10] sm:$0xff] %vm601_vm2, %v5066_v7  ;;  %v5067_v20 = vadd.f32 %v7060_v16, %v4873_v15  ;;  %v5004_v58 = vpop.f32.mrb[131].mxu1  ;;  %v5243_v24 = vpop.f32.mrb[145].mxu0 }
 0x39c   : > { %v4834_v25 = vadd.f32 %v4807_v61, %v4640_v19  ;;  %v4643_v26 = vld [vmem:[#allocation4 + $0x78] sm:$0xff]  ;;  %5080 = vst.msk [vmem:[#allocation4] sm:$0xff] %vm601_vm2, %v5064_v14  ;;  %v5065_v27 = vadd.f32 %v5004_v58, %v4871_v21  ;;  %v7080_v29 = vpop.f32.mrb[146].mxu0  ;;  %v4880_v4 = vld [vmem:[#allocation4 + $0x50] sm:$0xff] }
 0x39d   : > { %4852 = vst.msk [vmem:[#allocation4 + $0x70] sm:$0xff] %vm601_vm2, %v4836_v18  ;;  %v4837_v31 = vadd.f32 %v7052_v62, %v4643_v26  ;;  %v4641_v34 = vld [vmem:[#allocation4 + $0x68] sm:$0xff]  ;;  %5083 = vst.msk [vmem:[#allocation4 + $0x18] sm:$0xff] %vm601_vm2, %v5067_v20  ;;  %v5246_v36 = vpop.f32.mrb[147].mxu0  ;;  %v4878_v10 = vld [vmem:[#allocation4 + $0x40] sm:$0xff] }
 0x39e   : > { %4850 = vst.msk [vmem:[#allocation4 + $0x60] sm:$0xff] %vm601_vm2, %v4834_v25  ;;  %v4835_v23 = vadd.f32 %v4810_v1, %v4641_v34  ;;  %5081 = vst.msk [vmem:[#allocation4 + $0x8] sm:$0xff] %vm601_vm2, %v5065_v27  ;;  %v4881_v15 = vld [vmem:[#allocation4 + $0x58] sm:$0xff] }
 0x39f   : > { %4853 = vst.msk [vmem:[#allocation4 + $0x78] sm:$0xff] %vm601_vm2, %v4837_v31  ;;  %v4879_v21 = vld [vmem:[#allocation4 + $0x48] sm:$0xff] }
 0x3a0   : > { %4851 = vst.msk [vmem:[#allocation4 + $0x68] sm:$0xff] %vm601_vm2, %v4835_v23  ;;  %v7063_v40 = vpop.f32.mrb[132].mxu1 }
 0x3a1   : > { %v5070_v41 = vadd.f32 %v7063_v40, %v4876_v30  ;;  %v5017_v44 = vpop.f32.mrb[133].mxu1 }
 0x3a2   : > { %v5114_v46 = vld [vmem:[#allocation4 + $0x10] sm:$0xff]  ;;  %v5068_v47 = vadd.f32 %v5017_v44, %v4874_v42  ;;  %v7064_v51 = vpop.f32.mrb[134].mxu1  ;;  %v7083_v53 = vpop.f32.mrb[148].mxu0 }
 0x3a3   : > { %v5308_v54 = vadd.f32 %v7079_v17, %v5114_v46  ;;  %v5112_v32 = vld [vmem:[#allocation4] sm:$0xff]  ;;  %5086 = vst.msk [vmem:[#allocation4 + $0x30] sm:$0xff] %vm601_vm2, %v5070_v41  ;;  %v5071_v61 = vadd.f32 %v7064_v51, %v4877_v49  ;;  %v5020_v57 = vpop.f32.mrb[135].mxu1  ;;  %v5259_v33 = vpop.f32.mrb[149].mxu0 }
 0x3a4   : > { %v5306_v59 = vadd.f32 %v5243_v24, %v5112_v32  ;;  %v5115_v60 = vld [vmem:[#allocation4 + $0x18] sm:$0xff]  ;;  %5084 = vst.msk [vmem:[#allocation4 + $0x20] sm:$0xff] %vm601_vm2, %v5068_v47  ;;  %v5069_v62 = vadd.f32 %v5020_v57, %v4875_v9  ;;  %v7084_v38 = vpop.f32.mrb[150].mxu0  ;;  %v4884_v30 = vld [vmem:[#allocation4 + $0x70] sm:$0xff] }
 0x3a5   : > { %5324 = vst.msk [vmem:[#allocation4 + $0x10] sm:$0xff] %vm601_vm2, %v5308_v54  ;;  %v5309_v63 = vadd.f32 %v7080_v29, %v5115_v60  ;;  %v5113_v0 = vld [vmem:[#allocation4 + $0x8] sm:$0xff]  ;;  %5087 = vst.msk [vmem:[#allocation4 + $0x38] sm:$0xff] %vm601_vm2, %v5071_v61  ;;  %v5262_v1 = vpop.f32.mrb[151].mxu0  ;;  %v4882_v42 = vld [vmem:[#allocation4 + $0x60] sm:$0xff] }
 0x3a6   : > { %5322 = vst.msk [vmem:[#allocation4] sm:$0xff] %vm601_vm2, %v5306_v59  ;;  %v5307_v3 = vadd.f32 %v5246_v36, %v5113_v0  ;;  %5085 = vst.msk [vmem:[#allocation4 + $0x28] sm:$0xff] %vm601_vm2, %v5069_v62  ;;  %v4885_v49 = vld [vmem:[#allocation4 + $0x78] sm:$0xff] }
 0x3a7   : > { %5325 = vst.msk [vmem:[#allocation4 + $0x18] sm:$0xff] %vm601_vm2, %v5309_v63  ;;  %v4883_v9 = vld [vmem:[#allocation4 + $0x68] sm:$0xff] }
 0x3a8   : > { %5323 = vst.msk [vmem:[#allocation4 + $0x8] sm:$0xff] %vm601_vm2, %v5307_v3  ;;  %v7067_v6 = vpop.f32.mrb[136].mxu1 }
 0x3a9   : > { %v5074_v7 = vadd.f32 %v7067_v6, %v4880_v4  ;;  %v5033_v11 = vpop.f32.mrb[137].mxu1 }
 0x3aa   : > { %v5118_v13 = vld [vmem:[#allocation4 + $0x30] sm:$0xff]  ;;  %v5072_v14 = vadd.f32 %v5033_v11, %v4878_v10  ;;  %v7068_v16 = vpop.f32.mrb[138].mxu1  ;;  %v7087_v17 = vpop.f32.mrb[152].mxu0 }
 0x3ab   : > { %v5312_v18 = vadd.f32 %v7083_v53, %v5118_v13  ;;  %v5116_v19 = vld [vmem:[#allocation4 + $0x20] sm:$0xff]  ;;  %5090 = vst.msk [vmem:[#allocation4 + $0x50] sm:$0xff] %vm601_vm2, %v5074_v7  ;;  %v5075_v20 = vadd.f32 %v7068_v16, %v4881_v15  ;;  %v5036_v58 = vpop.f32.mrb[139].mxu1  ;;  %v5275_v24 = vpop.f32.mrb[153].mxu0 }
 0x3ac   : > { %v5310_v25 = vadd.f32 %v5259_v33, %v5116_v19  ;;  %v5119_v26 = vld [vmem:[#allocation4 + $0x38] sm:$0xff]  ;;  %5088 = vst.msk [vmem:[#allocation4 + $0x40] sm:$0xff] %vm601_vm2, %v5072_v14  ;;  %v5073_v27 = vadd.f32 %v5036_v58, %v4879_v21  ;;  %v7088_v29 = vpop.f32.mrb[154].mxu0  ;;  %v5356_v4 = vld [vmem:[#allocation4 + $0x10] sm:$0xff] }
 0x3ad   : > { %5328 = vst.msk [vmem:[#allocation4 + $0x30] sm:$0xff] %vm601_vm2, %v5312_v18  ;;  %v5313_v31 = vadd.f32 %v7084_v38, %v5119_v26  ;;  %v5117_v34 = vld [vmem:[#allocation4 + $0x28] sm:$0xff]  ;;  %5091 = vst.msk [vmem:[#allocation4 + $0x58] sm:$0xff] %vm601_vm2, %v5075_v20  ;;  %v5278_v36 = vpop.f32.mrb[155].mxu0  ;;  %v5354_v10 = vld [vmem:[#allocation4] sm:$0xff] }
 0x3ae   : > { %5326 = vst.msk [vmem:[#allocation4 + $0x20] sm:$0xff] %vm601_vm2, %v5310_v25  ;;  %v5311_v23 = vadd.f32 %v5262_v1, %v5117_v34  ;;  %5089 = vst.msk [vmem:[#allocation4 + $0x48] sm:$0xff] %vm601_vm2, %v5073_v27  ;;  %v5357_v15 = vld [vmem:[#allocation4 + $0x18] sm:$0xff] }
 0x3af   : > { %5329 = vst.msk [vmem:[#allocation4 + $0x38] sm:$0xff] %vm601_vm2, %v5313_v31  ;;  %v5355_v20 = vld [vmem:[#allocation4 + $0x8] sm:$0xff] }
 0x3b0   : > { %5327 = vst.msk [vmem:[#allocation4 + $0x28] sm:$0xff] %vm601_vm2, %v5311_v23  ;;  %v7071_v40 = vpop.f32.mrb[140].mxu1 }
 0x3b1   : > { %v5078_v41 = vadd.f32 %v7071_v40, %v4884_v30  ;;  %v5049_v44 = vpop.f32.mrb[141].mxu1 }
 0x3b2   : > { %v5122_v46 = vld [vmem:[#allocation4 + $0x50] sm:$0xff]  ;;  %v5076_v47 = vadd.f32 %v5049_v44, %v4882_v42  ;;  %v7072_v51 = vpop.f32.mrb[142].mxu1  ;;  %v7091_v53 = vpop.f32.mrb[156].mxu0 }
 0x3b3   : > { %v5316_v54 = vadd.f32 %v7087_v17, %v5122_v46  ;;  %v5120_v32 = vld [vmem:[#allocation4 + $0x40] sm:$0xff]  ;;  %5094 = vst.msk [vmem:[#allocation4 + $0x70] sm:$0xff] %vm601_vm2, %v5078_v41  ;;  %v5079_v61 = vadd.f32 %v7072_v51, %v4885_v49  ;;  %v5052_v57 = vpop.f32.mrb[143].mxu1  ;;  %v5291_v33 = vpop.f32.mrb[157].mxu0 }
 0x3b4   : > { %v5314_v59 = vadd.f32 %v5275_v24, %v5120_v32  ;;  %v5123_v60 = vld [vmem:[#allocation4 + $0x58] sm:$0xff]  ;;  %5092 = vst.msk [vmem:[#allocation4 + $0x60] sm:$0xff] %vm601_vm2, %v5076_v47  ;;  %v5077_v62 = vadd.f32 %v5052_v57, %v4883_v9  ;;  %v7092_v38 = vpop.f32.mrb[158].mxu0  ;;  %v5360_v31 = vld [vmem:[#allocation4 + $0x30] sm:$0xff] }
 0x3b5   : > { %5332 = vst.msk [vmem:[#allocation4 + $0x50] sm:$0xff] %vm601_vm2, %v5316_v54  ;;  %v5317_v63 = vadd.f32 %v7088_v29, %v5123_v60  ;;  %v5121_v0 = vld [vmem:[#allocation4 + $0x48] sm:$0xff]  ;;  %5095 = vst.msk [vmem:[#allocation4 + $0x78] sm:$0xff] %vm601_vm2, %v5079_v61  ;;  %v5294_v1 = vpop.f32.mrb[159].mxu0  ;;  %v5358_v23 = vld [vmem:[#allocation4 + $0x20] sm:$0xff]  ;;  %v5614_v60 = vsub.f32 1.0, %v8443_v43 }
 0x3b6   : > { %5330 = vst.msk [vmem:[#allocation4 + $0x40] sm:$0xff] %vm601_vm2, %v5314_v59  ;;  %v5315_v3 = vadd.f32 %v5278_v36, %v5121_v0  ;;  %5093 = vst.msk [vmem:[#allocation4 + $0x68] sm:$0xff] %vm601_vm2, %v5077_v62  ;;  %v5361_v42 = vld [vmem:[#allocation4 + $0x38] sm:$0xff] }
 0x3b7   : > { %5333 = vst.msk [vmem:[#allocation4 + $0x58] sm:$0xff] %vm601_vm2, %v5317_v63  ;;  %v5359_v49 = vld [vmem:[#allocation4 + $0x28] sm:$0xff] }
 0x3b8   : > { %5331 = vst.msk [vmem:[#allocation4 + $0x48] sm:$0xff] %vm601_vm2, %v5315_v3  ;;  %v7099_v6 = vpop.f32.mrb[144].mxu1 }
 0x3b9   : > { %v5550_v7 = vadd.f32 %v7099_v6, %v5356_v4  ;;  %v5485_v11 = vpop.f32.mrb[145].mxu1 }
 0x3ba   : > { %v5126_v13 = vld [vmem:[#allocation4 + $0x70] sm:$0xff]  ;;  %v5548_v14 = vadd.f32 %v5485_v11, %v5354_v10  ;;  %v7100_v16 = vpop.f32.mrb[146].mxu1  ;;  %v5615_v10 = vsub.f32 1.0, %v8447_v48 }
 0x3bb   : > { %v5320_v17 = vadd.f32 %v7091_v53, %v5126_v13  ;;  %v5124_v18 = vld [vmem:[#allocation4 + $0x60] sm:$0xff]  ;;  %5566 = vst.msk [vmem:[#allocation4 + $0x10] sm:$0xff] %vm601_vm2, %v5550_v7  ;;  %v5551_v19 = vadd.f32 %v7100_v16, %v5357_v15  ;;  %v5488_v21 = vpop.f32.mrb[147].mxu1  ;;  %v5613_v15 = vsub.f32 1.0, %v8451_v52 }
 0x3bc   : > { %v5318_v58 = vadd.f32 %v5291_v33, %v5124_v18  ;;  %v5127_v24 = vld [vmem:[#allocation4 + $0x78] sm:$0xff]  ;;  %5564 = vst.msk [vmem:[#allocation4] sm:$0xff] %vm601_vm2, %v5548_v14  ;;  %v5549_v25 = vadd.f32 %v5488_v21, %v5355_v20  ;;  %v5364_v61 = vld [vmem:[#allocation4 + $0x50] sm:$0xff] }
 0x3bd   : > { %5336 = vst.msk [vmem:[#allocation4 + $0x70] sm:$0xff] %vm601_vm2, %v5320_v17  ;;  %v5321_v26 = vadd.f32 %v7092_v38, %v5127_v24  ;;  %v5125_v27 = vld [vmem:[#allocation4 + $0x68] sm:$0xff]  ;;  %5567 = vst.msk [vmem:[#allocation4 + $0x18] sm:$0xff] %vm601_vm2, %v5551_v19  ;;  %v5362_v33 = vld [vmem:[#allocation4 + $0x40] sm:$0xff] }
 0x3be   : > { %5334 = vst.msk [vmem:[#allocation4 + $0x60] sm:$0xff] %vm601_vm2, %v5318_v58  ;;  %v5319_v29 = vadd.f32 %v5294_v1, %v5125_v27  ;;  %5565 = vst.msk [vmem:[#allocation4 + $0x8] sm:$0xff] %vm601_vm2, %v5549_v25  ;;  %v5365_v63 = vld [vmem:[#allocation4 + $0x58] sm:$0xff]  ;;  %v5612_v1 = vsub.f32 1.0, %v8445_v45  ;;  %v7457_v18 = vld [vmem:[%s7879_s20 + $0x10] sm:$0xff] }
 0x3bf   : > { %5337 = vst.msk [vmem:[#allocation4 + $0x78] sm:$0xff] %vm601_vm2, %v5321_v26  ;;  %v5363_v6 = vld [vmem:[#allocation4 + $0x48] sm:$0xff]  ;;  %v5630_v19 = vmul.f32 %v7457_v18, %v5614_v60  ;;  %v7458_v58 = vld [vmem:[%s7879_s20] sm:$0xff]  ;;  %v7459_v27 = vld [vmem:[%s7879_s20 + $0x18] sm:$0xff] }
 0x3c0   : > { %5335 = vst.msk [vmem:[#allocation4 + $0x68] sm:$0xff] %vm601_vm2, %v5319_v29  ;;  %v7103_v34 = vpop.f32.mrb[148].mxu1  ;;  %v5628_v24 = vmul.f32 %v7458_v58, %v5612_v1  ;;  %v5631_v29 = vmul.f32 %v7459_v27, %v5615_v10  ;;  %v7461_v1 = vld [vmem:[%s7879_s20 + $0x30] sm:$0xff]  ;;  %v7464_v18 = vld [vmem:[%s7879_s20 + $0x28] sm:$0xff] }
 0x3c1   : > { %v5554_v36 = vadd.f32 %v7103_v34, %v5360_v31  ;;  %v5501_v30 = vpop.f32.mrb[149].mxu1 }
 0x3c2   : > { %v5582_v40 = vld [vmem:[#allocation4 + $0x10] sm:$0xff]  ;;  %v5552_v41 = vadd.f32 %v5501_v30, %v5358_v23  ;;  %v7104_v44 = vpop.f32.mrb[150].mxu1  ;;  %v7460_v30 = vld [vmem:[%s7879_s20 + $0x8] sm:$0xff] }
 0x3c3   : > { %7419 = vtanh.f32 %v5582_v40  ;;  %v5580_v46 = vld [vmem:[#allocation4] sm:$0xff]  ;;  %5570 = vst.msk [vmem:[#allocation4 + $0x30] sm:$0xff] %vm601_vm2, %v5554_v36  ;;  %v5555_v47 = vadd.f32 %v7104_v44, %v5361_v42  ;;  %v5504_v51 = vpop.f32.mrb[151].mxu1  ;;  %v5629_v40 = vmul.f32 %v7460_v30, %v5613_v15 }
 0x3c4   : > { %7421 = vtanh.f32 %v5580_v46  ;;  %v5583_v53 = vld [vmem:[#allocation4 + $0x18] sm:$0xff]  ;;  %5568 = vst.msk [vmem:[#allocation4 + $0x20] sm:$0xff] %vm601_vm2, %v5552_v41  ;;  %v5553_v54 = vadd.f32 %v5504_v51, %v5359_v49  ;;  %v5368_v36 = vld [vmem:[#allocation4 + $0x70] sm:$0xff] }
 0x3c5   : > { %7423 = vtanh.f32 %v5583_v53  ;;  %v5581_v32 = vld [vmem:[#allocation4 + $0x8] sm:$0xff]  ;;  %5571 = vst.msk [vmem:[#allocation4 + $0x38] sm:$0xff] %vm601_vm2, %v5555_v47  ;;  %v5366_v44 = vld [vmem:[#allocation4 + $0x60] sm:$0xff]  ;;  %v5618_v47 = vsub.f32 1.0, %v8468_v2 }
 0x3c6   : > { %7425 = vtanh.f32 %v5581_v32  ;;  %5569 = vst.msk [vmem:[#allocation4 + $0x28] sm:$0xff] %vm601_vm2, %v5553_v54  ;;  %v5369_v51 = vld [vmem:[#allocation4 + $0x78] sm:$0xff]  ;;  %v5616_v54 = vsub.f32 1.0, %v8471_v5 }
 0x3c8   : > { %v7107_v9 = vpop.f32.mrb[152].mxu1 }
 0x3c9   : > { %v5558_v57 = vadd.f32 %v7107_v9, %v5364_v61  ;;  %v5517_v59 = vpop.f32.mrb[153].mxu1  ;;  %v5367_v9 = vld [vmem:[#allocation4 + $0x68] sm:$0xff] }
 0x3ca   : > { %v5586_v62 = vld [vmem:[#allocation4 + $0x30] sm:$0xff]  ;;  %v5556_v38 = vadd.f32 %v5517_v59, %v5362_v33  ;;  %v7108_v0 = vpop.f32.mrb[154].mxu1  ;;  %v5619_v33 = vsub.f32 1.0, %v8473_v8 }
 0x3cb   : > { %7427 = vtanh.f32 %v5586_v62  ;;  %v5584_v3 = vld [vmem:[#allocation4 + $0x20] sm:$0xff]  ;;  %5574 = vst.msk [vmem:[#allocation4 + $0x50] sm:$0xff] %vm601_vm2, %v5558_v57  ;;  %v5559_v4 = vadd.f32 %v7108_v0, %v5365_v63  ;;  %v5520_v7 = vpop.f32.mrb[155].mxu1 }
 0x3cc   : > { %7429 = vtanh.f32 %v5584_v3  ;;  %v5587_v11 = vld [vmem:[#allocation4 + $0x38] sm:$0xff]  ;;  %5572 = vst.msk [vmem:[#allocation4 + $0x40] sm:$0xff] %vm601_vm2, %v5556_v38  ;;  %v5557_v13 = vadd.f32 %v5520_v7, %v5363_v6  ;;  %v5617_v38 = vsub.f32 1.0, %v8478_v12  ;;  %v5634_v3 = vmul.f32 %v7461_v1, %v5618_v47  ;;  %v7462_v7 = vld [vmem:[%s7879_s20 + $0x20] sm:$0xff] }
 0x3cd   : > { %v7420_v14 = vpop.eup %7419  ;;  %7431 = vtanh.f32 %v5587_v11  ;;  %v5585_v16 = vld [vmem:[#allocation4 + $0x28] sm:$0xff]  ;;  %5575 = vst.msk [vmem:[#allocation4 + $0x58] sm:$0xff] %vm601_vm2, %v5559_v4  ;;  %v5632_v10 = vmul.f32 %v7462_v7, %v5616_v54  ;;  %v5626_v54 = vsub.f32 1.0, %v8512_v56  ;;  %v7471_v1 = vld [vmem:[%s7879_s20 + $0x78] sm:$0xff] }
 0x3ce   : > { %v7422_v17 = vpop.eup %7421  ;;  %v5646_v20 = vmul.f32 %v7420_v14, %v8443_v43  ;;  %7433 = vtanh.f32 %v5585_v16  ;;  %5573 = vst.msk [vmem:[#allocation4 + $0x48] sm:$0xff] %vm601_vm2, %v5557_v13  ;;  %v7463_v14 = vld [vmem:[%s7879_s20 + $0x38] sm:$0xff]  ;;  %v7472_v7 = vld [vmem:[%s7879_s20 + $0x68] sm:$0xff] }
 0x3cf   : > { %v7424_v21 = vpop.eup %7423  ;;  %v5644_v25 = vmul.f32 %v7422_v17, %v8445_v45  ;;  %v5635_v15 = vmul.f32 %v7463_v14, %v5619_v33 }
 0x3d0   : > { %v7426_v26 = vpop.eup %7425  ;;  %v5662_v31 = vadd.f32 %v5646_v20, %v5630_v19  ;;  %v5647_v34 = vmul.f32 %v7424_v21, %v8447_v48  ;;  %v7111_v23 = vpop.f32.mrb[156].mxu1  ;;  %v5633_v19 = vmul.f32 %v7464_v18, %v5617_v38  ;;  %v5622_v21 = vsub.f32 1.0, %v8488_v28 }
 0x3d1   : > { %v5660_v43 = vadd.f32 %v5644_v25, %v5628_v24  ;;  %v5645_v41 = vmul.f32 %v7426_v26, %v8451_v52  ;;  %v5562_v42 = vadd.f32 %v7111_v23, %v5368_v36  ;;  %v5533_v46 = vpop.f32.mrb[157].mxu1  ;;  %v5623_v26 = vsub.f32 1.0, %v8494_v39  ;;  %v7465_v36 = vld [vmem:[%s7879_s20 + $0x50] sm:$0xff] }
 0x3d2   : > { %5678 = vst.msk [vmem:[%s8681_s15 + $0x10] sm:$0xff] %vm601_vm2, %v5662_v31  ;;  %v5663_v45 = vadd.f32 %v5647_v34, %v5631_v29  ;;  %v5590_v48 = vld [vmem:[#allocation4 + $0x50] sm:$0xff]  ;;  %v5560_v49 = vadd.f32 %v5533_v46, %v5366_v44  ;;  %v7112_v53 = vpop.f32.mrb[158].mxu1  ;;  %v5621_v29 = vsub.f32 1.0, %v8492_v35  ;;  %v5638_v23 = vmul.f32 %v7465_v36, %v5622_v21  ;;  %v7467_v46 = vld [vmem:[%s7879_s20 + $0x58] sm:$0xff] }
 0x3d3   : > { %5676 = vst.msk [vmem:[%s8681_s15] sm:$0xff] %vm601_vm2, %v5660_v43  ;;  %v5661_v52 = vadd.f32 %v5645_v41, %v5629_v40  ;;  %7435 = vtanh.f32 %v5590_v48  ;;  %v5588_v32 = vld [vmem:[#allocation4 + $0x40] sm:$0xff]  ;;  %5578 = vst.msk [vmem:[#allocation4 + $0x70] sm:$0xff] %vm601_vm2, %v5562_v42  ;;  %v5563_v61 = vadd.f32 %v7112_v53, %v5369_v51  ;;  %v5536_v57 = vpop.f32.mrb[159].mxu1  ;;  %v5639_v47 = vmul.f32 %v7467_v46, %v5623_v26 }
 0x3d4   : > { %5679 = vst.msk [vmem:[%s8681_s15 + $0x18] sm:$0xff] %vm601_vm2, %v5663_v45  ;;  %7437 = vtanh.f32 %v5588_v32  ;;  %v5591_v59 = vld [vmem:[#allocation4 + $0x58] sm:$0xff]  ;;  %5576 = vst.msk [vmem:[#allocation4 + $0x60] sm:$0xff] %vm601_vm2, %v5560_v49  ;;  %v5561_v60 = vadd.f32 %v5536_v57, %v5367_v9  ;;  %v7466_v43 = vld [vmem:[%s7879_s20 + $0x40] sm:$0xff] }
 0x3d5   : > { %v7428_v62 = vpop.eup %7427  ;;  %5677 = vst.msk [vmem:[%s8681_s15 + $0x8] sm:$0xff] %vm601_vm2, %v5661_v52  ;;  %7439 = vtanh.f32 %v5591_v59  ;;  %v5589_v63 = vld [vmem:[#allocation4 + $0x48] sm:$0xff]  ;;  %5579 = vst.msk [vmem:[#allocation4 + $0x78] sm:$0xff] %vm601_vm2, %v5563_v61  ;;  %v5624_v52 = vsub.f32 1.0, %v8502_v50  ;;  %v7469_v57 = vld [vmem:[%s7879_s20 + $0x70] sm:$0xff] }
 0x3d6   : > { %v7430_v0 = vpop.eup %7429  ;;  %v5650_v4 = vmul.f32 %v7428_v62, %v8468_v2  ;;  %7441 = vtanh.f32 %v5589_v63  ;;  %5577 = vst.msk [vmem:[#allocation4 + $0x68] sm:$0xff] %vm601_vm2, %v5561_v60  ;;  %v7468_v49 = vld [vmem:[%s7879_s20 + $0x48] sm:$0xff]  ;;  %v5642_v33 = vmul.f32 %v7469_v57, %v5626_v54  ;;  %v7470_v62 = vld [vmem:[%s7879_s20 + $0x60] sm:$0xff]  ;;  %s6434_s20 = sshll.u32 (%p7629_p6), %s5700_s17, 3 }
 0x3d7   : > { %v7432_v6 = vpop.eup %7431  ;;  %v5648_v11 = vmul.f32 %v7430_v0, %v8471_v5  ;;  %v5620_v5 = vsub.f32 1.0, %v8486_v22  ;;  %v5637_v51 = vmul.f32 %v7468_v49, %v5621_v29  ;;  %v5640_v38 = vmul.f32 %v7470_v62, %v5624_v52  ;;  %s5702_s24 = scalar_lea.vmem (%p7629_p6), %s8806_s8, %s6434_s20 }
 0x3d8   : > { %v7434_v13 = vpop.eup %7433  ;;  %v5666_v16 = vadd.f32 %v5650_v4, %v5634_v3  ;;  %v5651_v17 = vmul.f32 %v7432_v6, %v8473_v8 }
 0x3d9   : > { %v5664_v2 = vadd.f32 %v5648_v11, %v5632_v10  ;;  %v5649_v20 = vmul.f32 %v7434_v13, %v8478_v12  ;;  %v5636_v41 = vmul.f32 %v7466_v43, %v5620_v5 }
 0x3da   : > { %5682 = vst.msk [vmem:[%s8681_s15 + $0x30] sm:$0xff] %vm601_vm2, %v5666_v16  ;;  %v5667_v58 = vadd.f32 %v5651_v17, %v5635_v15  ;;  %v5594_v24 = vld [vmem:[#allocation4 + $0x70] sm:$0xff] }
 0x3db   : > { %5680 = vst.msk [vmem:[%s8681_s15 + $0x20] sm:$0xff] %vm601_vm2, %v5664_v2  ;;  %v5665_v25 = vadd.f32 %v5649_v20, %v5633_v19  ;;  %7443 = vtanh.f32 %v5594_v24  ;;  %v5592_v8 = vld [vmem:[#allocation4 + $0x60] sm:$0xff]  ;;  %v5766_v15 = vld [vmem:[%s8681_s15 + $0x18] sm:$0xff] (%p7629_p6) }
 0x3dc   : > { %5683 = vst.msk [vmem:[%s8681_s15 + $0x38] sm:$0xff] %vm601_vm2, %v5667_v58  ;;  %7445 = vtanh.f32 %v5592_v8  ;;  %v5595_v12 = vld [vmem:[#allocation4 + $0x78] sm:$0xff]  ;;  %5767 = vst [vmem:[%s5702_s24 + $0x30] sm:$0xff] (%p7629_p6), %v5766_v15 }
 0x3dd   : > { %v7436_v27 = vpop.eup %7435  ;;  %5681 = vst.msk [vmem:[%s8681_s15 + $0x28] sm:$0xff] %vm601_vm2, %v5665_v25  ;;  %7447 = vtanh.f32 %v5595_v12  ;;  %v5593_v31 = vld [vmem:[#allocation4 + $0x68] sm:$0xff] }
 0x3de   : > { %v7438_v34 = vpop.eup %7437  ;;  %v5654_v30 = vmul.f32 %v7436_v27, %v8488_v28  ;;  %7449 = vtanh.f32 %v5593_v31 }
 0x3df   : > { %v7440_v40 = vpop.eup %7439  ;;  %v5652_v42 = vmul.f32 %v7438_v34, %v8486_v22 }
 0x3e0   : > { %v7442_v44 = vpop.eup %7441  ;;  %v5670_v45 = vadd.f32 %v5654_v30, %v5638_v23  ;;  %v5655_v48 = vmul.f32 %v7440_v40, %v8494_v39  ;;  %v5627_v39 = vsub.f32 1.0, %v8519_v37 }
 0x3e1   : > { %v5668_v28 = vadd.f32 %v5652_v42, %v5636_v41  ;;  %v5653_v53 = vmul.f32 %v7442_v44, %v8492_v35  ;;  %v5625_v35 = vsub.f32 1.0, %v8506_v55  ;;  %v5772_v18 = vld [vmem:[%s8681_s15 + $0x30] sm:$0xff] (%p7629_p6) }
 0x3e2   : > { %5686 = vst.msk [vmem:[%s8681_s15 + $0x50] sm:$0xff] %vm601_vm2, %v5670_v45  ;;  %v5671_v22 = vadd.f32 %v5655_v48, %v5639_v47  ;;  %v5643_v3 = vmul.f32 %v7471_v1, %v5627_v39  ;;  %v5768_v16 = vld [vmem:[%s8681_s15 + $0x20] sm:$0xff] (%p7629_p6)  ;;  %5773 = vst [vmem:[%s5702_s24 + $0x60] sm:$0xff] (%p7629_p6), %v5772_v18 }
 0x3e3   : > { %5684 = vst.msk [vmem:[%s8681_s15 + $0x40] sm:$0xff] %vm601_vm2, %v5668_v28  ;;  %v5669_v32 = vadd.f32 %v5653_v53, %v5637_v51  ;;  %v5641_v10 = vmul.f32 %v7472_v7, %v5625_v35  ;;  %v5774_v19 = vld [vmem:[%s8681_s15 + $0x38] sm:$0xff] (%p7629_p6)  ;;  %5769 = vst [vmem:[%s5702_s24 + $0x40] sm:$0xff] (%p7629_p6), %v5768_v16 }
 0x3e4   : > { %5687 = vst.msk [vmem:[%s8681_s15 + $0x58] sm:$0xff] %vm601_vm2, %v5671_v22  ;;  %v5770_v17 = vld [vmem:[%s8681_s15 + $0x28] sm:$0xff] (%p7629_p6)  ;;  %5775 = vst [vmem:[%s5702_s24 + $0x70] sm:$0xff] (%p7629_p6), %v5774_v19 }
 0x3e5   : > { %v7444_v61 = vpop.eup %7443  ;;  %5685 = vst.msk [vmem:[%s8681_s15 + $0x48] sm:$0xff] %vm601_vm2, %v5669_v32  ;;  %5771 = vst [vmem:[%s5702_s24 + $0x50] sm:$0xff] (%p7629_p6), %v5770_v17 }
 0x3e6   : > { %v7446_v9 = vpop.eup %7445  ;;  %v5658_v59 = vmul.f32 %v7444_v61, %v8512_v56 }
 0x3e7   : > { %v7448_v60 = vpop.eup %7447  ;;  %v5656_v63 = vmul.f32 %v7446_v9, %v8502_v50  ;;  %5698 = sbr.rel (!%p7629_p6) target bundleno = 1014 (0x3f6), region = 135  ;;  %v5760_v50 = vld [vmem:[%s8681_s15] sm:$0xff] (%p7629_p6) }
 0x3e8   : > { %v7450_v0 = vpop.eup %7449  ;;  %v5674_v4 = vadd.f32 %v5658_v59, %v5642_v33  ;;  %v5659_v6 = vmul.f32 %v7448_v60, %v8519_v37  ;;  %v5764_v37 = vld [vmem:[%s8681_s15 + $0x10] sm:$0xff] (%p7629_p6)  ;;  %5761 = vst [vmem:[%s5702_s24] sm:$0xff] (%p7629_p6), %v5760_v50 }
 0x3e9   : > { %v5672_v11 = vadd.f32 %v5656_v63, %v5640_v38  ;;  %v5657_v13 = vmul.f32 %v7450_v0, %v8506_v55  ;;  %v5762_v55 = vld [vmem:[%s8681_s15 + $0x8] sm:$0xff] (%p7629_p6)  ;;  %v5780_v21 = vld [vmem:[%s8681_s15 + $0x50] sm:$0xff] (%p7629_p6)  ;;  %5765 = vst [vmem:[%s5702_s24 + $0x20] sm:$0xff] (%p7629_p6), %v5764_v37 }
 0x3ea   : > { %5690 = vst.msk [vmem:[%s8681_s15 + $0x70] sm:$0xff] %vm601_vm2, %v5674_v4  ;;  %v5675_v56 = vadd.f32 %v5659_v6, %v5643_v3  ;;  %v5776_v2 = vld [vmem:[%s8681_s15 + $0x40] sm:$0xff] (%p7629_p6)  ;;  %5763 = vst [vmem:[%s5702_s24 + $0x10] sm:$0xff] (%p7629_p6), %v5762_v55 }
 0x3eb   : > { %5688 = vst.msk [vmem:[%s8681_s15 + $0x60] sm:$0xff] %vm601_vm2, %v5672_v11  ;;  %v5673_v14 = vadd.f32 %v5657_v13, %v5641_v10  ;;  %v5782_v58 = vld [vmem:[%s8681_s15 + $0x58] sm:$0xff] (%p7629_p6)  ;;  %5777 = vst [vmem:[%s5702_s24 + $0x80] sm:$0xff] (%p7629_p6), %v5776_v2 }
 0x3ec   : > { %5691 = vst.msk [vmem:[%s8681_s15 + $0x78] sm:$0xff] %vm601_vm2, %v5675_v56  ;;  %v5778_v20 = vld [vmem:[%s8681_s15 + $0x48] sm:$0xff] (%p7629_p6)  ;;  %5781 = vst [vmem:[%s5702_s24 + $0xa0] sm:$0xff] (%p7629_p6), %v5780_v21 }
 0x3ed   : > { %5689 = vst.msk [vmem:[%s8681_s15 + $0x68] sm:$0xff] %vm601_vm2, %v5673_v14  ;;  %5779 = vst [vmem:[%s5702_s24 + $0x90] sm:$0xff] (%p7629_p6), %v5778_v20 }
 0x3ee   : > { %5783 = vst [vmem:[%s5702_s24 + $0xb0] sm:$0xff] %v5782_v58 }
 0x3f1   : > { %v5788_v25 = vld [vmem:[%s8681_s15 + $0x70] sm:$0xff] }
 0x3f2   : > { %v5784_v24 = vld [vmem:[%s8681_s15 + $0x60] sm:$0xff]  ;;  %5789 = vst [vmem:[%s5702_s24 + $0xe0] sm:$0xff] %v5788_v25 }
 0x3f3   : > { %5785 = vst [vmem:[%s5702_s24 + $0xc0] sm:$0xff] %v5784_v24  ;;  %v5790_v8 = vld [vmem:[%s8681_s15 + $0x78] sm:$0xff] }
 0x3f4   : > { %v5786_v5 = vld [vmem:[%s8681_s15 + $0x68] sm:$0xff]  ;;  %5791 = vst [vmem:[%s5702_s24 + $0xf0] sm:$0xff] %v5790_v8 }
 0x3f5   : > { %5787 = vst [vmem:[%s5702_s24 + $0xd0] sm:$0xff] %v5786_v5 }
 0x3f6 PF: > { %s18_s11 = sadd.s32 1, %s7527_s11   ;;  %s8809_s27 = smov %s7507_s28 }
 0x3f7   : > { %p15_p12 = scmp.ge.s32.totalorder %s18_s11, 6   ;;  %s8810_s28 = smov %s7637_s21 }
 0x3f8   : > { %s8811_s29 = smov %s7519_s9  ;;  %s8812_s30 = smov %s7523_s10 }
 0x3f9   : > { %s8813_s9 = smov %s8816_s12  ;;  %s8814_s10 = smov %s8820_s13 }
 0x3fa   :  { %17 = sbr.rel (!%p15_p12) target bundleno = 4 (0x4), region = 237 }

// kernel: sepconv_gru.3
= control target key start
LH: loop header
LB: loop body
LE: loop exit
PB: predicated region body
PF: predicated region fallthrough
CT: control target
= control target key end

     0   :  { %s8808_s0 = inlined_call_operand.hbm [shape: f32[2,16,16,32], index: 0, kind: input, shape index: {}, may-alias: {0,8}]   ;;  %s8809_s1 = inlined_call_operand.vmem [shape: bf16[2,20,16,64], index: 1, kind: input, shape index: {}]   ;;  %s8810_s2 = inlined_call_operand.vmem [shape: bf16[5,64,64], index: 2, kind: input, shape index: {}]   ;;  %s8811_s3 = inlined_call_operand.vmem [shape: bf16[5,64,32], index: 3, kind: input, shape index: {}]   ;;  %s8812_s4 = inlined_call_operand.vmem [shape: bf16[5,32,64], index: 4, kind: input, shape index: {}]   ;;  %s8813_s5 = inlined_call_operand.vmem [shape: bf16[5,32,32], index: 5, kind: input, shape index: {}]   ;;  %s8814_s6 = inlined_call_operand.vmem [shape: f32[1,64], index: 6, kind: input, shape index: {}]   ;;  %s8815_s7 = inlined_call_operand.vmem [shape: f32[1,32], index: 7, kind: input, shape index: {}]   ;;  %s8816_s8 = inlined_call_operand.hbm [shape: f32[2,16,16,32], index: 8, kind: output, shape index: {}, may-alias: {0,8}]  }
   0x1   :  { %8823 = sst [smem:[#allocation18_spill]] %s8808_s0 }
   0x2   :  { %13 = vsyncpa [#allocation6], 0 }
   0x3   :  { %15 = vsyncpa [#allocation6 + $0x1], 0 }
   0x4   :  { %16 = vsyncpa [#allocation7], 0 }
   0x5   :  { %18 = vsyncpa [#allocation7 + $0x1], 0  ;;  %s7537_s27 = smov 0   ;;  %s7539_s28 = smov 0  }
   0x6   :  { %s7541_s29 = smov 0   ;;  %s7543_s30 = smov 0  }
   0x7   :  { %s7545_s9 = smov 0   ;;  %s7547_s10 = smov 0  }
   0x8   :  { %s7549_s11 = smov 0   ;;  %s7551_s12 = smov 0  }
   0x9 LB: > { %8824 = sst [smem:[#allocation12_spill]] %s7451_s27  ;;  %s5744_s13 = sadd.s32 4294967295, %s7479_s12   ;;  %s7479_s12 = sphi %s7551_s12, %s24_s12   ;;  %s7475_s11 = sphi %s7549_s11, %s8848_s11   ;;  %s7471_s10 = sphi %s7547_s10, %s8847_s10   ;;  %s7467_s9 = sphi %s7545_s9, %s8846_s9   ;;  %s7463_s30 = sphi %s7543_s30, %s8845_s30   ;;  %s7459_s29 = sphi %s7541_s29, %s8840_s29   ;;  %s7455_s28 = sphi %s7539_s28, %s8844_s28   ;;  %s7451_s27 = sphi %s7537_s27, %s8843_s27  }
   0xa   : > { %8825 = sst [smem:[#allocation13_spill]] %s7459_s29  ;;  %s5745_s14 = sadd.s32 4294967294, %s7479_s12  }
   0xb   : > { %s33_s15 = sadd.s32 1, %s7471_s10  ;;  %s36_s16 = sadd.s32 1, %s7475_s11 }
   0xc   : > { %p34_p0 = scmp.ge.s32.totalorder %s33_s15, 2  ;;  %p52_p1 = scmp.ne.s32.totalorder %s7459_s29, %s7455_s28 }
   0xd   : > { %p53_p2 = scmp.eq.s32.totalorder %s7479_s12, 0  ;;  %p58_p5 = scmp.ne.s32.totalorder %s7455_s28, %s7451_s27 }
   0xe   : > { %s8850_s15 = smov (%p34_p0, %s33_s15), 0  ;;  %s8852_s16 = smov (!%p34_p0, %s36_s16), %s7475_s11 }
   0xf   : > { %8826 = sst [smem:[#allocation14_spill]] %s8850_s15  ;;  %s41_s17 = ssub.s32 %s7471_s10, %s8850_s15 }
  0x10   : > { %p7589_p3 = por %p53_p2, %p52_p1  ;;  %p38_p4 = scmp.ge.s32.totalorder %s8852_s16, 2 }
  0x11   : > { %p59_p6 = scmp.eq.s32.totalorder %s5744_s13, 0  ;;  %p238_p7 = scmp.eq.s32.totalorder %s5744_s13, 3 }
  0x12   : > { %s8854_s16 = smov (%p38_p4, %s8852_s16), 0  ;;  %p244_p10 = scmp.eq.s32.totalorder %s5745_s14, 3 }
  0x13   : > { %8828 = sst [smem:[#allocation15_spill]] %s8854_s16  ;;  %p7597_p8 = por %p59_p6, %p58_p5 }
  0x14   : > { %p7601_p9 = por %p238_p7, %p52_p1  ;;  %s40_s21 = ssub.s32 %s7475_s11, %s8854_s16 }
  0x15   : > { %s42_s22 = sor.u32 %s41_s17, %s40_s21  ;;  %s45_s23 = sadd.s32 1, %s7459_s29 }
  0x16   : > { %s8830_s20 = scalar_select %p7601_p9, 1, 0 }
  0x17   : > { %p43_p11 = scmp.eq.s32.totalorder %s42_s22, 0  ;;  %p7608_p12 = por %p244_p10, %p58_p5 }
  0x18   : > { %p5747_p13 = scmp.ge.s32.totalorder %s7479_s12, 4 }
  0x19   : > { %s8831_s24 = scalar_select %p7608_p12, 1, 0 }
  0x1a   : > { %s7613_s25 = scalar_select %p43_p11, %s7459_s29, %s45_s23  }
  0x1b   : > { %8832 = sst [smem:[#allocation16_spill]] %s8831_s24  ;;  %278 = sbr.rel (%p5747_p13) target bundleno = 82 (0x52), region = 40 }
  0x1c   : > { %8833 = sst [smem:[#allocation17_spill]] %s7613_s25  ;;  %s7617_s26 = sand.u32 (!%p5747_p13), 1, %s7459_s29  }
  0x1d   : > { %s5749_s13 = sshll.u32 (!%p5747_p13), %s7475_s11, 5  ;;  %s5748_s14 = sshll.u32 (!%p5747_p13), %s7617_s26, 7 }
  0x1e   : > { %s291_s17 = sadd.s32 (!%p5747_p13), %s7471_s10, %s5749_s13  ;;  %s286_s22 = scalar_lea.vmem (!%p5747_p13), [#allocation5], %s5748_s14 }
  0x1f   : > { %s5750_s21 = sshll.u32 (!%p5747_p13), %s291_s17, 7  ;;  %s294_s16 = sshll.u32 (!%p5747_p13), %s286_s22, 4  ;;  %s7627_s16 = int_to_ptr.vmem [resolvable:$true] %s294_s16 }
  0x20   : > { %s8834_s0 = sld [smem:[#allocation18_spill]] (!%p5747_p13)  ;;  %s283_s29 = scalar_lea.sflag (!%p5747_p13), [#allocation6], %s7617_s26 }
  0x26   : > { %s7625_s25 = scalar_lea.hbm %s8834_s0, %s5750_s21  ;;  %s7357_s17 = scalar_lea.hbm %s8834_s0, 8192 }
  0x27   : > { %s7353_s24 = scalar_lea.hbm %s7625_s25, 2048  ;;  %p7358_p4 = scmp.lt.u32.totalorder %s7625_s25, %s8834_s0 }
  0x28   : > { %p7354_p0 = scmp.ne.s32.totalorder %s7625_s25, %s7353_s24  ;;  %p7359_p5 = scmp.lt.u32.totalorder %s7357_s17, %s7353_s24 }
  0x29   : > { %p7361_p7 = scmp.lt.u32.totalorder %s7353_s24, %s7625_s25 }
  0x2a   : > { %p7355_p1 = pnand %p7354_p0, %p7589_p3  ;;  %p7360_p6 = por %p7359_p5, %p7358_p4 }
  0x2c   : > { %p7356_p2 = pneg %p7355_p1  ;;  %p7362_p10 = por %p7361_p7, %p7360_p6 }
  0x2e   : > { %p7363_p11 = pnand %p7362_p10, %p7356_p2 }
  0x30   : > { %7366 = shalt.err (!%p7363_p11)
}
  0x31   : > { %s7367_s21 = scalar_lea.vmem %s7627_s16, 2048  ;;  %s7481_s23 = smov [#allocation5]  }
  0x32   : > { %p7368_p13 = scmp.ne.s32.totalorder %s7627_s16, %s7367_s21  ;;  %s7371_s13 = sshll.u32 %s7481_s23, 4  ;;  %s7372_s13 = int_to_ptr.vmem [resolvable:$false] %s7371_s13 }
  0x33   : > { %s7373_s14 = scalar_lea.vmem %s7372_s13, 4096  ;;  %p7374_p12 = scmp.lt.s32.totalorder %s7627_s16, %s7372_s13 }
  0x34   : > { %p7369_p0 = pnand %p7368_p13, %p7589_p3  ;;  %p7375_p9 = scmp.lt.s32.totalorder %s7373_s14, %s7367_s21 }
  0x36   : > { %p7370_p1 = pneg %p7369_p0  ;;  %p7376_p4 = por %p7375_p9, %p7374_p12 }
  0x38   : > { %p7377_p5 = pnand %p7376_p4, %p7370_p1 }
  0x3a   : > { %7380 = shalt.err (!%p7377_p5)
}
  0x3b   : > { %s7482_s24 = smov 256   ;;  %s7483_s17 = smov 128  }
  0x3c   : > { %s7484_s22 = smov 8   ;;  %303 = sbr.rel (!%p7589_p3) target bundleno = 82 (0x52), region = 48 }
  0x3d   : > { %6973 = dma.hbm_to_vmem [thread:$0]  (%p7589_p3), %s7625_s25, 2048, %s7627_s16, %s283_s29, %s7482_s24, %s7483_s17, %s7484_s22  }
  0x3e   : > { %s6970_s15 = smul.u32 (%p7589_p3), 80, %s7617_s26 }
  0x3f   : > { %s6971_s21 = smul.u32 (%p7589_p3), 40, %s7475_s11 }
  0x40   : > { %s7666_s29 = scalar_lea.vmem (%p7589_p3), [#allocation8], %s6970_s15 }
  0x41   : > { %s309_s23 = sadd.s32 (%p7589_p3), %s7471_s10, %s6971_s21 }
  0x42   : > { %s5751_s13 = sshll.u32 (%p7589_p3), %s309_s23, 2 }
  0x43   : > { %s7661_s27 = scalar_lea.vmem %s8809_s1, %s5751_s13 }
  0x44   : > { %v327_v0 = vld [vmem:[%s7661_s27] sm:$0xf]  ;;  %v329_v1 = vld [vmem:[%s7661_s27 + $0x8] sm:$0xf]  ;;  %v331_v2 = vld [vmem:[%s7661_s27 + $0x10] sm:$0xf] }
  0x45   : > { %328 = vst [vmem:[%s7666_s29] sm:$0xf] %v327_v0  ;;  %330 = vst [vmem:[%s7666_s29 + $0x4] sm:$0xf] %v329_v1  ;;  %v333_v3 = vld [vmem:[%s7661_s27 + $0x18] sm:$0xf] }
  0x46   : > { %332 = vst [vmem:[%s7666_s29 + $0x8] sm:$0xf] %v331_v2  ;;  %v335_v4 = vld [vmem:[%s7661_s27 + $0x20] sm:$0xf]  ;;  %v337_v5 = vld [vmem:[%s7661_s27 + $0x28] sm:$0xf] }
  0x47   : > { %334 = vst [vmem:[%s7666_s29 + $0xc] sm:$0xf] %v333_v3  ;;  %336 = vst [vmem:[%s7666_s29 + $0x10] sm:$0xf] %v335_v4  ;;  %v339_v6 = vld [vmem:[%s7661_s27 + $0x30] sm:$0xf] }
  0x48   : > { %338 = vst [vmem:[%s7666_s29 + $0x14] sm:$0xf] %v337_v5  ;;  %v341_v7 = vld [vmem:[%s7661_s27 + $0x38] sm:$0xf]  ;;  %v343_v8 = vld [vmem:[%s7661_s27 + $0x40] sm:$0xf] }
  0x49   : > { %340 = vst [vmem:[%s7666_s29 + $0x18] sm:$0xf] %v339_v6  ;;  %342 = vst [vmem:[%s7666_s29 + $0x1c] sm:$0xf] %v341_v7  ;;  %v345_v9 = vld [vmem:[%s7661_s27 + $0x48] sm:$0xf] }
  0x4a   : > { %344 = vst [vmem:[%s7666_s29 + $0x20] sm:$0xf] %v343_v8  ;;  %v347_v10 = vld [vmem:[%s7661_s27 + $0x50] sm:$0xf]  ;;  %v349_v11 = vld [vmem:[%s7661_s27 + $0x58] sm:$0xf] }
  0x4b   : > { %346 = vst [vmem:[%s7666_s29 + $0x24] sm:$0xf] %v345_v9  ;;  %348 = vst [vmem:[%s7666_s29 + $0x28] sm:$0xf] %v347_v10  ;;  %v351_v12 = vld [vmem:[%s7661_s27 + $0x60] sm:$0xf] }
  0x4c   : > { %350 = vst [vmem:[%s7666_s29 + $0x2c] sm:$0xf] %v349_v11  ;;  %v353_v13 = vld [vmem:[%s7661_s27 + $0x68] sm:$0xf]  ;;  %v355_v14 = vld [vmem:[%s7661_s27 + $0x70] sm:$0xf] }
  0x4d   : > { %352 = vst [vmem:[%s7666_s29 + $0x30] sm:$0xf] %v351_v12  ;;  %354 = vst [vmem:[%s7666_s29 + $0x34] sm:$0xf] %v353_v13  ;;  %v357_v15 = vld [vmem:[%s7661_s27 + $0x78] sm:$0xf] }
  0x4e   : > { %356 = vst [vmem:[%s7666_s29 + $0x38] sm:$0xf] %v355_v14  ;;  %v359_v16 = vld [vmem:[%s7661_s27 + $0x80] sm:$0xf]  ;;  %v361_v17 = vld [vmem:[%s7661_s27 + $0x88] sm:$0xf] }
  0x4f   : > { %358 = vst [vmem:[%s7666_s29 + $0x3c] sm:$0xf] %v357_v15  ;;  %360 = vst [vmem:[%s7666_s29 + $0x40] sm:$0xf] %v359_v16  ;;  %v363_v18 = vld [vmem:[%s7661_s27 + $0x90] sm:$0xf] }
  0x50   : > { %362 = vst [vmem:[%s7666_s29 + $0x44] sm:$0xf] %v361_v17  ;;  %v365_v19 = vld [vmem:[%s7661_s27 + $0x98] sm:$0xf]  ;;  %364 = vst [vmem:[%s7666_s29 + $0x48] sm:$0xf] %v363_v18 }
  0x51   : > { %366 = vst [vmem:[%s7666_s29 + $0x4c] sm:$0xf] %v365_v19 }
  0x52 PF: > { %p5752_p3 = scmp.ge.s32.totalorder %s7479_s12, 1  ;;  %p428_p9 = scmp.lt.s32.totalorder %s7479_s12, 5 }
  0x54   : > { %p429_p12 = pnand %p5752_p3, %p428_p9 }
  0x55   : > { %s7708_s0 = sand.u32 (!%p429_p12), 1, %s7455_s28  }
  0x56   : > { %432 = sbr.rel (%p429_p12) target bundleno = 1057 (0x421), region = 89  ;;  %s5753_s16 = sshll.u32 (!%p429_p12), %s7708_s0, 7 }
  0x57   : > { %s435_s18 = scalar_lea.sflag (!%p429_p12), [#allocation6], %s7708_s0  ;;  %s7714_s27 = scalar_lea.vmem (!%p429_p12), [#allocation5], %s5753_s16 }
  0x5d   : > { %7442 = dma.done.wait (%p7597_p8), %s435_s18, 2048  }
  0x5e   : > { %7444 = vsyncadd (%p7597_p8), %s435_s18, 4294965248  ;;  %v7055_v20 = vld [vmem:[%s8810_s2] sm:$0xff]   ;;  %s6972_s22 = smul.u32 80, %s7708_s0  ;;  %v7057_v22 = vld [vmem:[%s8810_s2 + $0x8] sm:$0xff]   ;;  %vm506_vm0 = vcmask 523264   ;;  %vm2729_vm1 = vcmask 257024  }
  0x5f   : > { %v7056_v21 = vld [vmem:[%s8811_s3] sm:$0xff]   ;;  %6530 = vmatprep.subr.bf16.mxu0 %v7055_v20  ;;  %v7058_v23 = vld [vmem:[%s8811_s3 + $0x8] sm:$0xff]   ;;  %v7059_v24 = vld [vmem:[%s8810_s2 + $0x10] sm:$0xff]   ;;  %v7485_v47 = vmov 0   ;;  %vm530_vm2 = vcmask 261120   ;;  %s7486_s19 = smov 32  }
  0x60   : > { %6554 = vmatprep.subr.bf16.mxu1 %v7056_v21  ;;  %6531 = vmatpush3.bf16.msra.mxu0 %v7055_v20  ;;  %v7060_v25 = vld [vmem:[%s8811_s3 + $0x10] sm:$0xff]   ;;  %v7061_v26 = vld [vmem:[%s8810_s2 + $0x18] sm:$0xff]   ;;  %s7742_s24 = scalar_lea.vmem [#allocation8], %s6972_s22  ;;  %v7065_v29 = vld [vmem:[%s8810_s2 + $0x20] sm:$0xff]   ;;  %2730 = vst.msk [vmem:[#allocation2] sm:$0xf] %vm2729_vm1, %v7485_v47 }
  0x61   : > { %6555 = vmatpush3.bf16.msra.mxu1 %v7056_v21  ;;  %6532 = vmatprep.subr.bf16.mxu0 %v7057_v22  ;;  %v7063_v27 = vld [vmem:[%s7742_s24] sm:$0xff]   ;;  %v7062_v28 = vld [vmem:[%s8811_s3 + $0x18] sm:$0xff]   ;;  %v7066_v31 = vld [vmem:[%s7742_s24 + $0x10] sm:$0xff]   ;;  %2731 = vst.msk [vmem:[#allocation2 + $0x4] sm:$0xf] %vm2729_vm1, %v7485_v47  ;;  %s7487_s23 = smov 96  }
  0x62   : > { %6556 = vmatprep.subr.bf16.mxu1 %v7058_v23  ;;  %6538 = vmatprep.mubr.msk.bf16.mxu0 %vm506_vm0, %v7063_v27  ;;  %v7064_v30 = vld [vmem:[%s7742_s24 + $0x8] sm:$0xff]   ;;  %v7072_v33 = vld [vmem:[%s8811_s3 + $0x20] sm:$0xff]   ;;  %v7071_v35 = vld [vmem:[%s8810_s2 + $0x30] sm:$0xff]   ;;  %2733 = vst.msk [vmem:[#allocation2 + $0x48] sm:$0xf] %vm2729_vm1, %v7485_v47  ;;  %s8673_s15 = scalar_lea.vmem [#allocation9], %s5753_s16 }
  0x63   : > { %6562 = vmatprep.mubr.msk.bf16.mxu1 %vm506_vm0, %v7063_v27  ;;  %v7068_v32 = vld [vmem:[%s8810_s2 + $0x28] sm:$0xff]   ;;  %v7069_v37 = vld [vmem:[%s7742_s24 + $0x20] sm:$0xff]   ;;  %v7076_v38 = vld [vmem:[%s8810_s2 + $0x38] sm:$0xff]   ;;  %2734 = vst.msk [vmem:[#allocation2 + $0x4c] sm:$0xf] %vm2729_vm1, %v7485_v47  ;;  %s6290_s16 = sshll.u32 %s7467_s9, 5 }
  0x64   : > { %6533 = vmatpush3.bf16.msra.mxu0 %v7057_v22  ;;  %v7073_v34 = vld [vmem:[%s8811_s3 + $0x28] sm:$0xff]   ;;  %v7077_v39 = vld [vmem:[%s8811_s3 + $0x30] sm:$0xff]   ;;  %v7078_v40 = vld [vmem:[%s8811_s3 + $0x38] sm:$0xff]   ;;  %s5633_s21 = sadd.s32 %s7463_s30, %s6290_s16  ;;  %s5636_s9 = sshll.u32 %s8673_s15, 4  ;;  %s8741_s9 = int_to_ptr.vmem [resolvable:$true] %s5636_s9 }
  0x65   : > { %6557 = vmatpush3.bf16.msra.mxu1 %v7058_v23  ;;  %6534 = vmatprep.subr.bf16.mxu0 %v7059_v24  ;;  %v7067_v36 = vld [vmem:[%s7742_s24 + $0x18] sm:$0xff]   ;;  %v7081_v41 = vld [vmem:[%s8810_s2 + $0x40] sm:$0xff]   ;;  %v7070_v42 = vld [vmem:[%s7742_s24 + $0x28] sm:$0xff]   ;;  %s6291_s30 = sshll.u32 %s5633_s21, 7  ;;  %s7381_s13 = scalar_lea.vmem %s8741_s9, 2048 }
  0x66   : > { %6558 = vmatprep.subr.bf16.mxu1 %v7060_v25  ;;  %v7074_v43 = vld [vmem:[%s7742_s24 + $0x30] sm:$0xff]   ;;  %v7075_v45 = vld [vmem:[%s7742_s24 + $0x38] sm:$0xff]   ;;  %v7079_v46 = vld [vmem:[%s7742_s24 + $0x4] sm:$0xff]   ;;  %p7382_p8 = scmp.ne.s32.totalorder %s8741_s9, %s7381_s13  ;;  %p8835_p2 = scmp.ne.s32.totalorder %s8830_s20, 0 }
  0x67   : > { %v7088_v44 = vld [vmem:[%s8811_s3 + $0x40] sm:$0xff]   ;;  %v7084_v50 = vld [vmem:[%s8810_s2 + $0x48] sm:$0xff]   ;;  %v7087_v52 = vld [vmem:[%s8810_s2 + $0x50] sm:$0xff]   ;;  %s7488_s14 = smov [#allocation9]  }
  0x68   : > { %6535 = vmatpush3.bf16.msra.mxu0 %v7059_v24  ;;  %v7080_v48 = vld [vmem:[%s7742_s24 + $0xc] sm:$0xff]   ;;  %v7082_v49 = vld [vmem:[%s7742_s24 + $0x14] sm:$0xff]   ;;  %v7083_v53 = vld [vmem:[%s7742_s24 + $0x1c] sm:$0xff]   ;;  %p7383_p6 = pnand %p7382_p8, %p8835_p2  ;;  %s7385_s29 = sshll.u32 %s7488_s14, 4  ;;  %s7386_s29 = int_to_ptr.vmem [resolvable:$false] %s7385_s29 }
  0x69   : > { %6559 = vmatpush3.bf16.msra.mxu1 %v7060_v25  ;;  %6536 = vmatprep.subr.bf16.mxu0 %v7061_v26  ;;  %v7089_v51 = vld [vmem:[%s8811_s3 + $0x48] sm:$0xff]   ;;  %v7093_v54 = vld [vmem:[%s8811_s3 + $0x50] sm:$0xff]   ;;  %v7092_v56 = vld [vmem:[%s8810_s2 + $0x58] sm:$0xff]   ;;  %s7387_s18 = scalar_lea.vmem %s7386_s29, 4096  ;;  %p7388_p10 = scmp.lt.s32.totalorder %s8741_s9, %s7386_s29 }
  0x6a   : > { %6560 = vmatprep.subr.bf16.mxu1 %v7062_v28  ;;  %v7085_v55 = vld [vmem:[%s7742_s24 + $0x24] sm:$0xff]   ;;  %v7086_v58 = vld [vmem:[%s7742_s24 + $0x2c] sm:$0xff]   ;;  %v7090_v61 = vld [vmem:[%s7742_s24 + $0x34] sm:$0xff]   ;;  %p7384_p7 = pneg %p7383_p6  ;;  %p7389_p11 = scmp.lt.s32.totalorder %s7387_s18, %s7381_s13 }
  0x6b   : > { %v7094_v57 = vld [vmem:[%s8811_s3 + $0x58] sm:$0xff]   ;;  %v7097_v59 = vld [vmem:[%s8810_s2 + $0x60] sm:$0xff]   ;;  %v7100_v2 = vld [vmem:[%s8810_s2 + $0x68] sm:$0xff]  }
  0x6c   : > { %6537 = vmatpush3.bf16.msra.mxu0 %v7061_v26  ;;  %v7104_v60 = vld [vmem:[%s8811_s3 + $0x60] sm:$0xff]   ;;  %v7095_v63 = vld [vmem:[%s7742_s24 + $0x8] sm:$0xff]   ;;  %v7098_v1 = vld [vmem:[%s7742_s24 + $0x18] sm:$0xff]   ;;  %p7390_p13 = por %p7389_p11, %p7388_p10 }
  0x6d   : > { %6561 = vmatpush3.bf16.msra.mxu1 %v7062_v28  ;;  %6578 = vmatprep.subr.bf16.mxu0 %v7065_v29  ;;  %v7091_v62 = vld [vmem:[%s7742_s24 + $0x3c] sm:$0xff]   ;;  %v7096_v0 = vld [vmem:[%s7742_s24 + $0x10] sm:$0xff]   ;;  %v7101_v8 = vld [vmem:[%s7742_s24 + $0x28] sm:$0xff]  }
  0x6e   : > { %6602 = vmatprep.subr.bf16.mxu1 %v7072_v33  ;;  %v7105_v3 = vld [vmem:[%s8811_s3 + $0x68] sm:$0xff]   ;;  %v7103_v4 = vld [vmem:[%s8810_s2 + $0x70] sm:$0xff]   ;;  %v7876_v7 = vld [vmem:[%s7714_s27 + $0x8] sm:$0xff]  ;;  %p7391_p0 = pnand %p7390_p13, %p7384_p7 }
  0x6f   : > { %6539 = vmatmul.mubr.msk.bf16.vlgmr.msra.gmra.mrb[0].mxu0 %vm506_vm0, %v7064_v30  ;;  %v7099_v5 = vld [vmem:[%s7742_s24 + $0x20] sm:$0xff]   ;;  %v2736_v10 = vpack.c.bf16 %v7876_v7, %v7876_v7  ;;  %v7108_v13 = vld [vmem:[%s8810_s2 + $0x78] sm:$0xff]   ;;  %v7895_v14 = vld [vmem:[%s7714_s27 + $0x18] sm:$0xff] }
  0x70   : > { %6563 = vmatmul.mubr.msk.bf16.vlgmr.msra.gmra.mrb[0].mxu1 %vm506_vm0, %v7064_v30  ;;  %6579 = vmatpush3.bf16.msra.mxu0 %v7065_v29  ;;  %v7873_v6 = vld [vmem:[%s7714_s27] sm:$0xff]  ;;  %v7887_v12 = vld [vmem:[%s7714_s27 + $0x10] sm:$0xff]  ;;  %v7903_v17 = vld [vmem:[%s7714_s27 + $0x28] sm:$0xff]  ;;  %v2738_v18 = vpack.c.bf16 %v7895_v14, %v7895_v14 }
  0x71   : > { %6542 = vmatprep.mubr.msk.bf16.mxu0 %vm506_vm0, %v7066_v31  ;;  %6566 = vmatprep.mubr.msk.bf16.mxu1 %vm506_vm0, %v7066_v31  ;;  %v2735_v9 = vpack.c.bf16 %v7873_v6, %v7873_v6  ;;  %v7109_v11 = vld [vmem:[%s8811_s3 + $0x70] sm:$0xff]   ;;  %2753 = vst.msk [vmem:[#allocation2 + $0xc] sm:$0xf] %vm2729_vm1, %v2736_v10  ;;  %v2737_v15 = vpack.c.bf16 %v7887_v12, %v7887_v12  ;;  %v7912_v21 = vld [vmem:[%s7714_s27 + $0x30] sm:$0xff]  ;;  %v7915_v22 = vld [vmem:[%s7714_s27 + $0x38] sm:$0xff] }
  0x72   : > { %6580 = vmatprep.subr.bf16.mxu0 %v7068_v32  ;;  %6603 = vmatpush3.bf16.msra.mxu1 %v7072_v33  ;;  %v7900_v16 = vld [vmem:[%s7714_s27 + $0x20] sm:$0xff]  ;;  %v2740_v20 = vpack.c.bf16 %v7903_v17, %v7903_v17  ;;  %v2741_v23 = vpack.c.bf16 %v7912_v21, %v7912_v21  ;;  %v2742_v24 = vpack.c.bf16 %v7915_v22, %v7915_v22  ;;  %v492_v26 = vld [vmem:[%s7714_s27 + $0x48] sm:$0xff]  ;;  %v493_v30 = vld [vmem:[%s7714_s27 + $0x50] sm:$0xff] }
  0x73   : > { %6604 = vmatprep.subr.bf16.mxu1 %v7073_v34  ;;  %2752 = vst.msk [vmem:[#allocation2 + $0x8] sm:$0xf] %vm2729_vm1, %v2735_v9  ;;  %v2739_v19 = vpack.c.bf16 %v7900_v16, %v7900_v16  ;;  %2754 = vst.msk [vmem:[#allocation2 + $0x10] sm:$0xf] %vm2729_vm1, %v2737_v15  ;;  %v491_v25 = vld [vmem:[%s7714_s27 + $0x40] sm:$0xff]  ;;  %v7110_v27 = vld [vmem:[%s8811_s3 + $0x78] sm:$0xff]   ;;  %v2744_v29 = vpack.c.bf16 %v492_v26, %v492_v26  ;;  %v2745_v33 = vpack.c.bf16 %v493_v30, %v493_v30 }
  0x74   : > { %6581 = vmatpush3.bf16.msra.mxu0 %v7068_v32  ;;  %2755 = vst.msk [vmem:[#allocation2 + $0x14] sm:$0xf] %vm2729_vm1, %v2738_v18  ;;  %2757 = vst.msk [vmem:[#allocation2 + $0x1c] sm:$0xf] %vm2729_vm1, %v2740_v20  ;;  %v2743_v28 = vpack.c.bf16 %v491_v25, %v491_v25  ;;  %v7102_v31 = vld [vmem:[%s7742_s24 + $0x30] sm:$0xff]   ;;  %v494_v32 = vld [vmem:[%s7714_s27 + $0x58] sm:$0xff]  ;;  %4108 = vrot.lane.b32.xlu0 %v7873_v6, %s7486_s19 }
  0x75   : > { %6582 = vmatprep.subr.bf16.mxu0 %v7071_v35  ;;  %2756 = vst.msk [vmem:[#allocation2 + $0x18] sm:$0xf] %vm2729_vm1, %v2739_v19  ;;  %2758 = vst.msk [vmem:[#allocation2 + $0x20] sm:$0xf] %vm2729_vm1, %v2741_v23  ;;  %v7114_v47 = vld [vmem:[%s7742_s24 + $0x1c] sm:$0xff]   ;;  %v7131_v9 = vld [vmem:[%s7742_s24 + $0x28] sm:$0xff]   ;;  %4112 = vrot.lane.b32.xlu1 %v7887_v12, %s7486_s19 }
  0x76   : > { %6605 = vmatpush3.bf16.msra.mxu1 %v7073_v34  ;;  %2759 = vst.msk [vmem:[#allocation2 + $0x24] sm:$0xf] %vm2729_vm1, %v2742_v24  ;;  %2760 = vst.msk [vmem:[#allocation2 + $0x28] sm:$0xf] %vm2729_vm1, %v2743_v28  ;;  %v495_v34 = vld [vmem:[%s7714_s27 + $0x60] sm:$0xff]  ;;  %v7137_v18 = vld [vmem:[%s7742_s24 + $0x48] sm:$0xff]  }
  0x77   : > { %6543 = vmatmul.mubr.msk.bf16.gmra.mrb[4].mxu0 %vm506_vm0, %v7067_v36  ;;  %6606 = vmatprep.subr.bf16.mxu1 %v7077_v39  ;;  %2761 = vst.msk [vmem:[#allocation2 + $0x2c] sm:$0xf] %vm2729_vm1, %v2744_v29  ;;  %2762 = vst.msk [vmem:[#allocation2 + $0x30] sm:$0xf] %vm2729_vm1, %v2745_v33  ;;  %v7151_v10 = vld [vmem:[%s8812_s4 + $0x30] sm:$0xff]   ;;  %v7138_v19 = vld [vmem:[#allocation2] sm:$0xff]  }
  0x78   : > { %6567 = vmatmul.mubr.msk.bf16.gmra.mrb[4].mxu1 %vm506_vm0, %v7067_v36  ;;  %6546 = vmatprep.mubr.msk.bf16.mxu0 %vm506_vm0, %v7069_v37  ;;  %v7113_v36 = vld [vmem:[%s8810_s2 + $0x80] sm:$0xff]   ;;  %v7148_v26 = vld [vmem:[%s8812_s4 + $0x28] sm:$0xff]   ;;  %v7161_v28 = vld [vmem:[%s8812_s4 + $0x38] sm:$0xff]  }
  0x79   : > { %6570 = vmatprep.mubr.msk.bf16.mxu1 %vm506_vm0, %v7069_v37  ;;  %6583 = vmatpush3.bf16.msra.mxu0 %v7071_v35  ;;  %v496_v35 = vld [vmem:[%s7714_s27 + $0x68] sm:$0xff]  ;;  %v2746_v37 = vpack.c.bf16 %v494_v32, %v494_v32  ;;  %v7136_v15 = vld [vmem:[%s7742_s24 + $0x40] sm:$0xff]  }
  0x7a   : > { %6584 = vmatprep.subr.bf16.mxu0 %v7076_v38  ;;  %6607 = vmatpush3.bf16.msra.mxu1 %v7077_v39  ;;  %v2748_v39 = vpack.c.bf16 %v496_v35, %v496_v35  ;;  %v7144_v20 = vld [vmem:[#allocation2 + $0x4] sm:$0xff]   ;;  %v7145_v25 = vld [vmem:[#allocation2 + $0xc] sm:$0xff]  }
  0x7b   : > { %6608 = vmatprep.subr.bf16.mxu1 %v7078_v40  ;;  %2763 = vst.msk [vmem:[#allocation2 + $0x34] sm:$0xf] %vm2729_vm1, %v2746_v37  ;;  %v7139_v23 = vld [vmem:[#allocation2 + $0x8] sm:$0xff]   ;;  %v7142_v24 = vld [vmem:[#allocation2 + $0x10] sm:$0xff]   ;;  %v7158_v29 = vld [vmem:[%s8812_s4 + $0x40] sm:$0xff]   ;;  %4110 = vrot.lane.b32.xlu0 %v7876_v7, %s7486_s19 }
  0x7c   : > { %2765 = vst.msk [vmem:[#allocation2 + $0x3c] sm:$0xf] %vm2729_vm1, %v2748_v39  ;;  %v7143_v30 = vld [vmem:[#allocation2 + $0x18] sm:$0xff]   ;;  %v7156_v39 = vld [vmem:[#allocation2 + $0x8] sm:$0xff]   ;;  %4114 = vrot.lane.b32.xlu1 %v7895_v14, %s7486_s19 }
  0x7d   : > { %6585 = vmatpush3.bf16.msra.mxu0 %v7076_v38  ;;  %v2747_v38 = vpack.c.bf16 %v495_v34, %v495_v34  ;;  %v7150_v32 = vld [vmem:[#allocation2 + $0x1c] sm:$0xff]   ;;  %v7154_v33 = vld [vmem:[#allocation2 + $0x24] sm:$0xff]  }
  0x7e   : > { %6626 = vmatprep.subr.bf16.mxu0 %v7081_v41  ;;  %6609 = vmatpush3.bf16.msra.mxu1 %v7078_v40  ;;  %v7120_v40 = vld [vmem:[%s8811_s3 + $0x80] sm:$0xff]   ;;  %v7147_v34 = vld [vmem:[#allocation2 + $0x28] sm:$0xff]  }
  0x7f   : > { %6547 = vmatmul.mubr.msk.bf16.gmra.mrb[8].mxu0 %vm506_vm0, %v7070_v42  ;;  %6650 = vmatprep.subr.bf16.mxu1 %v7088_v44  ;;  %2764 = vst.msk [vmem:[#allocation2 + $0x38] sm:$0xf] %vm2729_vm1, %v2747_v38 }
  0x80   : > { %6571 = vmatmul.mubr.msk.bf16.gmra.mrb[8].mxu1 %vm506_vm0, %v7070_v42  ;;  %6550 = vmatprep.mubr.msk.bf16.mxu0 %vm506_vm0, %v7074_v43  ;;  %v7107_v42 = vld [vmem:[%s7742_s24 + $0x40] sm:$0xff]  }
  0x81   : > { %6574 = vmatprep.mubr.msk.bf16.mxu1 %vm506_vm0, %v7074_v43  ;;  %v7111_v43 = vld [vmem:[%s7742_s24 + $0xc] sm:$0xff]   ;;  %4116 = vrot.lane.b32.xlu0 %v7900_v16, %s7486_s19 }
  0x82   : > { %v7152_v35 = vld [vmem:[#allocation2 + $0x30] sm:$0xff]   ;;  %4118 = vrot.lane.b32.xlu1 %v7903_v17, %s7486_s19 }
  0x85   : > { %4120 = vrot.lane.b32.xlu0 %v7912_v21, %s7486_s19 }
  0x86   : > { %v7159_v37 = vld [vmem:[#allocation2 + $0x34] sm:$0xff]   ;;  %4122 = vrot.lane.b32.xlu1 %v7915_v22, %s7486_s19 }
  0x87   : > { %6551 = vmatmul.mubr.msk.bf16.gmra.mrb[12].mxu0 %vm506_vm0, %v7075_v45  ;;  %v7153_v38 = vld [vmem:[#allocation2 + $0x38] sm:$0xff]   ;;  %v7331_v22 = vld [vmem:[%s7714_s27 + $0x40] sm:$0xff] }
  0x88   : > { %6575 = vmatmul.mubr.msk.bf16.gmra.mrb[12].mxu1 %vm506_vm0, %v7075_v45  ;;  %6586 = vmatprep.mubr.msk.bf16.mxu0 %vm506_vm0, %v7079_v46  ;;  %v7966_v45 = vld [vmem:[%s7714_s27 + $0x70] sm:$0xff] }
  0x89   : > { %6610 = vmatprep.mubr.msk.bf16.mxu1 %vm506_vm0, %v7079_v46  ;;  %v2749_v46 = vpack.c.bf16 %v7966_v45, %v7966_v45  ;;  %4124 = vrot.lane.b32.xlu0 %v7331_v22, %s7486_s19 }
  0x8b   : > { %2766 = vst.msk [vmem:[#allocation2 + $0x40] sm:$0xf] %vm2729_vm1, %v2749_v46  ;;  %v7168_v46 = vld [vmem:[%s8812_s4 + $0x48] sm:$0xff]  }
  0x8f   : > { %6587 = vmatmul.mubr.msk.bf16.vlgmr.msra.gmra.mrb[16].mxu0 %vm506_vm0, %v7080_v48 }
  0x90   : > { %6611 = vmatmul.mubr.msk.bf16.vlgmr.msra.gmra.mrb[16].mxu1 %vm506_vm0, %v7080_v48  ;;  %6627 = vmatpush3.bf16.msra.mxu0 %v7081_v41  ;;  %v7106_v41 = vld [vmem:[%s7742_s24 + $0x38] sm:$0xff]  }
  0x91   : > { %6590 = vmatprep.mubr.msk.bf16.mxu0 %vm506_vm0, %v7082_v49  ;;  %6614 = vmatprep.mubr.msk.bf16.mxu1 %vm506_vm0, %v7082_v49  ;;  %v7116_v48 = vld [vmem:[%s8810_s2 + $0x88] sm:$0xff]  }
  0x92   : > { %6628 = vmatprep.subr.bf16.mxu0 %v7084_v50  ;;  %6651 = vmatpush3.bf16.msra.mxu1 %v7088_v44  ;;  %v7112_v44 = vld [vmem:[%s7742_s24 + $0x14] sm:$0xff]  }
  0x93   : > { %6652 = vmatprep.subr.bf16.mxu1 %v7089_v51  ;;  %v7121_v49 = vld [vmem:[%s8811_s3 + $0x88] sm:$0xff]  }
  0x94   : > { %6629 = vmatpush3.bf16.msra.mxu0 %v7084_v50  ;;  %v7119_v50 = vld [vmem:[%s8810_s2 + $0x90] sm:$0xff]  }
  0x95   : > { %6630 = vmatprep.subr.bf16.mxu0 %v7087_v52 }
  0x96   : > { %6653 = vmatpush3.bf16.msra.mxu1 %v7089_v51  ;;  %v7115_v51 = vld [vmem:[%s7742_s24 + $0x24] sm:$0xff]  }
  0x97   : > { %6591 = vmatmul.mubr.msk.bf16.gmra.mrb[20].mxu0 %vm506_vm0, %v7083_v53  ;;  %6654 = vmatprep.subr.bf16.mxu1 %v7093_v54 }
  0x98   : > { %6615 = vmatmul.mubr.msk.bf16.gmra.mrb[20].mxu1 %vm506_vm0, %v7083_v53  ;;  %6594 = vmatprep.mubr.msk.bf16.mxu0 %vm506_vm0, %v7085_v55  ;;  %v7117_v53 = vld [vmem:[%s7742_s24 + $0x2c] sm:$0xff]  }
  0x99   : > { %6618 = vmatprep.mubr.msk.bf16.mxu1 %vm506_vm0, %v7085_v55  ;;  %6631 = vmatpush3.bf16.msra.mxu0 %v7087_v52  ;;  %v7125_v52 = vld [vmem:[%s8811_s3 + $0x90] sm:$0xff]   ;;  %v5755_v55 = vld [vmem:[%s8814_s6] ss:$0 sm:$0xff] }
  0x9a   : > { %6632 = vmatprep.subr.bf16.mxu0 %v7092_v56  ;;  %6655 = vmatpush3.bf16.msra.mxu1 %v7093_v54  ;;  %v7124_v54 = vld [vmem:[%s8810_s2 + $0x98] sm:$0xff]   ;;  %509 = vst.msk [vmem:[#allocation3 + $0x10] sm:$0xff] %vm506_vm0, %v5755_v55  ;;  %507 = vst.msk [vmem:[#allocation3] sm:$0xff] %vm506_vm0, %v5755_v55 }
  0x9b   : > { %6656 = vmatprep.subr.bf16.mxu1 %v7094_v57  ;;  %508 = vst.msk [vmem:[#allocation3 + $0x8] sm:$0xff] %vm506_vm0, %v5755_v55  ;;  %510 = vst.msk [vmem:[#allocation3 + $0x18] sm:$0xff] %vm506_vm0, %v5755_v55 }
  0x9c   : > { %511 = vst.msk [vmem:[#allocation3 + $0x20] sm:$0xff] %vm506_vm0, %v5755_v55  ;;  %512 = vst.msk [vmem:[#allocation3 + $0x28] sm:$0xff] %vm506_vm0, %v5755_v55 }
  0x9d   : > { %6633 = vmatpush3.bf16.msra.mxu0 %v7092_v56  ;;  %v7126_v56 = vld [vmem:[%s8811_s3 + $0x98] sm:$0xff]   ;;  %513 = vst.msk [vmem:[#allocation3 + $0x30] sm:$0xff] %vm506_vm0, %v5755_v55  ;;  %514 = vst.msk [vmem:[#allocation3 + $0x38] sm:$0xff] %vm506_vm0, %v5755_v55 }
  0x9e   : > { %6657 = vmatpush3.bf16.msra.mxu1 %v7094_v57  ;;  %6674 = vmatprep.subr.bf16.mxu0 %v7097_v59  ;;  %515 = vst.msk [vmem:[#allocation3 + $0x40] sm:$0xff] %vm506_vm0, %v5755_v55  ;;  %516 = vst.msk [vmem:[#allocation3 + $0x48] sm:$0xff] %vm506_vm0, %v5755_v55  ;;  %v8017_v57 = vld [vmem:[%s7714_s27 + $0x78] sm:$0xff] }
  0x9f   : > { %6595 = vmatmul.mubr.msk.bf16.gmra.mrb[24].mxu0 %vm506_vm0, %v7086_v58  ;;  %6698 = vmatprep.subr.bf16.mxu1 %v7104_v60  ;;  %517 = vst.msk [vmem:[#allocation3 + $0x50] sm:$0xff] %vm506_vm0, %v5755_v55  ;;  %518 = vst.msk [vmem:[#allocation3 + $0x58] sm:$0xff] %vm506_vm0, %v5755_v55 }
  0xa0   : > { %6619 = vmatmul.mubr.msk.bf16.gmra.mrb[24].mxu1 %vm506_vm0, %v7086_v58  ;;  %6598 = vmatprep.mubr.msk.bf16.mxu0 %vm506_vm0, %v7090_v61  ;;  %519 = vst.msk [vmem:[#allocation3 + $0x60] sm:$0xff] %vm506_vm0, %v5755_v55  ;;  %520 = vst.msk [vmem:[#allocation3 + $0x68] sm:$0xff] %vm506_vm0, %v5755_v55  ;;  %v2750_v58 = vpack.c.bf16 %v8017_v57, %v8017_v57 }
  0xa1   : > { %6622 = vmatprep.mubr.msk.bf16.mxu1 %vm506_vm0, %v7090_v61  ;;  %521 = vst.msk [vmem:[#allocation3 + $0x70] sm:$0xff] %vm506_vm0, %v5755_v55  ;;  %522 = vst.msk [vmem:[#allocation3 + $0x78] sm:$0xff] %vm506_vm0, %v5755_v55  ;;  %v7135_v61 = vld [vmem:[%s8812_s4 + $0x10] sm:$0xff]   ;;  %v7177_v55 = vld [vmem:[#allocation2 + $0x3c] sm:$0xff]  }
  0xa2   : > { %2767 = vst.msk [vmem:[#allocation2 + $0x44] sm:$0xf] %vm2729_vm1, %v2750_v58  ;;  %v563_v58 = vld [vmem:[#allocation3] sm:$0xff] }
  0xa7   : > { %6599 = vmatmul.mubr.msk.bf16.gmra.mrb[28].mxu0 %vm506_vm0, %v7091_v62  ;;  %v575_v14 = vld [vmem:[#allocation3 + $0x60] sm:$0xff] }
  0xa8   : > { %6623 = vmatmul.mubr.msk.bf16.gmra.mrb[28].mxu1 %vm506_vm0, %v7091_v62  ;;  %6634 = vmatprep.mubr.msk.bf16.mxu0 %vm506_vm0, %v7095_v63  ;;  %v7122_v62 = vld [vmem:[%s7742_s24 + $0x3c] sm:$0xff]  }
  0xa9   : > { %6658 = vmatprep.mubr.msk.bf16.mxu1 %vm506_vm0, %v7095_v63  ;;  %v5756_v63 = vld [vmem:[%s8815_s7] ss:$0 sm:$0xff] }
  0xaa   : > { %533 = vst.msk [vmem:[#allocation4 + $0x10] sm:$0xff] %vm530_vm2, %v5756_v63  ;;  %531 = vst.msk [vmem:[#allocation4] sm:$0xff] %vm530_vm2, %v5756_v63  ;;  %v577_v7 = vld [vmem:[#allocation3 + $0x70] sm:$0xff] }
  0xab   : > { %532 = vst.msk [vmem:[#allocation4 + $0x8] sm:$0xff] %vm530_vm2, %v5756_v63  ;;  %534 = vst.msk [vmem:[#allocation4 + $0x18] sm:$0xff] %vm530_vm2, %v5756_v63 }
  0xac   : > { %535 = vst.msk [vmem:[#allocation4 + $0x20] sm:$0xff] %vm530_vm2, %v5756_v63  ;;  %536 = vst.msk [vmem:[#allocation4 + $0x28] sm:$0xff] %vm530_vm2, %v5756_v63 }
  0xad   : > { %537 = vst.msk [vmem:[#allocation4 + $0x30] sm:$0xff] %vm530_vm2, %v5756_v63  ;;  %538 = vst.msk [vmem:[#allocation4 + $0x38] sm:$0xff] %vm530_vm2, %v5756_v63 }
  0xae   : > { %539 = vst.msk [vmem:[#allocation4 + $0x40] sm:$0xff] %vm530_vm2, %v5756_v63  ;;  %540 = vst.msk [vmem:[#allocation4 + $0x48] sm:$0xff] %vm530_vm2, %v5756_v63 }
  0xaf   : > { %6635 = vmatmul.mubr.msk.bf16.vlgmr.msra.gmra.mrb[32].mxu0 %vm506_vm0, %v7096_v0  ;;  %541 = vst.msk [vmem:[#allocation4 + $0x50] sm:$0xff] %vm530_vm2, %v5756_v63  ;;  %542 = vst.msk [vmem:[#allocation4 + $0x58] sm:$0xff] %vm530_vm2, %v5756_v63 }
  0xb0   : > { %6659 = vmatmul.mubr.msk.bf16.vlgmr.msra.gmra.mrb[32].mxu1 %vm506_vm0, %v7096_v0  ;;  %6675 = vmatpush3.bf16.msra.mxu0 %v7097_v59  ;;  %v7118_v59 = vld [vmem:[%s7742_s24 + $0x34] sm:$0xff]   ;;  %543 = vst.msk [vmem:[#allocation4 + $0x60] sm:$0xff] %vm530_vm2, %v5756_v63  ;;  %544 = vst.msk [vmem:[#allocation4 + $0x68] sm:$0xff] %vm530_vm2, %v5756_v63  ;;  %v7123_v0 = vld [vmem:[%s7742_s24 + $0x44] sm:$0xff]  }
  0xb1   : > { %6638 = vmatprep.mubr.msk.bf16.mxu0 %vm506_vm0, %v7098_v1  ;;  %6662 = vmatprep.mubr.msk.bf16.mxu1 %vm506_vm0, %v7098_v1  ;;  %545 = vst.msk [vmem:[#allocation4 + $0x70] sm:$0xff] %vm530_vm2, %v5756_v63  ;;  %546 = vst.msk [vmem:[#allocation4 + $0x78] sm:$0xff] %vm530_vm2, %v5756_v63  ;;  %v7127_v1 = vld [vmem:[%s7742_s24 + $0x10] sm:$0xff]  }
  0xb2   : > { %6676 = vmatprep.subr.bf16.mxu0 %v7100_v2  ;;  %6699 = vmatpush3.bf16.msra.mxu1 %v7104_v60  ;;  %v7129_v60 = vld [vmem:[%s8812_s4] sm:$0xff]  }
  0xb3   : > { %6700 = vmatprep.subr.bf16.mxu1 %v7105_v3 }
  0xb4   : > { %6677 = vmatpush3.bf16.msra.mxu0 %v7100_v2  ;;  %v7128_v2 = vld [vmem:[%s7742_s24 + $0x18] sm:$0xff]  }
  0xb5   : > { %6678 = vmatprep.subr.bf16.mxu0 %v7103_v4 }
  0xb6   : > { %6701 = vmatpush3.bf16.msra.mxu1 %v7105_v3  ;;  %v7130_v3 = vld [vmem:[%s7742_s24 + $0x20] sm:$0xff]  }
  0xb7   : > { %6639 = vmatmul.mubr.msk.bf16.gmra.mrb[36].mxu0 %vm506_vm0, %v7099_v5  ;;  %6702 = vmatprep.subr.bf16.mxu1 %v7109_v11 }
  0xb8   : > { %6663 = vmatmul.mubr.msk.bf16.gmra.mrb[36].mxu1 %vm506_vm0, %v7099_v5  ;;  %6642 = vmatprep.mubr.msk.bf16.mxu0 %vm506_vm0, %v7101_v8  ;;  %v7140_v5 = vld [vmem:[%s8812_s4 + $0x20] sm:$0xff]  }
  0xb9   : > { %6666 = vmatprep.mubr.msk.bf16.mxu1 %vm506_vm0, %v7101_v8  ;;  %6679 = vmatpush3.bf16.msra.mxu0 %v7103_v4  ;;  %v7134_v4 = vld [vmem:[%s8812_s4 + $0x8] sm:$0xff]   ;;  %v7141_v8 = vld [vmem:[%s8812_s4 + $0x18] sm:$0xff]  }
  0xba   : > { %6680 = vmatprep.subr.bf16.mxu0 %v7108_v13  ;;  %6703 = vmatpush3.bf16.msra.mxu1 %v7109_v11  ;;  %v7132_v11 = vld [vmem:[%s7742_s24 + $0x30] sm:$0xff]  }
  0xbb   : > { %6704 = vmatprep.subr.bf16.mxu1 %v7110_v27 }
  0xbd   : > { %6681 = vmatpush3.bf16.msra.mxu0 %v7108_v13  ;;  %v7133_v13 = vld [vmem:[%s7742_s24 + $0x38] sm:$0xff]  }
  0xbe   : > { %6705 = vmatpush3.bf16.msra.mxu1 %v7110_v27  ;;  %6722 = vmatprep.subr.bf16.mxu0 %v7113_v36  ;;  %v7149_v27 = vld [vmem:[#allocation2 + $0x14] sm:$0xff]  }
  0xbf   : > { %6643 = vmatmul.mubr.msk.bf16.gmra.mrb[40].mxu0 %vm506_vm0, %v7102_v31  ;;  %6746 = vmatprep.subr.bf16.mxu1 %v7120_v40 }
  0xc0   : > { %6667 = vmatmul.mubr.msk.bf16.gmra.mrb[40].mxu1 %vm506_vm0, %v7102_v31  ;;  %6646 = vmatprep.mubr.msk.bf16.mxu0 %vm506_vm0, %v7106_v41  ;;  %v7146_v31 = vld [vmem:[#allocation2 + $0x20] sm:$0xff]  }
  0xc1   : > { %6670 = vmatprep.mubr.msk.bf16.mxu1 %vm506_vm0, %v7106_v41  ;;  %v7164_v41 = vld [vmem:[#allocation2 + $0xc] sm:$0xff]  }
  0xc7   : > { %6647 = vmatmul.mubr.msk.bf16.gmra.mrb[44].mxu0 %vm506_vm0, %v7107_v42 }
  0xc8   : > { %6671 = vmatmul.mubr.msk.bf16.gmra.mrb[44].mxu1 %vm506_vm0, %v7107_v42  ;;  %6682 = vmatprep.mubr.msk.bf16.mxu0 %vm506_vm0, %v7111_v43  ;;  %v7157_v42 = vld [vmem:[#allocation2 + $0x10] sm:$0xff]  }
  0xc9   : > { %6706 = vmatprep.mubr.msk.bf16.mxu1 %vm506_vm0, %v7111_v43  ;;  %v7162_v43 = vld [vmem:[#allocation2 + $0x18] sm:$0xff]  }
  0xcf   : > { %6683 = vmatmul.mubr.msk.bf16.vlgmr.msra.gmra.mrb[48].mxu0 %vm506_vm0, %v7112_v44 }
  0xd0   : > { %6707 = vmatmul.mubr.msk.bf16.vlgmr.msra.gmra.mrb[48].mxu1 %vm506_vm0, %v7112_v44  ;;  %6723 = vmatpush3.bf16.msra.mxu0 %v7113_v36  ;;  %v7155_v36 = vld [vmem:[#allocation2 + $0x2c] sm:$0xff]   ;;  %v7165_v44 = vld [vmem:[#allocation2 + $0x14] sm:$0xff]  }
  0xd1   : > { %6686 = vmatprep.mubr.msk.bf16.mxu0 %vm506_vm0, %v7114_v47  ;;  %6710 = vmatprep.mubr.msk.bf16.mxu1 %vm506_vm0, %v7114_v47  ;;  %v7169_v47 = vld [vmem:[#allocation2 + $0x1c] sm:$0xff]  }
  0xd2   : > { %6724 = vmatprep.subr.bf16.mxu0 %v7116_v48  ;;  %6747 = vmatpush3.bf16.msra.mxu1 %v7120_v40  ;;  %v7160_v40 = vld [vmem:[#allocation2 + $0x3c] sm:$0xff]  }
  0xd3   : > { %6748 = vmatprep.subr.bf16.mxu1 %v7121_v49 }
  0xd4   : > { %6725 = vmatpush3.bf16.msra.mxu0 %v7116_v48  ;;  %v7163_v48 = vld [vmem:[#allocation2 + $0x20] sm:$0xff]  }
  0xd5   : > { %6726 = vmatprep.subr.bf16.mxu0 %v7119_v50 }
  0xd6   : > { %6749 = vmatpush3.bf16.msra.mxu1 %v7121_v49  ;;  %v7166_v49 = vld [vmem:[#allocation2 + $0x28] sm:$0xff]  }
  0xd7   : > { %6687 = vmatmul.mubr.msk.bf16.gmra.mrb[52].mxu0 %vm506_vm0, %v7115_v51  ;;  %6750 = vmatprep.subr.bf16.mxu1 %v7125_v52 }
  0xd8   : > { %6711 = vmatmul.mubr.msk.bf16.gmra.mrb[52].mxu1 %vm506_vm0, %v7115_v51  ;;  %6690 = vmatprep.mubr.msk.bf16.mxu0 %vm506_vm0, %v7117_v53  ;;  %v7173_v51 = vld [vmem:[#allocation2 + $0x2c] sm:$0xff]  }
  0xd9   : > { %6714 = vmatprep.mubr.msk.bf16.mxu1 %vm506_vm0, %v7117_v53  ;;  %6727 = vmatpush3.bf16.msra.mxu0 %v7119_v50  ;;  %v7170_v50 = vld [vmem:[#allocation2 + $0x24] sm:$0xff]   ;;  %v7171_v53 = vld [vmem:[#allocation2 + $0x38] sm:$0xff]  }
  0xda   : > { %6728 = vmatprep.subr.bf16.mxu0 %v7124_v54  ;;  %6751 = vmatpush3.bf16.msra.mxu1 %v7125_v52  ;;  %v7167_v52 = vld [vmem:[#allocation2 + $0x30] sm:$0xff]  }
  0xdb   : > { %6752 = vmatprep.subr.bf16.mxu1 %v7126_v56 }
  0xdd   : > { %6729 = vmatpush3.bf16.msra.mxu0 %v7124_v54  ;;  %v7174_v54 = vld [vmem:[#allocation2 + $0x34] sm:$0xff]  }
  0xde   : > { %6753 = vmatpush3.bf16.msra.mxu1 %v7126_v56  ;;  %6770 = vmatprep.subr.bf16.mxu0 %v7129_v60  ;;  %v565_v56 = vld [vmem:[#allocation3 + $0x10] sm:$0xff] }
  0xdf   : > { %6691 = vmatmul.mubr.msk.bf16.gmra.mrb[56].mxu0 %vm506_vm0, %v7118_v59  ;;  %6790 = vmatprep.subr.bf16.mxu1 %v7135_v61 }
  0xe0   : > { %6715 = vmatmul.mubr.msk.bf16.gmra.mrb[56].mxu1 %vm506_vm0, %v7118_v59  ;;  %6694 = vmatprep.mubr.msk.bf16.mxu0 %vm506_vm0, %v7122_v62  ;;  %v806_v59 = vld [vmem:[#allocation4 + $0x10] sm:$0xff] }
  0xe1   : > { %6718 = vmatprep.mubr.msk.bf16.mxu1 %vm506_vm0, %v7122_v62  ;;  %v804_v62 = vld [vmem:[#allocation4] sm:$0xff] }
  0xe7   : > { %6695 = vmatmul.mubr.msk.bf16.gmra.mrb[60].mxu0 %vm506_vm0, %v7123_v0 }
  0xe8   : > { %6719 = vmatmul.mubr.msk.bf16.gmra.mrb[60].mxu1 %vm506_vm0, %v7123_v0  ;;  %6730 = vmatprep.mubr.msk.bf16.mxu0 %vm506_vm0, %v7127_v1 }
  0xe9   : > { %6754 = vmatprep.mubr.msk.bf16.mxu1 %vm506_vm0, %v7127_v1  ;;  %v564_v1 = vld [vmem:[#allocation3 + $0x8] sm:$0xff] }
  0xef   : > { %6731 = vmatmul.mubr.msk.bf16.vlgmr.msra.gmra.mrb[64].mxu0 %vm506_vm0, %v7128_v2 }
  0xf0   : > { %6755 = vmatmul.mubr.msk.bf16.vlgmr.msra.gmra.mrb[64].mxu1 %vm506_vm0, %v7128_v2  ;;  %6771 = vmatpush3.bf16.msra.mxu0 %v7129_v60  ;;  %v7172_v2 = vld [vmem:[#allocation2 + $0x40] sm:$0xff]  }
  0xf1   : > { %6734 = vmatprep.mubr.msk.bf16.mxu0 %vm506_vm0, %v7130_v3  ;;  %6758 = vmatprep.mubr.msk.bf16.mxu1 %vm506_vm0, %v7130_v3 }
  0xf2   : > { %6772 = vmatprep.subr.bf16.mxu0 %v7134_v4  ;;  %6791 = vmatpush3.bf16.msra.mxu1 %v7135_v61  ;;  %v566_v61 = vld [vmem:[#allocation3 + $0x18] sm:$0xff] }
  0xf3   : > { %6792 = vmatprep.subr.bf16.mxu1 %v7141_v8 }
  0xf4   : > { %6773 = vmatpush3.bf16.msra.mxu0 %v7134_v4  ;;  %v807_v4 = vld [vmem:[#allocation4 + $0x18] sm:$0xff] }
  0xf5   : > { %6810 = vmatprep.subr.bf16.mxu0 %v7140_v5 }
  0xf6   : > { %6793 = vmatpush3.bf16.msra.mxu1 %v7141_v8 }
  0xf7   : > { %6735 = vmatmul.mubr.msk.bf16.gmra.mrb[68].mxu0 %vm506_vm0, %v7131_v9  ;;  %6830 = vmatprep.subr.bf16.mxu1 %v7151_v10 }
  0xf8   : > { %6759 = vmatmul.mubr.msk.bf16.gmra.mrb[68].mxu1 %vm506_vm0, %v7131_v9  ;;  %6738 = vmatprep.mubr.msk.bf16.mxu0 %vm506_vm0, %v7132_v11  ;;  %v7175_v9 = vld [vmem:[#allocation2 + $0x10] sm:$0xff]  }
  0xf9   : > { %6762 = vmatprep.mubr.msk.bf16.mxu1 %vm506_vm0, %v7132_v11 }
  0xff   : > { %6739 = vmatmul.mubr.msk.bf16.gmra.mrb[72].mxu0 %vm506_vm0, %v7133_v13 }
 0x100   : > { %6763 = vmatmul.mubr.msk.bf16.gmra.mrb[72].mxu1 %vm506_vm0, %v7133_v13  ;;  %6742 = vmatprep.mubr.msk.bf16.mxu0 %vm506_vm0, %v7136_v15  ;;  %v805_v13 = vld [vmem:[#allocation4 + $0x8] sm:$0xff] }
 0x101   : > { %6766 = vmatprep.mubr.msk.bf16.mxu1 %vm506_vm0, %v7136_v15 }
 0x107   : > { %6743 = vmatmul.mubr.msk.bf16.gmra.mrb[76].mxu0 %vm506_vm0, %v7137_v18 }
 0x108   : > { %6767 = vmatmul.mubr.msk.bf16.gmra.mrb[76].mxu1 %vm506_vm0, %v7137_v18  ;;  %6774 = vmatprep.mubr.msk.bf16.mxu0 %vm530_vm2, %v7138_v19  ;;  %v7178_v19 = vld [vmem:[#allocation2 + $0x44] sm:$0xff]  }
 0x109   : > { %6794 = vmatprep.mubr.msk.bf16.mxu1 %vm530_vm2, %v7144_v20 }
 0x10f   : > { %6775 = vmatmul.mubr.msk.bf16.vlgmr.msra.gmra.mrb[80].mxu0 %vm530_vm2, %v7139_v23 }
 0x110   : > { %6811 = vmatpush3.bf16.msra.mxu0 %v7140_v5  ;;  %6778 = vmatprep.mubr.msk.bf16.mxu0 %vm530_vm2, %v7142_v24 }
 0x111   : > { %6795 = vmatmul.mubr.msk.bf16.vlgmr.msra.gmra.mrb[80].mxu1 %vm530_vm2, %v7145_v25  ;;  %6812 = vmatprep.subr.bf16.mxu0 %v7148_v26 }
 0x112   : > { %6798 = vmatprep.mubr.msk.bf16.mxu1 %vm530_vm2, %v7149_v27  ;;  %6831 = vmatpush3.bf16.msra.mxu1 %v7151_v10 }
 0x113   : > { %6832 = vmatprep.subr.bf16.mxu1 %v7161_v28 }
 0x114   : > { %6813 = vmatpush3.bf16.msra.mxu0 %v7148_v26 }
 0x115   : > { %6850 = vmatprep.subr.bf16.mxu0 %v7158_v29 }
 0x116   : > { %6833 = vmatpush3.bf16.msra.mxu1 %v7161_v28  ;;  %v569_v28 = vld [vmem:[#allocation3 + $0x30] sm:$0xff] }
 0x117   : > { %6779 = vmatmul.mubr.msk.bf16.gmra.mrb[84].mxu0 %vm530_vm2, %v7143_v30  ;;  %v810_v30 = vld [vmem:[#allocation4 + $0x30] sm:$0xff] }
 0x118   : > { %6782 = vmatprep.mubr.msk.bf16.mxu0 %vm530_vm2, %v7146_v31 }
 0x119   : > { %6799 = vmatmul.mubr.msk.bf16.gmra.mrb[84].mxu1 %vm530_vm2, %v7150_v32  ;;  %v570_v32 = vld [vmem:[#allocation3 + $0x38] sm:$0xff] }
 0x11a   : > { %6802 = vmatprep.mubr.msk.bf16.mxu1 %vm530_vm2, %v7154_v33  ;;  %v808_v33 = vld [vmem:[#allocation4 + $0x20] sm:$0xff] }
 0x11f   : > { %6783 = vmatmul.mubr.msk.bf16.gmra.mrb[88].mxu0 %vm530_vm2, %v7147_v34 }
 0x120   : > { %6786 = vmatprep.mubr.msk.bf16.mxu0 %vm530_vm2, %v7152_v35 }
 0x121   : > { %6803 = vmatmul.mubr.msk.bf16.gmra.mrb[88].mxu1 %vm530_vm2, %v7155_v36  ;;  %v568_v36 = vld [vmem:[#allocation3 + $0x28] sm:$0xff] }
 0x122   : > { %6806 = vmatprep.mubr.msk.bf16.mxu1 %vm530_vm2, %v7159_v37  ;;  %v7176_v37 = vld [vmem:[#allocation2 + $0x18] sm:$0xff]  }
 0x127   : > { %6787 = vmatmul.mubr.msk.bf16.gmra.mrb[92].mxu0 %vm530_vm2, %v7153_v38 }
 0x128   : > { %6814 = vmatprep.mubr.msk.bf16.mxu0 %vm530_vm2, %v7156_v39  ;;  %v811_v39 = vld [vmem:[#allocation4 + $0x38] sm:$0xff] }
 0x129   : > { %6807 = vmatmul.mubr.msk.bf16.gmra.mrb[92].mxu1 %vm530_vm2, %v7160_v40 }
 0x12a   : > { %6834 = vmatprep.mubr.msk.bf16.mxu1 %vm530_vm2, %v7164_v41 }
 0x12f   : > { %6815 = vmatmul.mubr.msk.bf16.vlgmr.msra.gmra.mrb[96].mxu0 %vm530_vm2, %v7157_v42 }
 0x130   : > { %6851 = vmatpush3.bf16.msra.mxu0 %v7158_v29  ;;  %6818 = vmatprep.mubr.msk.bf16.mxu0 %vm530_vm2, %v7162_v43  ;;  %v567_v29 = vld [vmem:[#allocation3 + $0x20] sm:$0xff]  ;;  %v7179_v43 = vld [vmem:[#allocation2 + $0x20] sm:$0xff]  }
 0x131   : > { %6835 = vmatmul.mubr.msk.bf16.vlgmr.msra.gmra.mrb[96].mxu1 %vm530_vm2, %v7165_v44  ;;  %6852 = vmatprep.subr.bf16.mxu0 %v7168_v46 }
 0x132   : > { %6838 = vmatprep.mubr.msk.bf16.mxu1 %vm530_vm2, %v7169_v47 }
 0x134   : > { %6853 = vmatpush3.bf16.msra.mxu0 %v7168_v46  ;;  %v809_v46 = vld [vmem:[#allocation4 + $0x28] sm:$0xff] }
 0x137   : > { %6819 = vmatmul.mubr.msk.bf16.gmra.mrb[100].mxu0 %vm530_vm2, %v7163_v48 }
 0x138   : > { %6822 = vmatprep.mubr.msk.bf16.mxu0 %vm530_vm2, %v7166_v49 }
 0x139   : > { %6839 = vmatmul.mubr.msk.bf16.gmra.mrb[100].mxu1 %vm530_vm2, %v7170_v50 }
 0x13a   : > { %6842 = vmatprep.mubr.msk.bf16.mxu1 %vm530_vm2, %v7173_v51 }
 0x13f   : > { %6823 = vmatmul.mubr.msk.bf16.gmra.mrb[104].mxu0 %vm530_vm2, %v7167_v52 }
 0x140   : > { %6826 = vmatprep.mubr.msk.bf16.mxu0 %vm530_vm2, %v7171_v53 }
 0x141   : > { %6843 = vmatmul.mubr.msk.bf16.gmra.mrb[104].mxu1 %vm530_vm2, %v7174_v54 }
 0x142   : > { %v6540_v60 = vpop.f32.mrb[0].mxu0  ;;  %6846 = vmatprep.mubr.msk.bf16.mxu1 %vm530_vm2, %v7177_v55  ;;  %v573_v55 = vld [vmem:[#allocation3 + $0x50] sm:$0xff] }
 0x143   : > { %v774_v63 = vadd.f32 %v6540_v60, %v565_v56  ;;  %v709_v0 = vpop.f32.mrb[1].mxu0  ;;  %v6564_v3 = vpop.f32.mrb[0].mxu1  ;;  %v571_v56 = vld [vmem:[#allocation3 + $0x40] sm:$0xff]  ;;  %v574_v60 = vld [vmem:[#allocation3 + $0x58] sm:$0xff] }
 0x144   : > { %v772_v5 = vadd.f32 %v709_v0, %v563_v58  ;;  %v6541_v8 = vpop.f32.mrb[2].mxu0  ;;  %v951_v10 = vadd.f32 %v6564_v3, %v806_v59  ;;  %v886_v11 = vpop.f32.mrb[1].mxu1  ;;  %v814_v58 = vld [vmem:[#allocation4 + $0x50] sm:$0xff]  ;;  %v572_v0 = vld [vmem:[#allocation3 + $0x48] sm:$0xff]  ;;  %v815_v3 = vld [vmem:[#allocation4 + $0x58] sm:$0xff] }
 0x145   : > { %790 = vst.msk [vmem:[#allocation3 + $0x10] sm:$0xff] %vm506_vm0, %v774_v63  ;;  %v775_v15 = vadd.f32 %v6541_v8, %v566_v61  ;;  %v712_v18 = vpop.f32.mrb[3].mxu0  ;;  %v949_v20 = vadd.f32 %v886_v11, %v804_v62  ;;  %v6565_v23 = vpop.f32.mrb[2].mxu1  ;;  %v812_v61 = vld [vmem:[#allocation4 + $0x40] sm:$0xff] }
 0x146   : > { %788 = vst.msk [vmem:[#allocation3] sm:$0xff] %vm506_vm0, %v772_v5  ;;  %v773_v24 = vadd.f32 %v712_v18, %v564_v1  ;;  %v952_v25 = vadd.f32 %v6565_v23, %v807_v4  ;;  %v889_v26 = vpop.f32.mrb[3].mxu1  ;;  %v7180_v1 = vld [vmem:[#allocation2 + $0x28] sm:$0xff]   ;;  %v7181_v11 = vld [vmem:[#allocation2 + $0x30] sm:$0xff]  }
 0x147   : > { %967 = vst.msk [vmem:[#allocation4 + $0x10] sm:$0xff] %vm530_vm2, %v951_v10  ;;  %6827 = vmatmul.mubr.msk.bf16.gmra.mrb[108].mxu0 %vm530_vm2, %v7172_v2  ;;  %965 = vst.msk [vmem:[#allocation4] sm:$0xff] %vm530_vm2, %v949_v20  ;;  %v950_v27 = vadd.f32 %v889_v26, %v805_v13  ;;  %v813_v10 = vld [vmem:[#allocation4 + $0x48] sm:$0xff]  ;;  %v578_v26 = vld [vmem:[#allocation3 + $0x78] sm:$0xff] }
 0x148   : > { %791 = vst.msk [vmem:[#allocation3 + $0x18] sm:$0xff] %vm506_vm0, %v775_v15  ;;  %789 = vst.msk [vmem:[#allocation3 + $0x8] sm:$0xff] %vm506_vm0, %v773_v24  ;;  %6854 = vmatprep.mubr.msk.bf16.mxu0 %vm530_vm2, %v7175_v9  ;;  %v818_v24 = vld [vmem:[#allocation4 + $0x70] sm:$0xff] }
 0x149   : > { %968 = vst.msk [vmem:[#allocation4 + $0x18] sm:$0xff] %vm530_vm2, %v952_v25  ;;  %6847 = vmatmul.mubr.msk.bf16.gmra.mrb[108].mxu1 %vm530_vm2, %v7178_v19  ;;  %966 = vst.msk [vmem:[#allocation4 + $0x8] sm:$0xff] %vm530_vm2, %v950_v27  ;;  %v816_v27 = vld [vmem:[#allocation4 + $0x60] sm:$0xff] }
 0x14a   : > { %v6544_v31 = vpop.f32.mrb[4].mxu0 }
 0x14b   : > { %v778_v34 = vadd.f32 %v6544_v31, %v569_v28  ;;  %v725_v35 = vpop.f32.mrb[5].mxu0  ;;  %v6568_v38 = vpop.f32.mrb[4].mxu1 }
 0x14c   : > { %v776_v40 = vadd.f32 %v725_v35, %v567_v29  ;;  %v6545_v41 = vpop.f32.mrb[6].mxu0  ;;  %v955_v42 = vadd.f32 %v6568_v38, %v810_v30  ;;  %v902_v44 = vpop.f32.mrb[5].mxu1  ;;  %v576_v30 = vld [vmem:[#allocation3 + $0x68] sm:$0xff] }
 0x14d   : > { %794 = vst.msk [vmem:[#allocation3 + $0x30] sm:$0xff] %vm506_vm0, %v778_v34  ;;  %v779_v47 = vadd.f32 %v6545_v41, %v570_v32  ;;  %v728_v48 = vpop.f32.mrb[7].mxu0  ;;  %v953_v49 = vadd.f32 %v902_v44, %v808_v33  ;;  %v6569_v50 = vpop.f32.mrb[6].mxu1  ;;  %v7182_v32 = vld [vmem:[#allocation2 + $0x38] sm:$0xff]   ;;  %v819_v33 = vld [vmem:[#allocation4 + $0x78] sm:$0xff] }
 0x14e   : > { %792 = vst.msk [vmem:[#allocation3 + $0x20] sm:$0xff] %vm506_vm0, %v776_v40  ;;  %v777_v51 = vadd.f32 %v728_v48, %v568_v36  ;;  %v956_v52 = vadd.f32 %v6569_v50, %v811_v39  ;;  %v905_v53 = vpop.f32.mrb[7].mxu1  ;;  %v817_v38 = vld [vmem:[#allocation4 + $0x68] sm:$0xff]  ;;  %v7183_v39 = vld [vmem:[#allocation2 + $0x40] sm:$0xff]   ;;  %v1240_v50 = vld [vmem:[#allocation4] sm:$0xff] }
 0x14f   : > { %971 = vst.msk [vmem:[#allocation4 + $0x30] sm:$0xff] %vm530_vm2, %v955_v42  ;;  %6855 = vmatmul.mubr.msk.bf16.vlgmr.msra.gmra.mrb[112].mxu0 %vm530_vm2, %v7176_v37  ;;  %969 = vst.msk [vmem:[#allocation4 + $0x20] sm:$0xff] %vm530_vm2, %v953_v49  ;;  %v954_v54 = vadd.f32 %v905_v53, %v809_v46  ;;  %v1242_v21 = vld [vmem:[#allocation4 + $0x10] sm:$0xff]  ;;  %v998_v53 = vld [vmem:[#allocation3] sm:$0xff] }
 0x150   : > { %795 = vst.msk [vmem:[#allocation3 + $0x38] sm:$0xff] %vm506_vm0, %v779_v47  ;;  %793 = vst.msk [vmem:[#allocation3 + $0x28] sm:$0xff] %vm506_vm0, %v777_v51  ;;  %6858 = vmatprep.mubr.msk.bf16.mxu0 %vm530_vm2, %v7179_v43  ;;  %v7332_v47 = vld [vmem:[%s7714_s27 + $0x48] sm:$0xff]  ;;  %v1000_v48 = vld [vmem:[#allocation3 + $0x10] sm:$0xff] }
 0x151   : > { %972 = vst.msk [vmem:[#allocation4 + $0x38] sm:$0xff] %vm530_vm2, %v956_v52  ;;  %970 = vst.msk [vmem:[#allocation4 + $0x28] sm:$0xff] %vm530_vm2, %v954_v54  ;;  %4126 = vrot.lane.b32.xlu1 %v7332_v47, %s7486_s19 }
 0x152   : > { %v6548_v59 = vpop.f32.mrb[8].mxu0 }
 0x153   : > { %v782_v62 = vadd.f32 %v6548_v59, %v573_v55  ;;  %v741_v63 = vpop.f32.mrb[9].mxu0  ;;  %v6572_v2 = vpop.f32.mrb[8].mxu1  ;;  %v7184_v55 = vld [vmem:[#allocation2 + $0x48] sm:$0xff]  }
 0x154   : > { %v780_v4 = vadd.f32 %v741_v63, %v571_v56  ;;  %v6549_v5 = vpop.f32.mrb[10].mxu0  ;;  %v959_v8 = vadd.f32 %v6572_v2, %v814_v58  ;;  %v918_v9 = vpop.f32.mrb[9].mxu1  ;;  %v999_v2 = vld [vmem:[#allocation3 + $0x8] sm:$0xff] }
 0x155   : > { %798 = vst.msk [vmem:[#allocation3 + $0x50] sm:$0xff] %vm506_vm0, %v782_v62  ;;  %v783_v6 = vadd.f32 %v6549_v5, %v574_v60  ;;  %v744_v13 = vpop.f32.mrb[11].mxu0  ;;  %v957_v12 = vadd.f32 %v918_v9, %v812_v61  ;;  %v6573_v15 = vpop.f32.mrb[10].mxu1  ;;  %v1001_v60 = vld [vmem:[#allocation3 + $0x18] sm:$0xff] }
 0x156   : > { %796 = vst.msk [vmem:[#allocation3 + $0x40] sm:$0xff] %vm506_vm0, %v780_v4  ;;  %v781_v18 = vadd.f32 %v744_v13, %v572_v0  ;;  %v960_v19 = vadd.f32 %v6573_v15, %v815_v3  ;;  %v921_v20 = vpop.f32.mrb[11].mxu1  ;;  %v1243_v0 = vld [vmem:[#allocation4 + $0x18] sm:$0xff]  ;;  %v7333_v4 = vld [vmem:[%s7714_s27 + $0x50] sm:$0xff]  ;;  %v7336_v15 = vld [vmem:[%s7714_s27 + $0x68] sm:$0xff] }
 0x157   : > { %975 = vst.msk [vmem:[#allocation4 + $0x50] sm:$0xff] %vm530_vm2, %v959_v8  ;;  %6859 = vmatmul.mubr.msk.bf16.gmra.mrb[116].mxu0 %vm530_vm2, %v7180_v1  ;;  %973 = vst.msk [vmem:[#allocation4 + $0x40] sm:$0xff] %vm530_vm2, %v957_v12  ;;  %v958_v23 = vadd.f32 %v921_v20, %v813_v10  ;;  %4128 = vrot.lane.b32.xlu0 %v7333_v4, %s7486_s19  ;;  %v7334_v5 = vld [vmem:[%s7714_s27 + $0x58] sm:$0xff]  ;;  %v1241_v10 = vld [vmem:[#allocation4 + $0x8] sm:$0xff] }
 0x158   : > { %799 = vst.msk [vmem:[#allocation3 + $0x58] sm:$0xff] %vm506_vm0, %v783_v6  ;;  %797 = vst.msk [vmem:[#allocation3 + $0x48] sm:$0xff] %vm506_vm0, %v781_v18  ;;  %6862 = vmatprep.mubr.msk.bf16.mxu0 %vm530_vm2, %v7181_v11  ;;  %4130 = vrot.lane.b32.xlu1 %v7334_v5, %s7486_s19  ;;  %v1246_v13 = vld [vmem:[#allocation4 + $0x30] sm:$0xff]  ;;  %v7335_v12 = vld [vmem:[%s7714_s27 + $0x60] sm:$0xff] }
 0x159   : > { %976 = vst.msk [vmem:[#allocation4 + $0x58] sm:$0xff] %vm530_vm2, %v960_v19  ;;  %974 = vst.msk [vmem:[#allocation4 + $0x48] sm:$0xff] %vm530_vm2, %v958_v23  ;;  %v1004_v18 = vld [vmem:[#allocation3 + $0x30] sm:$0xff]  ;;  %v1244_v20 = vld [vmem:[#allocation4 + $0x20] sm:$0xff] }
 0x15a   : > { %v6552_v25 = vpop.f32.mrb[12].mxu0 }
 0x15b   : > { %v786_v28 = vadd.f32 %v6552_v25, %v577_v7  ;;  %v757_v29 = vpop.f32.mrb[13].mxu0  ;;  %v6576_v31 = vpop.f32.mrb[12].mxu1  ;;  %4132 = vrot.lane.b32.xlu0 %v7335_v12, %s7486_s19 }
 0x15c   : > { %v784_v34 = vadd.f32 %v757_v29, %v575_v14  ;;  %v6553_v35 = vpop.f32.mrb[14].mxu0  ;;  %v963_v36 = vadd.f32 %v6576_v31, %v818_v24  ;;  %v934_v37 = vpop.f32.mrb[13].mxu1  ;;  %4134 = vrot.lane.b32.xlu1 %v7336_v15, %s7486_s19  ;;  %v1002_v14 = vld [vmem:[#allocation3 + $0x20] sm:$0xff] }
 0x15d   : > { %802 = vst.msk [vmem:[#allocation3 + $0x70] sm:$0xff] %vm506_vm0, %v786_v28  ;;  %v787_v16 = vadd.f32 %v6553_v35, %v578_v26  ;;  %v760_v40 = vpop.f32.mrb[15].mxu0  ;;  %v961_v17 = vadd.f32 %v934_v37, %v816_v27  ;;  %v6577_v41 = vpop.f32.mrb[14].mxu1  ;;  %v1005_v28 = vld [vmem:[#allocation3 + $0x38] sm:$0xff] }
 0x15e   : > { %800 = vst.msk [vmem:[#allocation3 + $0x60] sm:$0xff] %vm506_vm0, %v784_v34  ;;  %v785_v42 = vadd.f32 %v760_v40, %v576_v30  ;;  %v964_v43 = vadd.f32 %v6577_v41, %v819_v33  ;;  %v937_v44 = vpop.f32.mrb[15].mxu1  ;;  %v1003_v34 = vld [vmem:[#allocation3 + $0x28] sm:$0xff] }
 0x15f   : > { %979 = vst.msk [vmem:[#allocation4 + $0x70] sm:$0xff] %vm530_vm2, %v963_v36  ;;  %977 = vst.msk [vmem:[#allocation4 + $0x60] sm:$0xff] %vm530_vm2, %v961_v17  ;;  %6863 = vmatmul.mubr.msk.bf16.gmra.mrb[120].mxu0 %vm530_vm2, %v7182_v32  ;;  %v962_v46 = vadd.f32 %v937_v44, %v817_v38  ;;  %v1247_v32 = vld [vmem:[#allocation4 + $0x38] sm:$0xff]  ;;  %4136 = vrot.lane.b32.xlu0 %v7966_v45, %s7486_s19  ;;  %v1245_v38 = vld [vmem:[#allocation4 + $0x28] sm:$0xff] }
 0x160   : > { %803 = vst.msk [vmem:[#allocation3 + $0x78] sm:$0xff] %vm506_vm0, %v787_v16  ;;  %801 = vst.msk [vmem:[#allocation3 + $0x68] sm:$0xff] %vm506_vm0, %v785_v42  ;;  %6866 = vmatprep.mubr.msk.bf16.mxu0 %vm530_vm2, %v7183_v39  ;;  %4138 = vrot.lane.b32.xlu1 %v8017_v57, %s7486_s19  ;;  %v1250_v45 = vld [vmem:[#allocation4 + $0x50] sm:$0xff]  ;;  %v1248_v17 = vld [vmem:[#allocation4 + $0x40] sm:$0xff]  ;;  %s8748_s19 = scalar_lea.hbm %s8816_s8, %s6291_s30 }
 0x161   : > { %980 = vst.msk [vmem:[#allocation4 + $0x78] sm:$0xff] %vm530_vm2, %v964_v43  ;;  %978 = vst.msk [vmem:[#allocation4 + $0x68] sm:$0xff] %vm530_vm2, %v962_v46  ;;  %v1008_v57 = vld [vmem:[#allocation3 + $0x50] sm:$0xff]  ;;  %v1006_v43 = vld [vmem:[#allocation3 + $0x40] sm:$0xff] }
 0x162   : > { %v6588_v49 = vpop.f32.mrb[16].mxu0  ;;  %v1009_v47 = vld [vmem:[#allocation3 + $0x58] sm:$0xff] }
 0x163   : > { %v1210_v51 = vadd.f32 %v6588_v49, %v1000_v48  ;;  %v6612_v52 = vpop.f32.mrb[16].mxu1  ;;  %v1145_v54 = vpop.f32.mrb[17].mxu0 }
 0x164   : > { %v1388_v56 = vadd.f32 %v6612_v52, %v1242_v21  ;;  %v1208_v58 = vadd.f32 %v1145_v54, %v998_v53  ;;  %v1323_v59 = vpop.f32.mrb[17].mxu1  ;;  %v6589_v61 = vpop.f32.mrb[18].mxu0  ;;  %v1007_v53 = vld [vmem:[#allocation3 + $0x48] sm:$0xff] }
 0x165   : > { %1226 = vst.msk [vmem:[#allocation3 + $0x10] sm:$0xff] %vm506_vm0, %v1210_v51  ;;  %v1386_v62 = vadd.f32 %v1323_v59, %v1240_v50  ;;  %v1211_v63 = vadd.f32 %v6589_v61, %v1001_v60  ;;  %v6613_v1 = vpop.f32.mrb[18].mxu1  ;;  %v1148_v3 = vpop.f32.mrb[19].mxu0  ;;  %v1251_v51 = vld [vmem:[#allocation4 + $0x58] sm:$0xff] }
 0x166   : > { %1404 = vst.msk [vmem:[#allocation4 + $0x10] sm:$0xff] %vm530_vm2, %v1388_v56  ;;  %v1389_v8 = vadd.f32 %v6613_v1, %v1243_v0  ;;  %v1209_v9 = vadd.f32 %v1148_v3, %v999_v2  ;;  %v1326_v11 = vpop.f32.mrb[19].mxu1  ;;  %v1254_v61 = vld [vmem:[#allocation4 + $0x70] sm:$0xff]  ;;  %v1252_v0 = vld [vmem:[#allocation4 + $0x60] sm:$0xff] }
 0x167   : > { %1224 = vst.msk [vmem:[#allocation3] sm:$0xff] %vm506_vm0, %v1208_v58  ;;  %1227 = vst.msk [vmem:[#allocation3 + $0x18] sm:$0xff] %vm506_vm0, %v1211_v63  ;;  %v1387_v6 = vadd.f32 %v1326_v11, %v1241_v10  ;;  %6867 = vmatmul.mubr.msk.bf16.gmra.mrb[124].mxu0 %vm530_vm2, %v7184_v55  ;;  %v1249_v58 = vld [vmem:[#allocation4 + $0x48] sm:$0xff]  ;;  %v1010_v3 = vld [vmem:[#allocation3 + $0x60] sm:$0xff] }
 0x168   : > { %1402 = vst.msk [vmem:[#allocation4] sm:$0xff] %vm530_vm2, %v1386_v62  ;;  %1405 = vst.msk [vmem:[#allocation4 + $0x18] sm:$0xff] %vm530_vm2, %v1389_v8  ;;  %v1012_v62 = vld [vmem:[#allocation3 + $0x70] sm:$0xff]  ;;  %v1013_v10 = vld [vmem:[#allocation3 + $0x78] sm:$0xff] }
 0x169   : > { %1225 = vst.msk [vmem:[#allocation3 + $0x8] sm:$0xff] %vm506_vm0, %v1209_v9  ;;  %v1255_v12 = vld [vmem:[#allocation4 + $0x78] sm:$0xff] }
 0x16a   : > { %1403 = vst.msk [vmem:[#allocation4 + $0x8] sm:$0xff] %vm530_vm2, %v1387_v6  ;;  %v6592_v19 = vpop.f32.mrb[20].mxu0 }
 0x16b   : > { %v1214_v23 = vadd.f32 %v6592_v19, %v1004_v18  ;;  %v6616_v7 = vpop.f32.mrb[20].mxu1  ;;  %v1161_v24 = vpop.f32.mrb[21].mxu0  ;;  %v1011_v18 = vld [vmem:[#allocation3 + $0x68] sm:$0xff] }
 0x16c   : > { %v1392_v25 = vadd.f32 %v6616_v7, %v1246_v13  ;;  %v1212_v26 = vadd.f32 %v1161_v24, %v1002_v14  ;;  %v1339_v27 = vpop.f32.mrb[21].mxu1  ;;  %v6593_v29 = vpop.f32.mrb[22].mxu0  ;;  %v1253_v7 = vld [vmem:[#allocation4 + $0x68] sm:$0xff] }
 0x16d   : > { %1230 = vst.msk [vmem:[#allocation3 + $0x30] sm:$0xff] %vm506_vm0, %v1214_v23  ;;  %v1390_v30 = vadd.f32 %v1339_v27, %v1244_v20  ;;  %v1215_v31 = vadd.f32 %v6593_v29, %v1005_v28  ;;  %v6617_v33 = vpop.f32.mrb[22].mxu1  ;;  %v1164_v35 = vpop.f32.mrb[23].mxu0  ;;  %v1679_v28 = vld [vmem:[#allocation4 + $0x10] sm:$0xff] }
 0x16e   : > { %1408 = vst.msk [vmem:[#allocation4 + $0x30] sm:$0xff] %vm530_vm2, %v1392_v25  ;;  %v1393_v36 = vadd.f32 %v6617_v33, %v1247_v32  ;;  %v1213_v37 = vadd.f32 %v1164_v35, %v1003_v34  ;;  %v1342_v39 = vpop.f32.mrb[23].mxu1  ;;  %v1437_v25 = vld [vmem:[#allocation3 + $0x10] sm:$0xff] }
 0x16f   : > { %1228 = vst.msk [vmem:[#allocation3 + $0x20] sm:$0xff] %vm506_vm0, %v1212_v26  ;;  %1231 = vst.msk [vmem:[#allocation3 + $0x38] sm:$0xff] %vm506_vm0, %v1215_v31  ;;  %v1391_v16 = vadd.f32 %v1342_v39, %v1245_v38  ;;  %v1677_v34 = vld [vmem:[#allocation4] sm:$0xff] }
 0x170   : > { %1406 = vst.msk [vmem:[#allocation4 + $0x20] sm:$0xff] %vm530_vm2, %v1390_v30  ;;  %1409 = vst.msk [vmem:[#allocation4 + $0x38] sm:$0xff] %vm530_vm2, %v1393_v36  ;;  %v1435_v30 = vld [vmem:[#allocation3] sm:$0xff]  ;;  %v1438_v36 = vld [vmem:[#allocation3 + $0x18] sm:$0xff] }
 0x171   : > { %1229 = vst.msk [vmem:[#allocation3 + $0x28] sm:$0xff] %vm506_vm0, %v1213_v37 }
 0x172   : > { %1407 = vst.msk [vmem:[#allocation4 + $0x28] sm:$0xff] %vm530_vm2, %v1391_v16  ;;  %v6596_v40 = vpop.f32.mrb[24].mxu0  ;;  %v1680_v16 = vld [vmem:[#allocation4 + $0x18] sm:$0xff] }
 0x173   : > { %v1218_v41 = vadd.f32 %v6596_v40, %v1008_v57  ;;  %v6620_v42 = vpop.f32.mrb[24].mxu1  ;;  %v1177_v44 = vpop.f32.mrb[25].mxu0  ;;  %v1436_v57 = vld [vmem:[#allocation3 + $0x8] sm:$0xff] }
 0x174   : > { %v1396_v46 = vadd.f32 %v6620_v42, %v1250_v45  ;;  %v1216_v21 = vadd.f32 %v1177_v44, %v1006_v43  ;;  %v1355_v22 = vpop.f32.mrb[25].mxu1  ;;  %v6597_v48 = vpop.f32.mrb[26].mxu0  ;;  %v1678_v42 = vld [vmem:[#allocation4 + $0x8] sm:$0xff] }
 0x175   : > { %1234 = vst.msk [vmem:[#allocation3 + $0x50] sm:$0xff] %vm506_vm0, %v1218_v41  ;;  %v1394_v49 = vadd.f32 %v1355_v22, %v1248_v17  ;;  %v1219_v50 = vadd.f32 %v6597_v48, %v1009_v47  ;;  %v6621_v52 = vpop.f32.mrb[26].mxu1  ;;  %v1180_v54 = vpop.f32.mrb[27].mxu0  ;;  %v1683_v47 = vld [vmem:[#allocation4 + $0x30] sm:$0xff] }
 0x176   : > { %1412 = vst.msk [vmem:[#allocation4 + $0x50] sm:$0xff] %vm530_vm2, %v1396_v46  ;;  %v1397_v55 = vadd.f32 %v6621_v52, %v1251_v51  ;;  %v1217_v56 = vadd.f32 %v1180_v54, %v1007_v53  ;;  %v1358_v59 = vpop.f32.mrb[27].mxu1  ;;  %v1441_v46 = vld [vmem:[#allocation3 + $0x30] sm:$0xff] }
 0x177   : > { %1232 = vst.msk [vmem:[#allocation3 + $0x40] sm:$0xff] %vm506_vm0, %v1216_v21  ;;  %1235 = vst.msk [vmem:[#allocation3 + $0x58] sm:$0xff] %vm506_vm0, %v1219_v50  ;;  %v1395_v60 = vadd.f32 %v1358_v59, %v1249_v58  ;;  %v1681_v53 = vld [vmem:[#allocation4 + $0x20] sm:$0xff] }
 0x178   : > { %1410 = vst.msk [vmem:[#allocation4 + $0x40] sm:$0xff] %vm530_vm2, %v1394_v49  ;;  %1413 = vst.msk [vmem:[#allocation4 + $0x58] sm:$0xff] %vm530_vm2, %v1397_v55  ;;  %v1439_v49 = vld [vmem:[#allocation3 + $0x20] sm:$0xff]  ;;  %v1442_v55 = vld [vmem:[#allocation3 + $0x38] sm:$0xff] }
 0x179   : > { %1233 = vst.msk [vmem:[#allocation3 + $0x48] sm:$0xff] %vm506_vm0, %v1217_v56 }
 0x17a   : > { %1411 = vst.msk [vmem:[#allocation4 + $0x48] sm:$0xff] %vm530_vm2, %v1395_v60  ;;  %v6600_v63 = vpop.f32.mrb[28].mxu0  ;;  %v1684_v60 = vld [vmem:[#allocation4 + $0x38] sm:$0xff] }
 0x17b   : > { %v1222_v1 = vadd.f32 %v6600_v63, %v1012_v62  ;;  %v6624_v2 = vpop.f32.mrb[28].mxu1  ;;  %v1193_v4 = vpop.f32.mrb[29].mxu0  ;;  %v1440_v62 = vld [vmem:[#allocation3 + $0x28] sm:$0xff] }
 0x17c   : > { %v1400_v5 = vadd.f32 %v6624_v2, %v1254_v61  ;;  %v1220_v8 = vadd.f32 %v1193_v4, %v1010_v3  ;;  %v1371_v9 = vpop.f32.mrb[29].mxu1  ;;  %v6601_v11 = vpop.f32.mrb[30].mxu0  ;;  %v1682_v2 = vld [vmem:[#allocation4 + $0x28] sm:$0xff] }
 0x17d   : > { %1238 = vst.msk [vmem:[#allocation3 + $0x70] sm:$0xff] %vm506_vm0, %v1222_v1  ;;  %v1398_v6 = vadd.f32 %v1371_v9, %v1252_v0  ;;  %v1223_v13 = vadd.f32 %v6601_v11, %v1013_v10  ;;  %v6625_v15 = vpop.f32.mrb[30].mxu1  ;;  %v1196_v19 = vpop.f32.mrb[31].mxu0  ;;  %v1687_v10 = vld [vmem:[#allocation4 + $0x50] sm:$0xff] }
 0x17e   : > { %1416 = vst.msk [vmem:[#allocation4 + $0x70] sm:$0xff] %vm530_vm2, %v1400_v5  ;;  %v1401_v20 = vadd.f32 %v6625_v15, %v1255_v12  ;;  %v1221_v23 = vadd.f32 %v1196_v19, %v1011_v18  ;;  %v1374_v14 = vpop.f32.mrb[31].mxu1  ;;  %v1445_v5 = vld [vmem:[#allocation3 + $0x50] sm:$0xff] }
 0x17f   : > { %1236 = vst.msk [vmem:[#allocation3 + $0x60] sm:$0xff] %vm506_vm0, %v1220_v8  ;;  %1239 = vst.msk [vmem:[#allocation3 + $0x78] sm:$0xff] %vm506_vm0, %v1223_v13  ;;  %v1399_v24 = vadd.f32 %v1374_v14, %v1253_v7  ;;  %v1685_v18 = vld [vmem:[#allocation4 + $0x40] sm:$0xff] }
 0x180   : > { %1414 = vst.msk [vmem:[#allocation4 + $0x60] sm:$0xff] %vm530_vm2, %v1398_v6  ;;  %1417 = vst.msk [vmem:[#allocation4 + $0x78] sm:$0xff] %vm530_vm2, %v1401_v20  ;;  %v1443_v6 = vld [vmem:[#allocation3 + $0x40] sm:$0xff]  ;;  %v1446_v20 = vld [vmem:[#allocation3 + $0x58] sm:$0xff] }
 0x181   : > { %1237 = vst.msk [vmem:[#allocation3 + $0x68] sm:$0xff] %vm506_vm0, %v1221_v23 }
 0x182   : > { %1415 = vst.msk [vmem:[#allocation4 + $0x68] sm:$0xff] %vm530_vm2, %v1399_v24  ;;  %v6636_v26 = vpop.f32.mrb[32].mxu0  ;;  %v1688_v24 = vld [vmem:[#allocation4 + $0x58] sm:$0xff] }
 0x183   : > { %v1647_v27 = vadd.f32 %v6636_v26, %v1437_v25  ;;  %v6660_v29 = vpop.f32.mrb[32].mxu1  ;;  %v1582_v31 = vpop.f32.mrb[33].mxu0  ;;  %v1444_v26 = vld [vmem:[#allocation3 + $0x48] sm:$0xff] }
 0x184   : > { %v1825_v32 = vadd.f32 %v6660_v29, %v1679_v28  ;;  %v1645_v33 = vadd.f32 %v1582_v31, %v1435_v30  ;;  %v1760_v35 = vpop.f32.mrb[33].mxu1  ;;  %v6637_v37 = vpop.f32.mrb[34].mxu0  ;;  %v1686_v30 = vld [vmem:[#allocation4 + $0x48] sm:$0xff] }
 0x185   : > { %1663 = vst.msk [vmem:[#allocation3 + $0x10] sm:$0xff] %vm506_vm0, %v1647_v27  ;;  %v1823_v38 = vadd.f32 %v1760_v35, %v1677_v34  ;;  %v1648_v39 = vadd.f32 %v6637_v37, %v1438_v36  ;;  %v6661_v45 = vpop.f32.mrb[34].mxu1  ;;  %v1585_v40 = vpop.f32.mrb[35].mxu0  ;;  %v1691_v36 = vld [vmem:[#allocation4 + $0x70] sm:$0xff] }
 0x186   : > { %1841 = vst.msk [vmem:[#allocation4 + $0x10] sm:$0xff] %vm530_vm2, %v1825_v32  ;;  %v1826_v17 = vadd.f32 %v6661_v45, %v1680_v16  ;;  %v1646_v41 = vadd.f32 %v1585_v40, %v1436_v57  ;;  %v1763_v43 = vpop.f32.mrb[35].mxu1 }
 0x187   : > { %1661 = vst.msk [vmem:[#allocation3] sm:$0xff] %vm506_vm0, %v1645_v33  ;;  %1664 = vst.msk [vmem:[#allocation3 + $0x18] sm:$0xff] %vm506_vm0, %v1648_v39  ;;  %v1824_v44 = vadd.f32 %v1763_v43, %v1678_v42  ;;  %v1449_v33 = vld [vmem:[#allocation3 + $0x70] sm:$0xff]  ;;  %v1689_v57 = vld [vmem:[#allocation4 + $0x60] sm:$0xff] }
 0x188   : > { %1839 = vst.msk [vmem:[#allocation4] sm:$0xff] %vm530_vm2, %v1823_v38  ;;  %1842 = vst.msk [vmem:[#allocation4 + $0x18] sm:$0xff] %vm530_vm2, %v1826_v17  ;;  %v1447_v38 = vld [vmem:[#allocation3 + $0x60] sm:$0xff]  ;;  %v1450_v17 = vld [vmem:[#allocation3 + $0x78] sm:$0xff] }
 0x189   : > { %1662 = vst.msk [vmem:[#allocation3 + $0x8] sm:$0xff] %vm506_vm0, %v1646_v41 }
 0x18a   : > { %1840 = vst.msk [vmem:[#allocation4 + $0x8] sm:$0xff] %vm530_vm2, %v1824_v44  ;;  %v6640_v21 = vpop.f32.mrb[36].mxu0  ;;  %v1692_v44 = vld [vmem:[#allocation4 + $0x78] sm:$0xff] }
 0x18b   : > { %v1651_v22 = vadd.f32 %v6640_v21, %v1441_v46  ;;  %v6664_v48 = vpop.f32.mrb[36].mxu1  ;;  %v1598_v50 = vpop.f32.mrb[37].mxu0  ;;  %v1448_v21 = vld [vmem:[#allocation3 + $0x68] sm:$0xff] }
 0x18c   : > { %v1829_v51 = vadd.f32 %v6664_v48, %v1683_v47  ;;  %v1649_v52 = vadd.f32 %v1598_v50, %v1439_v49  ;;  %v1776_v54 = vpop.f32.mrb[37].mxu1  ;;  %v6641_v56 = vpop.f32.mrb[38].mxu0  ;;  %v1690_v49 = vld [vmem:[#allocation4 + $0x68] sm:$0xff] }
 0x18d   : > { %1667 = vst.msk [vmem:[#allocation3 + $0x30] sm:$0xff] %vm506_vm0, %v1651_v22  ;;  %v1827_v58 = vadd.f32 %v1776_v54, %v1681_v53  ;;  %v1652_v59 = vadd.f32 %v6641_v56, %v1442_v55  ;;  %v6665_v61 = vpop.f32.mrb[38].mxu1  ;;  %v1601_v63 = vpop.f32.mrb[39].mxu0  ;;  %v2116_v55 = vld [vmem:[#allocation4 + $0x10] sm:$0xff] }
 0x18e   : > { %1845 = vst.msk [vmem:[#allocation4 + $0x30] sm:$0xff] %vm530_vm2, %v1829_v51  ;;  %v1830_v0 = vadd.f32 %v6665_v61, %v1684_v60  ;;  %v1650_v1 = vadd.f32 %v1601_v63, %v1440_v62  ;;  %v1779_v3 = vpop.f32.mrb[39].mxu1 }
 0x18f   : > { %1665 = vst.msk [vmem:[#allocation3 + $0x20] sm:$0xff] %vm506_vm0, %v1649_v52  ;;  %1668 = vst.msk [vmem:[#allocation3 + $0x38] sm:$0xff] %vm506_vm0, %v1652_v59  ;;  %v1828_v4 = vadd.f32 %v1779_v3, %v1682_v2  ;;  %v1874_v52 = vld [vmem:[#allocation3 + $0x10] sm:$0xff]  ;;  %v2114_v62 = vld [vmem:[#allocation4] sm:$0xff] }
 0x190   : > { %1843 = vst.msk [vmem:[#allocation4 + $0x20] sm:$0xff] %vm530_vm2, %v1827_v58  ;;  %1846 = vst.msk [vmem:[#allocation4 + $0x38] sm:$0xff] %vm530_vm2, %v1830_v0  ;;  %v1872_v58 = vld [vmem:[#allocation3] sm:$0xff]  ;;  %v1875_v0 = vld [vmem:[#allocation3 + $0x18] sm:$0xff] }
 0x191   : > { %1666 = vst.msk [vmem:[#allocation3 + $0x28] sm:$0xff] %vm506_vm0, %v1650_v1 }
 0x192   : > { %1844 = vst.msk [vmem:[#allocation4 + $0x28] sm:$0xff] %vm530_vm2, %v1828_v4  ;;  %v6644_v8 = vpop.f32.mrb[40].mxu0  ;;  %v2117_v4 = vld [vmem:[#allocation4 + $0x18] sm:$0xff] }
 0x193   : > { %v1655_v9 = vadd.f32 %v6644_v8, %v1445_v5  ;;  %v6668_v11 = vpop.f32.mrb[40].mxu1  ;;  %v1614_v13 = vpop.f32.mrb[41].mxu0  ;;  %v1873_v8 = vld [vmem:[#allocation3 + $0x8] sm:$0xff] }
 0x194   : > { %v1833_v12 = vadd.f32 %v6668_v11, %v1687_v10  ;;  %v1653_v15 = vadd.f32 %v1614_v13, %v1443_v6  ;;  %v1792_v19 = vpop.f32.mrb[41].mxu1  ;;  %v6645_v23 = vpop.f32.mrb[42].mxu0  ;;  %v2115_v6 = vld [vmem:[#allocation4 + $0x8] sm:$0xff] }
 0x195   : > { %1671 = vst.msk [vmem:[#allocation3 + $0x50] sm:$0xff] %vm506_vm0, %v1655_v9  ;;  %v1831_v7 = vadd.f32 %v1792_v19, %v1685_v18  ;;  %v1656_v14 = vadd.f32 %v6645_v23, %v1446_v20  ;;  %v6669_v25 = vpop.f32.mrb[42].mxu1  ;;  %v1617_v27 = vpop.f32.mrb[43].mxu0  ;;  %v2120_v20 = vld [vmem:[#allocation4 + $0x30] sm:$0xff] }
 0x196   : > { %1849 = vst.msk [vmem:[#allocation4 + $0x50] sm:$0xff] %vm530_vm2, %v1833_v12  ;;  %v1834_v28 = vadd.f32 %v6669_v25, %v1688_v24  ;;  %v1654_v29 = vadd.f32 %v1617_v27, %v1444_v26  ;;  %v1795_v31 = vpop.f32.mrb[43].mxu1 }
 0x197   : > { %1669 = vst.msk [vmem:[#allocation3 + $0x40] sm:$0xff] %vm506_vm0, %v1653_v15  ;;  %1672 = vst.msk [vmem:[#allocation3 + $0x58] sm:$0xff] %vm506_vm0, %v1656_v14  ;;  %v1832_v32 = vadd.f32 %v1795_v31, %v1686_v30  ;;  %v1878_v15 = vld [vmem:[#allocation3 + $0x30] sm:$0xff]  ;;  %v2118_v26 = vld [vmem:[#allocation4 + $0x20] sm:$0xff] }
 0x198   : > { %1847 = vst.msk [vmem:[#allocation4 + $0x40] sm:$0xff] %vm530_vm2, %v1831_v7  ;;  %1850 = vst.msk [vmem:[#allocation4 + $0x58] sm:$0xff] %vm530_vm2, %v1834_v28  ;;  %v1876_v7 = vld [vmem:[#allocation3 + $0x20] sm:$0xff]  ;;  %v1879_v28 = vld [vmem:[#allocation3 + $0x38] sm:$0xff] }
 0x199   : > { %1670 = vst.msk [vmem:[#allocation3 + $0x48] sm:$0xff] %vm506_vm0, %v1654_v29 }
 0x19a   : > { %1848 = vst.msk [vmem:[#allocation4 + $0x48] sm:$0xff] %vm530_vm2, %v1832_v32  ;;  %v6648_v34 = vpop.f32.mrb[44].mxu0  ;;  %v2121_v32 = vld [vmem:[#allocation4 + $0x38] sm:$0xff] }
 0x19b   : > { %v1659_v35 = vadd.f32 %v6648_v34, %v1449_v33  ;;  %v6672_v37 = vpop.f32.mrb[44].mxu1  ;;  %v1630_v39 = vpop.f32.mrb[45].mxu0  ;;  %v1877_v34 = vld [vmem:[#allocation3 + $0x28] sm:$0xff] }
 0x19c   : > { %v1837_v16 = vadd.f32 %v6672_v37, %v1691_v36  ;;  %v1657_v45 = vadd.f32 %v1630_v39, %v1447_v38  ;;  %v1808_v40 = vpop.f32.mrb[45].mxu1  ;;  %v6649_v41 = vpop.f32.mrb[46].mxu0  ;;  %v2119_v38 = vld [vmem:[#allocation4 + $0x28] sm:$0xff] }
 0x19d   : > { %1675 = vst.msk [vmem:[#allocation3 + $0x70] sm:$0xff] %vm506_vm0, %v1659_v35  ;;  %v1835_v42 = vadd.f32 %v1808_v40, %v1689_v57  ;;  %v1660_v43 = vadd.f32 %v6649_v41, %v1450_v17  ;;  %v6673_v46 = vpop.f32.mrb[46].mxu1  ;;  %v1633_v22 = vpop.f32.mrb[47].mxu0  ;;  %v2124_v17 = vld [vmem:[#allocation4 + $0x50] sm:$0xff] }
 0x19e   : > { %1853 = vst.msk [vmem:[#allocation4 + $0x70] sm:$0xff] %vm530_vm2, %v1837_v16  ;;  %v1838_v47 = vadd.f32 %v6673_v46, %v1692_v44  ;;  %v1658_v48 = vadd.f32 %v1633_v22, %v1448_v21  ;;  %v1811_v50 = vpop.f32.mrb[47].mxu1 }
 0x19f   : > { %1673 = vst.msk [vmem:[#allocation3 + $0x60] sm:$0xff] %vm506_vm0, %v1657_v45  ;;  %1676 = vst.msk [vmem:[#allocation3 + $0x78] sm:$0xff] %vm506_vm0, %v1660_v43  ;;  %v1836_v51 = vadd.f32 %v1811_v50, %v1690_v49  ;;  %v1882_v45 = vld [vmem:[#allocation3 + $0x50] sm:$0xff]  ;;  %v2122_v21 = vld [vmem:[#allocation4 + $0x40] sm:$0xff] }
 0x1a0   : > { %1851 = vst.msk [vmem:[#allocation4 + $0x60] sm:$0xff] %vm530_vm2, %v1835_v42  ;;  %1854 = vst.msk [vmem:[#allocation4 + $0x78] sm:$0xff] %vm530_vm2, %v1838_v47  ;;  %v1880_v42 = vld [vmem:[#allocation3 + $0x40] sm:$0xff]  ;;  %v1883_v47 = vld [vmem:[#allocation3 + $0x58] sm:$0xff] }
 0x1a1   : > { %1674 = vst.msk [vmem:[#allocation3 + $0x68] sm:$0xff] %vm506_vm0, %v1658_v48 }
 0x1a2   : > { %1852 = vst.msk [vmem:[#allocation4 + $0x68] sm:$0xff] %vm530_vm2, %v1836_v51  ;;  %v6684_v53 = vpop.f32.mrb[48].mxu0  ;;  %v2125_v51 = vld [vmem:[#allocation4 + $0x58] sm:$0xff] }
 0x1a3   : > { %v2084_v54 = vadd.f32 %v6684_v53, %v1874_v52  ;;  %v6708_v56 = vpop.f32.mrb[48].mxu1  ;;  %v2019_v59 = vpop.f32.mrb[49].mxu0  ;;  %v1881_v53 = vld [vmem:[#allocation3 + $0x48] sm:$0xff] }
 0x1a4   : > { %v2262_v60 = vadd.f32 %v6708_v56, %v2116_v55  ;;  %v2082_v61 = vadd.f32 %v2019_v59, %v1872_v58  ;;  %v2197_v63 = vpop.f32.mrb[49].mxu1  ;;  %v6685_v1 = vpop.f32.mrb[50].mxu0  ;;  %v2123_v58 = vld [vmem:[#allocation4 + $0x48] sm:$0xff] }
 0x1a5   : > { %2100 = vst.msk [vmem:[#allocation3 + $0x10] sm:$0xff] %vm506_vm0, %v2084_v54  ;;  %v2260_v2 = vadd.f32 %v2197_v63, %v2114_v62  ;;  %v2085_v3 = vadd.f32 %v6685_v1, %v1875_v0  ;;  %v6709_v5 = vpop.f32.mrb[50].mxu1  ;;  %v2022_v9 = vpop.f32.mrb[51].mxu0  ;;  %v2128_v0 = vld [vmem:[#allocation4 + $0x70] sm:$0xff] }
 0x1a6   : > { %2278 = vst.msk [vmem:[#allocation4 + $0x10] sm:$0xff] %vm530_vm2, %v2262_v60  ;;  %v2263_v10 = vadd.f32 %v6709_v5, %v2117_v4  ;;  %v2083_v11 = vadd.f32 %v2022_v9, %v1873_v8  ;;  %v2200_v13 = vpop.f32.mrb[51].mxu1 }
 0x1a7   : > { %2098 = vst.msk [vmem:[#allocation3] sm:$0xff] %vm506_vm0, %v2082_v61  ;;  %2101 = vst.msk [vmem:[#allocation3 + $0x18] sm:$0xff] %vm506_vm0, %v2085_v3  ;;  %v2261_v12 = vadd.f32 %v2200_v13, %v2115_v6  ;;  %v1886_v61 = vld [vmem:[#allocation3 + $0x70] sm:$0xff]  ;;  %v2126_v8 = vld [vmem:[#allocation4 + $0x60] sm:$0xff] }
 0x1a8   : > { %2276 = vst.msk [vmem:[#allocation4] sm:$0xff] %vm530_vm2, %v2260_v2  ;;  %2279 = vst.msk [vmem:[#allocation4 + $0x18] sm:$0xff] %vm530_vm2, %v2263_v10  ;;  %v1884_v2 = vld [vmem:[#allocation3 + $0x60] sm:$0xff]  ;;  %v1887_v10 = vld [vmem:[#allocation3 + $0x78] sm:$0xff] }
 0x1a9   : > { %2099 = vst.msk [vmem:[#allocation3 + $0x8] sm:$0xff] %vm506_vm0, %v2083_v11 }
 0x1aa   : > { %2277 = vst.msk [vmem:[#allocation4 + $0x8] sm:$0xff] %vm530_vm2, %v2261_v12  ;;  %v6688_v18 = vpop.f32.mrb[52].mxu0  ;;  %v2129_v12 = vld [vmem:[#allocation4 + $0x78] sm:$0xff] }
 0x1ab   : > { %v2088_v19 = vadd.f32 %v6688_v18, %v1878_v15  ;;  %v6712_v23 = vpop.f32.mrb[52].mxu1  ;;  %v2035_v14 = vpop.f32.mrb[53].mxu0  ;;  %v1885_v18 = vld [vmem:[#allocation3 + $0x68] sm:$0xff] }
 0x1ac   : > { %v2266_v24 = vadd.f32 %v6712_v23, %v2120_v20  ;;  %v2086_v25 = vadd.f32 %v2035_v14, %v1876_v7  ;;  %v2213_v27 = vpop.f32.mrb[53].mxu1  ;;  %v6689_v29 = vpop.f32.mrb[54].mxu0  ;;  %v2127_v7 = vld [vmem:[#allocation4 + $0x68] sm:$0xff] }
 0x1ad   : > { %2104 = vst.msk [vmem:[#allocation3 + $0x30] sm:$0xff] %vm506_vm0, %v2088_v19  ;;  %v2264_v30 = vadd.f32 %v2213_v27, %v2118_v26  ;;  %v2089_v31 = vadd.f32 %v6689_v29, %v1879_v28  ;;  %v6713_v33 = vpop.f32.mrb[54].mxu1  ;;  %v2038_v35 = vpop.f32.mrb[55].mxu0  ;;  %v2553_v28 = vld [vmem:[#allocation4 + $0x10] sm:$0xff] }
 0x1ae   : > { %2282 = vst.msk [vmem:[#allocation4 + $0x30] sm:$0xff] %vm530_vm2, %v2266_v24  ;;  %v2267_v36 = vadd.f32 %v6713_v33, %v2121_v32  ;;  %v2087_v37 = vadd.f32 %v2038_v35, %v1877_v34  ;;  %v2216_v39 = vpop.f32.mrb[55].mxu1 }
 0x1af   : > { %2102 = vst.msk [vmem:[#allocation3 + $0x20] sm:$0xff] %vm506_vm0, %v2086_v25  ;;  %2105 = vst.msk [vmem:[#allocation3 + $0x38] sm:$0xff] %vm506_vm0, %v2089_v31  ;;  %v2265_v16 = vadd.f32 %v2216_v39, %v2119_v38  ;;  %v2311_v25 = vld [vmem:[#allocation3 + $0x10] sm:$0xff]  ;;  %v2551_v34 = vld [vmem:[#allocation4] sm:$0xff] }
 0x1b0   : > { %2280 = vst.msk [vmem:[#allocation4 + $0x20] sm:$0xff] %vm530_vm2, %v2264_v30  ;;  %2283 = vst.msk [vmem:[#allocation4 + $0x38] sm:$0xff] %vm530_vm2, %v2267_v36  ;;  %v2309_v30 = vld [vmem:[#allocation3] sm:$0xff]  ;;  %v2312_v36 = vld [vmem:[#allocation3 + $0x18] sm:$0xff] }
 0x1b1   : > { %2103 = vst.msk [vmem:[#allocation3 + $0x28] sm:$0xff] %vm506_vm0, %v2087_v37 }
 0x1b2   : > { %2281 = vst.msk [vmem:[#allocation4 + $0x28] sm:$0xff] %vm530_vm2, %v2265_v16  ;;  %v6692_v57 = vpop.f32.mrb[56].mxu0  ;;  %v2554_v16 = vld [vmem:[#allocation4 + $0x18] sm:$0xff] }
 0x1b3   : > { %v2092_v40 = vadd.f32 %v6692_v57, %v1882_v45  ;;  %v6716_v41 = vpop.f32.mrb[56].mxu1  ;;  %v2051_v43 = vpop.f32.mrb[57].mxu0  ;;  %v2310_v57 = vld [vmem:[#allocation3 + $0x8] sm:$0xff] }
 0x1b4   : > { %v2270_v44 = vadd.f32 %v6716_v41, %v2124_v17  ;;  %v2090_v46 = vadd.f32 %v2051_v43, %v1880_v42  ;;  %v2229_v22 = vpop.f32.mrb[57].mxu1  ;;  %v6693_v48 = vpop.f32.mrb[58].mxu0  ;;  %v2552_v42 = vld [vmem:[#allocation4 + $0x8] sm:$0xff] }
 0x1b5   : > { %2108 = vst.msk [vmem:[#allocation3 + $0x50] sm:$0xff] %vm506_vm0, %v2092_v40  ;;  %v2268_v49 = vadd.f32 %v2229_v22, %v2122_v21  ;;  %v2093_v50 = vadd.f32 %v6693_v48, %v1883_v47  ;;  %v6717_v52 = vpop.f32.mrb[58].mxu1  ;;  %v2054_v54 = vpop.f32.mrb[59].mxu0  ;;  %v2557_v47 = vld [vmem:[#allocation4 + $0x30] sm:$0xff] }
 0x1b6   : > { %2286 = vst.msk [vmem:[#allocation4 + $0x50] sm:$0xff] %vm530_vm2, %v2270_v44  ;;  %v2271_v55 = vadd.f32 %v6717_v52, %v2125_v51  ;;  %v2091_v56 = vadd.f32 %v2054_v54, %v1881_v53  ;;  %v2232_v59 = vpop.f32.mrb[59].mxu1 }
 0x1b7   : > { %2106 = vst.msk [vmem:[#allocation3 + $0x40] sm:$0xff] %vm506_vm0, %v2090_v46  ;;  %2109 = vst.msk [vmem:[#allocation3 + $0x58] sm:$0xff] %vm506_vm0, %v2093_v50  ;;  %v2269_v60 = vadd.f32 %v2232_v59, %v2123_v58  ;;  %v2315_v46 = vld [vmem:[#allocation3 + $0x30] sm:$0xff]  ;;  %v2555_v53 = vld [vmem:[#allocation4 + $0x20] sm:$0xff] }
 0x1b8   : > { %2284 = vst.msk [vmem:[#allocation4 + $0x40] sm:$0xff] %vm530_vm2, %v2268_v49  ;;  %2287 = vst.msk [vmem:[#allocation4 + $0x58] sm:$0xff] %vm530_vm2, %v2271_v55  ;;  %v2313_v49 = vld [vmem:[#allocation3 + $0x20] sm:$0xff]  ;;  %v2316_v55 = vld [vmem:[#allocation3 + $0x38] sm:$0xff] }
 0x1b9   : > { %2107 = vst.msk [vmem:[#allocation3 + $0x48] sm:$0xff] %vm506_vm0, %v2091_v56 }
 0x1ba   : > { %2285 = vst.msk [vmem:[#allocation4 + $0x48] sm:$0xff] %vm530_vm2, %v2269_v60  ;;  %v6696_v62 = vpop.f32.mrb[60].mxu0  ;;  %v2558_v60 = vld [vmem:[#allocation4 + $0x38] sm:$0xff] }
 0x1bb   : > { %v2096_v63 = vadd.f32 %v6696_v62, %v1886_v61  ;;  %v6720_v1 = vpop.f32.mrb[60].mxu1  ;;  %v2067_v3 = vpop.f32.mrb[61].mxu0  ;;  %v2314_v62 = vld [vmem:[#allocation3 + $0x28] sm:$0xff] }
 0x1bc   : > { %v2274_v4 = vadd.f32 %v6720_v1, %v2128_v0  ;;  %v2094_v5 = vadd.f32 %v2067_v3, %v1884_v2  ;;  %v2245_v9 = vpop.f32.mrb[61].mxu1  ;;  %v6697_v11 = vpop.f32.mrb[62].mxu0  ;;  %v2556_v2 = vld [vmem:[#allocation4 + $0x28] sm:$0xff] }
 0x1bd   : > { %2112 = vst.msk [vmem:[#allocation3 + $0x70] sm:$0xff] %vm506_vm0, %v2096_v63  ;;  %v2272_v6 = vadd.f32 %v2245_v9, %v2126_v8  ;;  %v2097_v13 = vadd.f32 %v6697_v11, %v1887_v10  ;;  %v6721_v15 = vpop.f32.mrb[62].mxu1  ;;  %v2070_v19 = vpop.f32.mrb[63].mxu0  ;;  %v2561_v10 = vld [vmem:[#allocation4 + $0x50] sm:$0xff] }
 0x1be   : > { %2290 = vst.msk [vmem:[#allocation4 + $0x70] sm:$0xff] %vm530_vm2, %v2274_v4  ;;  %v2275_v20 = vadd.f32 %v6721_v15, %v2129_v12  ;;  %v2095_v23 = vadd.f32 %v2070_v19, %v1885_v18  ;;  %v2248_v14 = vpop.f32.mrb[63].mxu1 }
 0x1bf   : > { %2110 = vst.msk [vmem:[#allocation3 + $0x60] sm:$0xff] %vm506_vm0, %v2094_v5  ;;  %2113 = vst.msk [vmem:[#allocation3 + $0x78] sm:$0xff] %vm506_vm0, %v2097_v13  ;;  %v2273_v24 = vadd.f32 %v2248_v14, %v2127_v7  ;;  %v2319_v5 = vld [vmem:[#allocation3 + $0x50] sm:$0xff]  ;;  %v2559_v18 = vld [vmem:[#allocation4 + $0x40] sm:$0xff] }
 0x1c0   : > { %2288 = vst.msk [vmem:[#allocation4 + $0x60] sm:$0xff] %vm530_vm2, %v2272_v6  ;;  %2291 = vst.msk [vmem:[#allocation4 + $0x78] sm:$0xff] %vm530_vm2, %v2275_v20  ;;  %v2317_v6 = vld [vmem:[#allocation3 + $0x40] sm:$0xff]  ;;  %v2320_v20 = vld [vmem:[#allocation3 + $0x58] sm:$0xff] }
 0x1c1   : > { %2111 = vst.msk [vmem:[#allocation3 + $0x68] sm:$0xff] %vm506_vm0, %v2095_v23 }
 0x1c2   : > { %2289 = vst.msk [vmem:[#allocation4 + $0x68] sm:$0xff] %vm530_vm2, %v2273_v24  ;;  %v6732_v26 = vpop.f32.mrb[64].mxu0  ;;  %v2562_v24 = vld [vmem:[#allocation4 + $0x58] sm:$0xff] }
 0x1c3   : > { %v2521_v27 = vadd.f32 %v6732_v26, %v2311_v25  ;;  %v6756_v29 = vpop.f32.mrb[64].mxu1  ;;  %v2456_v31 = vpop.f32.mrb[65].mxu0  ;;  %v2318_v26 = vld [vmem:[#allocation3 + $0x48] sm:$0xff] }
 0x1c4   : > { %v2699_v32 = vadd.f32 %v6756_v29, %v2553_v28  ;;  %v2519_v33 = vadd.f32 %v2456_v31, %v2309_v30  ;;  %v2634_v35 = vpop.f32.mrb[65].mxu1  ;;  %v6733_v37 = vpop.f32.mrb[66].mxu0  ;;  %v2560_v30 = vld [vmem:[#allocation4 + $0x48] sm:$0xff] }
 0x1c5   : > { %2537 = vst.msk [vmem:[#allocation3 + $0x10] sm:$0xff] %vm506_vm0, %v2521_v27  ;;  %v2697_v38 = vadd.f32 %v2634_v35, %v2551_v34  ;;  %v2522_v39 = vadd.f32 %v6733_v37, %v2312_v36  ;;  %v6757_v45 = vpop.f32.mrb[66].mxu1  ;;  %v2459_v40 = vpop.f32.mrb[67].mxu0  ;;  %v2565_v36 = vld [vmem:[#allocation4 + $0x70] sm:$0xff] }
 0x1c6   : > { %2715 = vst.msk [vmem:[#allocation4 + $0x10] sm:$0xff] %vm530_vm2, %v2699_v32  ;;  %v2700_v17 = vadd.f32 %v6757_v45, %v2554_v16  ;;  %v2520_v41 = vadd.f32 %v2459_v40, %v2310_v57  ;;  %v2637_v43 = vpop.f32.mrb[67].mxu1 }
 0x1c7   : > { %2535 = vst.msk [vmem:[#allocation3] sm:$0xff] %vm506_vm0, %v2519_v33  ;;  %2538 = vst.msk [vmem:[#allocation3 + $0x18] sm:$0xff] %vm506_vm0, %v2522_v39  ;;  %v2698_v44 = vadd.f32 %v2637_v43, %v2552_v42  ;;  %v2323_v33 = vld [vmem:[#allocation3 + $0x70] sm:$0xff]  ;;  %v2563_v57 = vld [vmem:[#allocation4 + $0x60] sm:$0xff] }
 0x1c8   : > { %2713 = vst.msk [vmem:[#allocation4] sm:$0xff] %vm530_vm2, %v2697_v38  ;;  %2716 = vst.msk [vmem:[#allocation4 + $0x18] sm:$0xff] %vm530_vm2, %v2700_v17  ;;  %v2321_v38 = vld [vmem:[#allocation3 + $0x60] sm:$0xff]  ;;  %v2324_v17 = vld [vmem:[#allocation3 + $0x78] sm:$0xff] }
 0x1c9   : > { %2536 = vst.msk [vmem:[#allocation3 + $0x8] sm:$0xff] %vm506_vm0, %v2520_v41 }
 0x1ca   : > { %2714 = vst.msk [vmem:[#allocation4 + $0x8] sm:$0xff] %vm530_vm2, %v2698_v44  ;;  %v6736_v21 = vpop.f32.mrb[68].mxu0  ;;  %v2566_v44 = vld [vmem:[#allocation4 + $0x78] sm:$0xff] }
 0x1cb   : > { %v2525_v22 = vadd.f32 %v6736_v21, %v2315_v46  ;;  %v6760_v48 = vpop.f32.mrb[68].mxu1  ;;  %v2472_v50 = vpop.f32.mrb[69].mxu0  ;;  %v2322_v21 = vld [vmem:[#allocation3 + $0x68] sm:$0xff] }
 0x1cc   : > { %v2703_v51 = vadd.f32 %v6760_v48, %v2557_v47  ;;  %v2523_v52 = vadd.f32 %v2472_v50, %v2313_v49  ;;  %v2650_v54 = vpop.f32.mrb[69].mxu1  ;;  %v6737_v56 = vpop.f32.mrb[70].mxu0  ;;  %v2564_v49 = vld [vmem:[#allocation4 + $0x68] sm:$0xff] }
 0x1cd   : > { %2541 = vst.msk [vmem:[#allocation3 + $0x30] sm:$0xff] %vm506_vm0, %v2525_v22  ;;  %v2701_v58 = vadd.f32 %v2650_v54, %v2555_v53  ;;  %v2526_v59 = vadd.f32 %v6737_v56, %v2316_v55  ;;  %v6761_v61 = vpop.f32.mrb[70].mxu1  ;;  %v2475_v63 = vpop.f32.mrb[71].mxu0 }
 0x1ce   : > { %2719 = vst.msk [vmem:[#allocation4 + $0x30] sm:$0xff] %vm530_vm2, %v2703_v51  ;;  %v2704_v0 = vadd.f32 %v6761_v61, %v2558_v60  ;;  %v2524_v1 = vadd.f32 %v2475_v63, %v2314_v62  ;;  %v2653_v3 = vpop.f32.mrb[71].mxu1  ;;  %v2784_v55 = vld [vmem:[#allocation3] sm:$0xff] }
 0x1cf   : > { %2539 = vst.msk [vmem:[#allocation3 + $0x20] sm:$0xff] %vm506_vm0, %v2523_v52  ;;  %2542 = vst.msk [vmem:[#allocation3 + $0x38] sm:$0xff] %vm506_vm0, %v2526_v59  ;;  %v2702_v4 = vadd.f32 %v2653_v3, %v2556_v2  ;;  %v2786_v52 = vld [vmem:[#allocation3 + $0x10] sm:$0xff]  ;;  %v2787_v59 = vld [vmem:[#allocation3 + $0x18] sm:$0xff] }
 0x1d0   : > { %2717 = vst.msk [vmem:[#allocation4 + $0x20] sm:$0xff] %vm530_vm2, %v2701_v58  ;;  %2720 = vst.msk [vmem:[#allocation4 + $0x38] sm:$0xff] %vm530_vm2, %v2704_v0  ;;  %v2785_v63 = vld [vmem:[#allocation3 + $0x8] sm:$0xff] }
 0x1d1   : > { %2540 = vst.msk [vmem:[#allocation3 + $0x28] sm:$0xff] %vm506_vm0, %v2524_v1 }
 0x1d2   : > { %2718 = vst.msk [vmem:[#allocation4 + $0x28] sm:$0xff] %vm530_vm2, %v2702_v4  ;;  %v6740_v8 = vpop.f32.mrb[72].mxu0 }
 0x1d3   : > { %v2529_v9 = vadd.f32 %v6740_v8, %v2319_v5  ;;  %v6764_v11 = vpop.f32.mrb[72].mxu1  ;;  %v2488_v13 = vpop.f32.mrb[73].mxu0 }
 0x1d4   : > { %v2707_v12 = vadd.f32 %v6764_v11, %v2561_v10  ;;  %v2527_v15 = vadd.f32 %v2488_v13, %v2317_v6  ;;  %v2666_v19 = vpop.f32.mrb[73].mxu1  ;;  %v6741_v23 = vpop.f32.mrb[74].mxu0  ;;  %v2790_v5 = vld [vmem:[#allocation3 + $0x30] sm:$0xff] }
 0x1d5   : > { %2545 = vst.msk [vmem:[#allocation3 + $0x50] sm:$0xff] %vm506_vm0, %v2529_v9  ;;  %v2705_v7 = vadd.f32 %v2666_v19, %v2559_v18  ;;  %v2530_v14 = vadd.f32 %v6741_v23, %v2320_v20  ;;  %v6765_v25 = vpop.f32.mrb[74].mxu1  ;;  %v2491_v27 = vpop.f32.mrb[75].mxu0 }
 0x1d6   : > { %2723 = vst.msk [vmem:[#allocation4 + $0x50] sm:$0xff] %vm530_vm2, %v2707_v12  ;;  %v2708_v28 = vadd.f32 %v6765_v25, %v2562_v24  ;;  %v2528_v29 = vadd.f32 %v2491_v27, %v2318_v26  ;;  %v2669_v31 = vpop.f32.mrb[75].mxu1  ;;  %v2788_v10 = vld [vmem:[#allocation3 + $0x20] sm:$0xff]  ;;  %v2791_v13 = vld [vmem:[#allocation3 + $0x38] sm:$0xff] }
 0x1d7   : > { %2543 = vst.msk [vmem:[#allocation3 + $0x40] sm:$0xff] %vm506_vm0, %v2527_v15  ;;  %2546 = vst.msk [vmem:[#allocation3 + $0x58] sm:$0xff] %vm506_vm0, %v2530_v14  ;;  %v2706_v32 = vadd.f32 %v2669_v31, %v2560_v30 }
 0x1d8   : > { %2721 = vst.msk [vmem:[#allocation4 + $0x40] sm:$0xff] %vm530_vm2, %v2705_v7  ;;  %2724 = vst.msk [vmem:[#allocation4 + $0x58] sm:$0xff] %vm530_vm2, %v2708_v28  ;;  %v2789_v23 = vld [vmem:[#allocation3 + $0x28] sm:$0xff] }
 0x1d9   : > { %2544 = vst.msk [vmem:[#allocation3 + $0x48] sm:$0xff] %vm506_vm0, %v2528_v29 }
 0x1da   : > { %2722 = vst.msk [vmem:[#allocation4 + $0x48] sm:$0xff] %vm530_vm2, %v2706_v32  ;;  %v6744_v34 = vpop.f32.mrb[76].mxu0  ;;  %v7185_v32 = vld [vmem:[%s8813_s5] sm:$0xff]  }
 0x1db   : > { %v2533_v35 = vadd.f32 %v6744_v34, %v2323_v33  ;;  %v6768_v37 = vpop.f32.mrb[76].mxu1  ;;  %v2504_v39 = vpop.f32.mrb[77].mxu0  ;;  %v7186_v33 = vld [vmem:[%s8813_s5 + $0x8] sm:$0xff]   ;;  %6870 = vmatprep.subr.bf16.mxu1 %v7185_v32 }
 0x1dc   : > { %v2711_v16 = vadd.f32 %v6768_v37, %v2565_v36  ;;  %v2531_v45 = vadd.f32 %v2504_v39, %v2321_v38  ;;  %v2682_v40 = vpop.f32.mrb[77].mxu1  ;;  %v6745_v41 = vpop.f32.mrb[78].mxu0  ;;  %6871 = vmatpush3.bf16.msra.mxu1 %v7185_v32 }
 0x1dd   : > { %2549 = vst.msk [vmem:[#allocation3 + $0x70] sm:$0xff] %vm506_vm0, %v2533_v35  ;;  %v2709_v42 = vadd.f32 %v2682_v40, %v2563_v57  ;;  %v2534_v43 = vadd.f32 %v6745_v41, %v2324_v17  ;;  %v6769_v46 = vpop.f32.mrb[78].mxu1  ;;  %v2507_v22 = vpop.f32.mrb[79].mxu0  ;;  %v2794_v35 = vld [vmem:[#allocation3 + $0x50] sm:$0xff]  ;;  %6872 = vmatprep.subr.bf16.mxu1 %v7186_v33 }
 0x1de   : > { %2727 = vst.msk [vmem:[#allocation4 + $0x70] sm:$0xff] %vm530_vm2, %v2711_v16  ;;  %v2712_v47 = vadd.f32 %v6769_v46, %v2566_v44  ;;  %v2532_v48 = vadd.f32 %v2507_v22, %v2322_v21  ;;  %v2685_v50 = vpop.f32.mrb[79].mxu1  ;;  %v2792_v38 = vld [vmem:[#allocation3 + $0x40] sm:$0xff] }
 0x1df   : > { %2547 = vst.msk [vmem:[#allocation3 + $0x60] sm:$0xff] %vm506_vm0, %v2531_v45  ;;  %2550 = vst.msk [vmem:[#allocation3 + $0x78] sm:$0xff] %vm506_vm0, %v2534_v43  ;;  %v2710_v51 = vadd.f32 %v2685_v50, %v2564_v49  ;;  %v2795_v45 = vld [vmem:[#allocation3 + $0x58] sm:$0xff] }
 0x1e0   : > { %2725 = vst.msk [vmem:[#allocation4 + $0x60] sm:$0xff] %vm530_vm2, %v2709_v42  ;;  %2728 = vst.msk [vmem:[#allocation4 + $0x78] sm:$0xff] %vm530_vm2, %v2712_v47  ;;  %v2793_v43 = vld [vmem:[#allocation3 + $0x48] sm:$0xff]  ;;  %6873 = vmatpush3.bf16.msra.mxu1 %v7186_v33 }
 0x1e1   : > { %2548 = vst.msk [vmem:[#allocation3 + $0x68] sm:$0xff] %vm506_vm0, %v2532_v48 }
 0x1e2   : > { %2726 = vst.msk [vmem:[#allocation4 + $0x68] sm:$0xff] %vm530_vm2, %v2710_v51  ;;  %v6776_v53 = vpop.f32.mrb[80].mxu0 }
 0x1e3   : > { %v2979_v54 = vadd.f32 %v6776_v53, %v2786_v52  ;;  %v2914_v56 = vpop.f32.mrb[81].mxu0 }
 0x1e4   : > { %v2977_v58 = vadd.f32 %v2914_v56, %v2784_v55  ;;  %v6777_v60 = vpop.f32.mrb[82].mxu0  ;;  %v6796_v61 = vpop.f32.mrb[80].mxu1 }
 0x1e5   : > { %2995 = vst.msk [vmem:[#allocation3 + $0x10] sm:$0xff] %vm506_vm0, %v2979_v54  ;;  %v2980_v62 = vadd.f32 %v6777_v60, %v2787_v59  ;;  %v2917_v0 = vpop.f32.mrb[83].mxu0  ;;  %v3157_v1 = vpop.f32.mrb[81].mxu1  ;;  %v2798_v54 = vld [vmem:[#allocation3 + $0x70] sm:$0xff] }
 0x1e6   : > { %2993 = vst.msk [vmem:[#allocation3] sm:$0xff] %vm506_vm0, %v2977_v58  ;;  %v2978_v2 = vadd.f32 %v2917_v0, %v2785_v63  ;;  %v6797_v3 = vpop.f32.mrb[82].mxu1  ;;  %v2796_v58 = vld [vmem:[#allocation3 + $0x60] sm:$0xff] }
 0x1e7   : > { %2996 = vst.msk [vmem:[#allocation3 + $0x18] sm:$0xff] %vm506_vm0, %v2980_v62  ;;  %v3160_v4 = vpop.f32.mrb[83].mxu1 }
 0x1e8   : > { %2994 = vst.msk [vmem:[#allocation3 + $0x8] sm:$0xff] %vm506_vm0, %v2978_v2 }
 0x1ea   : > { %v6780_v8 = vpop.f32.mrb[84].mxu0 }
 0x1eb   : > { %v2983_v9 = vadd.f32 %v6780_v8, %v2790_v5  ;;  %v2930_v11 = vpop.f32.mrb[85].mxu0 }
 0x1ec   : > { %v2981_v6 = vadd.f32 %v2930_v11, %v2788_v10  ;;  %v6781_v12 = vpop.f32.mrb[86].mxu0  ;;  %v3028_v15 = vld [vmem:[#allocation3 + $0x10] sm:$0xff]  ;;  %v6800_v18 = vpop.f32.mrb[84].mxu1 }
 0x1ed   : > { %2999 = vst.msk [vmem:[#allocation3 + $0x30] sm:$0xff] %vm506_vm0, %v2983_v9  ;;  %v2984_v19 = vadd.f32 %v6781_v12, %v2791_v13  ;;  %v3222_v20 = vadd.f32 %v6796_v61, %v3028_v15  ;;  %v2933_v7 = vpop.f32.mrb[87].mxu0  ;;  %v3026_v14 = vld [vmem:[#allocation3] sm:$0xff]  ;;  %v3173_v24 = vpop.f32.mrb[85].mxu1  ;;  %v2799_v61 = vld [vmem:[#allocation3 + $0x78] sm:$0xff] }
 0x1ee   : > { %2997 = vst.msk [vmem:[#allocation3 + $0x20] sm:$0xff] %vm506_vm0, %v2981_v6  ;;  %v2982_v25 = vadd.f32 %v2933_v7, %v2789_v23  ;;  %v3220_v26 = vadd.f32 %v3157_v1, %v3026_v14  ;;  %v3029_v27 = vld [vmem:[#allocation3 + $0x18] sm:$0xff]  ;;  %v6801_v28 = vpop.f32.mrb[86].mxu1 }
 0x1ef   : > { %3000 = vst.msk [vmem:[#allocation3 + $0x38] sm:$0xff] %vm506_vm0, %v2984_v19  ;;  %3238 = vst.msk [vmem:[#allocation3 + $0x10] sm:$0xff] %vm506_vm0, %v3222_v20  ;;  %v3223_v29 = vadd.f32 %v6797_v3, %v3029_v27  ;;  %v3027_v30 = vld [vmem:[#allocation3 + $0x8] sm:$0xff]  ;;  %v3176_v31 = vpop.f32.mrb[87].mxu1 }
 0x1f0   : > { %2998 = vst.msk [vmem:[#allocation3 + $0x28] sm:$0xff] %vm506_vm0, %v2982_v25  ;;  %3236 = vst.msk [vmem:[#allocation3] sm:$0xff] %vm506_vm0, %v3220_v26  ;;  %v3221_v34 = vadd.f32 %v3160_v4, %v3027_v30  ;;  %v2797_v3 = vld [vmem:[#allocation3 + $0x68] sm:$0xff] }
 0x1f1   : > { %3239 = vst.msk [vmem:[#allocation3 + $0x18] sm:$0xff] %vm506_vm0, %v3223_v29 }
 0x1f2   : > { %3237 = vst.msk [vmem:[#allocation3 + $0x8] sm:$0xff] %vm506_vm0, %v3221_v34  ;;  %v6784_v36 = vpop.f32.mrb[88].mxu0 }
 0x1f3   : > { %v2987_v37 = vadd.f32 %v6784_v36, %v2794_v35  ;;  %v2946_v39 = vpop.f32.mrb[89].mxu0 }
 0x1f4   : > { %v2985_v16 = vadd.f32 %v2946_v39, %v2792_v38  ;;  %v6785_v57 = vpop.f32.mrb[90].mxu0  ;;  %v3032_v40 = vld [vmem:[#allocation3 + $0x30] sm:$0xff]  ;;  %v6804_v17 = vpop.f32.mrb[88].mxu1 }
 0x1f5   : > { %3003 = vst.msk [vmem:[#allocation3 + $0x50] sm:$0xff] %vm506_vm0, %v2987_v37  ;;  %v2988_v41 = vadd.f32 %v6785_v57, %v2795_v45  ;;  %v3226_v42 = vadd.f32 %v6800_v18, %v3032_v40  ;;  %v2949_v44 = vpop.f32.mrb[91].mxu0  ;;  %v3030_v46 = vld [vmem:[#allocation3 + $0x20] sm:$0xff]  ;;  %v3189_v21 = vpop.f32.mrb[89].mxu1 }
 0x1f6   : > { %3001 = vst.msk [vmem:[#allocation3 + $0x40] sm:$0xff] %vm506_vm0, %v2985_v16  ;;  %v2986_v22 = vadd.f32 %v2949_v44, %v2793_v43  ;;  %v3224_v47 = vadd.f32 %v3173_v24, %v3030_v46  ;;  %v3033_v48 = vld [vmem:[#allocation3 + $0x38] sm:$0xff]  ;;  %v6805_v49 = vpop.f32.mrb[90].mxu1  ;;  %v3270_v19 = vld [vmem:[#allocation3 + $0x10] sm:$0xff] }
 0x1f7   : > { %3004 = vst.msk [vmem:[#allocation3 + $0x58] sm:$0xff] %vm506_vm0, %v2988_v41  ;;  %3242 = vst.msk [vmem:[#allocation3 + $0x30] sm:$0xff] %vm506_vm0, %v3226_v42  ;;  %v3227_v50 = vadd.f32 %v6801_v28, %v3033_v48  ;;  %v3031_v51 = vld [vmem:[#allocation3 + $0x28] sm:$0xff]  ;;  %v3192_v52 = vpop.f32.mrb[91].mxu1  ;;  %v3268_v7 = vld [vmem:[#allocation3] sm:$0xff] }
 0x1f8   : > { %3002 = vst.msk [vmem:[#allocation3 + $0x48] sm:$0xff] %vm506_vm0, %v2986_v22  ;;  %3240 = vst.msk [vmem:[#allocation3 + $0x20] sm:$0xff] %vm506_vm0, %v3224_v47  ;;  %v3225_v53 = vadd.f32 %v3176_v31, %v3031_v51  ;;  %v3271_v26 = vld [vmem:[#allocation3 + $0x18] sm:$0xff] }
 0x1f9   : > { %3243 = vst.msk [vmem:[#allocation3 + $0x38] sm:$0xff] %vm506_vm0, %v3227_v50  ;;  %v3269_v32 = vld [vmem:[#allocation3 + $0x8] sm:$0xff] }
 0x1fa   : > { %3241 = vst.msk [vmem:[#allocation3 + $0x28] sm:$0xff] %vm506_vm0, %v3225_v53  ;;  %v6788_v55 = vpop.f32.mrb[92].mxu0 }
 0x1fb   : > { %v2991_v56 = vadd.f32 %v6788_v55, %v2798_v54  ;;  %v2962_v59 = vpop.f32.mrb[93].mxu0 }
 0x1fc   : > { %v2989_v60 = vadd.f32 %v2962_v59, %v2796_v58  ;;  %v6789_v62 = vpop.f32.mrb[94].mxu0  ;;  %v3036_v63 = vld [vmem:[#allocation3 + $0x50] sm:$0xff]  ;;  %v6808_v0 = vpop.f32.mrb[92].mxu1 }
 0x1fd   : > { %3007 = vst.msk [vmem:[#allocation3 + $0x70] sm:$0xff] %vm506_vm0, %v2991_v56  ;;  %v2992_v1 = vadd.f32 %v6789_v62, %v2799_v61  ;;  %v3230_v2 = vadd.f32 %v6804_v17, %v3036_v63  ;;  %v2965_v4 = vpop.f32.mrb[95].mxu0  ;;  %v3034_v5 = vld [vmem:[#allocation3 + $0x40] sm:$0xff]  ;;  %v3205_v8 = vpop.f32.mrb[93].mxu1 }
 0x1fe   : > { %3005 = vst.msk [vmem:[#allocation3 + $0x60] sm:$0xff] %vm506_vm0, %v2989_v60  ;;  %v2990_v9 = vadd.f32 %v2965_v4, %v2797_v3  ;;  %v3228_v10 = vadd.f32 %v3189_v21, %v3034_v5  ;;  %v3037_v11 = vld [vmem:[#allocation3 + $0x58] sm:$0xff]  ;;  %v6809_v6 = vpop.f32.mrb[94].mxu1  ;;  %v3274_v40 = vld [vmem:[#allocation3 + $0x30] sm:$0xff] }
 0x1ff   : > { %3008 = vst.msk [vmem:[#allocation3 + $0x78] sm:$0xff] %vm506_vm0, %v2992_v1  ;;  %3246 = vst.msk [vmem:[#allocation3 + $0x50] sm:$0xff] %vm506_vm0, %v3230_v2  ;;  %v3231_v13 = vadd.f32 %v6805_v49, %v3037_v11  ;;  %v3035_v12 = vld [vmem:[#allocation3 + $0x48] sm:$0xff]  ;;  %v3208_v15 = vpop.f32.mrb[95].mxu1  ;;  %v3272_v42 = vld [vmem:[#allocation3 + $0x20] sm:$0xff] }
 0x200   : > { %3006 = vst.msk [vmem:[#allocation3 + $0x68] sm:$0xff] %vm506_vm0, %v2990_v9  ;;  %3244 = vst.msk [vmem:[#allocation3 + $0x40] sm:$0xff] %vm506_vm0, %v3228_v10  ;;  %v3229_v18 = vadd.f32 %v3192_v52, %v3035_v12  ;;  %v3275_v46 = vld [vmem:[#allocation3 + $0x38] sm:$0xff] }
 0x201   : > { %3247 = vst.msk [vmem:[#allocation3 + $0x58] sm:$0xff] %vm506_vm0, %v3231_v13  ;;  %v3273_v50 = vld [vmem:[#allocation3 + $0x28] sm:$0xff] }
 0x202   : > { %3245 = vst.msk [vmem:[#allocation3 + $0x48] sm:$0xff] %vm506_vm0, %v3229_v18  ;;  %v6816_v20 = vpop.f32.mrb[96].mxu0 }
 0x203   : > { %v3464_v23 = vadd.f32 %v6816_v20, %v3270_v19  ;;  %v3399_v14 = vpop.f32.mrb[97].mxu0 }
 0x204   : > { %v3462_v24 = vadd.f32 %v3399_v14, %v3268_v7  ;;  %v3040_v25 = vld [vmem:[#allocation3 + $0x70] sm:$0xff]  ;;  %v6817_v27 = vpop.f32.mrb[98].mxu0  ;;  %v6836_v28 = vpop.f32.mrb[96].mxu1 }
 0x205   : > { %3480 = vst.msk [vmem:[#allocation3 + $0x10] sm:$0xff] %vm506_vm0, %v3464_v23  ;;  %v3234_v29 = vadd.f32 %v6808_v0, %v3040_v25  ;;  %v3465_v30 = vadd.f32 %v6817_v27, %v3271_v26  ;;  %v3038_v31 = vld [vmem:[#allocation3 + $0x60] sm:$0xff]  ;;  %v3402_v33 = vpop.f32.mrb[99].mxu0  ;;  %v3642_v34 = vpop.f32.mrb[97].mxu1 }
 0x206   : > { %3478 = vst.msk [vmem:[#allocation3] sm:$0xff] %vm506_vm0, %v3462_v24  ;;  %v3232_v35 = vadd.f32 %v3205_v8, %v3038_v31  ;;  %v3463_v36 = vadd.f32 %v3402_v33, %v3269_v32  ;;  %v3041_v37 = vld [vmem:[#allocation3 + $0x78] sm:$0xff]  ;;  %v6837_v38 = vpop.f32.mrb[98].mxu1  ;;  %v3278_v63 = vld [vmem:[#allocation3 + $0x50] sm:$0xff] }
 0x207   : > { %3250 = vst.msk [vmem:[#allocation3 + $0x70] sm:$0xff] %vm506_vm0, %v3234_v29  ;;  %3481 = vst.msk [vmem:[#allocation3 + $0x18] sm:$0xff] %vm506_vm0, %v3465_v30  ;;  %v3235_v39 = vadd.f32 %v6809_v6, %v3041_v37  ;;  %v3039_v16 = vld [vmem:[#allocation3 + $0x68] sm:$0xff]  ;;  %v3645_v45 = vpop.f32.mrb[99].mxu1  ;;  %v3276_v2 = vld [vmem:[#allocation3 + $0x40] sm:$0xff] }
 0x208   : > { %3248 = vst.msk [vmem:[#allocation3 + $0x60] sm:$0xff] %vm506_vm0, %v3232_v35  ;;  %3479 = vst.msk [vmem:[#allocation3 + $0x8] sm:$0xff] %vm506_vm0, %v3463_v36  ;;  %v3233_v57 = vadd.f32 %v3208_v15, %v3039_v16  ;;  %v3279_v5 = vld [vmem:[#allocation3 + $0x58] sm:$0xff] }
 0x209   : > { %3251 = vst.msk [vmem:[#allocation3 + $0x78] sm:$0xff] %vm506_vm0, %v3235_v39  ;;  %v3277_v13 = vld [vmem:[#allocation3 + $0x48] sm:$0xff] }
 0x20a   : > { %3249 = vst.msk [vmem:[#allocation3 + $0x68] sm:$0xff] %vm506_vm0, %v3233_v57  ;;  %v6820_v17 = vpop.f32.mrb[100].mxu0 }
 0x20b   : > { %v3468_v41 = vadd.f32 %v6820_v17, %v3274_v40  ;;  %v3415_v43 = vpop.f32.mrb[101].mxu0 }
 0x20c   : > { %v3466_v44 = vadd.f32 %v3415_v43, %v3272_v42  ;;  %v6821_v21 = vpop.f32.mrb[102].mxu0  ;;  %v3513_v22 = vld [vmem:[#allocation3 + $0x10] sm:$0xff]  ;;  %v6840_v47 = vpop.f32.mrb[100].mxu1 }
 0x20d   : > { %3484 = vst.msk [vmem:[#allocation3 + $0x30] sm:$0xff] %vm506_vm0, %v3468_v41  ;;  %v3469_v48 = vadd.f32 %v6821_v21, %v3275_v46  ;;  %v3707_v49 = vadd.f32 %v6836_v28, %v3513_v22  ;;  %v3418_v51 = vpop.f32.mrb[103].mxu0  ;;  %v3511_v52 = vld [vmem:[#allocation3] sm:$0xff]  ;;  %v3658_v53 = vpop.f32.mrb[101].mxu1 }
 0x20e   : > { %3482 = vst.msk [vmem:[#allocation3 + $0x20] sm:$0xff] %vm506_vm0, %v3466_v44  ;;  %v3467_v54 = vadd.f32 %v3418_v51, %v3273_v50  ;;  %v3705_v55 = vadd.f32 %v3642_v34, %v3511_v52  ;;  %v3514_v56 = vld [vmem:[#allocation3 + $0x18] sm:$0xff]  ;;  %v6841_v58 = vpop.f32.mrb[102].mxu1  ;;  %v3282_v27 = vld [vmem:[#allocation3 + $0x70] sm:$0xff] }
 0x20f   : > { %3485 = vst.msk [vmem:[#allocation3 + $0x38] sm:$0xff] %vm506_vm0, %v3469_v48  ;;  %3723 = vst.msk [vmem:[#allocation3 + $0x10] sm:$0xff] %vm506_vm0, %v3707_v49  ;;  %v3708_v59 = vadd.f32 %v6837_v38, %v3514_v56  ;;  %v3512_v60 = vld [vmem:[#allocation3 + $0x8] sm:$0xff]  ;;  %v3661_v61 = vpop.f32.mrb[103].mxu1  ;;  %v3280_v30 = vld [vmem:[#allocation3 + $0x60] sm:$0xff] }
 0x210   : > { %3483 = vst.msk [vmem:[#allocation3 + $0x28] sm:$0xff] %vm506_vm0, %v3467_v54  ;;  %3721 = vst.msk [vmem:[#allocation3] sm:$0xff] %vm506_vm0, %v3705_v55  ;;  %v3706_v62 = vadd.f32 %v3645_v45, %v3512_v60  ;;  %v3283_v33 = vld [vmem:[#allocation3 + $0x78] sm:$0xff] }
 0x211   : > { %3724 = vst.msk [vmem:[#allocation3 + $0x18] sm:$0xff] %vm506_vm0, %v3708_v59  ;;  %v3281_v39 = vld [vmem:[#allocation3 + $0x68] sm:$0xff] }
 0x212   : > { %3722 = vst.msk [vmem:[#allocation3 + $0x8] sm:$0xff] %vm506_vm0, %v3706_v62  ;;  %v6824_v0 = vpop.f32.mrb[104].mxu0 }
 0x213   : > { %v3472_v1 = vadd.f32 %v6824_v0, %v3278_v63  ;;  %v3431_v3 = vpop.f32.mrb[105].mxu0 }
 0x214   : > { %v3470_v4 = vadd.f32 %v3431_v3, %v3276_v2  ;;  %v6825_v8 = vpop.f32.mrb[106].mxu0  ;;  %v3517_v9 = vld [vmem:[#allocation3 + $0x30] sm:$0xff]  ;;  %v6844_v10 = vpop.f32.mrb[104].mxu1 }
 0x215   : > { %3488 = vst.msk [vmem:[#allocation3 + $0x50] sm:$0xff] %vm506_vm0, %v3472_v1  ;;  %v3473_v11 = vadd.f32 %v6825_v8, %v3279_v5  ;;  %v3711_v6 = vadd.f32 %v6840_v47, %v3517_v9  ;;  %v3434_v12 = vpop.f32.mrb[107].mxu0  ;;  %v3515_v15 = vld [vmem:[#allocation3 + $0x20] sm:$0xff]  ;;  %v3674_v18 = vpop.f32.mrb[105].mxu1 }
 0x216   : > { %3486 = vst.msk [vmem:[#allocation3 + $0x40] sm:$0xff] %vm506_vm0, %v3470_v4  ;;  %v3471_v19 = vadd.f32 %v3434_v12, %v3277_v13  ;;  %v3709_v20 = vadd.f32 %v3658_v53, %v3515_v15  ;;  %v3518_v23 = vld [vmem:[#allocation3 + $0x38] sm:$0xff]  ;;  %v6845_v7 = vpop.f32.mrb[106].mxu1  ;;  %v3756_v22 = vld [vmem:[#allocation3 + $0x10] sm:$0xff] }
 0x217   : > { %3489 = vst.msk [vmem:[#allocation3 + $0x58] sm:$0xff] %vm506_vm0, %v3473_v11  ;;  %3727 = vst.msk [vmem:[#allocation3 + $0x30] sm:$0xff] %vm506_vm0, %v3711_v6  ;;  %v3712_v14 = vadd.f32 %v6841_v58, %v3518_v23  ;;  %v3516_v24 = vld [vmem:[#allocation3 + $0x28] sm:$0xff]  ;;  %v3677_v25 = vpop.f32.mrb[107].mxu1  ;;  %v3754_v49 = vld [vmem:[#allocation3] sm:$0xff] }
 0x218   : > { %3487 = vst.msk [vmem:[#allocation3 + $0x48] sm:$0xff] %vm506_vm0, %v3471_v19  ;;  %3725 = vst.msk [vmem:[#allocation3 + $0x20] sm:$0xff] %vm506_vm0, %v3709_v20  ;;  %v3710_v26 = vadd.f32 %v3661_v61, %v3516_v24  ;;  %v3757_v53 = vld [vmem:[#allocation3 + $0x18] sm:$0xff] }
 0x219   : > { %3728 = vst.msk [vmem:[#allocation3 + $0x38] sm:$0xff] %vm506_vm0, %v3712_v14  ;;  %v3755_v59 = vld [vmem:[#allocation3 + $0x8] sm:$0xff] }
 0x21a   : > { %3726 = vst.msk [vmem:[#allocation3 + $0x28] sm:$0xff] %vm506_vm0, %v3710_v26  ;;  %v6828_v28 = vpop.f32.mrb[108].mxu0 }
 0x21b   : > { %v3476_v29 = vadd.f32 %v6828_v28, %v3282_v27  ;;  %v3447_v31 = vpop.f32.mrb[109].mxu0 }
 0x21c   : > { %v3474_v32 = vadd.f32 %v3447_v31, %v3280_v30  ;;  %v6829_v34 = vpop.f32.mrb[110].mxu0  ;;  %v3521_v35 = vld [vmem:[#allocation3 + $0x50] sm:$0xff]  ;;  %v6848_v36 = vpop.f32.mrb[108].mxu1 }
 0x21d   : > { %3492 = vst.msk [vmem:[#allocation3 + $0x70] sm:$0xff] %vm506_vm0, %v3476_v29  ;;  %v3477_v37 = vadd.f32 %v6829_v34, %v3283_v33  ;;  %v3715_v38 = vadd.f32 %v6844_v10, %v3521_v35  ;;  %v3450_v16 = vpop.f32.mrb[111].mxu0  ;;  %v3519_v45 = vld [vmem:[#allocation3 + $0x40] sm:$0xff]  ;;  %v3690_v57 = vpop.f32.mrb[109].mxu1 }
 0x21e   : > { %3490 = vst.msk [vmem:[#allocation3 + $0x60] sm:$0xff] %vm506_vm0, %v3474_v32  ;;  %v3475_v40 = vadd.f32 %v3450_v16, %v3281_v39  ;;  %v3713_v17 = vadd.f32 %v3674_v18, %v3519_v45  ;;  %v3522_v41 = vld [vmem:[#allocation3 + $0x58] sm:$0xff]  ;;  %v6849_v42 = vpop.f32.mrb[110].mxu1  ;;  %v3760_v3 = vld [vmem:[#allocation3 + $0x30] sm:$0xff] }
 0x21f   : > { %3493 = vst.msk [vmem:[#allocation3 + $0x78] sm:$0xff] %vm506_vm0, %v3477_v37  ;;  %3731 = vst.msk [vmem:[#allocation3 + $0x50] sm:$0xff] %vm506_vm0, %v3715_v38  ;;  %v3716_v43 = vadd.f32 %v6845_v7, %v3522_v41  ;;  %v3520_v44 = vld [vmem:[#allocation3 + $0x48] sm:$0xff]  ;;  %v3693_v46 = vpop.f32.mrb[111].mxu1  ;;  %v3758_v8 = vld [vmem:[#allocation3 + $0x20] sm:$0xff] }
 0x220   : > { %3491 = vst.msk [vmem:[#allocation3 + $0x68] sm:$0xff] %vm506_vm0, %v3475_v40  ;;  %3729 = vst.msk [vmem:[#allocation3 + $0x40] sm:$0xff] %vm506_vm0, %v3713_v17  ;;  %v3714_v21 = vadd.f32 %v3677_v25, %v3520_v44  ;;  %v3761_v11 = vld [vmem:[#allocation3 + $0x38] sm:$0xff]  ;;  %v8420_v17 = vpop.permute.xlu0 %4108 }
 0x221   : > { %3732 = vst.msk [vmem:[#allocation3 + $0x58] sm:$0xff] %vm506_vm0, %v3716_v43  ;;  %v3759_v15 = vld [vmem:[#allocation3 + $0x28] sm:$0xff] }
 0x222   : > { %3730 = vst.msk [vmem:[#allocation3 + $0x48] sm:$0xff] %vm506_vm0, %v3714_v21  ;;  %v6856_v47 = vpop.f32.mrb[112].mxu0 }
 0x223   : > { %v3950_v48 = vadd.f32 %v6856_v47, %v3756_v22  ;;  %v3885_v50 = vpop.f32.mrb[113].mxu0 }
 0x224   : > { %v3948_v51 = vadd.f32 %v3885_v50, %v3754_v49  ;;  %v3525_v52 = vld [vmem:[#allocation3 + $0x70] sm:$0xff]  ;;  %v6857_v54 = vpop.f32.mrb[114].mxu0 }
 0x225   : > { %3966 = vst.msk [vmem:[#allocation3 + $0x10] sm:$0xff] %vm506_vm0, %v3950_v48  ;;  %v3719_v55 = vadd.f32 %v6848_v36, %v3525_v52  ;;  %v3951_v56 = vadd.f32 %v6857_v54, %v3757_v53  ;;  %v3523_v58 = vld [vmem:[#allocation3 + $0x60] sm:$0xff]  ;;  %v3888_v60 = vpop.f32.mrb[115].mxu0  ;;  %v8423_v53 = vpop.permute.xlu1 %4112 }
 0x226   : > { %3964 = vst.msk [vmem:[#allocation3] sm:$0xff] %vm506_vm0, %v3948_v51  ;;  %v3717_v61 = vadd.f32 %v3690_v57, %v3523_v58  ;;  %v3949_v62 = vadd.f32 %v3888_v60, %v3755_v59  ;;  %v3526_v63 = vld [vmem:[#allocation3 + $0x78] sm:$0xff]  ;;  %v3764_v27 = vld [vmem:[#allocation3 + $0x50] sm:$0xff] }
 0x227   : > { %3735 = vst.msk [vmem:[#allocation3 + $0x70] sm:$0xff] %vm506_vm0, %v3719_v55  ;;  %3967 = vst.msk [vmem:[#allocation3 + $0x18] sm:$0xff] %vm506_vm0, %v3951_v56  ;;  %v3720_v0 = vadd.f32 %v6849_v42, %v3526_v63  ;;  %v3524_v1 = vld [vmem:[#allocation3 + $0x68] sm:$0xff]  ;;  %v3762_v30 = vld [vmem:[#allocation3 + $0x40] sm:$0xff] }
 0x228   : > { %3733 = vst.msk [vmem:[#allocation3 + $0x60] sm:$0xff] %vm506_vm0, %v3717_v61  ;;  %3965 = vst.msk [vmem:[#allocation3 + $0x8] sm:$0xff] %vm506_vm0, %v3949_v62  ;;  %v3718_v2 = vadd.f32 %v3693_v46, %v3524_v1  ;;  %v3765_v33 = vld [vmem:[#allocation3 + $0x58] sm:$0xff] }
 0x229   : > { %3736 = vst.msk [vmem:[#allocation3 + $0x78] sm:$0xff] %vm506_vm0, %v3720_v0  ;;  %v3763_v37 = vld [vmem:[#allocation3 + $0x48] sm:$0xff]  ;;  %v4111_v0 = vpop.permute.xlu0 %4110 }
 0x22a   : > { %3734 = vst.msk [vmem:[#allocation3 + $0x68] sm:$0xff] %vm506_vm0, %v3718_v2  ;;  %v6860_v4 = vpop.f32.mrb[116].mxu0 }
 0x22b   : > { %v3954_v5 = vadd.f32 %v6860_v4, %v3760_v3  ;;  %v3901_v9 = vpop.f32.mrb[117].mxu0 }
 0x22c   : > { %v3952_v10 = vadd.f32 %v3901_v9, %v3758_v8  ;;  %v6861_v6 = vpop.f32.mrb[118].mxu0  ;;  %v3982_v13 = vld [vmem:[#allocation3 + $0x10] sm:$0xff] }
 0x22d   : > { %3970 = vst.msk [vmem:[#allocation3 + $0x30] sm:$0xff] %vm506_vm0, %v3954_v5  ;;  %v3955_v12 = vadd.f32 %v6861_v6, %v3761_v11  ;;  %v3904_v18 = vpop.f32.mrb[119].mxu0  ;;  %v3980_v19 = vld [vmem:[#allocation3] sm:$0xff]  ;;  %v6153_v20 = vmul.f32 -1.442695, %v3982_v13  ;;  %v4115_v13 = vpop.permute.xlu1 %4114 }
 0x22e   : > { %3968 = vst.msk [vmem:[#allocation3 + $0x20] sm:$0xff] %vm506_vm0, %v3952_v10  ;;  %v3953_v23 = vadd.f32 %v3904_v18, %v3759_v15  ;;  %v6151_v7 = vmul.f32 -1.442695, %v3980_v19  ;;  %v3983_v14 = vld [vmem:[#allocation3 + $0x18] sm:$0xff]  ;;  %v3768_v21 = vld [vmem:[#allocation3 + $0x70] sm:$0xff] }
 0x22f   : > { %3971 = vst.msk [vmem:[#allocation3 + $0x38] sm:$0xff] %vm506_vm0, %v3955_v12  ;;  %7235 = vpow2.f32 %v6153_v20  ;;  %v3981_v24 = vld [vmem:[#allocation3 + $0x8] sm:$0xff]  ;;  %v6154_v25 = vmul.f32 -1.442695, %v3983_v14  ;;  %v3766_v50 = vld [vmem:[#allocation3 + $0x60] sm:$0xff]  ;;  %v8432_v20 = vpop.permute.xlu0 %4116 }
 0x230   : > { %3969 = vst.msk [vmem:[#allocation3 + $0x28] sm:$0xff] %vm506_vm0, %v3953_v23  ;;  %7237 = vpow2.f32 %v6151_v7  ;;  %v6152_v26 = vmul.f32 -1.442695, %v3981_v24  ;;  %v3769_v56 = vld [vmem:[#allocation3 + $0x78] sm:$0xff]  ;;  %v7187_v12 = vld [vmem:[%s8813_s5 + $0x10] sm:$0xff]  }
 0x231   : > { %7239 = vpow2.f32 %v6154_v25  ;;  %v3767_v62 = vld [vmem:[#allocation3 + $0x68] sm:$0xff]  ;;  %6890 = vmatprep.subr.bf16.mxu0 %v7187_v12 }
 0x232   : > { %v6864_v28 = vpop.f32.mrb[120].mxu0  ;;  %7241 = vpow2.f32 %v6152_v26  ;;  %6891 = vmatpush3.bf16.msra.mxu0 %v7187_v12 }
 0x233   : > { %v3958_v29 = vadd.f32 %v6864_v28, %v3764_v27  ;;  %v3917_v31 = vpop.f32.mrb[121].mxu0 }
 0x234   : > { %v3956_v32 = vadd.f32 %v3917_v31, %v3762_v30  ;;  %v6865_v34 = vpop.f32.mrb[122].mxu0  ;;  %v3986_v35 = vld [vmem:[#allocation3 + $0x30] sm:$0xff]  ;;  %v4119_v30 = vpop.permute.xlu1 %4118 }
 0x235   : > { %3974 = vst.msk [vmem:[#allocation3 + $0x50] sm:$0xff] %vm506_vm0, %v3958_v29  ;;  %v3959_v36 = vadd.f32 %v6865_v34, %v3765_v33  ;;  %v3920_v38 = vpop.f32.mrb[123].mxu0  ;;  %v3984_v39 = vld [vmem:[#allocation3 + $0x20] sm:$0xff]  ;;  %v6157_v16 = vmul.f32 -1.442695, %v3986_v35 }
 0x236   : > { %3972 = vst.msk [vmem:[#allocation3 + $0x40] sm:$0xff] %vm506_vm0, %v3956_v32  ;;  %v3957_v45 = vadd.f32 %v3920_v38, %v3763_v37  ;;  %v6155_v57 = vmul.f32 -1.442695, %v3984_v39  ;;  %v3987_v40 = vld [vmem:[#allocation3 + $0x38] sm:$0xff]  ;;  %v4121_v37 = vpop.permute.xlu0 %4120  ;;  %v7188_v38 = vld [vmem:[%s8813_s5 + $0x18] sm:$0xff]   ;;  %v7190_v39 = vld [vmem:[#allocation2] sm:$0xff]  }
 0x237   : > { %3975 = vst.msk [vmem:[#allocation3 + $0x58] sm:$0xff] %vm506_vm0, %v3959_v36  ;;  %v3985_v41 = vld [vmem:[#allocation3 + $0x28] sm:$0xff]  ;;  %7243 = vpow2.f32 %v6157_v16  ;;  %v6158_v42 = vmul.f32 -1.442695, %v3987_v40  ;;  %6892 = vmatprep.subr.bf16.mxu0 %v7188_v38  ;;  %6874 = vmatprep.mubr.msk.bf16.mxu1 %vm530_vm2, %v7190_v39 }
 0x238   : > { %3973 = vst.msk [vmem:[#allocation3 + $0x48] sm:$0xff] %vm506_vm0, %v3957_v45  ;;  %7245 = vpow2.f32 %v6155_v57  ;;  %v6156_v43 = vmul.f32 -1.442695, %v3985_v41  ;;  %6893 = vmatpush3.bf16.msra.mxu0 %v7188_v38 }
 0x239   : > { %v7236_v44 = vpop.eup %7235  ;;  %7247 = vpow2.f32 %v6158_v42  ;;  %v8454_v42 = vld [vmem:[%s8813_s5 + $0x20] sm:$0xff]  }
 0x23a   : > { %v7238_v46 = vpop.eup %7237  ;;  %v6868_v22 = vpop.f32.mrb[124].mxu0  ;;  %v4046_v47 = vadd.f32 1.0, %v7236_v44  ;;  %7249 = vpow2.f32 %v6156_v43  ;;  %6910 = vmatprep.subr.bf16.mxu1 %v8454_v42 }
 0x23b   : > { %v7240_v48 = vpop.eup %7239  ;;  %v3962_v49 = vadd.f32 %v6868_v22, %v3768_v21  ;;  %v3933_v51 = vpop.f32.mrb[125].mxu0  ;;  %v4044_v52 = vadd.f32 1.0, %v7238_v46 }
 0x23c   : > { %v7242_v54 = vpop.eup %7241  ;;  %v3960_v55 = vadd.f32 %v3933_v51, %v3766_v50  ;;  %v6869_v58 = vpop.f32.mrb[126].mxu0  ;;  %7251 = vrcp.f32 %v4046_v47  ;;  %v4047_v59 = vadd.f32 1.0, %v7240_v48  ;;  %v3990_v60 = vld [vmem:[#allocation3 + $0x50] sm:$0xff] }
 0x23d   : > { %3978 = vst.msk [vmem:[#allocation3 + $0x70] sm:$0xff] %vm506_vm0, %v3962_v49  ;;  %v3963_v61 = vadd.f32 %v6869_v58, %v3769_v56  ;;  %v3936_v63 = vpop.f32.mrb[127].mxu0  ;;  %7253 = vrcp.f32 %v4044_v52  ;;  %v4045_v1 = vadd.f32 1.0, %v7242_v54  ;;  %v3988_v2 = vld [vmem:[#allocation3 + $0x40] sm:$0xff]  ;;  %v6161_v3 = vmul.f32 -1.442695, %v3990_v60  ;;  %v4123_v48 = vpop.permute.xlu1 %4122 }
 0x23e   : > { %3976 = vst.msk [vmem:[#allocation3 + $0x60] sm:$0xff] %vm506_vm0, %v3960_v55  ;;  %v3961_v4 = vadd.f32 %v3936_v63, %v3767_v62  ;;  %7255 = vrcp.f32 %v4047_v59  ;;  %v6159_v5 = vmul.f32 -1.442695, %v3988_v2  ;;  %v3991_v8 = vld [vmem:[#allocation3 + $0x58] sm:$0xff]  ;;  %v4125_v54 = vpop.permute.xlu0 %4124 }
 0x23f   : > { %3979 = vst.msk [vmem:[#allocation3 + $0x78] sm:$0xff] %vm506_vm0, %v3963_v61  ;;  %7257 = vrcp.f32 %v4045_v1  ;;  %v3989_v9 = vld [vmem:[#allocation3 + $0x48] sm:$0xff]  ;;  %v6162_v10 = vmul.f32 -1.442695, %v3991_v8 }
 0x240   : > { %3977 = vst.msk [vmem:[#allocation3 + $0x68] sm:$0xff] %vm506_vm0, %v3961_v4  ;;  %7259 = vpow2.f32 %v6159_v5  ;;  %v6160_v11 = vmul.f32 -1.442695, %v3989_v9 }
 0x241   : > { %v7244_v6 = vpop.eup %7243  ;;  %7261 = vpow2.f32 %v6161_v3  ;;  %v4127_v1 = vpop.permute.xlu1 %4126 }
 0x242   : > { %v7246_v15 = vpop.eup %7245  ;;  %v4050_v18 = vadd.f32 1.0, %v7244_v6  ;;  %7263 = vpow2.f32 %v6160_v11  ;;  %v4129_v8 = vpop.permute.xlu0 %4128 }
 0x243   : > { %v7248_v19 = vpop.eup %7247  ;;  %v4048_v23 = vadd.f32 1.0, %v7246_v15  ;;  %7265 = vpow2.f32 %v6162_v10 }
 0x244   : > { %v7250_v7 = vpop.eup %7249  ;;  %7267 = vrcp.f32 %v4050_v18  ;;  %v4051_v14 = vadd.f32 1.0, %v7248_v19  ;;  %v3994_v26 = vld [vmem:[#allocation3 + $0x70] sm:$0xff] }
 0x245   : > { %7269 = vrcp.f32 %v4048_v23  ;;  %v4049_v24 = vadd.f32 1.0, %v7250_v7  ;;  %v3992_v25 = vld [vmem:[#allocation3 + $0x60] sm:$0xff]  ;;  %v6165_v35 = vmul.f32 -1.442695, %v3994_v26 }
 0x246   : > { %v8434_v27 = vpop.eup %7251  ;;  %7271 = vrcp.f32 %v4051_v14  ;;  %v6163_v28 = vmul.f32 -1.442695, %v3992_v25  ;;  %v3995_v22 = vld [vmem:[#allocation3 + $0x78] sm:$0xff]  ;;  %v4133_v25 = vpop.permute.xlu0 %4132 }
 0x247   : > { %v8436_v29 = vpop.eup %7253  ;;  %7273 = vrcp.f32 %v4049_v24  ;;  %v3993_v31 = vld [vmem:[#allocation3 + $0x68] sm:$0xff]  ;;  %v4158_v57 = vmul.f32 %v8434_v27, %v8423_v53  ;;  %v6166_v55 = vmul.f32 -1.442695, %v3995_v22 }
 0x248   : > { %v8438_v32 = vpop.eup %7255  ;;  %v4156_v33 = vmul.f32 %v8436_v29, %v8420_v17  ;;  %7275 = vpow2.f32 %v6163_v28  ;;  %v6164_v34 = vmul.f32 -1.442695, %v3993_v31 }
 0x249   : > { %v8442_v36 = vpop.eup %7257  ;;  %v4159_v46 = vmul.f32 %v8438_v32, %v4115_v13  ;;  %v6296_v51 = vpack.c.bf16 %v4158_v57, %v4158_v57  ;;  %v7205_v57 = vld [vmem:[%s8813_s5 + $0x30] sm:$0xff]  }
 0x24a   : > { %v7260_v16 = vpop.eup %7259  ;;  %v6294_v45 = vpack.c.bf16 %v4156_v33, %v4156_v33  ;;  %v4157_v40 = vmul.f32 %v8442_v36, %v4111_v0  ;;  %7277 = vpow2.f32 %v6164_v34  ;;  %v4137_v38 = vpop.permute.xlu0 %4136  ;;  %6930 = vmatprep.subr.bf16.mxu0 %v7205_v57 }
 0x24b   : > { %v7262_v41 = vpop.eup %7261  ;;  %v4052_v17 = vadd.f32 1.0, %v7260_v16  ;;  %7279 = vpow2.f32 %v6165_v35  ;;  %v6297_v58 = vpack.c.bf16 %v4159_v46, %v4159_v46 }
 0x24c   : > { %v7264_v43 = vpop.eup %7263  ;;  %v6295_v44 = vpack.c.bf16 %v4157_v40, %v4157_v40  ;;  %4236 = vrot.lane.b32.xlu0 %v6294_v45, %s7487_s23  ;;  %v4054_v21 = vadd.f32 1.0, %v7262_v41 }
 0x24d   : > { %v7266_v47 = vpop.eup %7265  ;;  %7281 = vrcp.f32 %v4052_v17  ;;  %v4053_v49 = vadd.f32 1.0, %v7264_v43 }
 0x24e   : > { %v8459_v50 = vpop.eup %7267  ;;  %4238 = vrot.lane.b32.xlu1 %v6295_v44, %s7487_s23  ;;  %7283 = vrcp.f32 %v4054_v21  ;;  %v4055_v52 = vadd.f32 1.0, %v7266_v47 }
 0x24f   : > { %v8462_v53 = vpop.eup %7269  ;;  %7285 = vrcp.f32 %v4053_v49  ;;  %v4162_v0 = vmul.f32 %v8459_v50, %v4121_v37 }
 0x250   : > { %v8464_v56 = vpop.eup %7271  ;;  %v4160_v59 = vmul.f32 %v8462_v53, %v8432_v20  ;;  %4240 = vrot.lane.b32.xlu0 %v6296_v51, %s7487_s23  ;;  %7287 = vrcp.f32 %v4055_v52  ;;  %v4131_v20 = vpop.permute.xlu1 %4130 }
 0x251   : > { %v8469_v60 = vpop.eup %7273  ;;  %7289 = vpow2.f32 %v6166_v55  ;;  %v4163_v4 = vmul.f32 %v8464_v56, %v4123_v48  ;;  %v6300_v10 = vpack.c.bf16 %v4162_v0, %v4162_v0 }
 0x252   : > { %v7276_v61 = vpop.eup %7275  ;;  %v6298_v62 = vpack.c.bf16 %v4160_v59, %v4160_v59  ;;  %v4161_v63 = vmul.f32 %v8469_v60, %v4119_v30  ;;  %4242 = vrot.lane.b32.xlu1 %v6297_v58, %s7487_s23  ;;  %v7201_v58 = vld [vmem:[%s8813_s5 + $0x28] sm:$0xff]  }
 0x253   : > { %v4056_v2 = vadd.f32 1.0, %v7276_v61  ;;  %v6301_v15 = vpack.c.bf16 %v4163_v4, %v4163_v4 }
 0x254   : > { %v6299_v3 = vpack.c.bf16 %v4161_v63, %v4161_v63  ;;  %4244 = vrot.lane.b32.xlu0 %v6298_v62, %s7487_s23  ;;  %v7278_v5 = vpop.eup %7277  ;;  %v4135_v45 = vpop.permute.xlu1 %4134  ;;  %v7210_v62 = vld [vmem:[%s8813_s5 + $0x38] sm:$0xff]  }
 0x255   : > { %7291 = vrcp.f32 %v4056_v2  ;;  %v7280_v9 = vpop.eup %7279  ;;  %v4057_v11 = vadd.f32 1.0, %v7278_v5 }
 0x256   : > { %4246 = vrot.lane.b32.xlu1 %v6299_v3, %s7487_s23  ;;  %v4058_v13 = vadd.f32 1.0, %v7280_v9 }
 0x257   : > { %v8477_v6 = vpop.eup %7281  ;;  %7293 = vrcp.f32 %v4057_v11 }
 0x258   : > { %v8479_v12 = vpop.eup %7283  ;;  %v4164_v18 = vmul.f32 %v8477_v6, %v4125_v54  ;;  %4248 = vrot.lane.b32.xlu0 %v6300_v10, %s7487_s23  ;;  %7295 = vrcp.f32 %v4058_v13  ;;  %v4139_v46 = vpop.permute.xlu1 %4138 }
 0x259   : > { %v8483_v19 = vpop.eup %7285  ;;  %v4166_v24 = vmul.f32 %v8479_v12, %v4129_v8 }
 0x25a   : > { %v8485_v23 = vpop.eup %7287  ;;  %v6302_v7 = vpack.c.bf16 %v4164_v18, %v4164_v18  ;;  %v4165_v14 = vmul.f32 %v8483_v19, %v4127_v1  ;;  %4250 = vrot.lane.b32.xlu1 %v6301_v15, %s7487_s23  ;;  %v7212_v1 = vld [vmem:[%s8813_s5 + $0x40] sm:$0xff]  }
 0x25b   : > { %v4167_v28 = vmul.f32 %v8485_v23, %v4131_v20  ;;  %v7290_v30 = vpop.eup %7289  ;;  %v6304_v31 = vpack.c.bf16 %v4166_v24, %v4166_v24 }
 0x25c   : > { %v6303_v26 = vpack.c.bf16 %v4165_v14, %v4165_v14  ;;  %4252 = vrot.lane.b32.xlu0 %v6302_v7, %s7487_s23  ;;  %v4059_v33 = vadd.f32 1.0, %v7290_v30 }
 0x25d   : > { %v6305_v35 = vpack.c.bf16 %v4167_v28, %v4167_v28 }
 0x25e   : > { %4254 = vrot.lane.b32.xlu1 %v6303_v26, %s7487_s23  ;;  %7297 = vrcp.f32 %v4059_v33 }
 0x25f   : > { %v8493_v34 = vpop.eup %7291 }
 0x260   : > { %v4168_v37 = vmul.f32 %v8493_v34, %v4133_v25  ;;  %4256 = vrot.lane.b32.xlu0 %v6304_v31, %s7487_s23 }
 0x261   : > { %v8497_v39 = vpop.eup %7293 }
 0x262   : > { %v6306_v16 = vpack.c.bf16 %v4168_v37, %v4168_v37  ;;  %4258 = vrot.lane.b32.xlu1 %v6305_v35, %s7487_s23  ;;  %v8503_v40 = vpop.eup %7295  ;;  %v4169_v41 = vmul.f32 %v8497_v39, %v4135_v45  ;;  %v7221_v37 = vld [vmem:[%s8813_s5 + $0x48] sm:$0xff]  }
 0x263   : > { %v4170_v17 = vmul.f32 %v8503_v40, %v4137_v38 }
 0x264   : > { %4260 = vrot.lane.b32.xlu0 %v6306_v16, %s7487_s23  ;;  %v6307_v43 = vpack.c.bf16 %v4169_v41, %v4169_v41 }
 0x265   : > { %v6308_v44 = vpack.c.bf16 %v4170_v17, %v4170_v17 }
 0x266   : > { %4262 = vrot.lane.b32.xlu1 %v6307_v43, %s7487_s23 }
 0x268   : > { %4264 = vrot.lane.b32.xlu0 %v6308_v44, %s7487_s23  ;;  %v8510_v21 = vpop.eup %7297 }
 0x269   : > { %v4171_v22 = vmul.f32 %v8510_v21, %v4139_v46 }
 0x26b   : > { %v6309_v47 = vpack.c.bf16 %v4171_v22, %v4171_v22 }
 0x26d   : > { %4266 = vrot.lane.b32.xlu1 %v6309_v47, %s7487_s23 }
 0x2be   : > { %v4237_v48 = vpop.permute.xlu0 %4236 }
 0x2bf   : > { %4284 = vst.msk [vmem:[#allocation2 + $0x8] sm:$0xf] %vm2729_vm1, %v4237_v48 }
 0x2c0   : > { %v4239_v49 = vpop.permute.xlu1 %4238 }
 0x2c1   : > { %4285 = vst.msk [vmem:[#allocation2 + $0xc] sm:$0xf] %vm2729_vm1, %v4239_v49 }
 0x2c2   : > { %v4241_v51 = vpop.permute.xlu0 %4240 }
 0x2c3   : > { %4286 = vst.msk [vmem:[#allocation2 + $0x10] sm:$0xf] %vm2729_vm1, %v4241_v51 }
 0x2c4   : > { %v4243_v52 = vpop.permute.xlu1 %4242 }
 0x2c5   : > { %4287 = vst.msk [vmem:[#allocation2 + $0x14] sm:$0xf] %vm2729_vm1, %v4243_v52 }
 0x2c6   : > { %v4245_v54 = vpop.permute.xlu0 %4244  ;;  %v7189_v55 = vld [vmem:[#allocation2 + $0x4] sm:$0xff]  }
 0x2c7   : > { %4288 = vst.msk [vmem:[#allocation2 + $0x18] sm:$0xf] %vm2729_vm1, %v4245_v54  ;;  %6894 = vmatprep.mubr.msk.bf16.mxu0 %vm530_vm2, %v7189_v55 }
 0x2c8   : > { %v4247_v59 = vpop.permute.xlu1 %4246  ;;  %v7191_v61 = vld [vmem:[#allocation2 + $0x8] sm:$0xff]  }
 0x2c9   : > { %4289 = vst.msk [vmem:[#allocation2 + $0x1c] sm:$0xf] %vm2729_vm1, %v4247_v59  ;;  %6875 = vmatmul.mubr.msk.bf16.vlgmr.msra.gmra.mrb[112].mxu1 %vm530_vm2, %v7191_v61  ;;  %v7207_v28 = vld [vmem:[#allocation2 + $0x8] sm:$0xff]  }
 0x2ca   : > { %v4249_v63 = vpop.permute.xlu0 %4248  ;;  %v7193_v0 = vld [vmem:[#allocation2 + $0xc] sm:$0xff]   ;;  %6911 = vmatpush3.bf16.msra.mxu1 %v8454_v42 }
 0x2cb   : > { %4290 = vst.msk [vmem:[#allocation2 + $0x20] sm:$0xf] %vm2729_vm1, %v4249_v63  ;;  %6895 = vmatmul.mubr.msk.bf16.vlgmr.msra.gmra.mrb[128].mxu0 %vm530_vm2, %v7193_v0  ;;  %6912 = vmatprep.subr.bf16.mxu1 %v7201_v58  ;;  %v7209_v35 = vld [vmem:[#allocation2 + $0xc] sm:$0xff]   ;;  %v4318_v0 = vld [vmem:[#allocation4 + $0x10] sm:$0xff] }
 0x2cc   : > { %v4251_v2 = vpop.permute.xlu1 %4250  ;;  %v7194_v3 = vld [vmem:[#allocation2 + $0x10] sm:$0xff]   ;;  %6931 = vmatpush3.bf16.msra.mxu0 %v7205_v57  ;;  %v7234_v63 = vld [vmem:[#allocation2 + $0x48] sm:$0xff]  }
 0x2cd   : > { %4291 = vst.msk [vmem:[#allocation2 + $0x24] sm:$0xf] %vm2729_vm1, %v4251_v2  ;;  %6878 = vmatprep.mubr.msk.bf16.mxu1 %vm530_vm2, %v7194_v3  ;;  %6932 = vmatprep.subr.bf16.mxu0 %v7210_v62  ;;  %v7211_v38 = vld [vmem:[#allocation2 + $0x10] sm:$0xff]  }
 0x2ce   : > { %v4253_v4 = vpop.permute.xlu0 %4252  ;;  %v7195_v5 = vld [vmem:[#allocation2 + $0x14] sm:$0xff]   ;;  %6913 = vmatpush3.bf16.msra.mxu1 %v7201_v58 }
 0x2cf   : > { %4292 = vst.msk [vmem:[#allocation2 + $0x28] sm:$0xf] %vm2729_vm1, %v4253_v4  ;;  %6898 = vmatprep.mubr.msk.bf16.mxu0 %vm530_vm2, %v7195_v5  ;;  %6950 = vmatprep.subr.bf16.mxu1 %v7212_v1  ;;  %v7214_v45 = vld [vmem:[#allocation2 + $0x14] sm:$0xff]  }
 0x2d0   : > { %v4255_v42 = vpop.permute.xlu1 %4254  ;;  %v7196_v8 = vld [vmem:[#allocation2 + $0x18] sm:$0xff]   ;;  %6933 = vmatpush3.bf16.msra.mxu0 %v7210_v62  ;;  %v7226_v51 = vld [vmem:[#allocation2 + $0x10] sm:$0xff]  }
 0x2d1   : > { %4293 = vst.msk [vmem:[#allocation2 + $0x2c] sm:$0xf] %vm2729_vm1, %v4255_v42  ;;  %6879 = vmatmul.mubr.msk.bf16.gmra.mrb[116].mxu1 %vm530_vm2, %v7196_v8  ;;  %v7213_v16 = vld [vmem:[#allocation2 + $0x18] sm:$0xff]   ;;  %v4316_v3 = vld [vmem:[#allocation4] sm:$0xff]  ;;  %v4319_v42 = vld [vmem:[#allocation4 + $0x18] sm:$0xff] }
 0x2d2   : > { %v4257_v9 = vpop.permute.xlu0 %4256  ;;  %v7197_v10 = vld [vmem:[#allocation2 + $0x1c] sm:$0xff]  }
 0x2d3   : > { %4294 = vst.msk [vmem:[#allocation2 + $0x30] sm:$0xf] %vm2729_vm1, %v4257_v9  ;;  %6899 = vmatmul.mubr.msk.bf16.gmra.mrb[132].mxu0 %vm530_vm2, %v7197_v10  ;;  %v7215_v57 = vld [vmem:[#allocation2 + $0x1c] sm:$0xff]  }
 0x2d4   : > { %v4259_v11 = vpop.permute.xlu1 %4258  ;;  %v7198_v13 = vld [vmem:[#allocation2 + $0x20] sm:$0xff]   ;;  %v7228_v54 = vld [vmem:[#allocation2 + $0x18] sm:$0xff]  }
 0x2d5   : > { %4295 = vst.msk [vmem:[#allocation2 + $0x34] sm:$0xf] %vm2729_vm1, %v4259_v11  ;;  %6882 = vmatprep.mubr.msk.bf16.mxu1 %vm530_vm2, %v7198_v13  ;;  %v7216_v41 = vld [vmem:[#allocation2 + $0x20] sm:$0xff]   ;;  %v4317_v11 = vld [vmem:[#allocation4 + $0x8] sm:$0xff] }
 0x2d6   : > { %v4261_v15 = vpop.permute.xlu0 %4260  ;;  %v7199_v18 = vld [vmem:[#allocation2 + $0x24] sm:$0xff]  }
 0x2d7   : > { %4296 = vst.msk [vmem:[#allocation2 + $0x38] sm:$0xf] %vm2729_vm1, %v4261_v15  ;;  %6902 = vmatprep.mubr.msk.bf16.mxu0 %vm530_vm2, %v7199_v18  ;;  %v7218_v43 = vld [vmem:[#allocation2 + $0x24] sm:$0xff]  }
 0x2d8   : > { %v7200_v20 = vld [vmem:[#allocation2 + $0x28] sm:$0xff]   ;;  %v4263_v7 = vpop.permute.xlu1 %4262  ;;  %v7229_v55 = vld [vmem:[#allocation2 + $0x20] sm:$0xff]  }
 0x2d9   : > { %4297 = vst.msk [vmem:[#allocation2 + $0x3c] sm:$0xf] %vm2729_vm1, %v4263_v7  ;;  %6883 = vmatmul.mubr.msk.bf16.gmra.mrb[120].mxu1 %vm530_vm2, %v7200_v20  ;;  %v7217_v17 = vld [vmem:[#allocation2 + $0x28] sm:$0xff]  }
 0x2da   : > { %v4265_v14 = vpop.permute.xlu0 %4264  ;;  %v7202_v24 = vld [vmem:[#allocation2 + $0x2c] sm:$0xff]  }
 0x2db   : > { %4298 = vst.msk [vmem:[#allocation2 + $0x40] sm:$0xf] %vm2729_vm1, %v4265_v14  ;;  %6903 = vmatmul.mubr.msk.bf16.gmra.mrb[136].mxu0 %vm530_vm2, %v7202_v24  ;;  %v7219_v44 = vld [vmem:[#allocation2 + $0x2c] sm:$0xff]   ;;  %v4322_v14 = vld [vmem:[#allocation4 + $0x30] sm:$0xff] }
 0x2dc   : > { %v7203_v25 = vld [vmem:[#allocation2 + $0x30] sm:$0xff]   ;;  %v7230_v58 = vld [vmem:[#allocation2 + $0x28] sm:$0xff]  }
 0x2dd   : > { %6886 = vmatprep.mubr.msk.bf16.mxu1 %vm530_vm2, %v7203_v25  ;;  %v7220_v46 = vld [vmem:[#allocation2 + $0x30] sm:$0xff]  }
 0x2de   : > { %v7204_v26 = vld [vmem:[#allocation2 + $0x34] sm:$0xff]  }
 0x2df   : > { %6906 = vmatprep.mubr.msk.bf16.mxu0 %vm530_vm2, %v7204_v26  ;;  %v4267_v30 = vpop.permute.xlu1 %4266  ;;  %v7223_v47 = vld [vmem:[#allocation2 + $0x34] sm:$0xff]  }
 0x2e0   : > { %v7206_v31 = vld [vmem:[#allocation2 + $0x38] sm:$0xff]   ;;  %4299 = vst.msk [vmem:[#allocation2 + $0x44] sm:$0xf] %vm2729_vm1, %v4267_v30  ;;  %v7231_v59 = vld [vmem:[#allocation2 + $0x30] sm:$0xff]  }
 0x2e1   : > { %6887 = vmatmul.mubr.msk.bf16.gmra.mrb[124].mxu1 %vm530_vm2, %v7206_v31  ;;  %v7222_v22 = vld [vmem:[#allocation2 + $0x38] sm:$0xff]   ;;  %v4320_v26 = vld [vmem:[#allocation4 + $0x20] sm:$0xff] }
 0x2e2   : > { %v7208_v33 = vld [vmem:[#allocation2 + $0x3c] sm:$0xff]   ;;  %6914 = vmatprep.mubr.msk.bf16.mxu1 %vm530_vm2, %v7207_v28 }
 0x2e3   : > { %6907 = vmatmul.mubr.msk.bf16.gmra.mrb[140].mxu0 %vm530_vm2, %v7208_v33  ;;  %v7224_v48 = vld [vmem:[#allocation2 + $0x3c] sm:$0xff]   ;;  %v4323_v33 = vld [vmem:[#allocation4 + $0x38] sm:$0xff] }
 0x2e4   : > { %6934 = vmatprep.mubr.msk.bf16.mxu0 %vm530_vm2, %v7209_v35  ;;  %v7232_v61 = vld [vmem:[#allocation2 + $0x38] sm:$0xff]  }
 0x2e7   : > { %v7225_v49 = vld [vmem:[#allocation2 + $0x40] sm:$0xff]  }
 0x2e8   : > { %v7227_v52 = vld [vmem:[#allocation2 + $0x44] sm:$0xff]  }
 0x2e9   : > { %6915 = vmatmul.mubr.msk.bf16.vlgmr.msra.gmra.mrb[128].mxu1 %vm530_vm2, %v7211_v38  ;;  %v7233_v62 = vld [vmem:[#allocation2 + $0x40] sm:$0xff]  }
 0x2ea   : > { %6918 = vmatprep.mubr.msk.bf16.mxu1 %vm530_vm2, %v7213_v16  ;;  %6951 = vmatpush3.bf16.msra.mxu1 %v7212_v1 }
 0x2eb   : > { %6935 = vmatmul.mubr.msk.bf16.vlgmr.msra.gmra.mrb[144].mxu0 %vm530_vm2, %v7214_v45  ;;  %6952 = vmatprep.subr.bf16.mxu1 %v7221_v37 }
 0x2ec   : > { %6938 = vmatprep.mubr.msk.bf16.mxu0 %vm530_vm2, %v7215_v57  ;;  %v4321_v57 = vld [vmem:[#allocation4 + $0x28] sm:$0xff] }
 0x2ee   : > { %6953 = vmatpush3.bf16.msra.mxu1 %v7221_v37 }
 0x2f1   : > { %6919 = vmatmul.mubr.msk.bf16.gmra.mrb[132].mxu1 %vm530_vm2, %v7216_v41 }
 0x2f2   : > { %6922 = vmatprep.mubr.msk.bf16.mxu1 %vm530_vm2, %v7217_v17 }
 0x2f3   : > { %6939 = vmatmul.mubr.msk.bf16.gmra.mrb[148].mxu0 %vm530_vm2, %v7218_v43 }
 0x2f4   : > { %6942 = vmatprep.mubr.msk.bf16.mxu0 %vm530_vm2, %v7219_v44 }
 0x2f9   : > { %6923 = vmatmul.mubr.msk.bf16.gmra.mrb[136].mxu1 %vm530_vm2, %v7220_v46 }
 0x2fa   : > { %6926 = vmatprep.mubr.msk.bf16.mxu1 %vm530_vm2, %v7222_v22 }
 0x2fb   : > { %6943 = vmatmul.mubr.msk.bf16.gmra.mrb[152].mxu0 %vm530_vm2, %v7223_v47 }
 0x2fc   : > { %6946 = vmatprep.mubr.msk.bf16.mxu0 %vm530_vm2, %v7224_v48 }
 0x301   : > { %6927 = vmatmul.mubr.msk.bf16.gmra.mrb[140].mxu1 %vm530_vm2, %v7225_v49 }
 0x302   : > { %6954 = vmatprep.mubr.msk.bf16.mxu1 %vm530_vm2, %v7226_v51 }
 0x303   : > { %6947 = vmatmul.mubr.msk.bf16.gmra.mrb[156].mxu0 %vm530_vm2, %v7227_v52  ;;  %v4326_v52 = vld [vmem:[#allocation4 + $0x50] sm:$0xff] }
 0x309   : > { %6955 = vmatmul.mubr.msk.bf16.vlgmr.msra.gmra.mrb[144].mxu1 %vm530_vm2, %v7228_v54 }
 0x30a   : > { %6958 = vmatprep.mubr.msk.bf16.mxu1 %vm530_vm2, %v7229_v55 }
 0x311   : > { %6959 = vmatmul.mubr.msk.bf16.gmra.mrb[148].mxu1 %vm530_vm2, %v7230_v58  ;;  %v4324_v58 = vld [vmem:[#allocation4 + $0x40] sm:$0xff] }
 0x312   : > { %6962 = vmatprep.mubr.msk.bf16.mxu1 %vm530_vm2, %v7231_v59 }
 0x319   : > { %6963 = vmatmul.mubr.msk.bf16.gmra.mrb[152].mxu1 %vm530_vm2, %v7232_v61 }
 0x31a   : > { %6966 = vmatprep.mubr.msk.bf16.mxu1 %vm530_vm2, %v7233_v62 }
 0x321   : > { %6967 = vmatmul.mubr.msk.bf16.gmra.mrb[156].mxu1 %vm530_vm2, %v7234_v63  ;;  %v4327_v63 = vld [vmem:[#allocation4 + $0x58] sm:$0xff] }
 0x39c   : > { %v6876_v1 = vpop.f32.mrb[112].mxu1 }
 0x39d   : > { %v4511_v2 = vadd.f32 %v6876_v1, %v4318_v0  ;;  %v4446_v4 = vpop.f32.mrb[113].mxu1 }
 0x39e   : > { %v4509_v5 = vadd.f32 %v4446_v4, %v4316_v3  ;;  %v6877_v8 = vpop.f32.mrb[114].mxu1  ;;  %v6896_v9 = vpop.f32.mrb[128].mxu0 }
 0x39f   : > { %4527 = vst.msk [vmem:[#allocation4 + $0x10] sm:$0xff] %vm530_vm2, %v4511_v2  ;;  %v4512_v10 = vadd.f32 %v6877_v8, %v4319_v42  ;;  %v4449_v13 = vpop.f32.mrb[115].mxu1  ;;  %v4688_v15 = vpop.f32.mrb[129].mxu0 }
 0x3a0   : > { %4525 = vst.msk [vmem:[#allocation4] sm:$0xff] %vm530_vm2, %v4509_v5  ;;  %v4510_v18 = vadd.f32 %v4449_v13, %v4317_v11  ;;  %v6897_v20 = vpop.f32.mrb[130].mxu0  ;;  %v4325_v5 = vld [vmem:[#allocation4 + $0x48] sm:$0xff] }
 0x3a1   : > { %4528 = vst.msk [vmem:[#allocation4 + $0x18] sm:$0xff] %vm530_vm2, %v4512_v10  ;;  %v4691_v7 = vpop.f32.mrb[131].mxu0 }
 0x3a2   : > { %4526 = vst.msk [vmem:[#allocation4 + $0x8] sm:$0xff] %vm530_vm2, %v4510_v18 }
 0x3a4   : > { %v6880_v24 = vpop.f32.mrb[116].mxu1 }
 0x3a5   : > { %v4515_v25 = vadd.f32 %v6880_v24, %v4322_v14  ;;  %v4462_v28 = vpop.f32.mrb[117].mxu1  ;;  %v4330_v14 = vld [vmem:[#allocation4 + $0x70] sm:$0xff] }
 0x3a6   : > { %v4559_v30 = vld [vmem:[#allocation4 + $0x10] sm:$0xff]  ;;  %v4513_v31 = vadd.f32 %v4462_v28, %v4320_v26  ;;  %v6881_v35 = vpop.f32.mrb[118].mxu1  ;;  %v6900_v37 = vpop.f32.mrb[132].mxu0  ;;  %v4328_v28 = vld [vmem:[#allocation4 + $0x60] sm:$0xff] }
 0x3a7   : > { %v4753_v38 = vadd.f32 %v6896_v9, %v4559_v30  ;;  %v4557_v16 = vld [vmem:[#allocation4] sm:$0xff]  ;;  %4531 = vst.msk [vmem:[#allocation4 + $0x30] sm:$0xff] %vm530_vm2, %v4515_v25  ;;  %v4516_v45 = vadd.f32 %v6881_v35, %v4323_v33  ;;  %v4465_v41 = vpop.f32.mrb[119].mxu1  ;;  %v4704_v17 = vpop.f32.mrb[133].mxu0 }
 0x3a8   : > { %v4751_v43 = vadd.f32 %v4688_v15, %v4557_v16  ;;  %v4560_v44 = vld [vmem:[#allocation4 + $0x18] sm:$0xff]  ;;  %4529 = vst.msk [vmem:[#allocation4 + $0x20] sm:$0xff] %vm530_vm2, %v4513_v31  ;;  %v4514_v46 = vadd.f32 %v4465_v41, %v4321_v57  ;;  %v6901_v22 = vpop.f32.mrb[134].mxu0 }
 0x3a9   : > { %4769 = vst.msk [vmem:[#allocation4 + $0x10] sm:$0xff] %vm530_vm2, %v4753_v38  ;;  %v4754_v47 = vadd.f32 %v6897_v20, %v4560_v44  ;;  %v4558_v48 = vld [vmem:[#allocation4 + $0x8] sm:$0xff]  ;;  %4532 = vst.msk [vmem:[#allocation4 + $0x38] sm:$0xff] %vm530_vm2, %v4516_v45  ;;  %v4707_v49 = vpop.f32.mrb[135].mxu0  ;;  %v4331_v38 = vld [vmem:[#allocation4 + $0x78] sm:$0xff] }
 0x3aa   : > { %4767 = vst.msk [vmem:[#allocation4] sm:$0xff] %vm530_vm2, %v4751_v43  ;;  %v4752_v51 = vadd.f32 %v4691_v7, %v4558_v48  ;;  %4530 = vst.msk [vmem:[#allocation4 + $0x28] sm:$0xff] %vm530_vm2, %v4514_v46  ;;  %v4329_v43 = vld [vmem:[#allocation4 + $0x68] sm:$0xff] }
 0x3ab   : > { %4770 = vst.msk [vmem:[#allocation4 + $0x18] sm:$0xff] %vm530_vm2, %v4754_v47 }
 0x3ac   : > { %4768 = vst.msk [vmem:[#allocation4 + $0x8] sm:$0xff] %vm530_vm2, %v4752_v51  ;;  %v6884_v54 = vpop.f32.mrb[120].mxu1 }
 0x3ad   : > { %v4519_v55 = vadd.f32 %v6884_v54, %v4326_v52  ;;  %v4478_v59 = vpop.f32.mrb[121].mxu1 }
 0x3ae   : > { %v4563_v61 = vld [vmem:[#allocation4 + $0x30] sm:$0xff]  ;;  %v4517_v62 = vadd.f32 %v4478_v59, %v4324_v58  ;;  %v6885_v0 = vpop.f32.mrb[122].mxu1  ;;  %v6904_v1 = vpop.f32.mrb[136].mxu0 }
 0x3af   : > { %v4757_v2 = vadd.f32 %v6900_v37, %v4563_v61  ;;  %v4561_v3 = vld [vmem:[#allocation4 + $0x20] sm:$0xff]  ;;  %4535 = vst.msk [vmem:[#allocation4 + $0x50] sm:$0xff] %vm530_vm2, %v4519_v55  ;;  %v4520_v4 = vadd.f32 %v6885_v0, %v4327_v63  ;;  %v4481_v42 = vpop.f32.mrb[123].mxu1  ;;  %v4720_v8 = vpop.f32.mrb[137].mxu0 }
 0x3b0   : > { %v4755_v9 = vadd.f32 %v4704_v17, %v4561_v3  ;;  %v4564_v10 = vld [vmem:[#allocation4 + $0x38] sm:$0xff]  ;;  %4533 = vst.msk [vmem:[#allocation4 + $0x40] sm:$0xff] %vm530_vm2, %v4517_v62  ;;  %v4518_v11 = vadd.f32 %v4481_v42, %v4325_v5  ;;  %v6905_v13 = vpop.f32.mrb[138].mxu0  ;;  %v4801_v52 = vld [vmem:[#allocation4 + $0x10] sm:$0xff] }
 0x3b1   : > { %4773 = vst.msk [vmem:[#allocation4 + $0x30] sm:$0xff] %vm530_vm2, %v4757_v2  ;;  %v4758_v15 = vadd.f32 %v6901_v22, %v4564_v10  ;;  %v4562_v18 = vld [vmem:[#allocation4 + $0x28] sm:$0xff]  ;;  %4536 = vst.msk [vmem:[#allocation4 + $0x58] sm:$0xff] %vm530_vm2, %v4520_v4  ;;  %v4723_v20 = vpop.f32.mrb[139].mxu0  ;;  %v4799_v58 = vld [vmem:[#allocation4] sm:$0xff] }
 0x3b2   : > { %4771 = vst.msk [vmem:[#allocation4 + $0x20] sm:$0xff] %vm530_vm2, %v4755_v9  ;;  %v4756_v7 = vadd.f32 %v4707_v49, %v4562_v18  ;;  %4534 = vst.msk [vmem:[#allocation4 + $0x48] sm:$0xff] %vm530_vm2, %v4518_v11  ;;  %v4802_v63 = vld [vmem:[#allocation4 + $0x18] sm:$0xff] }
 0x3b3   : > { %4774 = vst.msk [vmem:[#allocation4 + $0x38] sm:$0xff] %vm530_vm2, %v4758_v15  ;;  %v4800_v5 = vld [vmem:[#allocation4 + $0x8] sm:$0xff] }
 0x3b4   : > { %4772 = vst.msk [vmem:[#allocation4 + $0x28] sm:$0xff] %vm530_vm2, %v4756_v7  ;;  %v6888_v24 = vpop.f32.mrb[124].mxu1 }
 0x3b5   : > { %v4523_v26 = vadd.f32 %v6888_v24, %v4330_v14  ;;  %v4494_v30 = vpop.f32.mrb[125].mxu1 }
 0x3b6   : > { %v4567_v25 = vld [vmem:[#allocation4 + $0x50] sm:$0xff]  ;;  %v6908_v31 = vpop.f32.mrb[140].mxu0  ;;  %v4521_v37 = vadd.f32 %v4494_v30, %v4328_v28  ;;  %v6889_v16 = vpop.f32.mrb[126].mxu1 }
 0x3b7   : > { %v4761_v33 = vadd.f32 %v6904_v1, %v4567_v25  ;;  %v4565_v35 = vld [vmem:[#allocation4 + $0x40] sm:$0xff]  ;;  %v4736_v45 = vpop.f32.mrb[141].mxu0  ;;  %4539 = vst.msk [vmem:[#allocation4 + $0x70] sm:$0xff] %vm530_vm2, %v4523_v26  ;;  %v4524_v17 = vadd.f32 %v6889_v16, %v4331_v38  ;;  %v4497_v44 = vpop.f32.mrb[127].mxu1 }
 0x3b8   : > { %v4759_v57 = vadd.f32 %v4720_v8, %v4565_v35  ;;  %v4568_v41 = vld [vmem:[#allocation4 + $0x58] sm:$0xff]  ;;  %v6909_v46 = vpop.f32.mrb[142].mxu0  ;;  %4537 = vst.msk [vmem:[#allocation4 + $0x60] sm:$0xff] %vm530_vm2, %v4521_v37  ;;  %v4522_v48 = vadd.f32 %v4497_v44, %v4329_v43  ;;  %v4805_v14 = vld [vmem:[#allocation4 + $0x30] sm:$0xff] }
 0x3b9   : > { %4777 = vst.msk [vmem:[#allocation4 + $0x50] sm:$0xff] %vm530_vm2, %v4761_v33  ;;  %v4762_v22 = vadd.f32 %v6905_v13, %v4568_v41  ;;  %v4566_v47 = vld [vmem:[#allocation4 + $0x48] sm:$0xff]  ;;  %v4739_v49 = vpop.f32.mrb[143].mxu0  ;;  %4540 = vst.msk [vmem:[#allocation4 + $0x78] sm:$0xff] %vm530_vm2, %v4524_v17  ;;  %v4803_v26 = vld [vmem:[#allocation4 + $0x20] sm:$0xff] }
 0x3ba   : > { %4775 = vst.msk [vmem:[#allocation4 + $0x40] sm:$0xff] %vm530_vm2, %v4759_v57  ;;  %v4760_v51 = vadd.f32 %v4723_v20, %v4566_v47  ;;  %4538 = vst.msk [vmem:[#allocation4 + $0x68] sm:$0xff] %vm530_vm2, %v4522_v48  ;;  %v4806_v33 = vld [vmem:[#allocation4 + $0x38] sm:$0xff] }
 0x3bb   : > { %4778 = vst.msk [vmem:[#allocation4 + $0x58] sm:$0xff] %vm530_vm2, %v4762_v22  ;;  %v4804_v57 = vld [vmem:[#allocation4 + $0x28] sm:$0xff] }
 0x3bc   : > { %4776 = vst.msk [vmem:[#allocation4 + $0x48] sm:$0xff] %vm530_vm2, %v4760_v51  ;;  %v6916_v54 = vpop.f32.mrb[128].mxu1 }
 0x3bd   : > { %v4995_v55 = vadd.f32 %v6916_v54, %v4801_v52  ;;  %v4930_v59 = vpop.f32.mrb[129].mxu1 }
 0x3be   : > { %v4571_v61 = vld [vmem:[#allocation4 + $0x70] sm:$0xff]  ;;  %v4993_v62 = vadd.f32 %v4930_v59, %v4799_v58  ;;  %v6917_v0 = vpop.f32.mrb[130].mxu1  ;;  %v6936_v1 = vpop.f32.mrb[144].mxu0 }
 0x3bf   : > { %v4765_v2 = vadd.f32 %v6908_v31, %v4571_v61  ;;  %v4569_v3 = vld [vmem:[#allocation4 + $0x60] sm:$0xff]  ;;  %5011 = vst.msk [vmem:[#allocation4 + $0x10] sm:$0xff] %vm530_vm2, %v4995_v55  ;;  %v4996_v4 = vadd.f32 %v6917_v0, %v4802_v63  ;;  %v4933_v42 = vpop.f32.mrb[131].mxu1  ;;  %v5172_v8 = vpop.f32.mrb[145].mxu0 }
 0x3c0   : > { %v4763_v9 = vadd.f32 %v4736_v45, %v4569_v3  ;;  %v4572_v10 = vld [vmem:[#allocation4 + $0x78] sm:$0xff]  ;;  %5009 = vst.msk [vmem:[#allocation4] sm:$0xff] %vm530_vm2, %v4993_v62  ;;  %v4994_v11 = vadd.f32 %v4933_v42, %v4800_v5  ;;  %v6937_v13 = vpop.f32.mrb[146].mxu0  ;;  %v4809_v52 = vld [vmem:[#allocation4 + $0x50] sm:$0xff] }
 0x3c1   : > { %4781 = vst.msk [vmem:[#allocation4 + $0x70] sm:$0xff] %vm530_vm2, %v4765_v2  ;;  %v4766_v15 = vadd.f32 %v6909_v46, %v4572_v10  ;;  %v4570_v18 = vld [vmem:[#allocation4 + $0x68] sm:$0xff]  ;;  %5012 = vst.msk [vmem:[#allocation4 + $0x18] sm:$0xff] %vm530_vm2, %v4996_v4  ;;  %v5175_v20 = vpop.f32.mrb[147].mxu0  ;;  %v4807_v58 = vld [vmem:[#allocation4 + $0x40] sm:$0xff] }
 0x3c2   : > { %4779 = vst.msk [vmem:[#allocation4 + $0x60] sm:$0xff] %vm530_vm2, %v4763_v9  ;;  %v4764_v7 = vadd.f32 %v4739_v49, %v4570_v18  ;;  %5010 = vst.msk [vmem:[#allocation4 + $0x8] sm:$0xff] %vm530_vm2, %v4994_v11  ;;  %v4810_v63 = vld [vmem:[#allocation4 + $0x58] sm:$0xff] }
 0x3c3   : > { %4782 = vst.msk [vmem:[#allocation4 + $0x78] sm:$0xff] %vm530_vm2, %v4766_v15  ;;  %v4808_v5 = vld [vmem:[#allocation4 + $0x48] sm:$0xff] }
 0x3c4   : > { %4780 = vst.msk [vmem:[#allocation4 + $0x68] sm:$0xff] %vm530_vm2, %v4764_v7  ;;  %v6920_v24 = vpop.f32.mrb[132].mxu1 }
 0x3c5   : > { %v4999_v25 = vadd.f32 %v6920_v24, %v4805_v14  ;;  %v4946_v28 = vpop.f32.mrb[133].mxu1 }
 0x3c6   : > { %v5043_v30 = vld [vmem:[#allocation4 + $0x10] sm:$0xff]  ;;  %v4997_v31 = vadd.f32 %v4946_v28, %v4803_v26  ;;  %v6921_v35 = vpop.f32.mrb[134].mxu1  ;;  %v6940_v37 = vpop.f32.mrb[148].mxu0 }
 0x3c7   : > { %v5237_v38 = vadd.f32 %v6936_v1, %v5043_v30  ;;  %v5041_v16 = vld [vmem:[#allocation4] sm:$0xff]  ;;  %5015 = vst.msk [vmem:[#allocation4 + $0x30] sm:$0xff] %vm530_vm2, %v4999_v25  ;;  %v5000_v45 = vadd.f32 %v6921_v35, %v4806_v33  ;;  %v4949_v41 = vpop.f32.mrb[135].mxu1  ;;  %v5188_v17 = vpop.f32.mrb[149].mxu0 }
 0x3c8   : > { %v5235_v43 = vadd.f32 %v5172_v8, %v5041_v16  ;;  %v5044_v44 = vld [vmem:[#allocation4 + $0x18] sm:$0xff]  ;;  %5013 = vst.msk [vmem:[#allocation4 + $0x20] sm:$0xff] %vm530_vm2, %v4997_v31  ;;  %v4998_v46 = vadd.f32 %v4949_v41, %v4804_v57  ;;  %v6941_v22 = vpop.f32.mrb[150].mxu0  ;;  %v4813_v14 = vld [vmem:[#allocation4 + $0x70] sm:$0xff] }
 0x3c9   : > { %5253 = vst.msk [vmem:[#allocation4 + $0x10] sm:$0xff] %vm530_vm2, %v5237_v38  ;;  %v5238_v47 = vadd.f32 %v6937_v13, %v5044_v44  ;;  %v5042_v48 = vld [vmem:[#allocation4 + $0x8] sm:$0xff]  ;;  %5016 = vst.msk [vmem:[#allocation4 + $0x38] sm:$0xff] %vm530_vm2, %v5000_v45  ;;  %v5191_v49 = vpop.f32.mrb[151].mxu0  ;;  %v4811_v26 = vld [vmem:[#allocation4 + $0x60] sm:$0xff] }
 0x3ca   : > { %5251 = vst.msk [vmem:[#allocation4] sm:$0xff] %vm530_vm2, %v5235_v43  ;;  %v5236_v51 = vadd.f32 %v5175_v20, %v5042_v48  ;;  %5014 = vst.msk [vmem:[#allocation4 + $0x28] sm:$0xff] %vm530_vm2, %v4998_v46  ;;  %v4814_v33 = vld [vmem:[#allocation4 + $0x78] sm:$0xff] }
 0x3cb   : > { %5254 = vst.msk [vmem:[#allocation4 + $0x18] sm:$0xff] %vm530_vm2, %v5238_v47  ;;  %v4812_v57 = vld [vmem:[#allocation4 + $0x68] sm:$0xff] }
 0x3cc   : > { %5252 = vst.msk [vmem:[#allocation4 + $0x8] sm:$0xff] %vm530_vm2, %v5236_v51  ;;  %v6924_v54 = vpop.f32.mrb[136].mxu1 }
 0x3cd   : > { %v5003_v55 = vadd.f32 %v6924_v54, %v4809_v52  ;;  %v4962_v59 = vpop.f32.mrb[137].mxu1 }
 0x3ce   : > { %v5047_v61 = vld [vmem:[#allocation4 + $0x30] sm:$0xff]  ;;  %v5001_v62 = vadd.f32 %v4962_v59, %v4807_v58  ;;  %v6925_v0 = vpop.f32.mrb[138].mxu1  ;;  %v6944_v1 = vpop.f32.mrb[152].mxu0 }
 0x3cf   : > { %v5241_v2 = vadd.f32 %v6940_v37, %v5047_v61  ;;  %v5045_v3 = vld [vmem:[#allocation4 + $0x20] sm:$0xff]  ;;  %5019 = vst.msk [vmem:[#allocation4 + $0x50] sm:$0xff] %vm530_vm2, %v5003_v55  ;;  %v5004_v4 = vadd.f32 %v6925_v0, %v4810_v63  ;;  %v4965_v42 = vpop.f32.mrb[139].mxu1  ;;  %v5204_v8 = vpop.f32.mrb[153].mxu0 }
 0x3d0   : > { %v5239_v9 = vadd.f32 %v5188_v17, %v5045_v3  ;;  %v5048_v10 = vld [vmem:[#allocation4 + $0x38] sm:$0xff]  ;;  %5017 = vst.msk [vmem:[#allocation4 + $0x40] sm:$0xff] %vm530_vm2, %v5001_v62  ;;  %v5002_v11 = vadd.f32 %v4965_v42, %v4808_v5  ;;  %v6945_v13 = vpop.f32.mrb[154].mxu0  ;;  %v5285_v52 = vld [vmem:[#allocation4 + $0x10] sm:$0xff] }
 0x3d1   : > { %5257 = vst.msk [vmem:[#allocation4 + $0x30] sm:$0xff] %vm530_vm2, %v5241_v2  ;;  %v5242_v15 = vadd.f32 %v6941_v22, %v5048_v10  ;;  %v5046_v18 = vld [vmem:[#allocation4 + $0x28] sm:$0xff]  ;;  %5020 = vst.msk [vmem:[#allocation4 + $0x58] sm:$0xff] %vm530_vm2, %v5004_v4  ;;  %v5207_v20 = vpop.f32.mrb[155].mxu0  ;;  %v5283_v58 = vld [vmem:[#allocation4] sm:$0xff] }
 0x3d2   : > { %5255 = vst.msk [vmem:[#allocation4 + $0x20] sm:$0xff] %vm530_vm2, %v5239_v9  ;;  %v5240_v7 = vadd.f32 %v5191_v49, %v5046_v18  ;;  %5018 = vst.msk [vmem:[#allocation4 + $0x48] sm:$0xff] %vm530_vm2, %v5002_v11  ;;  %v5286_v63 = vld [vmem:[#allocation4 + $0x18] sm:$0xff] }
 0x3d3   : > { %5258 = vst.msk [vmem:[#allocation4 + $0x38] sm:$0xff] %vm530_vm2, %v5242_v15  ;;  %v5284_v4 = vld [vmem:[#allocation4 + $0x8] sm:$0xff] }
 0x3d4   : > { %5256 = vst.msk [vmem:[#allocation4 + $0x28] sm:$0xff] %vm530_vm2, %v5240_v7  ;;  %v6928_v24 = vpop.f32.mrb[140].mxu1 }
 0x3d5   : > { %v5007_v25 = vadd.f32 %v6928_v24, %v4813_v14  ;;  %v4978_v28 = vpop.f32.mrb[141].mxu1 }
 0x3d6   : > { %v5051_v30 = vld [vmem:[#allocation4 + $0x50] sm:$0xff]  ;;  %v5005_v31 = vadd.f32 %v4978_v28, %v4811_v26  ;;  %v6929_v35 = vpop.f32.mrb[142].mxu1  ;;  %v6948_v37 = vpop.f32.mrb[156].mxu0 }
 0x3d7   : > { %v5245_v38 = vadd.f32 %v6944_v1, %v5051_v30  ;;  %v5049_v16 = vld [vmem:[#allocation4 + $0x40] sm:$0xff]  ;;  %5023 = vst.msk [vmem:[#allocation4 + $0x70] sm:$0xff] %vm530_vm2, %v5007_v25  ;;  %v5008_v45 = vadd.f32 %v6929_v35, %v4814_v33  ;;  %v4981_v41 = vpop.f32.mrb[143].mxu1  ;;  %v5220_v17 = vpop.f32.mrb[157].mxu0 }
 0x3d8   : > { %v5243_v43 = vadd.f32 %v5204_v8, %v5049_v16  ;;  %v5052_v44 = vld [vmem:[#allocation4 + $0x58] sm:$0xff]  ;;  %5021 = vst.msk [vmem:[#allocation4 + $0x60] sm:$0xff] %vm530_vm2, %v5005_v31  ;;  %v5006_v46 = vadd.f32 %v4981_v41, %v4812_v57  ;;  %v6949_v22 = vpop.f32.mrb[158].mxu0  ;;  %v5289_v15 = vld [vmem:[#allocation4 + $0x30] sm:$0xff] }
 0x3d9   : > { %5261 = vst.msk [vmem:[#allocation4 + $0x50] sm:$0xff] %vm530_vm2, %v5245_v38  ;;  %v5246_v47 = vadd.f32 %v6945_v13, %v5052_v44  ;;  %v5050_v48 = vld [vmem:[#allocation4 + $0x48] sm:$0xff]  ;;  %5024 = vst.msk [vmem:[#allocation4 + $0x78] sm:$0xff] %vm530_vm2, %v5008_v45  ;;  %v5223_v49 = vpop.f32.mrb[159].mxu0  ;;  %v5287_v7 = vld [vmem:[#allocation4 + $0x20] sm:$0xff]  ;;  %v5543_v44 = vsub.f32 1.0, %v8434_v27 }
 0x3da   : > { %5259 = vst.msk [vmem:[#allocation4 + $0x40] sm:$0xff] %vm530_vm2, %v5243_v43  ;;  %v5244_v51 = vadd.f32 %v5207_v20, %v5050_v48  ;;  %5022 = vst.msk [vmem:[#allocation4 + $0x68] sm:$0xff] %vm530_vm2, %v5006_v46  ;;  %v5290_v26 = vld [vmem:[#allocation4 + $0x38] sm:$0xff] }
 0x3db   : > { %5262 = vst.msk [vmem:[#allocation4 + $0x58] sm:$0xff] %vm530_vm2, %v5246_v47  ;;  %v5288_v33 = vld [vmem:[#allocation4 + $0x28] sm:$0xff] }
 0x3dc   : > { %5260 = vst.msk [vmem:[#allocation4 + $0x48] sm:$0xff] %vm530_vm2, %v5244_v51  ;;  %v6956_v54 = vpop.f32.mrb[144].mxu1 }
 0x3dd   : > { %v5479_v55 = vadd.f32 %v6956_v54, %v5285_v52  ;;  %v5414_v59 = vpop.f32.mrb[145].mxu1 }
 0x3de   : > { %v5055_v61 = vld [vmem:[#allocation4 + $0x70] sm:$0xff]  ;;  %v5477_v62 = vadd.f32 %v5414_v59, %v5283_v58  ;;  %v6957_v0 = vpop.f32.mrb[146].mxu1  ;;  %v5544_v58 = vsub.f32 1.0, %v8438_v32 }
 0x3df   : > { %v5249_v1 = vadd.f32 %v6948_v37, %v5055_v61  ;;  %v5053_v2 = vld [vmem:[#allocation4 + $0x60] sm:$0xff]  ;;  %5495 = vst.msk [vmem:[#allocation4 + $0x10] sm:$0xff] %vm530_vm2, %v5479_v55  ;;  %v5480_v3 = vadd.f32 %v6957_v0, %v5286_v63  ;;  %v5417_v5 = vpop.f32.mrb[147].mxu1  ;;  %v5542_v63 = vsub.f32 1.0, %v8442_v36 }
 0x3e0   : > { %v5247_v42 = vadd.f32 %v5220_v17, %v5053_v2  ;;  %v5056_v8 = vld [vmem:[#allocation4 + $0x78] sm:$0xff]  ;;  %5493 = vst.msk [vmem:[#allocation4] sm:$0xff] %vm530_vm2, %v5477_v62  ;;  %v5478_v9 = vadd.f32 %v5417_v5, %v5284_v4  ;;  %v5293_v45 = vld [vmem:[#allocation4 + $0x50] sm:$0xff] }
 0x3e1   : > { %5265 = vst.msk [vmem:[#allocation4 + $0x70] sm:$0xff] %vm530_vm2, %v5249_v1  ;;  %v5250_v10 = vadd.f32 %v6949_v22, %v5056_v8  ;;  %v5054_v11 = vld [vmem:[#allocation4 + $0x68] sm:$0xff]  ;;  %5496 = vst.msk [vmem:[#allocation4 + $0x18] sm:$0xff] %vm530_vm2, %v5480_v3  ;;  %v5291_v17 = vld [vmem:[#allocation4 + $0x40] sm:$0xff] }
 0x3e2   : > { %5263 = vst.msk [vmem:[#allocation4 + $0x60] sm:$0xff] %vm530_vm2, %v5247_v42  ;;  %v5248_v13 = vadd.f32 %v5223_v49, %v5054_v11  ;;  %5494 = vst.msk [vmem:[#allocation4 + $0x8] sm:$0xff] %vm530_vm2, %v5478_v9  ;;  %v5294_v47 = vld [vmem:[#allocation4 + $0x58] sm:$0xff]  ;;  %v5541_v49 = vsub.f32 1.0, %v8436_v29  ;;  %v7337_v2 = vld [vmem:[%s7714_s27 + $0x10] sm:$0xff] }
 0x3e3   : > { %5266 = vst.msk [vmem:[#allocation4 + $0x78] sm:$0xff] %vm530_vm2, %v5250_v10  ;;  %v5292_v54 = vld [vmem:[#allocation4 + $0x48] sm:$0xff]  ;;  %v5559_v3 = vmul.f32 %v7337_v2, %v5543_v44  ;;  %v7338_v42 = vld [vmem:[%s7714_s27] sm:$0xff]  ;;  %v7339_v11 = vld [vmem:[%s7714_s27 + $0x18] sm:$0xff] }
 0x3e4   : > { %5264 = vst.msk [vmem:[#allocation4 + $0x68] sm:$0xff] %vm530_vm2, %v5248_v13  ;;  %v6960_v18 = vpop.f32.mrb[148].mxu1  ;;  %v5557_v8 = vmul.f32 %v7338_v42, %v5541_v49  ;;  %v5560_v13 = vmul.f32 %v7339_v11, %v5544_v58  ;;  %v7341_v49 = vld [vmem:[%s7714_s27 + $0x30] sm:$0xff]  ;;  %v7344_v2 = vld [vmem:[%s7714_s27 + $0x28] sm:$0xff] }
 0x3e5   : > { %v5483_v20 = vadd.f32 %v6960_v18, %v5289_v15  ;;  %v5430_v14 = vpop.f32.mrb[149].mxu1 }
 0x3e6   : > { %v5511_v24 = vld [vmem:[#allocation4 + $0x10] sm:$0xff]  ;;  %v5481_v25 = vadd.f32 %v5430_v14, %v5287_v7  ;;  %v6961_v28 = vpop.f32.mrb[150].mxu1  ;;  %v7340_v14 = vld [vmem:[%s7714_s27 + $0x8] sm:$0xff] }
 0x3e7   : > { %7299 = vtanh.f32 %v5511_v24  ;;  %v5509_v30 = vld [vmem:[#allocation4] sm:$0xff]  ;;  %5499 = vst.msk [vmem:[#allocation4 + $0x30] sm:$0xff] %vm530_vm2, %v5483_v20  ;;  %v5484_v31 = vadd.f32 %v6961_v28, %v5290_v26  ;;  %v5433_v35 = vpop.f32.mrb[151].mxu1  ;;  %v5558_v24 = vmul.f32 %v7340_v14, %v5542_v63 }
 0x3e8   : > { %7301 = vtanh.f32 %v5509_v30  ;;  %v5512_v37 = vld [vmem:[#allocation4 + $0x18] sm:$0xff]  ;;  %5497 = vst.msk [vmem:[#allocation4 + $0x20] sm:$0xff] %vm530_vm2, %v5481_v25  ;;  %v5482_v38 = vadd.f32 %v5433_v35, %v5288_v33  ;;  %v5297_v20 = vld [vmem:[#allocation4 + $0x70] sm:$0xff] }
 0x3e9   : > { %7303 = vtanh.f32 %v5512_v37  ;;  %v5510_v16 = vld [vmem:[#allocation4 + $0x8] sm:$0xff]  ;;  %5500 = vst.msk [vmem:[#allocation4 + $0x38] sm:$0xff] %vm530_vm2, %v5484_v31  ;;  %v5295_v28 = vld [vmem:[#allocation4 + $0x60] sm:$0xff]  ;;  %v5547_v31 = vsub.f32 1.0, %v8459_v50 }
 0x3ea   : > { %7305 = vtanh.f32 %v5510_v16  ;;  %5498 = vst.msk [vmem:[#allocation4 + $0x28] sm:$0xff] %vm530_vm2, %v5482_v38  ;;  %v5298_v35 = vld [vmem:[#allocation4 + $0x78] sm:$0xff] }
 0x3ec   : > { %v6964_v57 = vpop.f32.mrb[152].mxu1 }
 0x3ed   : > { %v5487_v41 = vadd.f32 %v6964_v57, %v5293_v45  ;;  %v5446_v43 = vpop.f32.mrb[153].mxu1  ;;  %v5296_v57 = vld [vmem:[#allocation4 + $0x68] sm:$0xff] }
 0x3ee   : > { %v5515_v46 = vld [vmem:[#allocation4 + $0x30] sm:$0xff]  ;;  %v5485_v22 = vadd.f32 %v5446_v43, %v5291_v17  ;;  %v6965_v48 = vpop.f32.mrb[154].mxu1  ;;  %v5548_v17 = vsub.f32 1.0, %v8464_v56 }
 0x3ef   : > { %7307 = vtanh.f32 %v5515_v46  ;;  %v5513_v51 = vld [vmem:[#allocation4 + $0x20] sm:$0xff]  ;;  %5503 = vst.msk [vmem:[#allocation4 + $0x50] sm:$0xff] %vm530_vm2, %v5487_v41  ;;  %v5488_v52 = vadd.f32 %v6965_v48, %v5294_v47  ;;  %v5449_v55 = vpop.f32.mrb[155].mxu1 }
 0x3f0   : > { %7309 = vtanh.f32 %v5513_v51  ;;  %v5516_v59 = vld [vmem:[#allocation4 + $0x38] sm:$0xff]  ;;  %5501 = vst.msk [vmem:[#allocation4 + $0x40] sm:$0xff] %vm530_vm2, %v5485_v22  ;;  %v5486_v61 = vadd.f32 %v5449_v55, %v5292_v54  ;;  %v5546_v22 = vsub.f32 1.0, %v8469_v60  ;;  %v5563_v51 = vmul.f32 %v7341_v49, %v5547_v31  ;;  %v7342_v55 = vld [vmem:[%s7714_s27 + $0x20] sm:$0xff] }
 0x3f1   : > { %v7300_v62 = vpop.eup %7299  ;;  %7311 = vtanh.f32 %v5516_v59  ;;  %v5514_v0 = vld [vmem:[#allocation4 + $0x28] sm:$0xff]  ;;  %5504 = vst.msk [vmem:[#allocation4 + $0x58] sm:$0xff] %vm530_vm2, %v5488_v52  ;;  %v7351_v49 = vld [vmem:[%s7714_s27 + $0x78] sm:$0xff] }
 0x3f2   : > { %v7302_v1 = vpop.eup %7301  ;;  %v5575_v4 = vmul.f32 %v7300_v62, %v8434_v27  ;;  %7313 = vtanh.f32 %v5514_v0  ;;  %5502 = vst.msk [vmem:[#allocation4 + $0x48] sm:$0xff] %vm530_vm2, %v5486_v61  ;;  %v7343_v62 = vld [vmem:[%s7714_s27 + $0x38] sm:$0xff] }
 0x3f3   : > { %v7304_v5 = vpop.eup %7303  ;;  %v5573_v9 = vmul.f32 %v7302_v1, %v8436_v29  ;;  %v5564_v63 = vmul.f32 %v7343_v62, %v5548_v17 }
 0x3f4   : > { %v7306_v10 = vpop.eup %7305  ;;  %v5591_v15 = vadd.f32 %v5575_v4, %v5559_v3  ;;  %v5576_v18 = vmul.f32 %v7304_v5, %v8438_v32  ;;  %v6968_v7 = vpop.f32.mrb[156].mxu1  ;;  %v5562_v3 = vmul.f32 %v7344_v2, %v5546_v22  ;;  %v5551_v5 = vsub.f32 1.0, %v8479_v12 }
 0x3f5   : > { %v5589_v27 = vadd.f32 %v5573_v9, %v5557_v8  ;;  %v5574_v25 = vmul.f32 %v7306_v10, %v8442_v36  ;;  %v5491_v26 = vadd.f32 %v6968_v7, %v5297_v20  ;;  %v5462_v30 = vpop.f32.mrb[157].mxu1  ;;  %v5545_v36 = vsub.f32 1.0, %v8462_v53  ;;  %v7345_v20 = vld [vmem:[%s7714_s27 + $0x50] sm:$0xff] }
 0x3f6   : > { %5607 = vst.msk [vmem:[%s8673_s15 + $0x10] sm:$0xff] %vm530_vm2, %v5591_v15  ;;  %v5592_v29 = vadd.f32 %v5576_v18, %v5560_v13  ;;  %v5519_v32 = vld [vmem:[#allocation4 + $0x50] sm:$0xff]  ;;  %v5489_v33 = vadd.f32 %v5462_v30, %v5295_v28  ;;  %v6969_v37 = vpop.f32.mrb[158].mxu1  ;;  %v5552_v10 = vsub.f32 1.0, %v8485_v23  ;;  %v5550_v13 = vsub.f32 1.0, %v8483_v19  ;;  %v7347_v30 = vld [vmem:[%s7714_s27 + $0x58] sm:$0xff] }
 0x3f7   : > { %5605 = vst.msk [vmem:[%s8673_s15] sm:$0xff] %vm530_vm2, %v5589_v27  ;;  %v5590_v38 = vadd.f32 %v5574_v25, %v5558_v24  ;;  %7315 = vtanh.f32 %v5519_v32  ;;  %v5517_v16 = vld [vmem:[#allocation4 + $0x40] sm:$0xff]  ;;  %5507 = vst.msk [vmem:[#allocation4 + $0x70] sm:$0xff] %vm530_vm2, %v5491_v26  ;;  %v5492_v45 = vadd.f32 %v6969_v37, %v5298_v35  ;;  %v5465_v41 = vpop.f32.mrb[159].mxu1  ;;  %v5561_v58 = vmul.f32 %v7342_v55, %v5545_v36 }
 0x3f8   : > { %5608 = vst.msk [vmem:[%s8673_s15 + $0x18] sm:$0xff] %vm530_vm2, %v5592_v29  ;;  %7317 = vtanh.f32 %v5517_v16  ;;  %v5520_v43 = vld [vmem:[#allocation4 + $0x58] sm:$0xff]  ;;  %5505 = vst.msk [vmem:[#allocation4 + $0x60] sm:$0xff] %vm530_vm2, %v5489_v33  ;;  %v5490_v44 = vadd.f32 %v5465_v41, %v5296_v57  ;;  %v5567_v7 = vmul.f32 %v7345_v20, %v5551_v5  ;;  %v7346_v27 = vld [vmem:[%s7714_s27 + $0x40] sm:$0xff]  ;;  %v5568_v31 = vmul.f32 %v7347_v30, %v5552_v10 }
 0x3f9   : > { %v7308_v46 = vpop.eup %7307  ;;  %5606 = vst.msk [vmem:[%s8673_s15 + $0x8] sm:$0xff] %vm530_vm2, %v5590_v38  ;;  %7319 = vtanh.f32 %v5520_v43  ;;  %v5518_v47 = vld [vmem:[#allocation4 + $0x48] sm:$0xff]  ;;  %5508 = vst.msk [vmem:[#allocation4 + $0x78] sm:$0xff] %vm530_vm2, %v5492_v45  ;;  %v5555_v36 = vsub.f32 1.0, %v8503_v40  ;;  %v5553_v38 = vsub.f32 1.0, %v8493_v34  ;;  %v5556_v16 = vsub.f32 1.0, %v8510_v21 }
 0x3fa   : > { %v7310_v48 = vpop.eup %7309  ;;  %v5579_v52 = vmul.f32 %v7308_v46, %v8459_v50  ;;  %7321 = vtanh.f32 %v5518_v47  ;;  %5506 = vst.msk [vmem:[#allocation4 + $0x68] sm:$0xff] %vm530_vm2, %v5490_v44  ;;  %v7348_v33 = vld [vmem:[%s7714_s27 + $0x48] sm:$0xff]  ;;  %v5554_v45 = vsub.f32 1.0, %v8497_v39  ;;  %v7349_v41 = vld [vmem:[%s7714_s27 + $0x70] sm:$0xff]  ;;  %v7350_v46 = vld [vmem:[%s7714_s27 + $0x60] sm:$0xff] }
 0x3fb   : > { %v7312_v54 = vpop.eup %7311  ;;  %v5577_v59 = vmul.f32 %v7310_v48, %v8462_v53  ;;  %v5549_v53 = vsub.f32 1.0, %v8477_v6  ;;  %v5566_v35 = vmul.f32 %v7348_v33, %v5550_v13  ;;  %v5571_v17 = vmul.f32 %v7349_v41, %v5555_v36 }
 0x3fc   : > { %v7314_v61 = vpop.eup %7313  ;;  %v5595_v0 = vadd.f32 %v5579_v52, %v5563_v51  ;;  %v5580_v1 = vmul.f32 %v7312_v54, %v8464_v56  ;;  %v5569_v22 = vmul.f32 %v7350_v46, %v5553_v38  ;;  %v5572_v51 = vmul.f32 %v7351_v49, %v5556_v16 }
 0x3fd   : > { %v5593_v50 = vadd.f32 %v5577_v59, %v5561_v58  ;;  %v5578_v4 = vmul.f32 %v7314_v61, %v8469_v60  ;;  %v5565_v25 = vmul.f32 %v7346_v27, %v5549_v53 }
 0x3fe   : > { %5611 = vst.msk [vmem:[%s8673_s15 + $0x30] sm:$0xff] %vm530_vm2, %v5595_v0  ;;  %v5596_v42 = vadd.f32 %v5580_v1, %v5564_v63  ;;  %v5523_v8 = vld [vmem:[#allocation4 + $0x70] sm:$0xff] }
 0x3ff   : > { %5609 = vst.msk [vmem:[%s8673_s15 + $0x20] sm:$0xff] %vm530_vm2, %v5593_v50  ;;  %v5594_v9 = vadd.f32 %v5578_v4, %v5562_v3  ;;  %7323 = vtanh.f32 %v5523_v8  ;;  %v5521_v56 = vld [vmem:[#allocation4 + $0x60] sm:$0xff] }
 0x400   : > { %5612 = vst.msk [vmem:[%s8673_s15 + $0x38] sm:$0xff] %vm530_vm2, %v5596_v42  ;;  %7325 = vtanh.f32 %v5521_v56  ;;  %v5524_v60 = vld [vmem:[#allocation4 + $0x78] sm:$0xff] }
 0x401   : > { %v7316_v11 = vpop.eup %7315  ;;  %5610 = vst.msk [vmem:[%s8673_s15 + $0x28] sm:$0xff] %vm530_vm2, %v5594_v9  ;;  %7327 = vtanh.f32 %v5524_v60  ;;  %v5522_v15 = vld [vmem:[#allocation4 + $0x68] sm:$0xff] }
 0x402   : > { %v7318_v18 = vpop.eup %7317  ;;  %v5583_v14 = vmul.f32 %v7316_v11, %v8479_v12  ;;  %7329 = vtanh.f32 %v5522_v15 }
 0x403   : > { %v7320_v24 = vpop.eup %7319  ;;  %v5581_v26 = vmul.f32 %v7318_v18, %v8477_v6 }
 0x404   : > { %v7322_v28 = vpop.eup %7321  ;;  %v5599_v29 = vadd.f32 %v5583_v14, %v5567_v7  ;;  %v5584_v32 = vmul.f32 %v7320_v24, %v8485_v23 }
 0x405   : > { %v5597_v12 = vadd.f32 %v5581_v26, %v5565_v25  ;;  %v5582_v37 = vmul.f32 %v7322_v28, %v8483_v19 }
 0x406   : > { %5615 = vst.msk [vmem:[%s8673_s15 + $0x50] sm:$0xff] %vm530_vm2, %v5599_v29  ;;  %v5600_v6 = vadd.f32 %v5584_v32, %v5568_v31 }
 0x407   : > { %5613 = vst.msk [vmem:[%s8673_s15 + $0x40] sm:$0xff] %vm530_vm2, %v5597_v12  ;;  %v5598_v23 = vadd.f32 %v5582_v37, %v5566_v35 }
 0x408   : > { %5616 = vst.msk [vmem:[%s8673_s15 + $0x58] sm:$0xff] %vm530_vm2, %v5600_v6 }
 0x409   : > { %v7324_v19 = vpop.eup %7323  ;;  %5614 = vst.msk [vmem:[%s8673_s15 + $0x48] sm:$0xff] %vm530_vm2, %v5598_v23 }
 0x40a   : > { %v7326_v57 = vpop.eup %7325  ;;  %v5587_v43 = vmul.f32 %v7324_v19, %v8503_v40  ;;  %v7352_v40 = vld [vmem:[%s7714_s27 + $0x68] sm:$0xff]  ;;  %s5622_s27 = scalar_lea.sflag [#allocation7], %s7708_s0 }
 0x40b   : > { %v7328_v44 = vpop.eup %7327  ;;  %v5585_v47 = vmul.f32 %v7326_v57, %v8493_v34  ;;  %v5570_v55 = vmul.f32 %v7352_v40, %v5554_v45 }
 0x40c   : > { %v7330_v48 = vpop.eup %7329  ;;  %v5603_v52 = vadd.f32 %v5587_v43, %v5571_v17  ;;  %v5588_v54 = vmul.f32 %v7328_v44, %v8510_v21 }
 0x40d   : > { %v5601_v58 = vadd.f32 %v5585_v47, %v5569_v22  ;;  %v5586_v59 = vmul.f32 %v7330_v48, %v8497_v39 }
 0x40e   : > { %5619 = vst.msk [vmem:[%s8673_s15 + $0x70] sm:$0xff] %vm530_vm2, %v5603_v52  ;;  %v5604_v34 = vadd.f32 %v5588_v54, %v5572_v51 }
 0x40f   : > { %5617 = vst.msk [vmem:[%s8673_s15 + $0x60] sm:$0xff] %vm530_vm2, %v5601_v58  ;;  %v5602_v21 = vadd.f32 %v5586_v59, %v5570_v55 }
 0x410   : > { %5620 = vst.msk [vmem:[%s8673_s15 + $0x78] sm:$0xff] %vm530_vm2, %v5604_v34 }
 0x411   : > { %5618 = vst.msk [vmem:[%s8673_s15 + $0x68] sm:$0xff] %vm530_vm2, %v5602_v21 }
 0x412   : > { %7394 = shalt.err (!%p7391_p0)
}
 0x413   : > { %s7395_s25 = scalar_lea.hbm %s8748_s19, 2048  ;;  %s7399_s17 = scalar_lea.hbm %s8816_s8, 8192 }
 0x414   : > { %p7396_p1 = scmp.ne.s32.totalorder %s8748_s19, %s7395_s25  ;;  %p7400_p3 = scmp.lt.u32.totalorder %s8748_s19, %s8816_s8 }
 0x415   : > { %p7401_p9 = scmp.lt.u32.totalorder %s7399_s17, %s7395_s25  ;;  %p7403_p8 = scmp.lt.u32.totalorder %s7395_s25, %s8748_s19 }
 0x416   : > { %p7397_p4 = pnand %p7396_p1, %p8835_p2 }
 0x417   : > { %p7402_p12 = por %p7401_p9, %p7400_p3 }
 0x418   : > { %p7398_p5 = pneg %p7397_p4 }
 0x419   : > { %p7404_p6 = por %p7403_p8, %p7402_p12 }
 0x41b   : > { %p7405_p7 = pnand %p7404_p6, %p7398_p5 }
 0x41d   : > { %7408 = shalt.err (!%p7405_p7)
}
 0x41e   : > { %s7489_s21 = smov 128   ;;  %s7490_s30 = smov 256  }
 0x41f   : > { %s7491_s23 = smov 8  }
 0x420   : > { %6975 = dma.vmem_to_hbm [thread:$0]  (%p8835_p2), %s8741_s9, 2048, %s8748_s19, %s5622_s27, %s7489_s21, %s7490_s30, %s7491_s23  }
 0x421 PF: > { %s8836_s22 = sld [smem:[#allocation12_spill]]  ;;  %s8837_s13 = sld [smem:[#allocation16_spill]] }
 0x422   : > { %p6981_p10 = scmp.ge.s32.totalorder %s7479_s12, 2 }
 0x427   : > { %s5651_s14 = sand.u32 1, %s8836_s22   ;;  %p8838_p11 = scmp.ne.s32.totalorder %s8837_s13, 0 }
 0x428   : > { %s5652_s29 = scalar_lea.sflag [#allocation7], %s5651_s14 }
 0x429   : > { %p6978_p13 = pnand %p6981_p10, %p8838_p11 }
 0x42b   : > { %7446 = dma.done.wait (!%p6978_p13), %s5652_s29, 2048  }
 0x42c   : > { %7448 = vsyncadd (!%p6978_p13), %s5652_s29, 4294965248  ;;  %s24_s12 = sadd.s32 1, %s7479_s12   ;;  %s8839_s18 = sld [smem:[#allocation13_spill]] }
 0x42d   : > { %p21_p0 = scmp.ge.s32.totalorder %s24_s12, 6   ;;  %s8840_s29 = sld [smem:[#allocation17_spill]] }
 0x42e   : > { %s8841_s20 = sld [smem:[#allocation14_spill]]  ;;  %s8842_s0 = sld [smem:[#allocation15_spill]] }
 0x42f   : > { %s8843_s27 = smov %s7455_s28  ;;  %s8845_s30 = smov %s7471_s10 }
 0x430   : > { %s8846_s9 = smov %s7475_s11  ;;  %23 = sbr.rel (!%p21_p0) target bundleno = 9 (0x9), region = 171 }
 0x432   : > { %s8844_s28 = smov %s8839_s18 }
 0x434   : > { %s8847_s10 = smov %s8841_s20  ;;  %s8848_s11 = smov %s8842_s0 }
 0x437   :  { %5657 = vsyncpa [#allocation6], 1 }
 0x438   :  { %5659 = vsyncpa [#allocation6 + $0x1], 1 }
 0x439   :  { %5660 = vsyncpa [#allocation7], 1 }
 0x43a   :  { %5662 = vsyncpa [#allocation7 + $0x1], 1 }

</bundles_post_ra>
